<compile_context>
chip_gen: v7x
topology: tpu7x:2x2x1
jax: 0.10.0
libtpu: 0.0.40
codegen_flags: <defaults>
</compile_context>

<pallas_src>
import functools

import jax
import jax.numpy as jnp
from jax.experimental import pallas as pl
from jax.experimental.pallas import tpu as pltpu

VMEM_LIMIT = 32 * 1024 * 1024


# ---------------------------------------------------------------------------
# static helpers (Python ints only)
# ---------------------------------------------------------------------------

def _cdiv(a, b):
    return -(-a // b)


def _round_up(a, b):
    return _cdiv(a, b) * b


def _choose_tile(dim, target, align):
    """Largest tile <= target (aligned); whole (padded) dim if it fits."""
    padded = _round_up(dim, align)
    if padded <= target:
        return padded
    ntiles = _cdiv(padded, target)
    return _round_up(_cdiv(padded, ntiles), align)


def _erf(x):
    # Abramowitz & Stegun 7.1.26 (abs err ~1.5e-7), VPU/EUP-only ops.
    p = 0.3275911
    a1, a2, a3, a4, a5 = (0.254829592, -0.284496736, 1.421413741,
                          -1.453152027, 1.061405429)
    s = jnp.where(x >= 0.0, 1.0, -1.0)
    ax = jnp.abs(x)
    t = 1.0 / (1.0 + p * ax)
    poly = ((((a5 * t + a4) * t + a3) * t + a2) * t + a1) * t
    return s * (1.0 - poly * jnp.exp(-ax * ax))


def _gelu(y):
    # exact-erf GELU, as nn.GELU()
    return 0.5 * y * (1.0 + _erf(y * 0.7071067811865476))


# ---------------------------------------------------------------------------
# fused 1x1-conv / dense matmul kernel:
#   [bf16 BN+ReLU prologue] -> full-K MXU matmul (f32 acc) -> [BN+ReLU epilogue]
# grid = (M/tm,)   (K is a single full block, N is a single full block)
# ---------------------------------------------------------------------------

def _fused_matmul_kernel(*refs, pre_bn, post_bn):
    idx = 2
    a_ref, w_ref = refs[0], refs[1]
    if pre_bn:
        ps_ref, pb_ref = refs[idx], refs[idx + 1]
        idx += 2
    if post_bn:
        qs_ref, qb_ref = refs[idx], refs[idx + 1]
        idx += 2
    o_ref = refs[idx]

    a = a_ref[...]                                            # (tm, K) bf16
    if pre_bn:
        # folded eval-mode BN + ReLU on input channels, kept in bf16 (VPU).
        a = jnp.maximum(a * ps_ref[...] + pb_ref[...], 0.0)
    y = jnp.dot(a, w_ref[...], preferred_element_type=jnp.float32)
    if post_bn:
        y = jnp.maximum(y * qs_ref[...] + qb_ref[...], 0.0)
    o_ref[...] = y.astype(o_ref.dtype)


def fused_matmul(a, w, pre=None, post=None, out_dtype=jnp.bfloat16, tm=1024):
    """out = [post_bn_relu]( [pre_bn_relu](a) @ w ); full-K, full-N blocks."""
    m, k = a.shape
    k2, n = w.shape
    assert k == k2

    tm_ = _choose_tile(m, tm, 16)           # 16-row alignment for bf16 tiles
    mp = _round_up(m, tm_)
    a_p = a.astype(jnp.bfloat16)
    if mp != m:
        a_p = jnp.pad(a_p, ((0, mp - m), (0, 0)))
    w_b = w.astype(jnp.bfloat16)

    operands = [a_p, w_b]
    in_specs = [pl.BlockSpec((tm_, k), lambda i: (i, 0)),
                pl.BlockSpec((k, n), lambda i: (0, 0))]
    if pre is not None:
        s, b = pre
        operands += [s.reshape(1, k).astype(jnp.bfloat16),
                     b.reshape(1, k).astype(jnp.bfloat16)]
        in_specs += [pl.BlockSpec((1, k), lambda i: (0, 0)),
                     pl.BlockSpec((1, k), lambda i: (0, 0))]
    if post is not None:
        s, b = post
        operands += [s.reshape(1, n).astype(jnp.float32),
                     b.reshape(1, n).astype(jnp.float32)]
        in_specs += [pl.BlockSpec((1, n), lambda i: (0, 0)),
                     pl.BlockSpec((1, n), lambda i: (0, 0))]

    cost = pl.CostEstimate(
        flops=2 * mp * n * k, transcendentals=0,
        bytes_accessed=int(a_p.size) * 2 + int(w_b.size) * 2
                       + mp * n * jnp.dtype(out_dtype).itemsize)

    out = pl.pallas_call(
        functools.partial(_fused_matmul_kernel,
                          pre_bn=pre is not None, post_bn=post is not None),
        out_shape=jax.ShapeDtypeStruct((mp, n), out_dtype),
        grid=(mp // tm_,),
        in_specs=in_specs,
        out_specs=pl.BlockSpec((tm_, n), lambda i: (i, 0)),
        compiler_params=pltpu.CompilerParams(
            dimension_semantics=("parallel",),
            vmem_limit_bytes=VMEM_LIMIT),
        cost_estimate=cost,
    )(*operands)

    return out[:m] if mp != m else out


# ---------------------------------------------------------------------------
# 3x3 / stride-1 / pad-1 conv: per-image kernel, 9 in-kernel taps, no im2col
# ---------------------------------------------------------------------------

def _conv3x3_kernel(x_ref, w_ref, o_ref, *, h, w, c, g):
    x = x_ref[0]                                      # (h+2, w+2, c) bf16
    acc = jnp.zeros((h * w, g), jnp.float32)
    t = 0
    for dy in range(3):
        for dx in range(3):
            a = x[dy:dy + h, dx:dx + w, :].reshape(h * w, c)
            acc = acc + jnp.dot(a, w_ref[t],
                                preferred_element_type=jnp.float32)
            t += 1
    o_ref[0] = acc.astype(o_ref.dtype)


def conv3x3_same(x_nhwc, w_hwio):
    n, h, w, c = x_nhwc.shape
    g = w_hwio.shape[-1]
    xp = jnp.pad(x_nhwc.astype(jnp.bfloat16), ((0, 0), (1, 1), (1, 1), (0, 0)))
    wt = w_hwio.reshape(9, c, g).astype(jnp.bfloat16)
    cost = pl.CostEstimate(
        flops=2 * n * h * w * 9 * c * g, transcendentals=0,
        bytes_accessed=int(xp.size) * 2 + int(wt.size) * 2 + n * h * w * g * 2)
    out = pl.pallas_call(
        functools.partial(_conv3x3_kernel, h=h, w=w, c=c, g=g),
        out_shape=jax.ShapeDtypeStruct((n, h * w, g), jnp.bfloat16),
        grid=(n,),
        in_specs=[pl.BlockSpec((1, h + 2, w + 2, c), lambda i: (i, 0, 0, 0)),
                  pl.BlockSpec((9, c, g), lambda i: (0, 0, 0))],
        out_specs=pl.BlockSpec((1, h * w, g), lambda i: (i, 0, 0)),
        compiler_params=pltpu.CompilerParams(
            dimension_semantics=("parallel",),
            vmem_limit_bytes=VMEM_LIMIT),
        cost_estimate=cost,
    )(xp, wt)
    return out                                        # (n, h*w, g)


# ---------------------------------------------------------------------------
# max pool 3x3 / stride 2 / pad 1 (stem): per-image kernel on column-parity
# views (no patch materialization)
# ---------------------------------------------------------------------------

def _maxpool3x3_kernel(xe_ref, xo_ref, o_ref, *, ho, wo):
    xe = xe_ref[0]                                    # (2*ho+2, wo+1, c)
    xo = xo_ref[0]
    # 3-wide / stride-2 max along W: cols 2c, 2c+1, 2c+2
    col = jnp.maximum(jnp.maximum(xe[:, :wo, :], xo[:, :wo, :]), xe[:, 1:, :])
    rows = col.reshape(ho + 1, 2, wo, col.shape[-1])  # leading-dim split only
    # 3-wide / stride-2 max along H: rows 2r, 2r+1, 2r+2
    out = jnp.maximum(jnp.maximum(rows[:ho, 0], rows[:ho, 1]), rows[1:, 0])
    o_ref[0] = out.astype(o_ref.dtype)


def maxpool_3x3_s2_p1(x):
    n, h, w, c = x.shape
    ho, wo = h // 2, w // 2
    xp = jnp.pad(x, ((0, 0), (1, 1), (1, 1), (0, 0)),
                 constant_values=-jnp.inf)            # MaxPool2d pads with -inf
    xe = xp[:, :, 0::2, :]                            # even padded columns
    xo = xp[:, :, 1::2, :]                            # odd padded columns
    # TODO(synk): output last dim is C (<128 for the stem) -> masked stores;
    # a lane-dense (ho, wo*C) output layout would remove the masking.
    return pl.pallas_call(
        functools.partial(_maxpool3x3_kernel, ho=ho, wo=wo),
        out_shape=jax.ShapeDtypeStruct((n, ho, wo, c), x.dtype),
        grid=(n,),
        in_specs=[pl.BlockSpec((1, h + 2, wo + 1, c), lambda i: (i, 0, 0, 0)),
                  pl.BlockSpec((1, h + 2, wo + 1, c), lambda i: (i, 0, 0, 0))],
        out_specs=pl.BlockSpec((1, ho, wo, c), lambda i: (i, 0, 0, 0)),
        compiler_params=pltpu.CompilerParams(
            dimension_semantics=("parallel",),
            vmem_limit_bytes=VMEM_LIMIT),
    )(xe, xo)


# ---------------------------------------------------------------------------
# avg pool 2x2 / stride 2 (transitions): free reshape + row-blocked reduction
# ---------------------------------------------------------------------------

def _avgpool2x2_kernel(x_ref, o_ref):
    x = x_ref[...].astype(jnp.float32)                # (tm, 2, wo, 2, c)
    s = x.sum(axis=1)                                 # (tm, wo, 2, c)
    s = s.sum(axis=2) * 0.25                          # (tm, wo, c)
    o_ref[...] = s.astype(o_ref.dtype)


def avgpool_2x2_s2(x):
    n, h, w, c = x.shape
    ho, wo = h // 2, w // 2
    rows = n * ho
    v = x.reshape(rows, 2, wo, 2, c)                  # free reshape of NHWC
    row_bytes = 2 * wo * 2 * c * 4
    tm = _choose_tile(rows, max(8, (2 << 20) // max(row_bytes, 1)), 8)
    rp = _round_up(rows, tm)
    if rp != rows:
        v = jnp.pad(v, ((0, rp - rows), (0, 0), (0, 0), (0, 0), (0, 0)))
    out = pl.pallas_call(
        _avgpool2x2_kernel,
        out_shape=jax.ShapeDtypeStruct((rp, wo, c), x.dtype),
        grid=(rp // tm,),
        in_specs=[pl.BlockSpec((tm, 2, wo, 2, c), lambda i: (i, 0, 0, 0, 0))],
        out_specs=pl.BlockSpec((tm, wo, c), lambda i: (i, 0, 0)),
        compiler_params=pltpu.CompilerParams(
            dimension_semantics=("parallel",),
            vmem_limit_bytes=VMEM_LIMIT),
    )(v)
    if rp != rows:
        out = out[:rows]
    return out.reshape(n, ho, wo, c)


# ---------------------------------------------------------------------------
# head: norm5 affine (no ReLU) + global-avg-pool + fc1+GELU + fc2+GELU,
# tiled over the batch axis
# ---------------------------------------------------------------------------

def _head_kernel(x_ref, s_ref, b_ref, w1_ref, b1_ref, w2_ref, b2_ref, o_ref):
    x = x_ref[...].astype(jnp.float32)                # (tb, hw, c)
    feat = jnp.mean(x, axis=1)                        # adaptive_avg_pool2d((1,1))
    feat = feat * s_ref[...] + b_ref[...]             # norm5 affine commutes w/ mean
    h = jnp.dot(feat.astype(jnp.bfloat16), w1_ref[...],
                preferred_element_type=jnp.float32) + b1_ref[...]
    h = _gelu(h)
    y = jnp.dot(h.astype(jnp.bfloat16), w2_ref[...],
                preferred_element_type=jnp.float32) + b2_ref[...]
    o_ref[...] = _gelu(y)


def pallas_head(x_nhwc, scale5, shift5, w1, b1, w2, b2):
    n, h, w, c = x_nhwc.shape
    hw = h * w
    x3 = x_nhwc.reshape(n, hw, c).astype(jnp.bfloat16)
    tb = _choose_tile(n, 32, 16)
    npad = _round_up(n, tb)
    if npad != n:
        x3 = jnp.pad(x3, ((0, npad - n), (0, 0), (0, 0)))
    e1, e2 = w1.shape[1], w2.shape[1]
    out = pl.pallas_call(
        _head_kernel,
        out_shape=jax.ShapeDtypeStruct((npad, e2), jnp.float32),
        grid=(npad // tb,),
        in_specs=[pl.BlockSpec((tb, hw, c), lambda i: (i, 0, 0)),
                  pl.BlockSpec((1, c), lambda i: (0, 0)),
                  pl.BlockSpec((1, c), lambda i: (0, 0)),
                  pl.BlockSpec((c, e1), lambda i: (0, 0)),
                  pl.BlockSpec((1, e1), lambda i: (0, 0)),
                  pl.BlockSpec((e1, e2), lambda i: (0, 0)),
                  pl.BlockSpec((1, e2), lambda i: (0, 0))],
        out_specs=pl.BlockSpec((tb, e2), lambda i: (i, 0)),
        compiler_params=pltpu.CompilerParams(
            dimension_semantics=("parallel",),
            vmem_limit_bytes=VMEM_LIMIT),
    )(x3, scale5.reshape(1, c).astype(jnp.float32),
      shift5.reshape(1, c).astype(jnp.float32),
      w1.astype(jnp.bfloat16), b1.astype(jnp.float32).reshape(1, e1),
      w2.astype(jnp.bfloat16), b2.astype(jnp.float32).reshape(1, e2))
    return out[:n]


# ---------------------------------------------------------------------------
# wrapper-side glue (layout only)
# ---------------------------------------------------------------------------

def extract_patches(x, k, stride, pad, pad_value=0.0):
    # Only used for conv0 (7x7/s2, 3 input channels).
    # TODO(synk): conv0 still uses im2col; a strided-tap kernel (like
    # conv3x3_same) would remove the 49x duplication of the 3-channel input.
    n, h, w, c = x.shape
    if pad > 0:
        x = jnp.pad(x, ((0, 0), (pad, pad), (pad, pad), (0, 0)),
                    constant_values=pad_value)
    ho = (h + 2 * pad - k) // stride + 1
    wo = (w + 2 * pad - k) // stride + 1
    cols = []
    for i in range(k):
        for j in range(k):
            cols.append(x[:, i:i + stride * (ho - 1) + 1:stride,
                            j:j + stride * (wo - 1) + 1:stride, :])
    return jnp.concatenate(cols, axis=-1), ho, wo


def bn_scale_shift(bn, eps=1e-5):
    # TODO(synk): eval-mode BatchNorm folding (running stats); training-mode
    # batch statistics are not reproduced.
    gamma, beta, mean, var = bn
    scale = gamma / jnp.sqrt(var + eps)
    shift = beta - mean * scale
    return scale.astype(jnp.float32), shift.astype(jnp.float32)


def dense_block(x, layers):
    """One DenseNet block without per-layer concatenation."""
    n, h, w, cin0 = x.shape
    hw = h * w
    growth = layers[0]["conv2"].shape[-1]
    nlayers = len(layers)
    cfin = cin0 + nlayers * growth
    # Preallocated block buffer: channels [0, cin) valid, zeros beyond.  conv1
    # always reads the full buffer with zero-padded weight rows, so the
    # not-yet-written (zero) channels contribute exactly 0.
    buf = jnp.pad(x.reshape(n, hw, cin0).astype(jnp.bfloat16),
                  ((0, 0), (0, 0), (0, nlayers * growth)))
    for li, lp in enumerate(layers):
        cin = cin0 + li * growth
        s1, b1 = bn_scale_shift(lp["norm1"])            # (cin,)
        s2, b2 = bn_scale_shift(lp["norm2"])            # (cmid,)
        w1 = lp["conv1"].reshape(cin, -1)               # (cin, cmid)
        cmid = w1.shape[1]
        w1p = jnp.pad(w1, ((0, cfin - cin), (0, 0)))    # zero rows for padding
        s1p = jnp.pad(s1, (0, cfin - cin))
        b1p = jnp.pad(b1, (0, cfin - cin))
        # norm1+relu1 (prologue) -> conv1 (1x1) -> norm2+relu2 (epilogue)
        y1 = fused_matmul(buf.reshape(n * hw, cfin), w1p,
                          pre=(s1p, b1p), post=(s2, b2))
        # conv2 (3x3, pad 1): in-kernel 9-tap accumulation, no im2col
        y2 = conv3x3_same(y1.reshape(n, h, w, cmid), lp["conv2"])
        # TODO(synk): true zero-copy writeback would need a Pallas
        # input_output_aliases path with a channel-grouped buffer layout; here
        # we rely on XLA performing this dynamic_update_slice in place.
        buf = jax.lax.dynamic_update_slice(buf, y2, (0, 0, cin))
    return buf.reshape(n, h, w, cfin)


# ---------------------------------------------------------------------------
# deterministic parameter init (shapes follow torchvision DenseNet / __init__)
# ---------------------------------------------------------------------------

def _kaiming_conv(key, k, cin, cout):
    std = (2.0 / (k * k * cin)) ** 0.5
    return std * jax.random.normal(key, (k, k, cin, cout), jnp.float32)


def _xavier_linear(key, fan_in, fan_out):
    a = (6.0 / (fan_in + fan_out)) ** 0.5
    return jax.random.uniform(key, (fan_in, fan_out), jnp.float32, -a, a)


def _bn_params(c):
    # nn.BatchNorm2d defaults: weight=1, bias=0, running_mean=0, running_var=1
    return (jnp.ones((c,), jnp.float32), jnp.zeros((c,), jnp.float32),
            jnp.zeros((c,), jnp.float32), jnp.ones((c,), jnp.float32))


def init_params(key, block_config, growth, init_feat, bn_size, embedding_dim):
    nkeys = 4 * sum(block_config) + len(block_config) + 8
    keys = iter(jax.random.split(key, nkeys))
    p = {"conv0": _kaiming_conv(next(keys), 7, 3, init_feat),
         "norm0": _bn_params(init_feat)}
    nfeat = init_feat
    for bi, nlayers in enumerate(block_config):
        layers = []
        for li in range(nlayers):
            cin = nfeat + li * growth
            layers.append({
                "norm1": _bn_params(cin),
                "conv1": _kaiming_conv(next(keys), 1, cin, bn_size * growth),
                "norm2": _bn_params(bn_size * growth),
                "conv2": _kaiming_conv(next(keys), 3, bn_size * growth, growth),
            })
        p[f"block{bi}"] = layers
        nfeat += nlayers * growth
        if bi != len(block_config) - 1:
            p[f"trans{bi}"] = {"norm": _bn_params(nfeat),
                               "conv": _kaiming_conv(next(keys), 1, nfeat, nfeat // 2)}
            nfeat //= 2
    p["norm5"] = _bn_params(nfeat)
    # embedding head (num_embed_layers == 2 default):
    # Linear(num_features, 2*emb) -> GELU -> Linear(2*emb, emb) -> GELU,
    # xavier_uniform weights, zero bias (matches _init_weights).
    p["fc1_w"] = _xavier_linear(next(keys), nfeat, 2 * embedding_dim)
    p["fc1_b"] = jnp.zeros((2 * embedding_dim,), jnp.float32)
    p["fc2_w"] = _xavier_linear(next(keys), 2 * embedding_dim, embedding_dim)
    p["fc2_b"] = jnp.zeros((embedding_dim,), jnp.float32)
    return p, nfeat


# ---------------------------------------------------------------------------
# forward pass (mirrors CustomDenseNet.forward)
# ---------------------------------------------------------------------------

def custom_densenet_forward(x_nchw, params, *, block_config):
    p = params
    x = jnp.transpose(x_nchw, (0, 2, 3, 1)).astype(jnp.bfloat16)  # NCHW->NHWC
    n = x.shape[0]

    # stem: conv0 (7x7/s2, fused norm0+relu0 epilogue) + maxpool0
    patches, ho, wo = extract_patches(x, 7, 2, 3)
    a = patches.reshape(n * ho * wo, 7 * 7 * 3)
    y = fused_matmul(a, p["conv0"].reshape(7 * 7 * 3, -1),
                     post=bn_scale_shift(p["norm0"]))
    x = maxpool_3x3_s2_p1(y.reshape(n, ho, wo, -1))

    # dense blocks + transitions
    for bi, nlayers in enumerate(block_config):
        x = dense_block(x, p[f"block{bi}"])
        if bi != len(block_config) - 1:
            tp = p[f"trans{bi}"]
            nb, hh, ww, cc = x.shape
            t = fused_matmul(x.reshape(nb * hh * ww, cc),
                             tp["conv"].reshape(cc, -1),
                             pre=bn_scale_shift(tp["norm"]))
            x = avgpool_2x2_s2(t.reshape(nb, hh, ww, -1))

    # norm5 (NO ReLU: forward uses model.features only) + GAP + embedding MLP
    s5, b5 = bn_scale_shift(p["norm5"])
    return pallas_head(x, s5, b5, p["fc1_w"], p["fc1_b"], p["fc2_w"], p["fc2_b"])


if __name__ == "__main__":
    # Scaled-down DenseNet (same structure as densenet121, which is
    # block_config=(6,12,24,16), growth=32, init=64, bn_size=4 -> 1024 feats).
    block_config = (2, 2, 2, 2)
    growth, init_feat, bn_size = 8, 16, 4
    embedding_dim = 16

    key = jax.random.PRNGKey(0)
    pkey, xkey = jax.random.split(key)
    params, num_features = init_params(pkey, block_config, growth,
                                       init_feat, bn_size, embedding_dim)

    # NCHW input (3-channel image, 32x32 so the 5 downsampling stages land on
    # a 1x1 final feature map).
    x = jax.random.normal(xkey, (2, 3, 32, 32), jnp.float32)

    fwd = jax.jit(functools.partial(custom_densenet_forward,
                                    block_config=block_config))
    out = fwd(x, params)
    out = jax.block_until_ready(out)

    assert out.shape == (2, embedding_dim), out.shape
    assert bool(jnp.all(jnp.isfinite(out)))
    print("KERNEL_OK")
</pallas_src>

<mosaic_0001>
module attributes {stable_mosaic.version = 11 : i64} {
  func.func @_fused_matmul_kernel(%arg0: i32, %arg1: memref<512x147xbf16, #tpu.memory_space<vmem>>, %arg2: memref<147x16xbf16, #tpu.memory_space<vmem>>, %arg3: memref<1x16xf32, #tpu.memory_space<vmem>>, %arg4: memref<1x16xf32, #tpu.memory_space<vmem>>, %arg5: memref<512x16xbf16, #tpu.memory_space<vmem>>) attributes {dimension_semantics = [#tpu.dimension_semantics<parallel>], iteration_bounds = array<i64: 1>, scalar_prefetch = 0 : i64, scratch_operands = 0 : i64, tpu.core_type = #tpu.core_type<tc>, window_params = [{transform_indices = @transform_0, window_bounds = array<i64: 512, 147>}, {pipeline_mode = #tpu.pipeline_mode<synchronous>, transform_indices = @transform_1, window_bounds = array<i64: 147, 16>}, {pipeline_mode = #tpu.pipeline_mode<synchronous>, transform_indices = @transform_2, window_bounds = array<i64: 1, 16>}, {pipeline_mode = #tpu.pipeline_mode<synchronous>, transform_indices = @transform_3, window_bounds = array<i64: 1, 16>}, {transform_indices = @transform_4, window_bounds = array<i64: 512, 16>}]} {
    %c0 = arith.constant 0 : index
    %c0_0 = arith.constant 0 : index
    %0 = vector.load %arg1[%c0, %c0_0] : memref<512x147xbf16, #tpu.memory_space<vmem>>, vector<512x147xbf16>
    %c0_1 = arith.constant 0 : index
    %c0_2 = arith.constant 0 : index
    %1 = vector.load %arg2[%c0_1, %c0_2] : memref<147x16xbf16, #tpu.memory_space<vmem>>, vector<147x16xbf16>
    %cst = arith.constant dense<0.000000e+00> : vector<512x16xf32>
    %2 = tpu.matmul %0, %1, %cst {dimension_numbers = #tpu.dot_dimension_numbers<[1], [0], [0], [1], [0, 0, 1, 1], [], []>} : vector<512x147xbf16>, vector<147x16xbf16>, vector<512x16xf32> -> vector<512x16xf32>
    %c0_3 = arith.constant 0 : index
    %c0_4 = arith.constant 0 : index
    %3 = vector.load %arg3[%c0_3, %c0_4] : memref<1x16xf32, #tpu.memory_space<vmem>>, vector<1x16xf32>
    %4 = vector.broadcast %3 : vector<1x16xf32> to vector<512x16xf32>
    %5 = arith.mulf %2, %4 : vector<512x16xf32>
    %c0_5 = arith.constant 0 : index
    %c0_6 = arith.constant 0 : index
    %6 = vector.load %arg4[%c0_5, %c0_6] : memref<1x16xf32, #tpu.memory_space<vmem>>, vector<1x16xf32>
    %7 = vector.broadcast %6 : vector<1x16xf32> to vector<512x16xf32>
    %8 = arith.addf %5, %7 : vector<512x16xf32>
    %cst_7 = arith.constant 0.000000e+00 : f32
    %9 = vector.broadcast %cst_7 : f32 to vector<512x16xf32>
    %10 = arith.maximumf %8, %9 : vector<512x16xf32>
    %11 = arith.truncf %10 : vector<512x16xf32> to vector<512x16xbf16>
    %c0_8 = arith.constant 0 : index
    %c0_9 = arith.constant 0 : index
    %12 = vector.load %arg5[%c0_8, %c0_9] : memref<512x16xbf16, #tpu.memory_space<vmem>>, vector<512x16xbf16>
    tpu.vector_store %arg5[%c0_8, %c0_9], %11 {strides = array<i32>} : memref<512x16xbf16, #tpu.memory_space<vmem>>, vector<512x16xbf16>,
    return
  }
  func.func @transform_0(%arg0: i32) -> (i32, i32) {
    %c0_i32 = arith.constant 0 : i32
    %c0_i32_0 = arith.constant 0 : i32
    return %arg0, %c0_i32 : i32, i32
  }
  func.func @transform_1(%arg0: i32) -> (i32, i32) {
    %c0_i32 = arith.constant 0 : i32
    %c0_i32_0 = arith.constant 0 : i32
    %c0_i32_1 = arith.constant 0 : i32
    return %c0_i32, %c0_i32_0 : i32, i32
  }
  func.func @transform_2(%arg0: i32) -> (i32, i32) {
    %c0_i32 = arith.constant 0 : i32
    %c0_i32_0 = arith.constant 0 : i32
    %c0_i32_1 = arith.constant 0 : i32
    return %c0_i32, %c0_i32_0 : i32, i32
  }
  func.func @transform_3(%arg0: i32) -> (i32, i32) {
    %c0_i32 = arith.constant 0 : i32
    %c0_i32_0 = arith.constant 0 : i32
    %c0_i32_1 = arith.constant 0 : i32
    return %c0_i32, %c0_i32_0 : i32, i32
  }
  func.func @transform_4(%arg0: i32) -> (i32, i32) {
    %c0_i32 = arith.constant 0 : i32
    %c0_i32_0 = arith.constant 0 : i32
    return %arg0, %c0_i32 : i32, i32
  }
}

module attributes {stable_mosaic.version = 11 : i64} {
  func.func @_maxpool3x3_kernel(%arg0: i32, %arg1: memref<1x18x9x16xbf16, #tpu.memory_space<vmem>>, %arg2: memref<1x18x9x16xbf16, #tpu.memory_space<vmem>>, %arg3: memref<1x8x8x16xbf16, #tpu.memory_space<vmem>>) attributes {dimension_semantics = [#tpu.dimension_semantics<parallel>], iteration_bounds = array<i64: 2>, scalar_prefetch = 0 : i64, scratch_operands = 0 : i64, tpu.core_type = #tpu.core_type<tc>, window_params = [{transform_indices = @transform_0, window_bounds = array<i64: 1, 18, 9, 16>}, {transform_indices = @transform_1, window_bounds = array<i64: 1, 18, 9, 16>}, {transform_indices = @transform_2, window_bounds = array<i64: 1, 8, 8, 16>}]} {
    %c0 = arith.constant 0 : index
    %c0_0 = arith.constant 0 : index
    %c0_1 = arith.constant 0 : index
    %c0_2 = arith.constant 0 : index
    %0 = vector.load %arg1[%c0, %c0_0, %c0_1, %c0_2] : memref<1x18x9x16xbf16, #tpu.memory_space<vmem>>, vector<1x18x9x16xbf16>
    %1 = vector.shape_cast %0 : vector<1x18x9x16xbf16> to vector<18x9x16xbf16>
    %c0_3 = arith.constant 0 : index
    %c0_4 = arith.constant 0 : index
    %c0_5 = arith.constant 0 : index
    %c0_6 = arith.constant 0 : index
    %2 = vector.load %arg2[%c0_3, %c0_4, %c0_5, %c0_6] : memref<1x18x9x16xbf16, #tpu.memory_space<vmem>>, vector<1x18x9x16xbf16>
    %3 = vector.shape_cast %2 : vector<1x18x9x16xbf16> to vector<18x9x16xbf16>
    %4 = vector.extract_strided_slice %1 {offsets = [0, 0, 0], sizes = [18, 8, 16], strides = [1, 1, 1]} : vector<18x9x16xbf16> to vector<18x8x16xbf16>
    %5 = vector.extract_strided_slice %3 {offsets = [0, 0, 0], sizes = [18, 8, 16], strides = [1, 1, 1]} : vector<18x9x16xbf16> to vector<18x8x16xbf16>
    %6 = arith.maximumf %4, %5 : vector<18x8x16xbf16>
    %7 = vector.extract_strided_slice %1 {offsets = [0, 1, 0], sizes = [18, 8, 16], strides = [1, 1, 1]} : vector<18x9x16xbf16> to vector<18x8x16xbf16>
    %8 = arith.maximumf %6, %7 : vector<18x8x16xbf16>
    %9 = vector.shape_cast %8 : vector<18x8x16xbf16> to vector<9x2x8x16xbf16>
    %10 = vector.extract_strided_slice %9 {offsets = [0, 0, 0, 0], sizes = [8, 1, 8, 16], strides = [1, 1, 1, 1]} : vector<9x2x8x16xbf16> to vector<8x1x8x16xbf16>
    %11 = vector.shape_cast %10 : vector<8x1x8x16xbf16> to vector<8x8x16xbf16>
    %12 = vector.extract_strided_slice %9 {offsets = [0, 1, 0, 0], sizes = [8, 1, 8, 16], strides = [1, 1, 1, 1]} : vector<9x2x8x16xbf16> to vector<8x1x8x16xbf16>
    %13 = vector.shape_cast %12 : vector<8x1x8x16xbf16> to vector<8x8x16xbf16>
    %14 = arith.maximumf %11, %13 : vector<8x8x16xbf16>
    %15 = vector.extract_strided_slice %9 {offsets = [1, 0, 0, 0], sizes = [8, 1, 8, 16], strides = [1, 1, 1, 1]} : vector<9x2x8x16xbf16> to vector<8x1x8x16xbf16>
    %16 = vector.shape_cast %15 : vector<8x1x8x16xbf16> to vector<8x8x16xbf16>
    %17 = arith.maximumf %14, %16 : vector<8x8x16xbf16>
    %c0_7 = arith.constant 0 : index
    %c0_8 = arith.constant 0 : index
    %c0_9 = arith.constant 0 : index
    %c0_10 = arith.constant 0 : index
    %18 = vector.load %arg3[%c0_7, %c0_8, %c0_9, %c0_10] : memref<1x8x8x16xbf16, #tpu.memory_space<vmem>>, vector<1x8x8x16xbf16>
    %19 = vector.shape_cast %18 : vector<1x8x8x16xbf16> to vector<8x8x16xbf16>
    %20 = vector.shape_cast %17 : vector<8x8x16xbf16> to vector<1x8x8x16xbf16>
    tpu.vector_store %arg3[%c0_7, %c0_8, %c0_9, %c0_10], %20 {strides = array<i32>} : memref<1x8x8x16xbf16, #tpu.memory_space<vmem>>, vector<1x8x8x16xbf16>,
    return
  }
  func.func @transform_0(%arg0: i32) -> (i32, i32, i32, i32) {
    %c0_i32 = arith.constant 0 : i32
    %c0_i32_0 = arith.constant 0 : i32
    %c0_i32_1 = arith.constant 0 : i32
    %c0_i32_2 = arith.constant 0 : i32
    return %arg0, %c0_i32, %c0_i32_0, %c0_i32_1 : i32, i32, i32, i32
  }
  func.func @transform_1(%arg0: i32) -> (i32, i32, i32, i32) {
    %c0_i32 = arith.constant 0 : i32
    %c0_i32_0 = arith.constant 0 : i32
    %c0_i32_1 = arith.constant 0 : i32
    %c0_i32_2 = arith.constant 0 : i32
    return %arg0, %c0_i32, %c0_i32_0, %c0_i32_1 : i32, i32, i32, i32
  }
  func.func @transform_2(%arg0: i32) -> (i32, i32, i32, i32) {
    %c0_i32 = arith.constant 0 : i32
    %c0_i32_0 = arith.constant 0 : i32
    %c0_i32_1 = arith.constant 0 : i32
    %c0_i32_2 = arith.constant 0 : i32
    return %arg0, %c0_i32, %c0_i32_0, %c0_i32_1 : i32, i32, i32, i32
  }
}

module attributes {stable_mosaic.version = 11 : i64} {
  func.func @_fused_matmul_kernel(%arg0: i32, %arg1: memref<128x32xbf16, #tpu.memory_space<vmem>>, %arg2: memref<32x32xbf16, #tpu.memory_space<vmem>>, %arg3: memref<1x32xbf16, #tpu.memory_space<vmem>>, %arg4: memref<1x32xbf16, #tpu.memory_space<vmem>>, %arg5: memref<1x32xf32, #tpu.memory_space<vmem>>, %arg6: memref<1x32xf32, #tpu.memory_space<vmem>>, %arg7: memref<128x32xbf16, #tpu.memory_space<vmem>>) attributes {dimension_semantics = [#tpu.dimension_semantics<parallel>], iteration_bounds = array<i64: 1>, scalar_prefetch = 0 : i64, scratch_operands = 0 : i64, tpu.core_type = #tpu.core_type<tc>, window_params = [{transform_indices = @transform_0, window_bounds = array<i64: 128, 32>}, {pipeline_mode = #tpu.pipeline_mode<synchronous>, transform_indices = @transform_1, window_bounds = array<i64: 32, 32>}, {pipeline_mode = #tpu.pipeline_mode<synchronous>, transform_indices = @transform_2, window_bounds = array<i64: 1, 32>}, {pipeline_mode = #tpu.pipeline_mode<synchronous>, transform_indices = @transform_3, window_bounds = array<i64: 1, 32>}, {pipeline_mode = #tpu.pipeline_mode<synchronous>, transform_indices = @transform_4, window_bounds = array<i64: 1, 32>}, {pipeline_mode = #tpu.pipeline_mode<synchronous>, transform_indices = @transform_5, window_bounds = array<i64: 1, 32>}, {transform_indices = @transform_6, window_bounds = array<i64: 128, 32>}]} {
    %c0 = arith.constant 0 : index
    %c0_0 = arith.constant 0 : index
    %0 = vector.load %arg1[%c0, %c0_0] : memref<128x32xbf16, #tpu.memory_space<vmem>>, vector<128x32xbf16>
    %c0_1 = arith.constant 0 : index
    %c0_2 = arith.constant 0 : index
    %1 = vector.load %arg3[%c0_1, %c0_2] : memref<1x32xbf16, #tpu.memory_space<vmem>>, vector<1x32xbf16>
    %2 = vector.broadcast %1 : vector<1x32xbf16> to vector<128x32xbf16>
    %3 = arith.mulf %0, %2 : vector<128x32xbf16>
    %c0_3 = arith.constant 0 : index
    %c0_4 = arith.constant 0 : index
    %4 = vector.load %arg4[%c0_3, %c0_4] : memref<1x32xbf16, #tpu.memory_space<vmem>>, vector<1x32xbf16>
    %5 = vector.broadcast %4 : vector<1x32xbf16> to vector<128x32xbf16>
    %6 = arith.addf %3, %5 : vector<128x32xbf16>
    %cst = arith.constant 0.000000e+00 : bf16
    %7 = vector.broadcast %cst : bf16 to vector<128x32xbf16>
    %8 = arith.maximumf %6, %7 : vector<128x32xbf16>
    %c0_5 = arith.constant 0 : index
    %c0_6 = arith.constant 0 : index
    %9 = vector.load %arg2[%c0_5, %c0_6] : memref<32x32xbf16, #tpu.memory_space<vmem>>, vector<32x32xbf16>
    %cst_7 = arith.constant dense<0.000000e+00> : vector<128x32xf32>
    %10 = tpu.matmul %8, %9, %cst_7 {dimension_numbers = #tpu.dot_dimension_numbers<[1], [0], [0], [1], [0, 0, 1, 1], [], []>} : vector<128x32xbf16>, vector<32x32xbf16>, vector<128x32xf32> -> vector<128x32xf32>
    %c0_8 = arith.constant 0 : index
    %c0_9 = arith.constant 0 : index
    %11 = vector.load %arg5[%c0_8, %c0_9] : memref<1x32xf32, #tpu.memory_space<vmem>>, vector<1x32xf32>
    %12 = vector.broadcast %11 : vector<1x32xf32> to vector<128x32xf32>
    %13 = arith.mulf %10, %12 : vector<128x32xf32>
    %c0_10 = arith.constant 0 : index
    %c0_11 = arith.constant 0 : index
    %14 = vector.load %arg6[%c0_10, %c0_11] : memref<1x32xf32, #tpu.memory_space<vmem>>, vector<1x32xf32>
    %15 = vector.broadcast %14 : vector<1x32xf32> to vector<128x32xf32>
    %16 = arith.addf %13, %15 : vector<128x32xf32>
    %cst_12 = arith.constant 0.000000e+00 : f32
    %17 = vector.broadcast %cst_12 : f32 to vector<128x32xf32>
    %18 = arith.maximumf %16, %17 : vector<128x32xf32>
    %19 = arith.truncf %18 : vector<128x32xf32> to vector<128x32xbf16>
    %c0_13 = arith.constant 0 : index
    %c0_14 = arith.constant 0 : index
    %20 = vector.load %arg7[%c0_13, %c0_14] : memref<128x32xbf16, #tpu.memory_space<vmem>>, vector<128x32xbf16>
    tpu.vector_store %arg7[%c0_13, %c0_14], %19 {strides = array<i32>} : memref<128x32xbf16, #tpu.memory_space<vmem>>, vector<128x32xbf16>,
    return
  }
  func.func @transform_0(%arg0: i32) -> (i32, i32) {
    %c0_i32 = arith.constant 0 : i32
    %c0_i32_0 = arith.constant 0 : i32
    return %arg0, %c0_i32 : i32, i32
  }
  func.func @transform_1(%arg0: i32) -> (i32, i32) {
    %c0_i32 = arith.constant 0 : i32
    %c0_i32_0 = arith.constant 0 : i32
    %c0_i32_1 = arith.constant 0 : i32
    return %c0_i32, %c0_i32_0 : i32, i32
  }
  func.func @transform_2(%arg0: i32) -> (i32, i32) {
    %c0_i32 = arith.constant 0 : i32
    %c0_i32_0 = arith.constant 0 : i32
    %c0_i32_1 = arith.constant 0 : i32
    return %c0_i32, %c0_i32_0 : i32, i32
  }
  func.func @transform_3(%arg0: i32) -> (i32, i32) {
    %c0_i32 = arith.constant 0 : i32
    %c0_i32_0 = arith.constant 0 : i32
    %c0_i32_1 = arith.constant 0 : i32
    return %c0_i32, %c0_i32_0 : i32, i32
  }
  func.func @transform_4(%arg0: i32) -> (i32, i32) {
    %c0_i32 = arith.constant 0 : i32
    %c0_i32_0 = arith.constant 0 : i32
    %c0_i32_1 = arith.constant 0 : i32
    return %c0_i32, %c0_i32_0 : i32, i32
  }
  func.func @transform_5(%arg0: i32) -> (i32, i32) {
    %c0_i32 = arith.constant 0 : i32
    %c0_i32_0 = arith.constant 0 : i32
    %c0_i32_1 = arith.constant 0 : i32
    return %c0_i32, %c0_i32_0 : i32, i32
  }
  func.func @transform_6(%arg0: i32) -> (i32, i32) {
    %c0_i32 = arith.constant 0 : i32
    %c0_i32_0 = arith.constant 0 : i32
    return %arg0, %c0_i32 : i32, i32
  }
}

module attributes {stable_mosaic.version = 11 : i64} {
  func.func @_conv3x3_kernel(%arg0: i32, %arg1: memref<1x10x10x32xbf16, #tpu.memory_space<vmem>>, %arg2: memref<9x32x8xbf16, #tpu.memory_space<vmem>>, %arg3: memref<1x64x8xbf16, #tpu.memory_space<vmem>>) attributes {dimension_semantics = [#tpu.dimension_semantics<parallel>], iteration_bounds = array<i64: 2>, scalar_prefetch = 0 : i64, scratch_operands = 0 : i64, tpu.core_type = #tpu.core_type<tc>, window_params = [{transform_indices = @transform_0, window_bounds = array<i64: 1, 10, 10, 32>}, {pipeline_mode = #tpu.pipeline_mode<synchronous>, transform_indices = @transform_1, window_bounds = array<i64: 9, 32, 8>}, {transform_indices = @transform_2, window_bounds = array<i64: 1, 64, 8>}]} {
    %c0 = arith.constant 0 : index
    %c0_0 = arith.constant 0 : index
    %c0_1 = arith.constant 0 : index
    %c0_2 = arith.constant 0 : index
    %0 = vector.load %arg1[%c0, %c0_0, %c0_1, %c0_2] : memref<1x10x10x32xbf16, #tpu.memory_space<vmem>>, vector<1x10x10x32xbf16>
    %1 = vector.shape_cast %0 : vector<1x10x10x32xbf16> to vector<10x10x32xbf16>
    %cst = arith.constant 0.000000e+00 : f32
    %2 = vector.broadcast %cst : f32 to vector<64x8xf32>
    %3 = vector.extract_strided_slice %1 {offsets = [0, 0, 0], sizes = [8, 8, 32], strides = [1, 1, 1]} : vector<10x10x32xbf16> to vector<8x8x32xbf16>
    %4 = vector.shape_cast %3 : vector<8x8x32xbf16> to vector<64x32xbf16>
    %c0_3 = arith.constant 0 : index
    %c0_4 = arith.constant 0 : index
    %c0_5 = arith.constant 0 : index
    %5 = vector.load %arg2[%c0_3, %c0_4, %c0_5] : memref<9x32x8xbf16, #tpu.memory_space<vmem>>, vector<1x32x8xbf16>
    %6 = vector.shape_cast %5 : vector<1x32x8xbf16> to vector<32x8xbf16>
    %cst_6 = arith.constant dense<0.000000e+00> : vector<64x8xf32>
    %7 = tpu.matmul %4, %6, %cst_6 {dimension_numbers = #tpu.dot_dimension_numbers<[1], [0], [0], [1], [0, 0, 1, 1], [], []>} : vector<64x32xbf16>, vector<32x8xbf16>, vector<64x8xf32> -> vector<64x8xf32>
    %8 = arith.addf %2, %7 : vector<64x8xf32>
    %9 = vector.extract_strided_slice %1 {offsets = [0, 1, 0], sizes = [8, 8, 32], strides = [1, 1, 1]} : vector<10x10x32xbf16> to vector<8x8x32xbf16>
    %10 = vector.shape_cast %9 : vector<8x8x32xbf16> to vector<64x32xbf16>
    %c1 = arith.constant 1 : index
    %c0_7 = arith.constant 0 : index
    %c0_8 = arith.constant 0 : index
    %11 = vector.load %arg2[%c1, %c0_7, %c0_8] : memref<9x32x8xbf16, #tpu.memory_space<vmem>>, vector<1x32x8xbf16>
    %12 = vector.shape_cast %11 : vector<1x32x8xbf16> to vector<32x8xbf16>
    %cst_9 = arith.constant dense<0.000000e+00> : vector<64x8xf32>
    %13 = tpu.matmul %10, %12, %cst_9 {dimension_numbers = #tpu.dot_dimension_numbers<[1], [0], [0], [1], [0, 0, 1, 1], [], []>} : vector<64x32xbf16>, vector<32x8xbf16>, vector<64x8xf32> -> vector<64x8xf32>
    %14 = arith.addf %8, %13 : vector<64x8xf32>
    %15 = vector.extract_strided_slice %1 {offsets = [0, 2, 0], sizes = [8, 8, 32], strides = [1, 1, 1]} : vector<10x10x32xbf16> to vector<8x8x32xbf16>
    %16 = vector.shape_cast %15 : vector<8x8x32xbf16> to vector<64x32xbf16>
    %c2 = arith.constant 2 : index
    %c0_10 = arith.constant 0 : index
    %c0_11 = arith.constant 0 : index
    %17 = vector.load %arg2[%c2, %c0_10, %c0_11] : memref<9x32x8xbf16, #tpu.memory_space<vmem>>, vector<1x32x8xbf16>
    %18 = vector.shape_cast %17 : vector<1x32x8xbf16> to vector<32x8xbf16>
    %cst_12 = arith.constant dense<0.000000e+00> : vector<64x8xf32>
    %19 = tpu.matmul %16, %18, %cst_12 {dimension_numbers = #tpu.dot_dimension_numbers<[1], [0], [0], [1], [0, 0, 1, 1], [], []>} : vector<64x32xbf16>, vector<32x8xbf16>, vector<64x8xf32> -> vector<64x8xf32>
    %20 = arith.addf %14, %19 : vector<64x8xf32>
    %21 = vector.extract_strided_slice %1 {offsets = [1, 0, 0], sizes = [8, 8, 32], strides = [1, 1, 1]} : vector<10x10x32xbf16> to vector<8x8x32xbf16>
    %22 = vector.shape_cast %21 : vector<8x8x32xbf16> to vector<64x32xbf16>
    %c3 = arith.constant 3 : index
    %c0_13 = arith.constant 0 : index
    %c0_14 = arith.constant 0 : index
    %23 = vector.load %arg2[%c3, %c0_13, %c0_14] : memref<9x32x8xbf16, #tpu.memory_space<vmem>>, vector<1x32x8xbf16>
    %24 = vector.shape_cast %23 : vector<1x32x8xbf16> to vector<32x8xbf16>
    %cst_15 = arith.constant dense<0.000000e+00> : vector<64x8xf32>
    %25 = tpu.matmul %22, %24, %cst_15 {dimension_numbers = #tpu.dot_dimension_numbers<[1], [0], [0], [1], [0, 0, 1, 1], [], []>} : vector<64x32xbf16>, vector<32x8xbf16>, vector<64x8xf32> -> vector<64x8xf32>
    %26 = arith.addf %20, %25 : vector<64x8xf32>
    %27 = vector.extract_strided_slice %1 {offsets = [1, 1, 0], sizes = [8, 8, 32], strides = [1, 1, 1]} : vector<10x10x32xbf16> to vector<8x8x32xbf16>
    %28 = vector.shape_cast %27 : vector<8x8x32xbf16> to vector<64x32xbf16>
    %c4 = arith.constant 4 : index
    %c0_16 = arith.constant 0 : index
    %c0_17 = arith.constant 0 : index
    %29 = vector.load %arg2[%c4, %c0_16, %c0_17] : memref<9x32x8xbf16, #tpu.memory_space<vmem>>, vector<1x32x8xbf16>
    %30 = vector.shape_cast %29 : vector<1x32x8xbf16> to vector<32x8xbf16>
    %cst_18 = arith.constant dense<0.000000e+00> : vector<64x8xf32>
    %31 = tpu.matmul %28, %30, %cst_18 {dimension_numbers = #tpu.dot_dimension_numbers<[1], [0], [0], [1], [0, 0, 1, 1], [], []>} : vector<64x32xbf16>, vector<32x8xbf16>, vector<64x8xf32> -> vector<64x8xf32>
    %32 = arith.addf %26, %31 : vector<64x8xf32>
    %33 = vector.extract_strided_slice %1 {offsets = [1, 2, 0], sizes = [8, 8, 32], strides = [1, 1, 1]} : vector<10x10x32xbf16> to vector<8x8x32xbf16>
    %34 = vector.shape_cast %33 : vector<8x8x32xbf16> to vector<64x32xbf16>
    %c5 = arith.constant 5 : index
    %c0_19 = arith.constant 0 : index
    %c0_20 = arith.constant 0 : index
    %35 = vector.load %arg2[%c5, %c0_19, %c0_20] : memref<9x32x8xbf16, #tpu.memory_space<vmem>>, vector<1x32x8xbf16>
    %36 = vector.shape_cast %35 : vector<1x32x8xbf16> to vector<32x8xbf16>
    %cst_21 = arith.constant dense<0.000000e+00> : vector<64x8xf32>
    %37 = tpu.matmul %34, %36, %cst_21 {dimension_numbers = #tpu.dot_dimension_numbers<[1], [0], [0], [1], [0, 0, 1, 1], [], []>} : vector<64x32xbf16>, vector<32x8xbf16>, vector<64x8xf32> -> vector<64x8xf32>
    %38 = arith.addf %32, %37 : vector<64x8xf32>
    %39 = vector.extract_strided_slice %1 {offsets = [2, 0, 0], sizes = [8, 8, 32], strides = [1, 1, 1]} : vector<10x10x32xbf16> to vector<8x8x32xbf16>
    %40 = vector.shape_cast %39 : vector<8x8x32xbf16> to vector<64x32xbf16>
    %c6 = arith.constant 6 : index
    %c0_22 = arith.constant 0 : index
    %c0_23 = arith.constant 0 : index
    %41 = vector.load %arg2[%c6, %c0_22, %c0_23] : memref<9x32x8xbf16, #tpu.memory_space<vmem>>, vector<1x32x8xbf16>
    %42 = vector.shape_cast %41 : vector<1x32x8xbf16> to vector<32x8xbf16>
    %cst_24 = arith.constant dense<0.000000e+00> : vector<64x8xf32>
    %43 = tpu.matmul %40, %42, %cst_24 {dimension_numbers = #tpu.dot_dimension_numbers<[1], [0], [0], [1], [0, 0, 1, 1], [], []>} : vector<64x32xbf16>, vector<32x8xbf16>, vector<64x8xf32> -> vector<64x8xf32>
    %44 = arith.addf %38, %43 : vector<64x8xf32>
    %45 = vector.extract_strided_slice %1 {offsets = [2, 1, 0], sizes = [8, 8, 32], strides = [1, 1, 1]} : vector<10x10x32xbf16> to vector<8x8x32xbf16>
    %46 = vector.shape_cast %45 : vector<8x8x32xbf16> to vector<64x32xbf16>
    %c7 = arith.constant 7 : index
    %c0_25 = arith.constant 0 : index
    %c0_26 = arith.constant 0 : index
    %47 = vector.load %arg2[%c7, %c0_25, %c0_26] : memref<9x32x8xbf16, #tpu.memory_space<vmem>>, vector<1x32x8xbf16>
    %48 = vector.shape_cast %47 : vector<1x32x8xbf16> to vector<32x8xbf16>
    %cst_27 = arith.constant dense<0.000000e+00> : vector<64x8xf32>
    %49 = tpu.matmul %46, %48, %cst_27 {dimension_numbers = #tpu.dot_dimension_numbers<[1], [0], [0], [1], [0, 0, 1, 1], [], []>} : vector<64x32xbf16>, vector<32x8xbf16>, vector<64x8xf32> -> vector<64x8xf32>
    %50 = arith.addf %44, %49 : vector<64x8xf32>
    %51 = vector.extract_strided_slice %1 {offsets = [2, 2, 0], sizes = [8, 8, 32], strides = [1, 1, 1]} : vector<10x10x32xbf16> to vector<8x8x32xbf16>
    %52 = vector.shape_cast %51 : vector<8x8x32xbf16> to vector<64x32xbf16>
    %c8 = arith.constant 8 : index
    %c0_28 = arith.constant 0 : index
    %c0_29 = arith.constant 0 : index
    %53 = vector.load %arg2[%c8, %c0_28, %c0_29] : memref<9x32x8xbf16, #tpu.memory_space<vmem>>, vector<1x32x8xbf16>
    %54 = vector.shape_cast %53 : vector<1x32x8xbf16> to vector<32x8xbf16>
    %cst_30 = arith.constant dense<0.000000e+00> : vector<64x8xf32>
    %55 = tpu.matmul %52, %54, %cst_30 {dimension_numbers = #tpu.dot_dimension_numbers<[1], [0], [0], [1], [0, 0, 1, 1], [], []>} : vector<64x32xbf16>, vector<32x8xbf16>, vector<64x8xf32> -> vector<64x8xf32>
    %56 = arith.addf %50, %55 : vector<64x8xf32>
    %57 = arith.truncf %56 : vector<64x8xf32> to vector<64x8xbf16>
    %c0_31 = arith.constant 0 : index
    %c0_32 = arith.constant 0 : index
    %c0_33 = arith.constant 0 : index
    %58 = vector.load %arg3[%c0_31, %c0_32, %c0_33] : memref<1x64x8xbf16, #tpu.memory_space<vmem>>, vector<1x64x8xbf16>
    %59 = vector.shape_cast %58 : vector<1x64x8xbf16> to vector<64x8xbf16>
    %60 = vector.shape_cast %57 : vector<64x8xbf16> to vector<1x64x8xbf16>
    tpu.vector_store %arg3[%c0_31, %c0_32, %c0_33], %60 {strides = array<i32>} : memref<1x64x8xbf16, #tpu.memory_space<vmem>>, vector<1x64x8xbf16>,
    return
  }
  func.func @transform_0(%arg0: i32) -> (i32, i32, i32, i32) {
    %c0_i32 = arith.constant 0 : i32
    %c0_i32_0 = arith.constant 0 : i32
    %c0_i32_1 = arith.constant 0 : i32
    %c0_i32_2 = arith.constant 0 : i32
    return %arg0, %c0_i32, %c0_i32_0, %c0_i32_1 : i32, i32, i32, i32
  }
  func.func @transform_1(%arg0: i32) -> (i32, i32, i32) {
    %c0_i32 = arith.constant 0 : i32
    %c0_i32_0 = arith.constant 0 : i32
    %c0_i32_1 = arith.constant 0 : i32
    %c0_i32_2 = arith.constant 0 : i32
    return %c0_i32, %c0_i32_0, %c0_i32_1 : i32, i32, i32
  }
  func.func @transform_2(%arg0: i32) -> (i32, i32, i32) {
    %c0_i32 = arith.constant 0 : i32
    %c0_i32_0 = arith.constant 0 : i32
    %c0_i32_1 = arith.constant 0 : i32
    return %arg0, %c0_i32, %c0_i32_0 : i32, i32, i32
  }
}

module attributes {stable_mosaic.version = 11 : i64} {
  func.func @_fused_matmul_kernel(%arg0: i32, %arg1: memref<128x32xbf16, #tpu.memory_space<vmem>>, %arg2: memref<32x16xbf16, #tpu.memory_space<vmem>>, %arg3: memref<1x32xbf16, #tpu.memory_space<vmem>>, %arg4: memref<1x32xbf16, #tpu.memory_space<vmem>>, %arg5: memref<128x16xbf16, #tpu.memory_space<vmem>>) attributes {dimension_semantics = [#tpu.dimension_semantics<parallel>], iteration_bounds = array<i64: 1>, scalar_prefetch = 0 : i64, scratch_operands = 0 : i64, tpu.core_type = #tpu.core_type<tc>, window_params = [{transform_indices = @transform_0, window_bounds = array<i64: 128, 32>}, {pipeline_mode = #tpu.pipeline_mode<synchronous>, transform_indices = @transform_1, window_bounds = array<i64: 32, 16>}, {pipeline_mode = #tpu.pipeline_mode<synchronous>, transform_indices = @transform_2, window_bounds = array<i64: 1, 32>}, {pipeline_mode = #tpu.pipeline_mode<synchronous>, transform_indices = @transform_3, window_bounds = array<i64: 1, 32>}, {transform_indices = @transform_4, window_bounds = array<i64: 128, 16>}]} {
    %c0 = arith.constant 0 : index
    %c0_0 = arith.constant 0 : index
    %0 = vector.load %arg1[%c0, %c0_0] : memref<128x32xbf16, #tpu.memory_space<vmem>>, vector<128x32xbf16>
    %c0_1 = arith.constant 0 : index
    %c0_2 = arith.constant 0 : index
    %1 = vector.load %arg3[%c0_1, %c0_2] : memref<1x32xbf16, #tpu.memory_space<vmem>>, vector<1x32xbf16>
    %2 = vector.broadcast %1 : vector<1x32xbf16> to vector<128x32xbf16>
    %3 = arith.mulf %0, %2 : vector<128x32xbf16>
    %c0_3 = arith.constant 0 : index
    %c0_4 = arith.constant 0 : index
    %4 = vector.load %arg4[%c0_3, %c0_4] : memref<1x32xbf16, #tpu.memory_space<vmem>>, vector<1x32xbf16>
    %5 = vector.broadcast %4 : vector<1x32xbf16> to vector<128x32xbf16>
    %6 = arith.addf %3, %5 : vector<128x32xbf16>
    %cst = arith.constant 0.000000e+00 : bf16
    %7 = vector.broadcast %cst : bf16 to vector<128x32xbf16>
    %8 = arith.maximumf %6, %7 : vector<128x32xbf16>
    %c0_5 = arith.constant 0 : index
    %c0_6 = arith.constant 0 : index
    %9 = vector.load %arg2[%c0_5, %c0_6] : memref<32x16xbf16, #tpu.memory_space<vmem>>, vector<32x16xbf16>
    %cst_7 = arith.constant dense<0.000000e+00> : vector<128x16xf32>
    %10 = tpu.matmul %8, %9, %cst_7 {dimension_numbers = #tpu.dot_dimension_numbers<[1], [0], [0], [1], [0, 0, 1, 1], [], []>} : vector<128x32xbf16>, vector<32x16xbf16>, vector<128x16xf32> -> vector<128x16xf32>
    %11 = arith.truncf %10 : vector<128x16xf32> to vector<128x16xbf16>
    %c0_8 = arith.constant 0 : index
    %c0_9 = arith.constant 0 : index
    %12 = vector.load %arg5[%c0_8, %c0_9] : memref<128x16xbf16, #tpu.memory_space<vmem>>, vector<128x16xbf16>
    tpu.vector_store %arg5[%c0_8, %c0_9], %11 {strides = array<i32>} : memref<128x16xbf16, #tpu.memory_space<vmem>>, vector<128x16xbf16>,
    return
  }
  func.func @transform_0(%arg0: i32) -> (i32, i32) {
    %c0_i32 = arith.constant 0 : i32
    %c0_i32_0 = arith.constant 0 : i32
    return %arg0, %c0_i32 : i32, i32
  }
  func.func @transform_1(%arg0: i32) -> (i32, i32) {
    %c0_i32 = arith.constant 0 : i32
    %c0_i32_0 = arith.constant 0 : i32
    %c0_i32_1 = arith.constant 0 : i32
    return %c0_i32, %c0_i32_0 : i32, i32
  }
  func.func @transform_2(%arg0: i32) -> (i32, i32) {
    %c0_i32 = arith.constant 0 : i32
    %c0_i32_0 = arith.constant 0 : i32
    %c0_i32_1 = arith.constant 0 : i32
    return %c0_i32, %c0_i32_0 : i32, i32
  }
  func.func @transform_3(%arg0: i32) -> (i32, i32) {
    %c0_i32 = arith.constant 0 : i32
    %c0_i32_0 = arith.constant 0 : i32
    %c0_i32_1 = arith.constant 0 : i32
    return %c0_i32, %c0_i32_0 : i32, i32
  }
  func.func @transform_4(%arg0: i32) -> (i32, i32) {
    %c0_i32 = arith.constant 0 : i32
    %c0_i32_0 = arith.constant 0 : i32
    return %arg0, %c0_i32 : i32, i32
  }
}

module attributes {stable_mosaic.version = 11 : i64} {
  func.func @_avgpool2x2_kernel(%arg0: i32, %arg1: memref<8x2x4x2x16xbf16, #tpu.memory_space<vmem>>, %arg2: memref<8x4x16xbf16, #tpu.memory_space<vmem>>) attributes {dimension_semantics = [#tpu.dimension_semantics<parallel>], iteration_bounds = array<i64: 1>, scalar_prefetch = 0 : i64, scratch_operands = 0 : i64, tpu.core_type = #tpu.core_type<tc>, window_params = [{transform_indices = @transform_0, window_bounds = array<i64: 8, 2, 4, 2, 16>}, {transform_indices = @transform_1, window_bounds = array<i64: 8, 4, 16>}]} {
    %c0 = arith.constant 0 : index
    %c0_0 = arith.constant 0 : index
    %c0_1 = arith.constant 0 : index
    %c0_2 = arith.constant 0 : index
    %c0_3 = arith.constant 0 : index
    %0 = vector.load %arg1[%c0, %c0_0, %c0_1, %c0_2, %c0_3] : memref<8x2x4x2x16xbf16, #tpu.memory_space<vmem>>, vector<8x2x4x2x16xbf16>
    %1 = arith.extf %0 : vector<8x2x4x2x16xbf16> to vector<8x2x4x2x16xf32>
    %cst = arith.constant dense<0.000000e+00> : vector<8x4x2x16xf32>
    %2 = vector.multi_reduction <add>, %1, %cst [1] : vector<8x2x4x2x16xf32> to vector<8x4x2x16xf32>
    %cst_4 = arith.constant dense<0.000000e+00> : vector<8x4x16xf32>
    %3 = vector.multi_reduction <add>, %2, %cst_4 [2] : vector<8x4x2x16xf32> to vector<8x4x16xf32>
    %cst_5 = arith.constant 2.500000e-01 : f32
    %4 = vector.broadcast %cst_5 : f32 to vector<8x4x16xf32>
    %5 = arith.mulf %3, %4 : vector<8x4x16xf32>
    %6 = arith.truncf %5 : vector<8x4x16xf32> to vector<8x4x16xbf16>
    %c0_6 = arith.constant 0 : index
    %c0_7 = arith.constant 0 : index
    %c0_8 = arith.constant 0 : index
    %7 = vector.load %arg2[%c0_6, %c0_7, %c0_8] : memref<8x4x16xbf16, #tpu.memory_space<vmem>>, vector<8x4x16xbf16>
    tpu.vector_store %arg2[%c0_6, %c0_7, %c0_8], %6 {strides = array<i32>} : memref<8x4x16xbf16, #tpu.memory_space<vmem>>, vector<8x4x16xbf16>,
    return
  }
  func.func @transform_0(%arg0: i32) -> (i32, i32, i32, i32, i32) {
    %c0_i32 = arith.constant 0 : i32
    %c0_i32_0 = arith.constant 0 : i32
    %c0_i32_1 = arith.constant 0 : i32
    %c0_i32_2 = arith.constant 0 : i32
    %c0_i32_3 = arith.constant 0 : i32
    return %arg0, %c0_i32, %c0_i32_0, %c0_i32_1, %c0_i32_2 : i32, i32, i32, i32, i32
  }
  func.func @transform_1(%arg0: i32) -> (i32, i32, i32) {
    %c0_i32 = arith.constant 0 : i32
    %c0_i32_0 = arith.constant 0 : i32
    %c0_i32_1 = arith.constant 0 : i32
    return %arg0, %c0_i32, %c0_i32_0 : i32, i32, i32
  }
}

module attributes {stable_mosaic.version = 11 : i64} {
  func.func @_fused_matmul_kernel(%arg0: i32, %arg1: memref<32x32xbf16, #tpu.memory_space<vmem>>, %arg2: memref<32x32xbf16, #tpu.memory_space<vmem>>, %arg3: memref<1x32xbf16, #tpu.memory_space<vmem>>, %arg4: memref<1x32xbf16, #tpu.memory_space<vmem>>, %arg5: memref<1x32xf32, #tpu.memory_space<vmem>>, %arg6: memref<1x32xf32, #tpu.memory_space<vmem>>, %arg7: memref<32x32xbf16, #tpu.memory_space<vmem>>) attributes {dimension_semantics = [#tpu.dimension_semantics<parallel>], iteration_bounds = array<i64: 1>, scalar_prefetch = 0 : i64, scratch_operands = 0 : i64, tpu.core_type = #tpu.core_type<tc>, window_params = [{transform_indices = @transform_0, window_bounds = array<i64: 32, 32>}, {pipeline_mode = #tpu.pipeline_mode<synchronous>, transform_indices = @transform_1, window_bounds = array<i64: 32, 32>}, {pipeline_mode = #tpu.pipeline_mode<synchronous>, transform_indices = @transform_2, window_bounds = array<i64: 1, 32>}, {pipeline_mode = #tpu.pipeline_mode<synchronous>, transform_indices = @transform_3, window_bounds = array<i64: 1, 32>}, {pipeline_mode = #tpu.pipeline_mode<synchronous>, transform_indices = @transform_4, window_bounds = array<i64: 1, 32>}, {pipeline_mode = #tpu.pipeline_mode<synchronous>, transform_indices = @transform_5, window_bounds = array<i64: 1, 32>}, {transform_indices = @transform_6, window_bounds = array<i64: 32, 32>}]} {
    %c0 = arith.constant 0 : index
    %c0_0 = arith.constant 0 : index
    %0 = vector.load %arg1[%c0, %c0_0] : memref<32x32xbf16, #tpu.memory_space<vmem>>, vector<32x32xbf16>
    %c0_1 = arith.constant 0 : index
    %c0_2 = arith.constant 0 : index
    %1 = vector.load %arg3[%c0_1, %c0_2] : memref<1x32xbf16, #tpu.memory_space<vmem>>, vector<1x32xbf16>
    %2 = vector.broadcast %1 : vector<1x32xbf16> to vector<32x32xbf16>
    %3 = arith.mulf %0, %2 : vector<32x32xbf16>
    %c0_3 = arith.constant 0 : index
    %c0_4 = arith.constant 0 : index
    %4 = vector.load %arg4[%c0_3, %c0_4] : memref<1x32xbf16, #tpu.memory_space<vmem>>, vector<1x32xbf16>
    %5 = vector.broadcast %4 : vector<1x32xbf16> to vector<32x32xbf16>
    %6 = arith.addf %3, %5 : vector<32x32xbf16>
    %cst = arith.constant 0.000000e+00 : bf16
    %7 = vector.broadcast %cst : bf16 to vector<32x32xbf16>
    %8 = arith.maximumf %6, %7 : vector<32x32xbf16>
    %c0_5 = arith.constant 0 : index
    %c0_6 = arith.constant 0 : index
    %9 = vector.load %arg2[%c0_5, %c0_6] : memref<32x32xbf16, #tpu.memory_space<vmem>>, vector<32x32xbf16>
    %cst_7 = arith.constant dense<0.000000e+00> : vector<32x32xf32>
    %10 = tpu.matmul %8, %9, %cst_7 {dimension_numbers = #tpu.dot_dimension_numbers<[1], [0], [0], [1], [0, 0, 1, 1], [], []>} : vector<32x32xbf16>, vector<32x32xbf16>, vector<32x32xf32> -> vector<32x32xf32>
    %c0_8 = arith.constant 0 : index
    %c0_9 = arith.constant 0 : index
    %11 = vector.load %arg5[%c0_8, %c0_9] : memref<1x32xf32, #tpu.memory_space<vmem>>, vector<1x32xf32>
    %12 = vector.broadcast %11 : vector<1x32xf32> to vector<32x32xf32>
    %13 = arith.mulf %10, %12 : vector<32x32xf32>
    %c0_10 = arith.constant 0 : index
    %c0_11 = arith.constant 0 : index
    %14 = vector.load %arg6[%c0_10, %c0_11] : memref<1x32xf32, #tpu.memory_space<vmem>>, vector<1x32xf32>
    %15 = vector.broadcast %14 : vector<1x32xf32> to vector<32x32xf32>
    %16 = arith.addf %13, %15 : vector<32x32xf32>
    %cst_12 = arith.constant 0.000000e+00 : f32
    %17 = vector.broadcast %cst_12 : f32 to vector<32x32xf32>
    %18 = arith.maximumf %16, %17 : vector<32x32xf32>
    %19 = arith.truncf %18 : vector<32x32xf32> to vector<32x32xbf16>
    %c0_13 = arith.constant 0 : index
    %c0_14 = arith.constant 0 : index
    %20 = vector.load %arg7[%c0_13, %c0_14] : memref<32x32xbf16, #tpu.memory_space<vmem>>, vector<32x32xbf16>
    tpu.vector_store %arg7[%c0_13, %c0_14], %19 {strides = array<i32>} : memref<32x32xbf16, #tpu.memory_space<vmem>>, vector<32x32xbf16>,
    return
  }
  func.func @transform_0(%arg0: i32) -> (i32, i32) {
    %c0_i32 = arith.constant 0 : i32
    %c0_i32_0 = arith.constant 0 : i32
    return %arg0, %c0_i32 : i32, i32
  }
  func.func @transform_1(%arg0: i32) -> (i32, i32) {
    %c0_i32 = arith.constant 0 : i32
    %c0_i32_0 = arith.constant 0 : i32
    %c0_i32_1 = arith.constant 0 : i32
    return %c0_i32, %c0_i32_0 : i32, i32
  }
  func.func @transform_2(%arg0: i32) -> (i32, i32) {
    %c0_i32 = arith.constant 0 : i32
    %c0_i32_0 = arith.constant 0 : i32
    %c0_i32_1 = arith.constant 0 : i32
    return %c0_i32, %c0_i32_0 : i32, i32
  }
  func.func @transform_3(%arg0: i32) -> (i32, i32) {
    %c0_i32 = arith.constant 0 : i32
    %c0_i32_0 = arith.constant 0 : i32
    %c0_i32_1 = arith.constant 0 : i32
    return %c0_i32, %c0_i32_0 : i32, i32
  }
  func.func @transform_4(%arg0: i32) -> (i32, i32) {
    %c0_i32 = arith.constant 0 : i32
    %c0_i32_0 = arith.constant 0 : i32
    %c0_i32_1 = arith.constant 0 : i32
    return %c0_i32, %c0_i32_0 : i32, i32
  }
  func.func @transform_5(%arg0: i32) -> (i32, i32) {
    %c0_i32 = arith.constant 0 : i32
    %c0_i32_0 = arith.constant 0 : i32
    %c0_i32_1 = arith.constant 0 : i32
    return %c0_i32, %c0_i32_0 : i32, i32
  }
  func.func @transform_6(%arg0: i32) -> (i32, i32) {
    %c0_i32 = arith.constant 0 : i32
    %c0_i32_0 = arith.constant 0 : i32
    return %arg0, %c0_i32 : i32, i32
  }
}

module attributes {stable_mosaic.version = 11 : i64} {
  func.func @_conv3x3_kernel(%arg0: i32, %arg1: memref<1x6x6x32xbf16, #tpu.memory_space<vmem>>, %arg2: memref<9x32x8xbf16, #tpu.memory_space<vmem>>, %arg3: memref<1x16x8xbf16, #tpu.memory_space<vmem>>) attributes {dimension_semantics = [#tpu.dimension_semantics<parallel>], iteration_bounds = array<i64: 2>, scalar_prefetch = 0 : i64, scratch_operands = 0 : i64, tpu.core_type = #tpu.core_type<tc>, window_params = [{transform_indices = @transform_0, window_bounds = array<i64: 1, 6, 6, 32>}, {pipeline_mode = #tpu.pipeline_mode<synchronous>, transform_indices = @transform_1, window_bounds = array<i64: 9, 32, 8>}, {transform_indices = @transform_2, window_bounds = array<i64: 1, 16, 8>}]} {
    %c0 = arith.constant 0 : index
    %c0_0 = arith.constant 0 : index
    %c0_1 = arith.constant 0 : index
    %c0_2 = arith.constant 0 : index
    %0 = vector.load %arg1[%c0, %c0_0, %c0_1, %c0_2] : memref<1x6x6x32xbf16, #tpu.memory_space<vmem>>, vector<1x6x6x32xbf16>
    %1 = vector.shape_cast %0 : vector<1x6x6x32xbf16> to vector<6x6x32xbf16>
    %cst = arith.constant 0.000000e+00 : f32
    %2 = vector.broadcast %cst : f32 to vector<16x8xf32>
    %3 = vector.extract_strided_slice %1 {offsets = [0, 0, 0], sizes = [4, 4, 32], strides = [1, 1, 1]} : vector<6x6x32xbf16> to vector<4x4x32xbf16>
    %4 = vector.shape_cast %3 : vector<4x4x32xbf16> to vector<16x32xbf16>
    %c0_3 = arith.constant 0 : index
    %c0_4 = arith.constant 0 : index
    %c0_5 = arith.constant 0 : index
    %5 = vector.load %arg2[%c0_3, %c0_4, %c0_5] : memref<9x32x8xbf16, #tpu.memory_space<vmem>>, vector<1x32x8xbf16>
    %6 = vector.shape_cast %5 : vector<1x32x8xbf16> to vector<32x8xbf16>
    %cst_6 = arith.constant dense<0.000000e+00> : vector<16x8xf32>
    %7 = tpu.matmul %4, %6, %cst_6 {dimension_numbers = #tpu.dot_dimension_numbers<[1], [0], [0], [1], [0, 0, 1, 1], [], []>} : vector<16x32xbf16>, vector<32x8xbf16>, vector<16x8xf32> -> vector<16x8xf32>
    %8 = arith.addf %2, %7 : vector<16x8xf32>
    %9 = vector.extract_strided_slice %1 {offsets = [0, 1, 0], sizes = [4, 4, 32], strides = [1, 1, 1]} : vector<6x6x32xbf16> to vector<4x4x32xbf16>
    %10 = vector.shape_cast %9 : vector<4x4x32xbf16> to vector<16x32xbf16>
    %c1 = arith.constant 1 : index
    %c0_7 = arith.constant 0 : index
    %c0_8 = arith.constant 0 : index
    %11 = vector.load %arg2[%c1, %c0_7, %c0_8] : memref<9x32x8xbf16, #tpu.memory_space<vmem>>, vector<1x32x8xbf16>
    %12 = vector.shape_cast %11 : vector<1x32x8xbf16> to vector<32x8xbf16>
    %cst_9 = arith.constant dense<0.000000e+00> : vector<16x8xf32>
    %13 = tpu.matmul %10, %12, %cst_9 {dimension_numbers = #tpu.dot_dimension_numbers<[1], [0], [0], [1], [0, 0, 1, 1], [], []>} : vector<16x32xbf16>, vector<32x8xbf16>, vector<16x8xf32> -> vector<16x8xf32>
    %14 = arith.addf %8, %13 : vector<16x8xf32>
    %15 = vector.extract_strided_slice %1 {offsets = [0, 2, 0], sizes = [4, 4, 32], strides = [1, 1, 1]} : vector<6x6x32xbf16> to vector<4x4x32xbf16>
    %16 = vector.shape_cast %15 : vector<4x4x32xbf16> to vector<16x32xbf16>
    %c2 = arith.constant 2 : index
    %c0_10 = arith.constant 0 : index
    %c0_11 = arith.constant 0 : index
    %17 = vector.load %arg2[%c2, %c0_10, %c0_11] : memref<9x32x8xbf16, #tpu.memory_space<vmem>>, vector<1x32x8xbf16>
    %18 = vector.shape_cast %17 : vector<1x32x8xbf16> to vector<32x8xbf16>
    %cst_12 = arith.constant dense<0.000000e+00> : vector<16x8xf32>
    %19 = tpu.matmul %16, %18, %cst_12 {dimension_numbers = #tpu.dot_dimension_numbers<[1], [0], [0], [1], [0, 0, 1, 1], [], []>} : vector<16x32xbf16>, vector<32x8xbf16>, vector<16x8xf32> -> vector<16x8xf32>
    %20 = arith.addf %14, %19 : vector<16x8xf32>
    %21 = vector.extract_strided_slice %1 {offsets = [1, 0, 0], sizes = [4, 4, 32], strides = [1, 1, 1]} : vector<6x6x32xbf16> to vector<4x4x32xbf16>
    %22 = vector.shape_cast %21 : vector<4x4x32xbf16> to vector<16x32xbf16>
    %c3 = arith.constant 3 : index
    %c0_13 = arith.constant 0 : index
    %c0_14 = arith.constant 0 : index
    %23 = vector.load %arg2[%c3, %c0_13, %c0_14] : memref<9x32x8xbf16, #tpu.memory_space<vmem>>, vector<1x32x8xbf16>
    %24 = vector.shape_cast %23 : vector<1x32x8xbf16> to vector<32x8xbf16>
    %cst_15 = arith.constant dense<0.000000e+00> : vector<16x8xf32>
    %25 = tpu.matmul %22, %24, %cst_15 {dimension_numbers = #tpu.dot_dimension_numbers<[1], [0], [0], [1], [0, 0, 1, 1], [], []>} : vector<16x32xbf16>, vector<32x8xbf16>, vector<16x8xf32> -> vector<16x8xf32>
    %26 = arith.addf %20, %25 : vector<16x8xf32>
    %27 = vector.extract_strided_slice %1 {offsets = [1, 1, 0], sizes = [4, 4, 32], strides = [1, 1, 1]} : vector<6x6x32xbf16> to vector<4x4x32xbf16>
    %28 = vector.shape_cast %27 : vector<4x4x32xbf16> to vector<16x32xbf16>
    %c4 = arith.constant 4 : index
    %c0_16 = arith.constant 0 : index
    %c0_17 = arith.constant 0 : index
    %29 = vector.load %arg2[%c4, %c0_16, %c0_17] : memref<9x32x8xbf16, #tpu.memory_space<vmem>>, vector<1x32x8xbf16>
    %30 = vector.shape_cast %29 : vector<1x32x8xbf16> to vector<32x8xbf16>
    %cst_18 = arith.constant dense<0.000000e+00> : vector<16x8xf32>
    %31 = tpu.matmul %28, %30, %cst_18 {dimension_numbers = #tpu.dot_dimension_numbers<[1], [0], [0], [1], [0, 0, 1, 1], [], []>} : vector<16x32xbf16>, vector<32x8xbf16>, vector<16x8xf32> -> vector<16x8xf32>
    %32 = arith.addf %26, %31 : vector<16x8xf32>
    %33 = vector.extract_strided_slice %1 {offsets = [1, 2, 0], sizes = [4, 4, 32], strides = [1, 1, 1]} : vector<6x6x32xbf16> to vector<4x4x32xbf16>
    %34 = vector.shape_cast %33 : vector<4x4x32xbf16> to vector<16x32xbf16>
    %c5 = arith.constant 5 : index
    %c0_19 = arith.constant 0 : index
    %c0_20 = arith.constant 0 : index
    %35 = vector.load %arg2[%c5, %c0_19, %c0_20] : memref<9x32x8xbf16, #tpu.memory_space<vmem>>, vector<1x32x8xbf16>
    %36 = vector.shape_cast %35 : vector<1x32x8xbf16> to vector<32x8xbf16>
    %cst_21 = arith.constant dense<0.000000e+00> : vector<16x8xf32>
    %37 = tpu.matmul %34, %36, %cst_21 {dimension_numbers = #tpu.dot_dimension_numbers<[1], [0], [0], [1], [0, 0, 1, 1], [], []>} : vector<16x32xbf16>, vector<32x8xbf16>, vector<16x8xf32> -> vector<16x8xf32>
    %38 = arith.addf %32, %37 : vector<16x8xf32>
    %39 = vector.extract_strided_slice %1 {offsets = [2, 0, 0], sizes = [4, 4, 32], strides = [1, 1, 1]} : vector<6x6x32xbf16> to vector<4x4x32xbf16>
    %40 = vector.shape_cast %39 : vector<4x4x32xbf16> to vector<16x32xbf16>
    %c6 = arith.constant 6 : index
    %c0_22 = arith.constant 0 : index
    %c0_23 = arith.constant 0 : index
    %41 = vector.load %arg2[%c6, %c0_22, %c0_23] : memref<9x32x8xbf16, #tpu.memory_space<vmem>>, vector<1x32x8xbf16>
    %42 = vector.shape_cast %41 : vector<1x32x8xbf16> to vector<32x8xbf16>
    %cst_24 = arith.constant dense<0.000000e+00> : vector<16x8xf32>
    %43 = tpu.matmul %40, %42, %cst_24 {dimension_numbers = #tpu.dot_dimension_numbers<[1], [0], [0], [1], [0, 0, 1, 1], [], []>} : vector<16x32xbf16>, vector<32x8xbf16>, vector<16x8xf32> -> vector<16x8xf32>
    %44 = arith.addf %38, %43 : vector<16x8xf32>
    %45 = vector.extract_strided_slice %1 {offsets = [2, 1, 0], sizes = [4, 4, 32], strides = [1, 1, 1]} : vector<6x6x32xbf16> to vector<4x4x32xbf16>
    %46 = vector.shape_cast %45 : vector<4x4x32xbf16> to vector<16x32xbf16>
    %c7 = arith.constant 7 : index
    %c0_25 = arith.constant 0 : index
    %c0_26 = arith.constant 0 : index
    %47 = vector.load %arg2[%c7, %c0_25, %c0_26] : memref<9x32x8xbf16, #tpu.memory_space<vmem>>, vector<1x32x8xbf16>
    %48 = vector.shape_cast %47 : vector<1x32x8xbf16> to vector<32x8xbf16>
    %cst_27 = arith.constant dense<0.000000e+00> : vector<16x8xf32>
    %49 = tpu.matmul %46, %48, %cst_27 {dimension_numbers = #tpu.dot_dimension_numbers<[1], [0], [0], [1], [0, 0, 1, 1], [], []>} : vector<16x32xbf16>, vector<32x8xbf16>, vector<16x8xf32> -> vector<16x8xf32>
    %50 = arith.addf %44, %49 : vector<16x8xf32>
    %51 = vector.extract_strided_slice %1 {offsets = [2, 2, 0], sizes = [4, 4, 32], strides = [1, 1, 1]} : vector<6x6x32xbf16> to vector<4x4x32xbf16>
    %52 = vector.shape_cast %51 : vector<4x4x32xbf16> to vector<16x32xbf16>
    %c8 = arith.constant 8 : index
    %c0_28 = arith.constant 0 : index
    %c0_29 = arith.constant 0 : index
    %53 = vector.load %arg2[%c8, %c0_28, %c0_29] : memref<9x32x8xbf16, #tpu.memory_space<vmem>>, vector<1x32x8xbf16>
    %54 = vector.shape_cast %53 : vector<1x32x8xbf16> to vector<32x8xbf16>
    %cst_30 = arith.constant dense<0.000000e+00> : vector<16x8xf32>
    %55 = tpu.matmul %52, %54, %cst_30 {dimension_numbers = #tpu.dot_dimension_numbers<[1], [0], [0], [1], [0, 0, 1, 1], [], []>} : vector<16x32xbf16>, vector<32x8xbf16>, vector<16x8xf32> -> vector<16x8xf32>
    %56 = arith.addf %50, %55 : vector<16x8xf32>
    %57 = arith.truncf %56 : vector<16x8xf32> to vector<16x8xbf16>
    %c0_31 = arith.constant 0 : index
    %c0_32 = arith.constant 0 : index
    %c0_33 = arith.constant 0 : index
    %58 = vector.load %arg3[%c0_31, %c0_32, %c0_33] : memref<1x16x8xbf16, #tpu.memory_space<vmem>>, vector<1x16x8xbf16>
    %59 = vector.shape_cast %58 : vector<1x16x8xbf16> to vector<16x8xbf16>
    %60 = vector.shape_cast %57 : vector<16x8xbf16> to vector<1x16x8xbf16>
    tpu.vector_store %arg3[%c0_31, %c0_32, %c0_33], %60 {strides = array<i32>} : memref<1x16x8xbf16, #tpu.memory_space<vmem>>, vector<1x16x8xbf16>,
    return
  }
  func.func @transform_0(%arg0: i32) -> (i32, i32, i32, i32) {
    %c0_i32 = arith.constant 0 : i32
    %c0_i32_0 = arith.constant 0 : i32
    %c0_i32_1 = arith.constant 0 : i32
    %c0_i32_2 = arith.constant 0 : i32
    return %arg0, %c0_i32, %c0_i32_0, %c0_i32_1 : i32, i32, i32, i32
  }
  func.func @transform_1(%arg0: i32) -> (i32, i32, i32) {
    %c0_i32 = arith.constant 0 : i32
    %c0_i32_0 = arith.constant 0 : i32
    %c0_i32_1 = arith.constant 0 : i32
    %c0_i32_2 = arith.constant 0 : i32
    return %c0_i32, %c0_i32_0, %c0_i32_1 : i32, i32, i32
  }
  func.func @transform_2(%arg0: i32) -> (i32, i32, i32) {
    %c0_i32 = arith.constant 0 : i32
    %c0_i32_0 = arith.constant 0 : i32
    %c0_i32_1 = arith.constant 0 : i32
    return %arg0, %c0_i32, %c0_i32_0 : i32, i32, i32
  }
}

module attributes {stable_mosaic.version = 11 : i64} {
  func.func @_fused_matmul_kernel(%arg0: i32, %arg1: memref<32x32xbf16, #tpu.memory_space<vmem>>, %arg2: memref<32x16xbf16, #tpu.memory_space<vmem>>, %arg3: memref<1x32xbf16, #tpu.memory_space<vmem>>, %arg4: memref<1x32xbf16, #tpu.memory_space<vmem>>, %arg5: memref<32x16xbf16, #tpu.memory_space<vmem>>) attributes {dimension_semantics = [#tpu.dimension_semantics<parallel>], iteration_bounds = array<i64: 1>, scalar_prefetch = 0 : i64, scratch_operands = 0 : i64, tpu.core_type = #tpu.core_type<tc>, window_params = [{transform_indices = @transform_0, window_bounds = array<i64: 32, 32>}, {pipeline_mode = #tpu.pipeline_mode<synchronous>, transform_indices = @transform_1, window_bounds = array<i64: 32, 16>}, {pipeline_mode = #tpu.pipeline_mode<synchronous>, transform_indices = @transform_2, window_bounds = array<i64: 1, 32>}, {pipeline_mode = #tpu.pipeline_mode<synchronous>, transform_indices = @transform_3, window_bounds = array<i64: 1, 32>}, {transform_indices = @transform_4, window_bounds = array<i64: 32, 16>}]} {
    %c0 = arith.constant 0 : index
    %c0_0 = arith.constant 0 : index
    %0 = vector.load %arg1[%c0, %c0_0] : memref<32x32xbf16, #tpu.memory_space<vmem>>, vector<32x32xbf16>
    %c0_1 = arith.constant 0 : index
    %c0_2 = arith.constant 0 : index
    %1 = vector.load %arg3[%c0_1, %c0_2] : memref<1x32xbf16, #tpu.memory_space<vmem>>, vector<1x32xbf16>
    %2 = vector.broadcast %1 : vector<1x32xbf16> to vector<32x32xbf16>
    %3 = arith.mulf %0, %2 : vector<32x32xbf16>
    %c0_3 = arith.constant 0 : index
    %c0_4 = arith.constant 0 : index
    %4 = vector.load %arg4[%c0_3, %c0_4] : memref<1x32xbf16, #tpu.memory_space<vmem>>, vector<1x32xbf16>
    %5 = vector.broadcast %4 : vector<1x32xbf16> to vector<32x32xbf16>
    %6 = arith.addf %3, %5 : vector<32x32xbf16>
    %cst = arith.constant 0.000000e+00 : bf16
    %7 = vector.broadcast %cst : bf16 to vector<32x32xbf16>
    %8 = arith.maximumf %6, %7 : vector<32x32xbf16>
    %c0_5 = arith.constant 0 : index
    %c0_6 = arith.constant 0 : index
    %9 = vector.load %arg2[%c0_5, %c0_6] : memref<32x16xbf16, #tpu.memory_space<vmem>>, vector<32x16xbf16>
    %cst_7 = arith.constant dense<0.000000e+00> : vector<32x16xf32>
    %10 = tpu.matmul %8, %9, %cst_7 {dimension_numbers = #tpu.dot_dimension_numbers<[1], [0], [0], [1], [0, 0, 1, 1], [], []>} : vector<32x32xbf16>, vector<32x16xbf16>, vector<32x16xf32> -> vector<32x16xf32>
    %11 = arith.truncf %10 : vector<32x16xf32> to vector<32x16xbf16>
    %c0_8 = arith.constant 0 : index
    %c0_9 = arith.constant 0 : index
    %12 = vector.load %arg5[%c0_8, %c0_9] : memref<32x16xbf16, #tpu.memory_space<vmem>>, vector<32x16xbf16>
    tpu.vector_store %arg5[%c0_8, %c0_9], %11 {strides = array<i32>} : memref<32x16xbf16, #tpu.memory_space<vmem>>, vector<32x16xbf16>,
    return
  }
  func.func @transform_0(%arg0: i32) -> (i32, i32) {
    %c0_i32 = arith.constant 0 : i32
    %c0_i32_0 = arith.constant 0 : i32
    return %arg0, %c0_i32 : i32, i32
  }
  func.func @transform_1(%arg0: i32) -> (i32, i32) {
    %c0_i32 = arith.constant 0 : i32
    %c0_i32_0 = arith.constant 0 : i32
    %c0_i32_1 = arith.constant 0 : i32
    return %c0_i32, %c0_i32_0 : i32, i32
  }
  func.func @transform_2(%arg0: i32) -> (i32, i32) {
    %c0_i32 = arith.constant 0 : i32
    %c0_i32_0 = arith.constant 0 : i32
    %c0_i32_1 = arith.constant 0 : i32
    return %c0_i32, %c0_i32_0 : i32, i32
  }
  func.func @transform_3(%arg0: i32) -> (i32, i32) {
    %c0_i32 = arith.constant 0 : i32
    %c0_i32_0 = arith.constant 0 : i32
    %c0_i32_1 = arith.constant 0 : i32
    return %c0_i32, %c0_i32_0 : i32, i32
  }
  func.func @transform_4(%arg0: i32) -> (i32, i32) {
    %c0_i32 = arith.constant 0 : i32
    %c0_i32_0 = arith.constant 0 : i32
    return %arg0, %c0_i32 : i32, i32
  }
}

module attributes {stable_mosaic.version = 11 : i64} {
  func.func @_avgpool2x2_kernel(%arg0: i32, %arg1: memref<8x2x2x2x16xbf16, #tpu.memory_space<vmem>>, %arg2: memref<8x2x16xbf16, #tpu.memory_space<vmem>>) attributes {dimension_semantics = [#tpu.dimension_semantics<parallel>], iteration_bounds = array<i64: 1>, scalar_prefetch = 0 : i64, scratch_operands = 0 : i64, tpu.core_type = #tpu.core_type<tc>, window_params = [{transform_indices = @transform_0, window_bounds = array<i64: 8, 2, 2, 2, 16>}, {transform_indices = @transform_1, window_bounds = array<i64: 8, 2, 16>}]} {
    %c0 = arith.constant 0 : index
    %c0_0 = arith.constant 0 : index
    %c0_1 = arith.constant 0 : index
    %c0_2 = arith.constant 0 : index
    %c0_3 = arith.constant 0 : index
    %0 = vector.load %arg1[%c0, %c0_0, %c0_1, %c0_2, %c0_3] : memref<8x2x2x2x16xbf16, #tpu.memory_space<vmem>>, vector<8x2x2x2x16xbf16>
    %1 = arith.extf %0 : vector<8x2x2x2x16xbf16> to vector<8x2x2x2x16xf32>
    %cst = arith.constant dense<0.000000e+00> : vector<8x2x2x16xf32>
    %2 = vector.multi_reduction <add>, %1, %cst [1] : vector<8x2x2x2x16xf32> to vector<8x2x2x16xf32>
    %cst_4 = arith.constant dense<0.000000e+00> : vector<8x2x16xf32>
    %3 = vector.multi_reduction <add>, %2, %cst_4 [2] : vector<8x2x2x16xf32> to vector<8x2x16xf32>
    %cst_5 = arith.constant 2.500000e-01 : f32
    %4 = vector.broadcast %cst_5 : f32 to vector<8x2x16xf32>
    %5 = arith.mulf %3, %4 : vector<8x2x16xf32>
    %6 = arith.truncf %5 : vector<8x2x16xf32> to vector<8x2x16xbf16>
    %c0_6 = arith.constant 0 : index
    %c0_7 = arith.constant 0 : index
    %c0_8 = arith.constant 0 : index
    %7 = vector.load %arg2[%c0_6, %c0_7, %c0_8] : memref<8x2x16xbf16, #tpu.memory_space<vmem>>, vector<8x2x16xbf16>
    tpu.vector_store %arg2[%c0_6, %c0_7, %c0_8], %6 {strides = array<i32>} : memref<8x2x16xbf16, #tpu.memory_space<vmem>>, vector<8x2x16xbf16>,
    return
  }
  func.func @transform_0(%arg0: i32) -> (i32, i32, i32, i32, i32) {
    %c0_i32 = arith.constant 0 : i32
    %c0_i32_0 = arith.constant 0 : i32
    %c0_i32_1 = arith.constant 0 : i32
    %c0_i32_2 = arith.constant 0 : i32
    %c0_i32_3 = arith.constant 0 : i32
    return %arg0, %c0_i32, %c0_i32_0, %c0_i32_1, %c0_i32_2 : i32, i32, i32, i32, i32
  }
  func.func @transform_1(%arg0: i32) -> (i32, i32, i32) {
    %c0_i32 = arith.constant 0 : i32
    %c0_i32_0 = arith.constant 0 : i32
    %c0_i32_1 = arith.constant 0 : i32
    return %arg0, %c0_i32, %c0_i32_0 : i32, i32, i32
  }
}

module attributes {stable_mosaic.version = 11 : i64} {
  func.func @_fused_matmul_kernel(%arg0: i32, %arg1: memref<16x32xbf16, #tpu.memory_space<vmem>>, %arg2: memref<32x32xbf16, #tpu.memory_space<vmem>>, %arg3: memref<1x32xbf16, #tpu.memory_space<vmem>>, %arg4: memref<1x32xbf16, #tpu.memory_space<vmem>>, %arg5: memref<1x32xf32, #tpu.memory_space<vmem>>, %arg6: memref<1x32xf32, #tpu.memory_space<vmem>>, %arg7: memref<16x32xbf16, #tpu.memory_space<vmem>>) attributes {dimension_semantics = [#tpu.dimension_semantics<parallel>], iteration_bounds = array<i64: 1>, scalar_prefetch = 0 : i64, scratch_operands = 0 : i64, tpu.core_type = #tpu.core_type<tc>, window_params = [{transform_indices = @transform_0, window_bounds = array<i64: 16, 32>}, {pipeline_mode = #tpu.pipeline_mode<synchronous>, transform_indices = @transform_1, window_bounds = array<i64: 32, 32>}, {pipeline_mode = #tpu.pipeline_mode<synchronous>, transform_indices = @transform_2, window_bounds = array<i64: 1, 32>}, {pipeline_mode = #tpu.pipeline_mode<synchronous>, transform_indices = @transform_3, window_bounds = array<i64: 1, 32>}, {pipeline_mode = #tpu.pipeline_mode<synchronous>, transform_indices = @transform_4, window_bounds = array<i64: 1, 32>}, {pipeline_mode = #tpu.pipeline_mode<synchronous>, transform_indices = @transform_5, window_bounds = array<i64: 1, 32>}, {transform_indices = @transform_6, window_bounds = array<i64: 16, 32>}]} {
    %c0 = arith.constant 0 : index
    %c0_0 = arith.constant 0 : index
    %0 = vector.load %arg1[%c0, %c0_0] : memref<16x32xbf16, #tpu.memory_space<vmem>>, vector<16x32xbf16>
    %c0_1 = arith.constant 0 : index
    %c0_2 = arith.constant 0 : index
    %1 = vector.load %arg3[%c0_1, %c0_2] : memref<1x32xbf16, #tpu.memory_space<vmem>>, vector<1x32xbf16>
    %2 = vector.broadcast %1 : vector<1x32xbf16> to vector<16x32xbf16>
    %3 = arith.mulf %0, %2 : vector<16x32xbf16>
    %c0_3 = arith.constant 0 : index
    %c0_4 = arith.constant 0 : index
    %4 = vector.load %arg4[%c0_3, %c0_4] : memref<1x32xbf16, #tpu.memory_space<vmem>>, vector<1x32xbf16>
    %5 = vector.broadcast %4 : vector<1x32xbf16> to vector<16x32xbf16>
    %6 = arith.addf %3, %5 : vector<16x32xbf16>
    %cst = arith.constant 0.000000e+00 : bf16
    %7 = vector.broadcast %cst : bf16 to vector<16x32xbf16>
    %8 = arith.maximumf %6, %7 : vector<16x32xbf16>
    %c0_5 = arith.constant 0 : index
    %c0_6 = arith.constant 0 : index
    %9 = vector.load %arg2[%c0_5, %c0_6] : memref<32x32xbf16, #tpu.memory_space<vmem>>, vector<32x32xbf16>
    %cst_7 = arith.constant dense<0.000000e+00> : vector<16x32xf32>
    %10 = tpu.matmul %8, %9, %cst_7 {dimension_numbers = #tpu.dot_dimension_numbers<[1], [0], [0], [1], [0, 0, 1, 1], [], []>} : vector<16x32xbf16>, vector<32x32xbf16>, vector<16x32xf32> -> vector<16x32xf32>
    %c0_8 = arith.constant 0 : index
    %c0_9 = arith.constant 0 : index
    %11 = vector.load %arg5[%c0_8, %c0_9] : memref<1x32xf32, #tpu.memory_space<vmem>>, vector<1x32xf32>
    %12 = vector.broadcast %11 : vector<1x32xf32> to vector<16x32xf32>
    %13 = arith.mulf %10, %12 : vector<16x32xf32>
    %c0_10 = arith.constant 0 : index
    %c0_11 = arith.constant 0 : index
    %14 = vector.load %arg6[%c0_10, %c0_11] : memref<1x32xf32, #tpu.memory_space<vmem>>, vector<1x32xf32>
    %15 = vector.broadcast %14 : vector<1x32xf32> to vector<16x32xf32>
    %16 = arith.addf %13, %15 : vector<16x32xf32>
    %cst_12 = arith.constant 0.000000e+00 : f32
    %17 = vector.broadcast %cst_12 : f32 to vector<16x32xf32>
    %18 = arith.maximumf %16, %17 : vector<16x32xf32>
    %19 = arith.truncf %18 : vector<16x32xf32> to vector<16x32xbf16>
    %c0_13 = arith.constant 0 : index
    %c0_14 = arith.constant 0 : index
    %20 = vector.load %arg7[%c0_13, %c0_14] : memref<16x32xbf16, #tpu.memory_space<vmem>>, vector<16x32xbf16>
    tpu.vector_store %arg7[%c0_13, %c0_14], %19 {strides = array<i32>} : memref<16x32xbf16, #tpu.memory_space<vmem>>, vector<16x32xbf16>,
    return
  }
  func.func @transform_0(%arg0: i32) -> (i32, i32) {
    %c0_i32 = arith.constant 0 : i32
    %c0_i32_0 = arith.constant 0 : i32
    return %arg0, %c0_i32 : i32, i32
  }
  func.func @transform_1(%arg0: i32) -> (i32, i32) {
    %c0_i32 = arith.constant 0 : i32
    %c0_i32_0 = arith.constant 0 : i32
    %c0_i32_1 = arith.constant 0 : i32
    return %c0_i32, %c0_i32_0 : i32, i32
  }
  func.func @transform_2(%arg0: i32) -> (i32, i32) {
    %c0_i32 = arith.constant 0 : i32
    %c0_i32_0 = arith.constant 0 : i32
    %c0_i32_1 = arith.constant 0 : i32
    return %c0_i32, %c0_i32_0 : i32, i32
  }
  func.func @transform_3(%arg0: i32) -> (i32, i32) {
    %c0_i32 = arith.constant 0 : i32
    %c0_i32_0 = arith.constant 0 : i32
    %c0_i32_1 = arith.constant 0 : i32
    return %c0_i32, %c0_i32_0 : i32, i32
  }
  func.func @transform_4(%arg0: i32) -> (i32, i32) {
    %c0_i32 = arith.constant 0 : i32
    %c0_i32_0 = arith.constant 0 : i32
    %c0_i32_1 = arith.constant 0 : i32
    return %c0_i32, %c0_i32_0 : i32, i32
  }
  func.func @transform_5(%arg0: i32) -> (i32, i32) {
    %c0_i32 = arith.constant 0 : i32
    %c0_i32_0 = arith.constant 0 : i32
    %c0_i32_1 = arith.constant 0 : i32
    return %c0_i32, %c0_i32_0 : i32, i32
  }
  func.func @transform_6(%arg0: i32) -> (i32, i32) {
    %c0_i32 = arith.constant 0 : i32
    %c0_i32_0 = arith.constant 0 : i32
    return %arg0, %c0_i32 : i32, i32
  }
}

module attributes {stable_mosaic.version = 11 : i64} {
  func.func @_conv3x3_kernel(%arg0: i32, %arg1: memref<1x4x4x32xbf16, #tpu.memory_space<vmem>>, %arg2: memref<9x32x8xbf16, #tpu.memory_space<vmem>>, %arg3: memref<1x4x8xbf16, #tpu.memory_space<vmem>>) attributes {dimension_semantics = [#tpu.dimension_semantics<parallel>], iteration_bounds = array<i64: 2>, scalar_prefetch = 0 : i64, scratch_operands = 0 : i64, tpu.core_type = #tpu.core_type<tc>, window_params = [{transform_indices = @transform_0, window_bounds = array<i64: 1, 4, 4, 32>}, {pipeline_mode = #tpu.pipeline_mode<synchronous>, transform_indices = @transform_1, window_bounds = array<i64: 9, 32, 8>}, {transform_indices = @transform_2, window_bounds = array<i64: 1, 4, 8>}]} {
    %c0 = arith.constant 0 : index
    %c0_0 = arith.constant 0 : index
    %c0_1 = arith.constant 0 : index
    %c0_2 = arith.constant 0 : index
    %0 = vector.load %arg1[%c0, %c0_0, %c0_1, %c0_2] : memref<1x4x4x32xbf16, #tpu.memory_space<vmem>>, vector<1x4x4x32xbf16>
    %1 = vector.shape_cast %0 : vector<1x4x4x32xbf16> to vector<4x4x32xbf16>
    %cst = arith.constant 0.000000e+00 : f32
    %2 = vector.broadcast %cst : f32 to vector<4x8xf32>
    %3 = vector.extract_strided_slice %1 {offsets = [0, 0, 0], sizes = [2, 2, 32], strides = [1, 1, 1]} : vector<4x4x32xbf16> to vector<2x2x32xbf16>
    %4 = vector.shape_cast %3 : vector<2x2x32xbf16> to vector<4x32xbf16>
    %c0_3 = arith.constant 0 : index
    %c0_4 = arith.constant 0 : index
    %c0_5 = arith.constant 0 : index
    %5 = vector.load %arg2[%c0_3, %c0_4, %c0_5] : memref<9x32x8xbf16, #tpu.memory_space<vmem>>, vector<1x32x8xbf16>
    %6 = vector.shape_cast %5 : vector<1x32x8xbf16> to vector<32x8xbf16>
    %cst_6 = arith.constant dense<0.000000e+00> : vector<4x8xf32>
    %7 = tpu.matmul %4, %6, %cst_6 {dimension_numbers = #tpu.dot_dimension_numbers<[1], [0], [0], [1], [0, 0, 1, 1], [], []>} : vector<4x32xbf16>, vector<32x8xbf16>, vector<4x8xf32> -> vector<4x8xf32>
    %8 = arith.addf %2, %7 : vector<4x8xf32>
    %9 = vector.extract_strided_slice %1 {offsets = [0, 1, 0], sizes = [2, 2, 32], strides = [1, 1, 1]} : vector<4x4x32xbf16> to vector<2x2x32xbf16>
    %10 = vector.shape_cast %9 : vector<2x2x32xbf16> to vector<4x32xbf16>
    %c1 = arith.constant 1 : index
    %c0_7 = arith.constant 0 : index
    %c0_8 = arith.constant 0 : index
    %11 = vector.load %arg2[%c1, %c0_7, %c0_8] : memref<9x32x8xbf16, #tpu.memory_space<vmem>>, vector<1x32x8xbf16>
    %12 = vector.shape_cast %11 : vector<1x32x8xbf16> to vector<32x8xbf16>
    %cst_9 = arith.constant dense<0.000000e+00> : vector<4x8xf32>
    %13 = tpu.matmul %10, %12, %cst_9 {dimension_numbers = #tpu.dot_dimension_numbers<[1], [0], [0], [1], [0, 0, 1, 1], [], []>} : vector<4x32xbf16>, vector<32x8xbf16>, vector<4x8xf32> -> vector<4x8xf32>
    %14 = arith.addf %8, %13 : vector<4x8xf32>
    %15 = vector.extract_strided_slice %1 {offsets = [0, 2, 0], sizes = [2, 2, 32], strides = [1, 1, 1]} : vector<4x4x32xbf16> to vector<2x2x32xbf16>
    %16 = vector.shape_cast %15 : vector<2x2x32xbf16> to vector<4x32xbf16>
    %c2 = arith.constant 2 : index
    %c0_10 = arith.constant 0 : index
    %c0_11 = arith.constant 0 : index
    %17 = vector.load %arg2[%c2, %c0_10, %c0_11] : memref<9x32x8xbf16, #tpu.memory_space<vmem>>, vector<1x32x8xbf16>
    %18 = vector.shape_cast %17 : vector<1x32x8xbf16> to vector<32x8xbf16>
    %cst_12 = arith.constant dense<0.000000e+00> : vector<4x8xf32>
    %19 = tpu.matmul %16, %18, %cst_12 {dimension_numbers = #tpu.dot_dimension_numbers<[1], [0], [0], [1], [0, 0, 1, 1], [], []>} : vector<4x32xbf16>, vector<32x8xbf16>, vector<4x8xf32> -> vector<4x8xf32>
    %20 = arith.addf %14, %19 : vector<4x8xf32>
    %21 = vector.extract_strided_slice %1 {offsets = [1, 0, 0], sizes = [2, 2, 32], strides = [1, 1, 1]} : vector<4x4x32xbf16> to vector<2x2x32xbf16>
    %22 = vector.shape_cast %21 : vector<2x2x32xbf16> to vector<4x32xbf16>
    %c3 = arith.constant 3 : index
    %c0_13 = arith.constant 0 : index
    %c0_14 = arith.constant 0 : index
    %23 = vector.load %arg2[%c3, %c0_13, %c0_14] : memref<9x32x8xbf16, #tpu.memory_space<vmem>>, vector<1x32x8xbf16>
    %24 = vector.shape_cast %23 : vector<1x32x8xbf16> to vector<32x8xbf16>
    %cst_15 = arith.constant dense<0.000000e+00> : vector<4x8xf32>
    %25 = tpu.matmul %22, %24, %cst_15 {dimension_numbers = #tpu.dot_dimension_numbers<[1], [0], [0], [1], [0, 0, 1, 1], [], []>} : vector<4x32xbf16>, vector<32x8xbf16>, vector<4x8xf32> -> vector<4x8xf32>
    %26 = arith.addf %20, %25 : vector<4x8xf32>
    %27 = vector.extract_strided_slice %1 {offsets = [1, 1, 0], sizes = [2, 2, 32], strides = [1, 1, 1]} : vector<4x4x32xbf16> to vector<2x2x32xbf16>
    %28 = vector.shape_cast %27 : vector<2x2x32xbf16> to vector<4x32xbf16>
    %c4 = arith.constant 4 : index
    %c0_16 = arith.constant 0 : index
    %c0_17 = arith.constant 0 : index
    %29 = vector.load %arg2[%c4, %c0_16, %c0_17] : memref<9x32x8xbf16, #tpu.memory_space<vmem>>, vector<1x32x8xbf16>
    %30 = vector.shape_cast %29 : vector<1x32x8xbf16> to vector<32x8xbf16>
    %cst_18 = arith.constant dense<0.000000e+00> : vector<4x8xf32>
    %31 = tpu.matmul %28, %30, %cst_18 {dimension_numbers = #tpu.dot_dimension_numbers<[1], [0], [0], [1], [0, 0, 1, 1], [], []>} : vector<4x32xbf16>, vector<32x8xbf16>, vector<4x8xf32> -> vector<4x8xf32>
    %32 = arith.addf %26, %31 : vector<4x8xf32>
    %33 = vector.extract_strided_slice %1 {offsets = [1, 2, 0], sizes = [2, 2, 32], strides = [1, 1, 1]} : vector<4x4x32xbf16> to vector<2x2x32xbf16>
    %34 = vector.shape_cast %33 : vector<2x2x32xbf16> to vector<4x32xbf16>
    %c5 = arith.constant 5 : index
    %c0_19 = arith.constant 0 : index
    %c0_20 = arith.constant 0 : index
    %35 = vector.load %arg2[%c5, %c0_19, %c0_20] : memref<9x32x8xbf16, #tpu.memory_space<vmem>>, vector<1x32x8xbf16>
    %36 = vector.shape_cast %35 : vector<1x32x8xbf16> to vector<32x8xbf16>
    %cst_21 = arith.constant dense<0.000000e+00> : vector<4x8xf32>
    %37 = tpu.matmul %34, %36, %cst_21 {dimension_numbers = #tpu.dot_dimension_numbers<[1], [0], [0], [1], [0, 0, 1, 1], [], []>} : vector<4x32xbf16>, vector<32x8xbf16>, vector<4x8xf32> -> vector<4x8xf32>
    %38 = arith.addf %32, %37 : vector<4x8xf32>
    %39 = vector.extract_strided_slice %1 {offsets = [2, 0, 0], sizes = [2, 2, 32], strides = [1, 1, 1]} : vector<4x4x32xbf16> to vector<2x2x32xbf16>
    %40 = vector.shape_cast %39 : vector<2x2x32xbf16> to vector<4x32xbf16>
    %c6 = arith.constant 6 : index
    %c0_22 = arith.constant 0 : index
    %c0_23 = arith.constant 0 : index
    %41 = vector.load %arg2[%c6, %c0_22, %c0_23] : memref<9x32x8xbf16, #tpu.memory_space<vmem>>, vector<1x32x8xbf16>
    %42 = vector.shape_cast %41 : vector<1x32x8xbf16> to vector<32x8xbf16>
    %cst_24 = arith.constant dense<0.000000e+00> : vector<4x8xf32>
    %43 = tpu.matmul %40, %42, %cst_24 {dimension_numbers = #tpu.dot_dimension_numbers<[1], [0], [0], [1], [0, 0, 1, 1], [], []>} : vector<4x32xbf16>, vector<32x8xbf16>, vector<4x8xf32> -> vector<4x8xf32>
    %44 = arith.addf %38, %43 : vector<4x8xf32>
    %45 = vector.extract_strided_slice %1 {offsets = [2, 1, 0], sizes = [2, 2, 32], strides = [1, 1, 1]} : vector<4x4x32xbf16> to vector<2x2x32xbf16>
    %46 = vector.shape_cast %45 : vector<2x2x32xbf16> to vector<4x32xbf16>
    %c7 = arith.constant 7 : index
    %c0_25 = arith.constant 0 : index
    %c0_26 = arith.constant 0 : index
    %47 = vector.load %arg2[%c7, %c0_25, %c0_26] : memref<9x32x8xbf16, #tpu.memory_space<vmem>>, vector<1x32x8xbf16>
    %48 = vector.shape_cast %47 : vector<1x32x8xbf16> to vector<32x8xbf16>
    %cst_27 = arith.constant dense<0.000000e+00> : vector<4x8xf32>
    %49 = tpu.matmul %46, %48, %cst_27 {dimension_numbers = #tpu.dot_dimension_numbers<[1], [0], [0], [1], [0, 0, 1, 1], [], []>} : vector<4x32xbf16>, vector<32x8xbf16>, vector<4x8xf32> -> vector<4x8xf32>
    %50 = arith.addf %44, %49 : vector<4x8xf32>
    %51 = vector.extract_strided_slice %1 {offsets = [2, 2, 0], sizes = [2, 2, 32], strides = [1, 1, 1]} : vector<4x4x32xbf16> to vector<2x2x32xbf16>
    %52 = vector.shape_cast %51 : vector<2x2x32xbf16> to vector<4x32xbf16>
    %c8 = arith.constant 8 : index
    %c0_28 = arith.constant 0 : index
    %c0_29 = arith.constant 0 : index
    %53 = vector.load %arg2[%c8, %c0_28, %c0_29] : memref<9x32x8xbf16, #tpu.memory_space<vmem>>, vector<1x32x8xbf16>
    %54 = vector.shape_cast %53 : vector<1x32x8xbf16> to vector<32x8xbf16>
    %cst_30 = arith.constant dense<0.000000e+00> : vector<4x8xf32>
    %55 = tpu.matmul %52, %54, %cst_30 {dimension_numbers = #tpu.dot_dimension_numbers<[1], [0], [0], [1], [0, 0, 1, 1], [], []>} : vector<4x32xbf16>, vector<32x8xbf16>, vector<4x8xf32> -> vector<4x8xf32>
    %56 = arith.addf %50, %55 : vector<4x8xf32>
    %57 = arith.truncf %56 : vector<4x8xf32> to vector<4x8xbf16>
    %c0_31 = arith.constant 0 : index
    %c0_32 = arith.constant 0 : index
    %c0_33 = arith.constant 0 : index
    %58 = vector.load %arg3[%c0_31, %c0_32, %c0_33] : memref<1x4x8xbf16, #tpu.memory_space<vmem>>, vector<1x4x8xbf16>
    %59 = vector.shape_cast %58 : vector<1x4x8xbf16> to vector<4x8xbf16>
    %60 = vector.shape_cast %57 : vector<4x8xbf16> to vector<1x4x8xbf16>
    tpu.vector_store %arg3[%c0_31, %c0_32, %c0_33], %60 {strides = array<i32>} : memref<1x4x8xbf16, #tpu.memory_space<vmem>>, vector<1x4x8xbf16>,
    return
  }
  func.func @transform_0(%arg0: i32) -> (i32, i32, i32, i32) {
    %c0_i32 = arith.constant 0 : i32
    %c0_i32_0 = arith.constant 0 : i32
    %c0_i32_1 = arith.constant 0 : i32
    %c0_i32_2 = arith.constant 0 : i32
    return %arg0, %c0_i32, %c0_i32_0, %c0_i32_1 : i32, i32, i32, i32
  }
  func.func @transform_1(%arg0: i32) -> (i32, i32, i32) {
    %c0_i32 = arith.constant 0 : i32
    %c0_i32_0 = arith.constant 0 : i32
    %c0_i32_1 = arith.constant 0 : i32
    %c0_i32_2 = arith.constant 0 : i32
    return %c0_i32, %c0_i32_0, %c0_i32_1 : i32, i32, i32
  }
  func.func @transform_2(%arg0: i32) -> (i32, i32, i32) {
    %c0_i32 = arith.constant 0 : i32
    %c0_i32_0 = arith.constant 0 : i32
    %c0_i32_1 = arith.constant 0 : i32
    return %arg0, %c0_i32, %c0_i32_0 : i32, i32, i32
  }
}

module attributes {stable_mosaic.version = 11 : i64} {
  func.func @_fused_matmul_kernel(%arg0: i32, %arg1: memref<16x32xbf16, #tpu.memory_space<vmem>>, %arg2: memref<32x16xbf16, #tpu.memory_space<vmem>>, %arg3: memref<1x32xbf16, #tpu.memory_space<vmem>>, %arg4: memref<1x32xbf16, #tpu.memory_space<vmem>>, %arg5: memref<16x16xbf16, #tpu.memory_space<vmem>>) attributes {dimension_semantics = [#tpu.dimension_semantics<parallel>], iteration_bounds = array<i64: 1>, scalar_prefetch = 0 : i64, scratch_operands = 0 : i64, tpu.core_type = #tpu.core_type<tc>, window_params = [{transform_indices = @transform_0, window_bounds = array<i64: 16, 32>}, {pipeline_mode = #tpu.pipeline_mode<synchronous>, transform_indices = @transform_1, window_bounds = array<i64: 32, 16>}, {pipeline_mode = #tpu.pipeline_mode<synchronous>, transform_indices = @transform_2, window_bounds = array<i64: 1, 32>}, {pipeline_mode = #tpu.pipeline_mode<synchronous>, transform_indices = @transform_3, window_bounds = array<i64: 1, 32>}, {transform_indices = @transform_4, window_bounds = array<i64: 16, 16>}]} {
    %c0 = arith.constant 0 : index
    %c0_0 = arith.constant 0 : index
    %0 = vector.load %arg1[%c0, %c0_0] : memref<16x32xbf16, #tpu.memory_space<vmem>>, vector<16x32xbf16>
    %c0_1 = arith.constant 0 : index
    %c0_2 = arith.constant 0 : index
    %1 = vector.load %arg3[%c0_1, %c0_2] : memref<1x32xbf16, #tpu.memory_space<vmem>>, vector<1x32xbf16>
    %2 = vector.broadcast %1 : vector<1x32xbf16> to vector<16x32xbf16>
    %3 = arith.mulf %0, %2 : vector<16x32xbf16>
    %c0_3 = arith.constant 0 : index
    %c0_4 = arith.constant 0 : index
    %4 = vector.load %arg4[%c0_3, %c0_4] : memref<1x32xbf16, #tpu.memory_space<vmem>>, vector<1x32xbf16>
    %5 = vector.broadcast %4 : vector<1x32xbf16> to vector<16x32xbf16>
    %6 = arith.addf %3, %5 : vector<16x32xbf16>
    %cst = arith.constant 0.000000e+00 : bf16
    %7 = vector.broadcast %cst : bf16 to vector<16x32xbf16>
    %8 = arith.maximumf %6, %7 : vector<16x32xbf16>
    %c0_5 = arith.constant 0 : index
    %c0_6 = arith.constant 0 : index
    %9 = vector.load %arg2[%c0_5, %c0_6] : memref<32x16xbf16, #tpu.memory_space<vmem>>, vector<32x16xbf16>
    %cst_7 = arith.constant dense<0.000000e+00> : vector<16x16xf32>
    %10 = tpu.matmul %8, %9, %cst_7 {dimension_numbers = #tpu.dot_dimension_numbers<[1], [0], [0], [1], [0, 0, 1, 1], [], []>} : vector<16x32xbf16>, vector<32x16xbf16>, vector<16x16xf32> -> vector<16x16xf32>
    %11 = arith.truncf %10 : vector<16x16xf32> to vector<16x16xbf16>
    %c0_8 = arith.constant 0 : index
    %c0_9 = arith.constant 0 : index
    %12 = vector.load %arg5[%c0_8, %c0_9] : memref<16x16xbf16, #tpu.memory_space<vmem>>, vector<16x16xbf16>
    tpu.vector_store %arg5[%c0_8, %c0_9], %11 {strides = array<i32>} : memref<16x16xbf16, #tpu.memory_space<vmem>>, vector<16x16xbf16>,
    return
  }
  func.func @transform_0(%arg0: i32) -> (i32, i32) {
    %c0_i32 = arith.constant 0 : i32
    %c0_i32_0 = arith.constant 0 : i32
    return %arg0, %c0_i32 : i32, i32
  }
  func.func @transform_1(%arg0: i32) -> (i32, i32) {
    %c0_i32 = arith.constant 0 : i32
    %c0_i32_0 = arith.constant 0 : i32
    %c0_i32_1 = arith.constant 0 : i32
    return %c0_i32, %c0_i32_0 : i32, i32
  }
  func.func @transform_2(%arg0: i32) -> (i32, i32) {
    %c0_i32 = arith.constant 0 : i32
    %c0_i32_0 = arith.constant 0 : i32
    %c0_i32_1 = arith.constant 0 : i32
    return %c0_i32, %c0_i32_0 : i32, i32
  }
  func.func @transform_3(%arg0: i32) -> (i32, i32) {
    %c0_i32 = arith.constant 0 : i32
    %c0_i32_0 = arith.constant 0 : i32
    %c0_i32_1 = arith.constant 0 : i32
    return %c0_i32, %c0_i32_0 : i32, i32
  }
  func.func @transform_4(%arg0: i32) -> (i32, i32) {
    %c0_i32 = arith.constant 0 : i32
    %c0_i32_0 = arith.constant 0 : i32
    return %arg0, %c0_i32 : i32, i32
  }
}

module attributes {stable_mosaic.version = 11 : i64} {
  func.func @_avgpool2x2_kernel(%arg0: i32, %arg1: memref<8x2x1x2x16xbf16, #tpu.memory_space<vmem>>, %arg2: memref<8x1x16xbf16, #tpu.memory_space<vmem>>) attributes {dimension_semantics = [#tpu.dimension_semantics<parallel>], iteration_bounds = array<i64: 1>, scalar_prefetch = 0 : i64, scratch_operands = 0 : i64, tpu.core_type = #tpu.core_type<tc>, window_params = [{transform_indices = @transform_0, window_bounds = array<i64: 8, 2, 1, 2, 16>}, {transform_indices = @transform_1, window_bounds = array<i64: 8, 1, 16>}]} {
    %c0 = arith.constant 0 : index
    %c0_0 = arith.constant 0 : index
    %c0_1 = arith.constant 0 : index
    %c0_2 = arith.constant 0 : index
    %c0_3 = arith.constant 0 : index
    %0 = vector.load %arg1[%c0, %c0_0, %c0_1, %c0_2, %c0_3] : memref<8x2x1x2x16xbf16, #tpu.memory_space<vmem>>, vector<8x2x1x2x16xbf16>
    %1 = arith.extf %0 : vector<8x2x1x2x16xbf16> to vector<8x2x1x2x16xf32>
    %cst = arith.constant dense<0.000000e+00> : vector<8x1x2x16xf32>
    %2 = vector.multi_reduction <add>, %1, %cst [1] : vector<8x2x1x2x16xf32> to vector<8x1x2x16xf32>
    %cst_4 = arith.constant dense<0.000000e+00> : vector<8x1x16xf32>
    %3 = vector.multi_reduction <add>, %2, %cst_4 [2] : vector<8x1x2x16xf32> to vector<8x1x16xf32>
    %cst_5 = arith.constant 2.500000e-01 : f32
    %4 = vector.broadcast %cst_5 : f32 to vector<8x1x16xf32>
    %5 = arith.mulf %3, %4 : vector<8x1x16xf32>
    %6 = arith.truncf %5 : vector<8x1x16xf32> to vector<8x1x16xbf16>
    %c0_6 = arith.constant 0 : index
    %c0_7 = arith.constant 0 : index
    %c0_8 = arith.constant 0 : index
    %7 = vector.load %arg2[%c0_6, %c0_7, %c0_8] : memref<8x1x16xbf16, #tpu.memory_space<vmem>>, vector<8x1x16xbf16>
    tpu.vector_store %arg2[%c0_6, %c0_7, %c0_8], %6 {strides = array<i32>} : memref<8x1x16xbf16, #tpu.memory_space<vmem>>, vector<8x1x16xbf16>,
    return
  }
  func.func @transform_0(%arg0: i32) -> (i32, i32, i32, i32, i32) {
    %c0_i32 = arith.constant 0 : i32
    %c0_i32_0 = arith.constant 0 : i32
    %c0_i32_1 = arith.constant 0 : i32
    %c0_i32_2 = arith.constant 0 : i32
    %c0_i32_3 = arith.constant 0 : i32
    return %arg0, %c0_i32, %c0_i32_0, %c0_i32_1, %c0_i32_2 : i32, i32, i32, i32, i32
  }
  func.func @transform_1(%arg0: i32) -> (i32, i32, i32) {
    %c0_i32 = arith.constant 0 : i32
    %c0_i32_0 = arith.constant 0 : i32
    %c0_i32_1 = arith.constant 0 : i32
    return %arg0, %c0_i32, %c0_i32_0 : i32, i32, i32
  }
}

module attributes {stable_mosaic.version = 11 : i64} {
  func.func @_conv3x3_kernel(%arg0: i32, %arg1: memref<1x3x3x32xbf16, #tpu.memory_space<vmem>>, %arg2: memref<9x32x8xbf16, #tpu.memory_space<vmem>>, %arg3: memref<1x1x8xbf16, #tpu.memory_space<vmem>>) attributes {dimension_semantics = [#tpu.dimension_semantics<parallel>], iteration_bounds = array<i64: 2>, scalar_prefetch = 0 : i64, scratch_operands = 0 : i64, tpu.core_type = #tpu.core_type<tc>, window_params = [{transform_indices = @transform_0, window_bounds = array<i64: 1, 3, 3, 32>}, {pipeline_mode = #tpu.pipeline_mode<synchronous>, transform_indices = @transform_1, window_bounds = array<i64: 9, 32, 8>}, {transform_indices = @transform_2, window_bounds = array<i64: 1, 1, 8>}]} {
    %c0 = arith.constant 0 : index
    %c0_0 = arith.constant 0 : index
    %c0_1 = arith.constant 0 : index
    %c0_2 = arith.constant 0 : index
    %0 = vector.load %arg1[%c0, %c0_0, %c0_1, %c0_2] : memref<1x3x3x32xbf16, #tpu.memory_space<vmem>>, vector<1x3x3x32xbf16>
    %1 = vector.shape_cast %0 : vector<1x3x3x32xbf16> to vector<3x3x32xbf16>
    %cst = arith.constant 0.000000e+00 : f32
    %2 = vector.broadcast %cst : f32 to vector<1x8xf32>
    %3 = vector.extract_strided_slice %1 {offsets = [0, 0, 0], sizes = [1, 1, 32], strides = [1, 1, 1]} : vector<3x3x32xbf16> to vector<1x1x32xbf16>
    %4 = vector.shape_cast %3 : vector<1x1x32xbf16> to vector<1x32xbf16>
    %c0_3 = arith.constant 0 : index
    %c0_4 = arith.constant 0 : index
    %c0_5 = arith.constant 0 : index
    %5 = vector.load %arg2[%c0_3, %c0_4, %c0_5] : memref<9x32x8xbf16, #tpu.memory_space<vmem>>, vector<1x32x8xbf16>
    %6 = vector.shape_cast %5 : vector<1x32x8xbf16> to vector<32x8xbf16>
    %cst_6 = arith.constant dense<0.000000e+00> : vector<1x8xf32>
    %7 = tpu.matmul %4, %6, %cst_6 {dimension_numbers = #tpu.dot_dimension_numbers<[1], [0], [0], [1], [0, 0, 1, 1], [], []>} : vector<1x32xbf16>, vector<32x8xbf16>, vector<1x8xf32> -> vector<1x8xf32>
    %8 = arith.addf %2, %7 : vector<1x8xf32>
    %9 = vector.extract_strided_slice %1 {offsets = [0, 1, 0], sizes = [1, 1, 32], strides = [1, 1, 1]} : vector<3x3x32xbf16> to vector<1x1x32xbf16>
    %10 = vector.shape_cast %9 : vector<1x1x32xbf16> to vector<1x32xbf16>
    %c1 = arith.constant 1 : index
    %c0_7 = arith.constant 0 : index
    %c0_8 = arith.constant 0 : index
    %11 = vector.load %arg2[%c1, %c0_7, %c0_8] : memref<9x32x8xbf16, #tpu.memory_space<vmem>>, vector<1x32x8xbf16>
    %12 = vector.shape_cast %11 : vector<1x32x8xbf16> to vector<32x8xbf16>
    %cst_9 = arith.constant dense<0.000000e+00> : vector<1x8xf32>
    %13 = tpu.matmul %10, %12, %cst_9 {dimension_numbers = #tpu.dot_dimension_numbers<[1], [0], [0], [1], [0, 0, 1, 1], [], []>} : vector<1x32xbf16>, vector<32x8xbf16>, vector<1x8xf32> -> vector<1x8xf32>
    %14 = arith.addf %8, %13 : vector<1x8xf32>
    %15 = vector.extract_strided_slice %1 {offsets = [0, 2, 0], sizes = [1, 1, 32], strides = [1, 1, 1]} : vector<3x3x32xbf16> to vector<1x1x32xbf16>
    %16 = vector.shape_cast %15 : vector<1x1x32xbf16> to vector<1x32xbf16>
    %c2 = arith.constant 2 : index
    %c0_10 = arith.constant 0 : index
    %c0_11 = arith.constant 0 : index
    %17 = vector.load %arg2[%c2, %c0_10, %c0_11] : memref<9x32x8xbf16, #tpu.memory_space<vmem>>, vector<1x32x8xbf16>
    %18 = vector.shape_cast %17 : vector<1x32x8xbf16> to vector<32x8xbf16>
    %cst_12 = arith.constant dense<0.000000e+00> : vector<1x8xf32>
    %19 = tpu.matmul %16, %18, %cst_12 {dimension_numbers = #tpu.dot_dimension_numbers<[1], [0], [0], [1], [0, 0, 1, 1], [], []>} : vector<1x32xbf16>, vector<32x8xbf16>, vector<1x8xf32> -> vector<1x8xf32>
    %20 = arith.addf %14, %19 : vector<1x8xf32>
    %21 = vector.extract_strided_slice %1 {offsets = [1, 0, 0], sizes = [1, 1, 32], strides = [1, 1, 1]} : vector<3x3x32xbf16> to vector<1x1x32xbf16>
    %22 = vector.shape_cast %21 : vector<1x1x32xbf16> to vector<1x32xbf16>
    %c3 = arith.constant 3 : index
    %c0_13 = arith.constant 0 : index
    %c0_14 = arith.constant 0 : index
    %23 = vector.load %arg2[%c3, %c0_13, %c0_14] : memref<9x32x8xbf16, #tpu.memory_space<vmem>>, vector<1x32x8xbf16>
    %24 = vector.shape_cast %23 : vector<1x32x8xbf16> to vector<32x8xbf16>
    %cst_15 = arith.constant dense<0.000000e+00> : vector<1x8xf32>
    %25 = tpu.matmul %22, %24, %cst_15 {dimension_numbers = #tpu.dot_dimension_numbers<[1], [0], [0], [1], [0, 0, 1, 1], [], []>} : vector<1x32xbf16>, vector<32x8xbf16>, vector<1x8xf32> -> vector<1x8xf32>
    %26 = arith.addf %20, %25 : vector<1x8xf32>
    %27 = vector.extract_strided_slice %1 {offsets = [1, 1, 0], sizes = [1, 1, 32], strides = [1, 1, 1]} : vector<3x3x32xbf16> to vector<1x1x32xbf16>
    %28 = vector.shape_cast %27 : vector<1x1x32xbf16> to vector<1x32xbf16>
    %c4 = arith.constant 4 : index
    %c0_16 = arith.constant 0 : index
    %c0_17 = arith.constant 0 : index
    %29 = vector.load %arg2[%c4, %c0_16, %c0_17] : memref<9x32x8xbf16, #tpu.memory_space<vmem>>, vector<1x32x8xbf16>
    %30 = vector.shape_cast %29 : vector<1x32x8xbf16> to vector<32x8xbf16>
    %cst_18 = arith.constant dense<0.000000e+00> : vector<1x8xf32>
    %31 = tpu.matmul %28, %30, %cst_18 {dimension_numbers = #tpu.dot_dimension_numbers<[1], [0], [0], [1], [0, 0, 1, 1], [], []>} : vector<1x32xbf16>, vector<32x8xbf16>, vector<1x8xf32> -> vector<1x8xf32>
    %32 = arith.addf %26, %31 : vector<1x8xf32>
    %33 = vector.extract_strided_slice %1 {offsets = [1, 2, 0], sizes = [1, 1, 32], strides = [1, 1, 1]} : vector<3x3x32xbf16> to vector<1x1x32xbf16>
    %34 = vector.shape_cast %33 : vector<1x1x32xbf16> to vector<1x32xbf16>
    %c5 = arith.constant 5 : index
    %c0_19 = arith.constant 0 : index
    %c0_20 = arith.constant 0 : index
    %35 = vector.load %arg2[%c5, %c0_19, %c0_20] : memref<9x32x8xbf16, #tpu.memory_space<vmem>>, vector<1x32x8xbf16>
    %36 = vector.shape_cast %35 : vector<1x32x8xbf16> to vector<32x8xbf16>
    %cst_21 = arith.constant dense<0.000000e+00> : vector<1x8xf32>
    %37 = tpu.matmul %34, %36, %cst_21 {dimension_numbers = #tpu.dot_dimension_numbers<[1], [0], [0], [1], [0, 0, 1, 1], [], []>} : vector<1x32xbf16>, vector<32x8xbf16>, vector<1x8xf32> -> vector<1x8xf32>
    %38 = arith.addf %32, %37 : vector<1x8xf32>
    %39 = vector.extract_strided_slice %1 {offsets = [2, 0, 0], sizes = [1, 1, 32], strides = [1, 1, 1]} : vector<3x3x32xbf16> to vector<1x1x32xbf16>
    %40 = vector.shape_cast %39 : vector<1x1x32xbf16> to vector<1x32xbf16>
    %c6 = arith.constant 6 : index
    %c0_22 = arith.constant 0 : index
    %c0_23 = arith.constant 0 : index
    %41 = vector.load %arg2[%c6, %c0_22, %c0_23] : memref<9x32x8xbf16, #tpu.memory_space<vmem>>, vector<1x32x8xbf16>
    %42 = vector.shape_cast %41 : vector<1x32x8xbf16> to vector<32x8xbf16>
    %cst_24 = arith.constant dense<0.000000e+00> : vector<1x8xf32>
    %43 = tpu.matmul %40, %42, %cst_24 {dimension_numbers = #tpu.dot_dimension_numbers<[1], [0], [0], [1], [0, 0, 1, 1], [], []>} : vector<1x32xbf16>, vector<32x8xbf16>, vector<1x8xf32> -> vector<1x8xf32>
    %44 = arith.addf %38, %43 : vector<1x8xf32>
    %45 = vector.extract_strided_slice %1 {offsets = [2, 1, 0], sizes = [1, 1, 32], strides = [1, 1, 1]} : vector<3x3x32xbf16> to vector<1x1x32xbf16>
    %46 = vector.shape_cast %45 : vector<1x1x32xbf16> to vector<1x32xbf16>
    %c7 = arith.constant 7 : index
    %c0_25 = arith.constant 0 : index
    %c0_26 = arith.constant 0 : index
    %47 = vector.load %arg2[%c7, %c0_25, %c0_26] : memref<9x32x8xbf16, #tpu.memory_space<vmem>>, vector<1x32x8xbf16>
    %48 = vector.shape_cast %47 : vector<1x32x8xbf16> to vector<32x8xbf16>
    %cst_27 = arith.constant dense<0.000000e+00> : vector<1x8xf32>
    %49 = tpu.matmul %46, %48, %cst_27 {dimension_numbers = #tpu.dot_dimension_numbers<[1], [0], [0], [1], [0, 0, 1, 1], [], []>} : vector<1x32xbf16>, vector<32x8xbf16>, vector<1x8xf32> -> vector<1x8xf32>
    %50 = arith.addf %44, %49 : vector<1x8xf32>
    %51 = vector.extract_strided_slice %1 {offsets = [2, 2, 0], sizes = [1, 1, 32], strides = [1, 1, 1]} : vector<3x3x32xbf16> to vector<1x1x32xbf16>
    %52 = vector.shape_cast %51 : vector<1x1x32xbf16> to vector<1x32xbf16>
    %c8 = arith.constant 8 : index
    %c0_28 = arith.constant 0 : index
    %c0_29 = arith.constant 0 : index
    %53 = vector.load %arg2[%c8, %c0_28, %c0_29] : memref<9x32x8xbf16, #tpu.memory_space<vmem>>, vector<1x32x8xbf16>
    %54 = vector.shape_cast %53 : vector<1x32x8xbf16> to vector<32x8xbf16>
    %cst_30 = arith.constant dense<0.000000e+00> : vector<1x8xf32>
    %55 = tpu.matmul %52, %54, %cst_30 {dimension_numbers = #tpu.dot_dimension_numbers<[1], [0], [0], [1], [0, 0, 1, 1], [], []>} : vector<1x32xbf16>, vector<32x8xbf16>, vector<1x8xf32> -> vector<1x8xf32>
    %56 = arith.addf %50, %55 : vector<1x8xf32>
    %57 = arith.truncf %56 : vector<1x8xf32> to vector<1x8xbf16>
    %c0_31 = arith.constant 0 : index
    %c0_32 = arith.constant 0 : index
    %c0_33 = arith.constant 0 : index
    %58 = vector.load %arg3[%c0_31, %c0_32, %c0_33] : memref<1x1x8xbf16, #tpu.memory_space<vmem>>, vector<1x1x8xbf16>
    %59 = vector.shape_cast %58 : vector<1x1x8xbf16> to vector<1x8xbf16>
    %60 = vector.shape_cast %57 : vector<1x8xbf16> to vector<1x1x8xbf16>
    tpu.vector_store %arg3[%c0_31, %c0_32, %c0_33], %60 {strides = array<i32>} : memref<1x1x8xbf16, #tpu.memory_space<vmem>>, vector<1x1x8xbf16>,
    return
  }
  func.func @transform_0(%arg0: i32) -> (i32, i32, i32, i32) {
    %c0_i32 = arith.constant 0 : i32
    %c0_i32_0 = arith.constant 0 : i32
    %c0_i32_1 = arith.constant 0 : i32
    %c0_i32_2 = arith.constant 0 : i32
    return %arg0, %c0_i32, %c0_i32_0, %c0_i32_1 : i32, i32, i32, i32
  }
  func.func @transform_1(%arg0: i32) -> (i32, i32, i32) {
    %c0_i32 = arith.constant 0 : i32
    %c0_i32_0 = arith.constant 0 : i32
    %c0_i32_1 = arith.constant 0 : i32
    %c0_i32_2 = arith.constant 0 : i32
    return %c0_i32, %c0_i32_0, %c0_i32_1 : i32, i32, i32
  }
  func.func @transform_2(%arg0: i32) -> (i32, i32, i32) {
    %c0_i32 = arith.constant 0 : i32
    %c0_i32_0 = arith.constant 0 : i32
    %c0_i32_1 = arith.constant 0 : i32
    return %arg0, %c0_i32, %c0_i32_0 : i32, i32, i32
  }
}

module attributes {stable_mosaic.version = 11 : i64} {
  func.func @_head_kernel(%arg0: i32, %arg1: memref<16x1x32xbf16, #tpu.memory_space<vmem>>, %arg2: memref<1x32xf32, #tpu.memory_space<vmem>>, %arg3: memref<1x32xf32, #tpu.memory_space<vmem>>, %arg4: memref<32x32xbf16, #tpu.memory_space<vmem>>, %arg5: memref<1x32xf32, #tpu.memory_space<vmem>>, %arg6: memref<32x16xbf16, #tpu.memory_space<vmem>>, %arg7: memref<1x16xf32, #tpu.memory_space<vmem>>, %arg8: memref<16x16xf32, #tpu.memory_space<vmem>>) attributes {dimension_semantics = [#tpu.dimension_semantics<parallel>], iteration_bounds = array<i64: 1>, scalar_prefetch = 0 : i64, scratch_operands = 0 : i64, tpu.core_type = #tpu.core_type<tc>, window_params = [{transform_indices = @transform_0, window_bounds = array<i64: 16, 1, 32>}, {pipeline_mode = #tpu.pipeline_mode<synchronous>, transform_indices = @transform_1, window_bounds = array<i64: 1, 32>}, {pipeline_mode = #tpu.pipeline_mode<synchronous>, transform_indices = @transform_2, window_bounds = array<i64: 1, 32>}, {pipeline_mode = #tpu.pipeline_mode<synchronous>, transform_indices = @transform_3, window_bounds = array<i64: 32, 32>}, {pipeline_mode = #tpu.pipeline_mode<synchronous>, transform_indices = @transform_4, window_bounds = array<i64: 1, 32>}, {pipeline_mode = #tpu.pipeline_mode<synchronous>, transform_indices = @transform_5, window_bounds = array<i64: 32, 16>}, {pipeline_mode = #tpu.pipeline_mode<synchronous>, transform_indices = @transform_6, window_bounds = array<i64: 1, 16>}, {transform_indices = @transform_7, window_bounds = array<i64: 16, 16>}]} {
    %c0 = arith.constant 0 : index
    %c0_0 = arith.constant 0 : index
    %c0_1 = arith.constant 0 : index
    %0 = vector.load %arg1[%c0, %c0_0, %c0_1] : memref<16x1x32xbf16, #tpu.memory_space<vmem>>, vector<16x1x32xbf16>
    %1 = arith.extf %0 : vector<16x1x32xbf16> to vector<16x1x32xf32>
    %cst = arith.constant dense<0.000000e+00> : vector<16x32xf32>
    %2 = vector.multi_reduction <add>, %1, %cst [1] : vector<16x1x32xf32> to vector<16x32xf32>
    %cst_2 = arith.constant 1.000000e+00 : f32
    %3 = vector.broadcast %cst_2 : f32 to vector<16x32xf32>
    %4 = arith.divf %2, %3 : vector<16x32xf32>
    %c0_3 = arith.constant 0 : index
    %c0_4 = arith.constant 0 : index
    %5 = vector.load %arg2[%c0_3, %c0_4] : memref<1x32xf32, #tpu.memory_space<vmem>>, vector<1x32xf32>
    %6 = vector.broadcast %5 : vector<1x32xf32> to vector<16x32xf32>
    %7 = arith.mulf %4, %6 : vector<16x32xf32>
    %c0_5 = arith.constant 0 : index
    %c0_6 = arith.constant 0 : index
    %8 = vector.load %arg3[%c0_5, %c0_6] : memref<1x32xf32, #tpu.memory_space<vmem>>, vector<1x32xf32>
    %9 = vector.broadcast %8 : vector<1x32xf32> to vector<16x32xf32>
    %10 = arith.addf %7, %9 : vector<16x32xf32>
    %11 = arith.truncf %10 : vector<16x32xf32> to vector<16x32xbf16>
    %c0_7 = arith.constant 0 : index
    %c0_8 = arith.constant 0 : index
    %12 = vector.load %arg4[%c0_7, %c0_8] : memref<32x32xbf16, #tpu.memory_space<vmem>>, vector<32x32xbf16>
    %cst_9 = arith.constant dense<0.000000e+00> : vector<16x32xf32>
    %13 = tpu.matmul %11, %12, %cst_9 {dimension_numbers = #tpu.dot_dimension_numbers<[1], [0], [0], [1], [0, 0, 1, 1], [], []>} : vector<16x32xbf16>, vector<32x32xbf16>, vector<16x32xf32> -> vector<16x32xf32>
    %c0_10 = arith.constant 0 : index
    %c0_11 = arith.constant 0 : index
    %14 = vector.load %arg5[%c0_10, %c0_11] : memref<1x32xf32, #tpu.memory_space<vmem>>, vector<1x32xf32>
    %15 = vector.broadcast %14 : vector<1x32xf32> to vector<16x32xf32>
    %16 = arith.addf %13, %15 : vector<16x32xf32>
    %cst_12 = arith.constant 5.000000e-01 : f32
    %17 = vector.broadcast %cst_12 : f32 to vector<16x32xf32>
    %18 = arith.mulf %17, %16 : vector<16x32xf32>
    %cst_13 = arith.constant 0.707106769 : f32
    %19 = vector.broadcast %cst_13 : f32 to vector<16x32xf32>
    %20 = arith.mulf %16, %19 : vector<16x32xf32>
    %cst_14 = arith.constant 0.000000e+00 : f32
    %21 = vector.broadcast %cst_14 : f32 to vector<16x32xf32>
    %22 = arith.cmpf oge, %20, %21 : vector<16x32xf32>
    %cst_15 = arith.constant 1.000000e+00 : f32
    %cst_16 = arith.constant -1.000000e+00 : f32
    %23 = vector.broadcast %cst_15 : f32 to vector<16x32xf32>
    %24 = vector.broadcast %cst_16 : f32 to vector<16x32xf32>
    %25 = arith.select %22, %23, %24 : vector<16x32xi1>, vector<16x32xf32>
    %26 = math.absf %20 : vector<16x32xf32>
    %cst_17 = arith.constant 0.327591091 : f32
    %27 = vector.broadcast %cst_17 : f32 to vector<16x32xf32>
    %28 = arith.mulf %27, %26 : vector<16x32xf32>
    %cst_18 = arith.constant 1.000000e+00 : f32
    %29 = vector.broadcast %cst_18 : f32 to vector<16x32xf32>
    %30 = arith.addf %29, %28 : vector<16x32xf32>
    %cst_19 = arith.constant 1.000000e+00 : f32
    %31 = vector.broadcast %cst_19 : f32 to vector<16x32xf32>
    %32 = arith.divf %31, %30 : vector<16x32xf32>
    %cst_20 = arith.constant 1.06140542 : f32
    %33 = vector.broadcast %cst_20 : f32 to vector<16x32xf32>
    %34 = arith.mulf %33, %32 : vector<16x32xf32>
    %cst_21 = arith.constant -1.45315206 : f32
    %35 = vector.broadcast %cst_21 : f32 to vector<16x32xf32>
    %36 = arith.addf %34, %35 : vector<16x32xf32>
    %37 = arith.mulf %36, %32 : vector<16x32xf32>
    %cst_22 = arith.constant 1.42141378 : f32
    %38 = vector.broadcast %cst_22 : f32 to vector<16x32xf32>
    %39 = arith.addf %37, %38 : vector<16x32xf32>
    %40 = arith.mulf %39, %32 : vector<16x32xf32>
    %cst_23 = arith.constant -0.284496725 : f32
    %41 = vector.broadcast %cst_23 : f32 to vector<16x32xf32>
    %42 = arith.addf %40, %41 : vector<16x32xf32>
    %43 = arith.mulf %42, %32 : vector<16x32xf32>
    %cst_24 = arith.constant 0.254829586 : f32
    %44 = vector.broadcast %cst_24 : f32 to vector<16x32xf32>
    %45 = arith.addf %43, %44 : vector<16x32xf32>
    %46 = arith.mulf %45, %32 : vector<16x32xf32>
    %cst_25 = arith.constant 0.000000e+00 : f32
    %47 = vector.broadcast %cst_25 : f32 to vector<16x32xf32>
    %48 = arith.subf %47, %26 : vector<16x32xf32>
    %49 = arith.mulf %48, %26 : vector<16x32xf32>
    %50 = math.exp %49 : vector<16x32xf32>
    %51 = arith.mulf %46, %50 : vector<16x32xf32>
    %cst_26 = arith.constant 1.000000e+00 : f32
    %52 = vector.broadcast %cst_26 : f32 to vector<16x32xf32>
    %53 = arith.subf %52, %51 : vector<16x32xf32>
    %54 = arith.mulf %25, %53 : vector<16x32xf32>
    %cst_27 = arith.constant 1.000000e+00 : f32
    %55 = vector.broadcast %cst_27 : f32 to vector<16x32xf32>
    %56 = arith.addf %55, %54 : vector<16x32xf32>
    %57 = arith.mulf %18, %56 : vector<16x32xf32>
    %58 = arith.truncf %57 : vector<16x32xf32> to vector<16x32xbf16>
    %c0_28 = arith.constant 0 : index
    %c0_29 = arith.constant 0 : index
    %59 = vector.load %arg6[%c0_28, %c0_29] : memref<32x16xbf16, #tpu.memory_space<vmem>>, vector<32x16xbf16>
    %cst_30 = arith.constant dense<0.000000e+00> : vector<16x16xf32>
    %60 = tpu.matmul %58, %59, %cst_30 {dimension_numbers = #tpu.dot_dimension_numbers<[1], [0], [0], [1], [0, 0, 1, 1], [], []>} : vector<16x32xbf16>, vector<32x16xbf16>, vector<16x16xf32> -> vector<16x16xf32>
    %c0_31 = arith.constant 0 : index
    %c0_32 = arith.constant 0 : index
    %61 = vector.load %arg7[%c0_31, %c0_32] : memref<1x16xf32, #tpu.memory_space<vmem>>, vector<1x16xf32>
    %62 = vector.broadcast %61 : vector<1x16xf32> to vector<16x16xf32>
    %63 = arith.addf %60, %62 : vector<16x16xf32>
    %cst_33 = arith.constant 5.000000e-01 : f32
    %64 = vector.broadcast %cst_33 : f32 to vector<16x16xf32>
    %65 = arith.mulf %64, %63 : vector<16x16xf32>
    %cst_34 = arith.constant 0.707106769 : f32
    %66 = vector.broadcast %cst_34 : f32 to vector<16x16xf32>
    %67 = arith.mulf %63, %66 : vector<16x16xf32>
    %cst_35 = arith.constant 0.000000e+00 : f32
    %68 = vector.broadcast %cst_35 : f32 to vector<16x16xf32>
    %69 = arith.cmpf oge, %67, %68 : vector<16x16xf32>
    %cst_36 = arith.constant 1.000000e+00 : f32
    %cst_37 = arith.constant -1.000000e+00 : f32
    %70 = vector.broadcast %cst_36 : f32 to vector<16x16xf32>
    %71 = vector.broadcast %cst_37 : f32 to vector<16x16xf32>
    %72 = arith.select %69, %70, %71 : vector<16x16xi1>, vector<16x16xf32>
    %73 = math.absf %67 : vector<16x16xf32>
    %cst_38 = arith.constant 0.327591091 : f32
    %74 = vector.broadcast %cst_38 : f32 to vector<16x16xf32>
    %75 = arith.mulf %74, %73 : vector<16x16xf32>
    %cst_39 = arith.constant 1.000000e+00 : f32
    %76 = vector.broadcast %cst_39 : f32 to vector<16x16xf32>
    %77 = arith.addf %76, %75 : vector<16x16xf32>
    %cst_40 = arith.constant 1.000000e+00 : f32
    %78 = vector.broadcast %cst_40 : f32 to vector<16x16xf32>
    %79 = arith.divf %78, %77 : vector<16x16xf32>
    %cst_41 = arith.constant 1.06140542 : f32
    %80 = vector.broadcast %cst_41 : f32 to vector<16x16xf32>
    %81 = arith.mulf %80, %79 : vector<16x16xf32>
    %cst_42 = arith.constant -1.45315206 : f32
    %82 = vector.broadcast %cst_42 : f32 to vector<16x16xf32>
    %83 = arith.addf %81, %82 : vector<16x16xf32>
    %84 = arith.mulf %83, %79 : vector<16x16xf32>
    %cst_43 = arith.constant 1.42141378 : f32
    %85 = vector.broadcast %cst_43 : f32 to vector<16x16xf32>
    %86 = arith.addf %84, %85 : vector<16x16xf32>
    %87 = arith.mulf %86, %79 : vector<16x16xf32>
    %cst_44 = arith.constant -0.284496725 : f32
    %88 = vector.broadcast %cst_44 : f32 to vector<16x16xf32>
    %89 = arith.addf %87, %88 : vector<16x16xf32>
    %90 = arith.mulf %89, %79 : vector<16x16xf32>
    %cst_45 = arith.constant 0.254829586 : f32
    %91 = vector.broadcast %cst_45 : f32 to vector<16x16xf32>
    %92 = arith.addf %90, %91 : vector<16x16xf32>
    %93 = arith.mulf %92, %79 : vector<16x16xf32>
    %cst_46 = arith.constant 0.000000e+00 : f32
    %94 = vector.broadcast %cst_46 : f32 to vector<16x16xf32>
    %95 = arith.subf %94, %73 : vector<16x16xf32>
    %96 = arith.mulf %95, %73 : vector<16x16xf32>
    %97 = math.exp %96 : vector<16x16xf32>
    %98 = arith.mulf %93, %97 : vector<16x16xf32>
    %cst_47 = arith.constant 1.000000e+00 : f32
    %99 = vector.broadcast %cst_47 : f32 to vector<16x16xf32>
    %100 = arith.subf %99, %98 : vector<16x16xf32>
    %101 = arith.mulf %72, %100 : vector<16x16xf32>
    %cst_48 = arith.constant 1.000000e+00 : f32
    %102 = vector.broadcast %cst_48 : f32 to vector<16x16xf32>
    %103 = arith.addf %102, %101 : vector<16x16xf32>
    %104 = arith.mulf %65, %103 : vector<16x16xf32>
    %c0_49 = arith.constant 0 : index
    %c0_50 = arith.constant 0 : index
    %105 = vector.load %arg8[%c0_49, %c0_50] : memref<16x16xf32, #tpu.memory_space<vmem>>, vector<16x16xf32>
    tpu.vector_store %arg8[%c0_49, %c0_50], %104 {strides = array<i32>} : memref<16x16xf32, #tpu.memory_space<vmem>>, vector<16x16xf32>,
    return
  }
  func.func @transform_0(%arg0: i32) -> (i32, i32, i32) {
    %c0_i32 = arith.constant 0 : i32
    %c0_i32_0 = arith.constant 0 : i32
    %c0_i32_1 = arith.constant 0 : i32
    return %arg0, %c0_i32, %c0_i32_0 : i32, i32, i32
  }
  func.func @transform_1(%arg0: i32) -> (i32, i32) {
    %c0_i32 = arith.constant 0 : i32
    %c0_i32_0 = arith.constant 0 : i32
    %c0_i32_1 = arith.constant 0 : i32
    return %c0_i32, %c0_i32_0 : i32, i32
  }
  func.func @transform_2(%arg0: i32) -> (i32, i32) {
    %c0_i32 = arith.constant 0 : i32
    %c0_i32_0 = arith.constant 0 : i32
    %c0_i32_1 = arith.constant 0 : i32
    return %c0_i32, %c0_i32_0 : i32, i32
  }
  func.func @transform_3(%arg0: i32) -> (i32, i32) {
    %c0_i32 = arith.constant 0 : i32
    %c0_i32_0 = arith.constant 0 : i32
    %c0_i32_1 = arith.constant 0 : i32
    return %c0_i32, %c0_i32_0 : i32, i32
  }
  func.func @transform_4(%arg0: i32) -> (i32, i32) {
    %c0_i32 = arith.constant 0 : i32
    %c0_i32_0 = arith.constant 0 : i32
    %c0_i32_1 = arith.constant 0 : i32
    return %c0_i32, %c0_i32_0 : i32, i32
  }
  func.func @transform_5(%arg0: i32) -> (i32, i32) {
    %c0_i32 = arith.constant 0 : i32
    %c0_i32_0 = arith.constant 0 : i32
    %c0_i32_1 = arith.constant 0 : i32
    return %c0_i32, %c0_i32_0 : i32, i32
  }
  func.func @transform_6(%arg0: i32) -> (i32, i32) {
    %c0_i32 = arith.constant 0 : i32
    %c0_i32_0 = arith.constant 0 : i32
    %c0_i32_1 = arith.constant 0 : i32
    return %c0_i32, %c0_i32_0 : i32, i32
  }
  func.func @transform_7(%arg0: i32) -> (i32, i32) {
    %c0_i32 = arith.constant 0 : i32
    %c0_i32_0 = arith.constant 0 : i32
    return %arg0, %c0_i32 : i32, i32
  }
}

</mosaic_0001>

<bundles_post_ra>
// kernel: custom_densenet_forward.27
= control target key start
LH: loop header
LB: loop body
LE: loop exit
PB: predicated region body
PF: predicated region fallthrough
CT: control target
= control target key end

     0   :  { %v44_v0 = vlaneseq  ;;  %vm168_vm0 = vcmask 261120   ;;  %v528_v39 = vmov 0   ;;  %vm416_vm1 = vcmask 257024   ;;  %s774_s1 = inlined_call_operand.vmem [shape: bf16[32,32], index: 1, kind: input, shape index: {}]   ;;  %s775_s2 = inlined_call_operand.vmem [shape: bf16[1,32], index: 2, kind: input, shape index: {}]   ;;  %s776_s3 = inlined_call_operand.vmem [shape: bf16[1,32], index: 3, kind: input, shape index: {}]   ;;  %s777_s0 = inlined_call_operand.vmem [shape: bf16[128,32], index: 0, kind: input, shape index: {}]   ;;  %s778_s4 = inlined_call_operand.vmem [shape: f32[1,32], index: 4, kind: input, shape index: {}]   ;;  %s779_s5 = inlined_call_operand.vmem [shape: f32[1,32], index: 5, kind: input, shape index: {}]   ;;  %s780_s6 = inlined_call_operand.vmem [shape: bf16[128,32], index: 6, kind: output, shape index: {}]  }
   0x1   :  { %v526_v1 = vld [vmem:[%s774_s1] sm:$0xff]   ;;  %v527_v2 = vld [vmem:[%s774_s1 + $0x8] sm:$0xff]   ;;  %v28_v37 = vld [vmem:[%s777_s0 + $0x10] sm:$0xf] }
   0x2   :  { %v45_v3 = vshrl.u32 %v44_v0, 7  ;;  %501 = vmatprep.subr.bf16.mxu0 %v526_v1  ;;  %521 = vmatprep.subr.bf16.mxu1 %v526_v1  ;;  %v40_v4 = vld [vmem:[%s775_s2] sm:$0x1]  ;;  %v25_v10 = vld [vmem:[%s777_s0 + $0x4] sm:$0xf] }
   0x3   :  { %502 = vmatpush3.bf16.msra.mxu0 %v526_v1  ;;  %523 = vmatpush3.bf16.msra.mxu1 %v526_v1  ;;  %v42_v5 = vpack.i.b16 %v40_v4, %v40_v4  ;;  %v68_v7 = vld [vmem:[%s776_s3] sm:$0x1]  ;;  %v33_v14 = vld [vmem:[%s777_s0 + $0x24] sm:$0xf]  ;;  %v26_v15 = vld [vmem:[%s777_s0 + $0x8] sm:$0xf] }
   0x4   :  { %v46_v6 = vsub.s32 0, %v45_v3  ;;  %503 = vmatprep.subr.bf16.mxu0 %v527_v2  ;;  %522 = vmatprep.subr.bf16.mxu1 %v527_v2  ;;  %v70_v8 = vpack.i.b16 %v68_v7, %v68_v7  ;;  %v24_v9 = vld [vmem:[%s777_s0] sm:$0xf]  ;;  %v27_v17 = vld [vmem:[%s777_s0 + $0xc] sm:$0xf] }
   0x5   :  { %v32_v13 = vld [vmem:[%s777_s0 + $0x20] sm:$0xf]  ;;  %v34_v18 = vld [vmem:[%s777_s0 + $0x28] sm:$0xf]  ;;  %v35_v19 = vld [vmem:[%s777_s0 + $0x2c] sm:$0xf] }
   0x6   :  { %v47_v11 = vrot.slane %v42_v5, %v46_v6  ;;  %v75_v12 = vrot.slane %v70_v8, %v46_v6  ;;  %v29_v38 = vld [vmem:[%s777_s0 + $0x14] sm:$0xf]  ;;  %v36_v44 = vld [vmem:[%s777_s0 + $0x30] sm:$0xf]  ;;  %v30_v50 = vld [vmem:[%s777_s0 + $0x18] sm:$0xf] }
   0x7   :  { %504 = vmatpush3.bf16.msra.mxu0 %v527_v2  ;;  %524 = vmatpush3.bf16.msra.mxu1 %v527_v2  ;;  %v37_v45 = vld [vmem:[%s777_s0 + $0x34] sm:$0xf]  ;;  %v31_v55 = vld [vmem:[%s777_s0 + $0x1c] sm:$0xf]  ;;  %v38_v60 = vld [vmem:[%s777_s0 + $0x38] sm:$0xf] }
   0x8   :  { %v591_v16 = vcombine.low %v47_v11, %v47_v11  ;;  %v602_v20 = vcombine.low %v75_v12, %v75_v12  ;;  %v39_v0 = vld [vmem:[%s777_s0 + $0x3c] sm:$0xf] }
   0xa   :  { %v52_v21 = vmul.bf16 %v591_v16, %v24_v9  ;;  %v53_v22 = vmul.bf16 %v591_v16, %v25_v10  ;;  %v60_v23 = vmul.bf16 %v591_v16, %v32_v13  ;;  %v61_v24 = vmul.bf16 %v591_v16, %v33_v14 }
   0xb   :  { %v54_v25 = vmul.bf16 %v591_v16, %v26_v15  ;;  %v55_v26 = vmul.bf16 %v591_v16, %v27_v17  ;;  %v62_v27 = vmul.bf16 %v591_v16, %v34_v18  ;;  %v63_v28 = vmul.bf16 %v591_v16, %v35_v19 }
   0xc   :  { %v80_v29 = vadd.bf16 %v602_v20, %v52_v21  ;;  %v81_v30 = vadd.bf16 %v602_v20, %v53_v22  ;;  %v88_v31 = vadd.bf16 %v602_v20, %v60_v23  ;;  %v89_v32 = vadd.bf16 %v602_v20, %v61_v24 }
   0xd   :  { %v82_v33 = vadd.bf16 %v602_v20, %v54_v25  ;;  %v83_v34 = vadd.bf16 %v602_v20, %v55_v26  ;;  %v90_v35 = vadd.bf16 %v602_v20, %v62_v27  ;;  %v91_v36 = vadd.bf16 %v602_v20, %v63_v28 }
   0xe   :  { %v96_v40 = vmax.bf16 %v528_v39, %v80_v29  ;;  %v97_v41 = vmax.bf16 %v528_v39, %v81_v30  ;;  %v104_v42 = vmax.bf16 %v528_v39, %v88_v31  ;;  %v105_v43 = vmax.bf16 %v528_v39, %v89_v32 }
   0xf   :  { %v98_v46 = vmax.bf16 %v528_v39, %v82_v33  ;;  %v99_v47 = vmax.bf16 %v528_v39, %v83_v34  ;;  %v106_v48 = vmax.bf16 %v528_v39, %v90_v35  ;;  %v107_v49 = vmax.bf16 %v528_v39, %v91_v36 }
  0x10   :  { %v439_v51 = vcombine.low %v96_v40, %v97_v41  ;;  %v443_v52 = vcombine.low %v104_v42, %v105_v43  ;;  %v56_v53 = vmul.bf16 %v591_v16, %v28_v37  ;;  %v57_v54 = vmul.bf16 %v591_v16, %v29_v38 }
  0x11   :  { %v440_v56 = vcombine.low %v98_v46, %v99_v47  ;;  %v444_v57 = vcombine.low %v106_v48, %v107_v49  ;;  %v64_v58 = vmul.bf16 %v591_v16, %v36_v44  ;;  %v65_v59 = vmul.bf16 %v591_v16, %v37_v45 }
  0x12   :  { %505 = vmatprep.mubr.msk.bf16.mxu0 %vm168_vm0, %v439_v51  ;;  %513 = vmatprep.mubr.msk.bf16.mxu1 %vm168_vm0, %v443_v52  ;;  %v84_v61 = vadd.bf16 %v602_v20, %v56_v53  ;;  %v85_v62 = vadd.bf16 %v602_v20, %v57_v54  ;;  %v58_v63 = vmul.bf16 %v591_v16, %v30_v50 }
  0x13   :  { %506 = vmatmul.mubr.msk.bf16.vlgmr.msra.gmra.mrb[0].mxu0 %vm168_vm0, %v440_v56  ;;  %514 = vmatmul.mubr.msk.bf16.vlgmr.msra.gmra.mrb[0].mxu1 %vm168_vm0, %v444_v57  ;;  %v92_v1 = vadd.bf16 %v602_v20, %v64_v58  ;;  %v93_v2 = vadd.bf16 %v602_v20, %v65_v59  ;;  %v59_v3 = vmul.bf16 %v591_v16, %v31_v55 }
  0x14   :  { %v100_v4 = vmax.bf16 %v528_v39, %v84_v61  ;;  %v101_v5 = vmax.bf16 %v528_v39, %v85_v62  ;;  %v86_v6 = vadd.bf16 %v602_v20, %v58_v63  ;;  %v66_v7 = vmul.bf16 %v591_v16, %v38_v60 }
  0x15   :  { %v108_v8 = vmax.bf16 %v528_v39, %v92_v1  ;;  %v109_v9 = vmax.bf16 %v528_v39, %v93_v2  ;;  %v87_v10 = vadd.bf16 %v602_v20, %v59_v3  ;;  %v67_v11 = vmul.bf16 %v591_v16, %v39_v0  ;;  %v671_v16 = vld [vmem:[%s778_s4] ss:$0 sm:$0xff] }
  0x16   :  { %v441_v12 = vcombine.low %v100_v4, %v101_v5  ;;  %v102_v13 = vmax.bf16 %v528_v39, %v86_v6  ;;  %v94_v14 = vadd.bf16 %v602_v20, %v66_v7 }
  0x17   :  { %v445_v15 = vcombine.low %v108_v8, %v109_v9  ;;  %v103_v17 = vmax.bf16 %v528_v39, %v87_v10  ;;  %v95_v18 = vadd.bf16 %v602_v20, %v67_v11  ;;  %v676_v20 = vld [vmem:[%s779_s5] ss:$0 sm:$0xff] }
  0x18   :  { %509 = vmatprep.mubr.msk.bf16.mxu0 %vm168_vm0, %v441_v12  ;;  %v110_v19 = vmax.bf16 %v528_v39, %v94_v14 }
  0x19   :  { %517 = vmatprep.mubr.msk.bf16.mxu1 %vm168_vm0, %v445_v15  ;;  %v442_v21 = vcombine.low %v102_v13, %v103_v17  ;;  %v111_v22 = vmax.bf16 %v528_v39, %v95_v18 }
  0x1b   :  { %510 = vmatmul.mubr.msk.bf16.gmra.mrb[4].mxu0 %vm168_vm0, %v442_v21  ;;  %v446_v23 = vcombine.low %v110_v19, %v111_v22 }
  0x1d   :  { %518 = vmatmul.mubr.msk.bf16.gmra.mrb[4].mxu1 %vm168_vm0, %v446_v23 }
  0xe6   :  { %v507_v24 = vpop.f32.mrb[0].mxu0  ;;  %v515_v25 = vpop.f32.mrb[0].mxu1 }
  0xe7   :  { %v299_v26 = vmul.f32 %v507_v24, %v671_v16  ;;  %v307_v27 = vmul.f32 %v515_v25, %v671_v16  ;;  %v227_v28 = vpop.f32.mrb[1].mxu0  ;;  %v259_v29 = vpop.f32.mrb[1].mxu1 }
  0xe8   :  { %v297_v30 = vmul.f32 %v671_v16, %v227_v28  ;;  %v305_v31 = vmul.f32 %v671_v16, %v259_v29  ;;  %v508_v32 = vpop.f32.mrb[2].mxu0  ;;  %v516_v33 = vpop.f32.mrb[2].mxu1 }
  0xe9   :  { %v322_v34 = vadd.f32 %v676_v20, %v299_v26  ;;  %v330_v35 = vadd.f32 %v676_v20, %v307_v27  ;;  %v300_v36 = vmul.f32 %v508_v32, %v671_v16  ;;  %v308_v37 = vmul.f32 %v516_v33, %v671_v16  ;;  %v230_v38 = vpop.f32.mrb[3].mxu0  ;;  %v262_v39 = vpop.f32.mrb[3].mxu1 }
  0xea   :  { %v320_v40 = vadd.f32 %v676_v20, %v297_v30  ;;  %v328_v41 = vadd.f32 %v676_v20, %v305_v31  ;;  %v298_v42 = vmul.f32 %v671_v16, %v230_v38  ;;  %v306_v43 = vmul.f32 %v671_v16, %v262_v39 }
  0xeb   :  { %v338_v44 = vmax.f32 %v322_v34, 0.0  ;;  %v346_v45 = vmax.f32 %v330_v35, 0.0  ;;  %v323_v46 = vadd.f32 %v676_v20, %v300_v36  ;;  %v331_v47 = vadd.f32 %v676_v20, %v308_v37 }
  0xec   :  { %v336_v48 = vmax.f32 %v320_v40, 0.0  ;;  %v344_v49 = vmax.f32 %v328_v41, 0.0  ;;  %v321_v50 = vadd.f32 %v676_v20, %v298_v42  ;;  %v329_v51 = vadd.f32 %v676_v20, %v306_v43 }
  0xed   :  { %v477_v52 = vpack.c.bf16 %v338_v44, %v338_v44  ;;  %v485_v53 = vpack.c.bf16 %v346_v45, %v346_v45  ;;  %v339_v54 = vmax.f32 %v323_v46, 0.0  ;;  %v347_v55 = vmax.f32 %v331_v47, 0.0 }
  0xee   :  { %v475_v56 = vpack.c.bf16 %v336_v48, %v336_v48  ;;  %v483_v57 = vpack.c.bf16 %v344_v49, %v344_v49  ;;  %v337_v58 = vmax.f32 %v321_v50, 0.0  ;;  %v345_v59 = vmax.f32 %v329_v51, 0.0  ;;  %v511_v60 = vpop.f32.mrb[4].mxu0 }
  0xef   :  { %419 = vst.msk [vmem:[%s780_s6 + $0x8] sm:$0xf] %vm416_vm1, %v477_v52  ;;  %427 = vst.msk [vmem:[%s780_s6 + $0x28] sm:$0xf] %vm416_vm1, %v485_v53  ;;  %v478_v61 = vpack.c.bf16 %v339_v54, %v339_v54  ;;  %v486_v62 = vpack.c.bf16 %v347_v55, %v347_v55  ;;  %v303_v63 = vmul.f32 %v511_v60, %v671_v16  ;;  %v243_v0 = vpop.f32.mrb[5].mxu0 }
  0xf0   :  { %417 = vst.msk [vmem:[%s780_s6] sm:$0xf] %vm416_vm1, %v475_v56  ;;  %425 = vst.msk [vmem:[%s780_s6 + $0x20] sm:$0xf] %vm416_vm1, %v483_v57  ;;  %v476_v1 = vpack.c.bf16 %v337_v58, %v337_v58  ;;  %v484_v2 = vpack.c.bf16 %v345_v59, %v345_v59  ;;  %v519_v3 = vpop.f32.mrb[4].mxu1  ;;  %v301_v4 = vmul.f32 %v671_v16, %v243_v0  ;;  %v512_v5 = vpop.f32.mrb[6].mxu0 }
  0xf1   :  { %420 = vst.msk [vmem:[%s780_s6 + $0xc] sm:$0xf] %vm416_vm1, %v478_v61  ;;  %428 = vst.msk [vmem:[%s780_s6 + $0x2c] sm:$0xf] %vm416_vm1, %v486_v62  ;;  %v326_v6 = vadd.f32 %v676_v20, %v303_v63  ;;  %v311_v7 = vmul.f32 %v519_v3, %v671_v16  ;;  %v275_v8 = vpop.f32.mrb[5].mxu1  ;;  %v304_v9 = vmul.f32 %v512_v5, %v671_v16  ;;  %v246_v10 = vpop.f32.mrb[7].mxu0 }
  0xf2   :  { %418 = vst.msk [vmem:[%s780_s6 + $0x4] sm:$0xf] %vm416_vm1, %v476_v1  ;;  %426 = vst.msk [vmem:[%s780_s6 + $0x24] sm:$0xf] %vm416_vm1, %v484_v2  ;;  %v324_v11 = vadd.f32 %v676_v20, %v301_v4  ;;  %v309_v12 = vmul.f32 %v671_v16, %v275_v8  ;;  %v520_v13 = vpop.f32.mrb[6].mxu1  ;;  %v302_v14 = vmul.f32 %v671_v16, %v246_v10 }
  0xf3   :  { %v342_v15 = vmax.f32 %v326_v6, 0.0  ;;  %v334_v17 = vadd.f32 %v676_v20, %v311_v7  ;;  %v327_v18 = vadd.f32 %v676_v20, %v304_v9  ;;  %v312_v19 = vmul.f32 %v520_v13, %v671_v16  ;;  %v278_v21 = vpop.f32.mrb[7].mxu1 }
  0xf4   :  { %v340_v22 = vmax.f32 %v324_v11, 0.0  ;;  %v332_v23 = vadd.f32 %v676_v20, %v309_v12  ;;  %v325_v24 = vadd.f32 %v676_v20, %v302_v14  ;;  %v310_v25 = vmul.f32 %v671_v16, %v278_v21 }
  0xf5   :  { %v481_v26 = vpack.c.bf16 %v342_v15, %v342_v15  ;;  %v350_v27 = vmax.f32 %v334_v17, 0.0  ;;  %v343_v28 = vmax.f32 %v327_v18, 0.0  ;;  %v335_v29 = vadd.f32 %v676_v20, %v312_v19 }
  0xf6   :  { %v479_v30 = vpack.c.bf16 %v340_v22, %v340_v22  ;;  %v348_v31 = vmax.f32 %v332_v23, 0.0  ;;  %v341_v32 = vmax.f32 %v325_v24, 0.0  ;;  %v333_v33 = vadd.f32 %v676_v20, %v310_v25 }
  0xf7   :  { %423 = vst.msk [vmem:[%s780_s6 + $0x18] sm:$0xf] %vm416_vm1, %v481_v26  ;;  %v489_v34 = vpack.c.bf16 %v350_v27, %v350_v27  ;;  %v482_v35 = vpack.c.bf16 %v343_v28, %v343_v28  ;;  %v351_v36 = vmax.f32 %v335_v29, 0.0 }
  0xf8   :  { %421 = vst.msk [vmem:[%s780_s6 + $0x10] sm:$0xf] %vm416_vm1, %v479_v30  ;;  %v487_v16 = vpack.c.bf16 %v348_v31, %v348_v31  ;;  %v480_v37 = vpack.c.bf16 %v341_v32, %v341_v32  ;;  %v349_v38 = vmax.f32 %v333_v33, 0.0 }
  0xf9   :  { %431 = vst.msk [vmem:[%s780_s6 + $0x38] sm:$0xf] %vm416_vm1, %v489_v34  ;;  %424 = vst.msk [vmem:[%s780_s6 + $0x1c] sm:$0xf] %vm416_vm1, %v482_v35  ;;  %v490_v20 = vpack.c.bf16 %v351_v36, %v351_v36 }
  0xfa   :  { %429 = vst.msk [vmem:[%s780_s6 + $0x30] sm:$0xf] %vm416_vm1, %v487_v16  ;;  %422 = vst.msk [vmem:[%s780_s6 + $0x14] sm:$0xf] %vm416_vm1, %v480_v37  ;;  %v488_v39 = vpack.c.bf16 %v349_v38, %v349_v38 }
  0xfb   :  { %432 = vst.msk [vmem:[%s780_s6 + $0x3c] sm:$0xf] %vm416_vm1, %v490_v20 }
  0xfc   :  { %430 = vst.msk [vmem:[%s780_s6 + $0x34] sm:$0xf] %vm416_vm1, %v488_v39 }

// kernel: custom_densenet_forward.26
= control target key start
LH: loop header
LB: loop body
LE: loop exit
PB: predicated region body
PF: predicated region fallthrough
CT: control target
= control target key end

     0   :  { %s643_s9 = smov 0   ;;  %s840_s0 = inlined_call_operand.vmem [shape: bf16[2,18,9,16], index: 0, kind: input, shape index: {}]   ;;  %s841_s1 = inlined_call_operand.vmem [shape: bf16[2,18,9,16], index: 1, kind: input, shape index: {}]   ;;  %s842_s2 = inlined_call_operand.vmem [shape: bf16[2,8,8,16], index: 2, kind: output, shape index: {}]  }
   0x1 LB: > { %s599_s10 = sadd.s32 4294967295, %s626_s9   ;;  %p603_p0 = scmp.ge.s32.totalorder %s626_s9, 1  ;;  %s626_s9 = sphi %s643_s9, %s12_s9  }
   0x2   : > { %p122_p1 = scmp.lt.s32.totalorder %s626_s9, 3 }
   0x4   : > { %p123_p2 = pnand %p603_p0, %p122_p1 }
   0x5   : > { %p149_p3 = scmp.lt.s32.totalorder (!%p123_p2), %s599_s10, 1  ;;  %vm232_vm0 = vsmask.f32 (!%p123_p2), 3328  ;;  %vm233_vm1 = vsmask.f32 (!%p123_p2), 7440  ;;  %vm523_vm2 = vcmask (!%p123_p2), 125952  }
   0x6   : > { %126 = sbr.rel (%p123_p2) target bundleno = 78 (0x4e), region = 28  ;;  %vm687_vm3 = vmor (!%p123_p2), %vm232_vm0, %vm233_vm1 }
   0xd   : > { %s846_s10 = smov (!%p149_p3, %s599_s10), 1 }
   0xe   : > { %s611_s11 = smul.u32 144, %s846_s10  ;;  %s610_s18 = sshll.u32 %s846_s10, 5 }
   0xf   : > { %s720_s21 = scalar_lea.vmem %s842_s2, %s610_s18 }
  0x10   : > { %s657_s14 = scalar_lea.vmem %s840_s0, %s611_s11  ;;  %s662_s17 = scalar_lea.vmem %s841_s1, %s611_s11 }
  0x11   : > { %v164_v0 = vld [vmem:[%s657_s14] sm:$0xf]  ;;  %v165_v1 = vld [vmem:[%s657_s14 + $0x4] sm:$0x1]  ;;  %v166_v2 = vld [vmem:[%s657_s14 + $0x8] sm:$0xf] }
  0x12   : > { %v167_v3 = vld [vmem:[%s657_s14 + $0xc] sm:$0x1]  ;;  %v669_v4 = vld [vmem:[%s657_s14 + $0x10] sm:$0xf]  ;;  %v198_v5 = vld [vmem:[%s662_s17] sm:$0xf] }
  0x13   : > { %v169_v6 = vld [vmem:[%s657_s14 + $0x14] sm:$0x1]  ;;  %v199_v7 = vld [vmem:[%s662_s17 + $0x8] sm:$0xf]  ;;  %v215_v8 = vmax.bf16 %v198_v5, %v164_v0  ;;  %v236_v9 = vshrl.u32 %v164_v0, 16  ;;  %v239_v11 = vshll.u32 %v164_v0, 16 }
  0x14   : > { %v200_v10 = vld [vmem:[%s662_s17 + $0x10] sm:$0xf]  ;;  %v245_v12 = vshll.u32 %v165_v1, 16  ;;  %v250_v13 = vshrl.u32 %v166_v2, 16  ;;  %v253_v14 = vshll.u32 %v166_v2, 16  ;;  %v259_v16 = vshll.u32 %v167_v3, 16 }
  0x15   : > { %v238_v15 = vrot.slane %v236_v9, 4  ;;  %v264_v17 = vshrl.u32 %v669_v4, 16  ;;  %v267_v18 = vshll.u32 %v669_v4, 16  ;;  %v678_v19 = vld [vmem:[%s657_s14 + $0x18] sm:$0xf]  ;;  %v216_v20 = vmax.bf16 %v199_v7, %v166_v2 }
  0x16   : > { %v241_v21 = vrot.slane %v239_v11, 5  ;;  %v252_v22 = vrot.slane %v250_v13, 4  ;;  %v255_v23 = vrot.slane %v253_v14, 5  ;;  %v171_v24 = vld [vmem:[%s657_s14 + $0x1c] sm:$0x1]  ;;  %v217_v25 = vmax.bf16 %v200_v10, %v669_v4 }
  0x17   : > { %v266_v26 = vrot.slane %v264_v17, 4  ;;  %v269_v27 = vrot.slane %v267_v18, 5  ;;  %v273_v28 = vshll.u32 %v169_v6, 16  ;;  %v683_v29 = vld [vmem:[%s657_s14 + $0x20] sm:$0xf]  ;;  %v247_v31 = vrot.slane %v245_v12, 5 }
  0x18   : > { %v242_v30 = vor.u32 %v241_v21, %v238_v15  ;;  %v256_v32 = vor.u32 %v255_v23, %v252_v22  ;;  %v261_v33 = vrot.slane %v259_v16, 5  ;;  %v173_v37 = vld [vmem:[%s657_s14 + $0x24] sm:$0x1]  ;;  %v278_v38 = vshrl.u32 %v678_v19, 16  ;;  %v201_v42 = vld [vmem:[%s662_s17 + $0x18] sm:$0xf] }
  0x19   : > { %v270_v35 = vor.u32 %v269_v27, %v266_v26  ;;  %v275_v36 = vrot.slane %v273_v28, 5  ;;  %v281_v39 = vshll.u32 %v678_v19, 16  ;;  %v287_v43 = vshll.u32 %v171_v24, 16  ;;  %v202_v46 = vld [vmem:[%s662_s17 + $0x20] sm:$0xf] }
  0x1a   : > { %v243_v40 = vrot.slane %v242_v30, 4  ;;  %v257_v41 = vrot.slane %v256_v32, 4  ;;  %v292_v44 = vshrl.u32 %v683_v29, 16  ;;  %v280_v47 = vrot.slane %v278_v38, 4  ;;  %v703_v54 = vld [vmem:[%s657_s14 + $0x28] sm:$0xf] }
  0x1b   : > { %v271_v45 = vrot.slane %v270_v35, 4  ;;  %v283_v48 = vrot.slane %v281_v39, 5  ;;  %v295_v49 = vshll.u32 %v683_v29, 16  ;;  %v289_v52 = vrot.slane %v287_v43, 5  ;;  %v175_v59 = vld [vmem:[%s657_s14 + $0x2c] sm:$0x1] }
  0x1c   : > { %v248_v50 = vsel %vm687_vm3, %v243_v40, %v247_v31  ;;  %v262_v51 = vsel %vm687_vm3, %v257_v41, %v261_v33  ;;  %v294_v53 = vrot.slane %v292_v44, 4  ;;  %v218_v60 = vmax.bf16 %v201_v42, %v678_v19  ;;  %v712_v0 = vld [vmem:[%s657_s14 + $0x30] sm:$0xf]  ;;  %v177_v4 = vld [vmem:[%s657_s14 + $0x34] sm:$0x1] }
  0x1d   : > { %v276_v55 = vsel %vm687_vm3, %v271_v45, %v275_v36  ;;  %v490_v56 = vmax.bf16 %v248_v50, %v215_v8  ;;  %v491_v57 = vmax.bf16 %v262_v51, %v216_v20  ;;  %v284_v58 = vor.u32 %v283_v48, %v280_v47  ;;  %v203_v5 = vld [vmem:[%s662_s17 + $0x28] sm:$0xf]  ;;  %v204_v9 = vld [vmem:[%s662_s17 + $0x30] sm:$0xf]  ;;  %v729_v20 = vld [vmem:[%s657_s14 + $0x38] sm:$0xf] }
  0x1e   : > { %v219_v61 = vmax.bf16 %v202_v46, %v683_v29  ;;  %v297_v62 = vrot.slane %v295_v49, 5  ;;  %v301_v63 = vshll.u32 %v173_v37, 16  ;;  %v492_v1 = vmax.bf16 %v276_v55, %v217_v25  ;;  %v179_v21 = vld [vmem:[%s657_s14 + $0x3c] sm:$0x1]  ;;  %v737_v26 = vld [vmem:[%s657_s14 + $0x40] sm:$0xf] }
  0x1f   : > { %v507_v2 = vmax.bf16 %v491_v57, %v490_v56  ;;  %v285_v3 = vrot.slane %v284_v58, 4  ;;  %v306_v6 = vshrl.u32 %v703_v54, 16  ;;  %v309_v10 = vshll.u32 %v703_v54, 16  ;;  %v205_v35 = vld [vmem:[%s662_s17 + $0x38] sm:$0xf] }
  0x20   : > { %v298_v7 = vor.u32 %v297_v62, %v294_v53  ;;  %v303_v8 = vrot.slane %v301_v63, 5  ;;  %v315_v11 = vshll.u32 %v175_v59, 16  ;;  %v320_v15 = vshrl.u32 %v712_v0, 16  ;;  %v181_v38 = vld [vmem:[%s657_s14 + $0x44] sm:$0x1] }
  0x21   : > { %v515_v12 = vmax.bf16 %v507_v2, %v492_v1  ;;  %v290_v13 = vsel %vm687_vm3, %v285_v3, %v289_v52  ;;  %v308_v14 = vrot.slane %v306_v6, 4  ;;  %v220_v18 = vmax.bf16 %v203_v5, %v703_v54  ;;  %v206_v44 = vld [vmem:[%s662_s17 + $0x40] sm:$0xf]  ;;  %v749_v47 = vld [vmem:[%s657_s14 + $0x48] sm:$0xf] }
  0x22   : > { %v299_v16 = vrot.slane %v298_v7, 4  ;;  %v493_v17 = vmax.bf16 %v290_v13, %v218_v60  ;;  %v311_v19 = vrot.slane %v309_v10, 5  ;;  %v221_v22 = vmax.bf16 %v204_v9, %v712_v0  ;;  %v183_v59 = vld [vmem:[%s657_s14 + $0x4c] sm:$0x1]  ;;  %v759_v60 = vld [vmem:[%s657_s14 + $0x50] sm:$0xf] }
  0x23   : > { %524 = vst.msk [vmem:[%s720_s21] sm:$0xf] %vm523_vm2, %v515_v12  ;;  %v322_v23 = vrot.slane %v320_v15, 4  ;;  %v323_v24 = vshll.u32 %v712_v0, 16  ;;  %v329_v25 = vshll.u32 %v177_v4, 16  ;;  %v317_v30 = vrot.slane %v315_v11, 5 }
  0x24   : > { %v304_v27 = vsel %vm687_vm3, %v299_v16, %v303_v8  ;;  %v508_v28 = vmax.bf16 %v493_v17, %v492_v1  ;;  %v312_v29 = vor.u32 %v311_v19, %v308_v14  ;;  %v334_v36 = vshrl.u32 %v729_v20, 16  ;;  %v185_v2 = vld [vmem:[%s657_s14 + $0x54] sm:$0x1]  ;;  %v207_v5 = vld [vmem:[%s662_s17 + $0x48] sm:$0xf] }
  0x25   : > { %v494_v31 = vmax.bf16 %v304_v27, %v219_v61  ;;  %v325_v32 = vrot.slane %v323_v24, 5  ;;  %v331_v33 = vrot.slane %v329_v25, 5  ;;  %v337_v39 = vshll.u32 %v729_v20, 16  ;;  %v208_v9 = vld [vmem:[%s662_s17 + $0x50] sm:$0xf] }
  0x26   : > { %v313_v37 = vrot.slane %v312_v29, 4  ;;  %v343_v40 = vshll.u32 %v179_v21, 16  ;;  %v348_v41 = vshrl.u32 %v737_v26, 16  ;;  %v336_v45 = vrot.slane %v334_v36, 4  ;;  %v773_v17 = vld [vmem:[%s657_s14 + $0x58] sm:$0xf] }
  0x27   : > { %v516_v42 = vmax.bf16 %v508_v28, %v494_v31  ;;  %v326_v43 = vor.u32 %v325_v32, %v322_v23  ;;  %v351_v46 = vshll.u32 %v737_v26, 16  ;;  %v222_v49 = vmax.bf16 %v205_v35, %v729_v20  ;;  %v783_v27 = vld [vmem:[%s657_s14 + $0x60] sm:$0xf]  ;;  %v189_v36 = vld [vmem:[%s657_s14 + $0x64] sm:$0x1] }
  0x28   : > { %v318_v48 = vsel %vm687_vm3, %v313_v37, %v317_v30  ;;  %v339_v50 = vrot.slane %v337_v39, 5  ;;  %v350_v51 = vrot.slane %v348_v41, 4  ;;  %v357_v55 = vshll.u32 %v181_v38, 16 }
  0x29   : > { %525 = vst.msk [vmem:[%s720_s21 + $0x4] sm:$0xf] %vm523_vm2, %v516_v42  ;;  %v327_v52 = vrot.slane %v326_v43, 4  ;;  %v495_v53 = vmax.bf16 %v318_v48, %v220_v18  ;;  %v353_v54 = vrot.slane %v351_v46, 5  ;;  %v223_v56 = vmax.bf16 %v206_v44, %v737_v26  ;;  %v796_v48 = vld [vmem:[%s657_s14 + $0x68] sm:$0xf] }
  0x2a   : > { %v340_v57 = vor.u32 %v339_v50, %v336_v45  ;;  %v345_v58 = vrot.slane %v343_v40, 5  ;;  %v362_v61 = vshrl.u32 %v749_v47, 16  ;;  %v359_v1 = vrot.slane %v357_v55, 5  ;;  %v210_v40 = vld [vmem:[%s662_s17 + $0x60] sm:$0xf] }
  0x2b   : > { %v332_v62 = vsel %vm687_vm3, %v327_v52, %v331_v33  ;;  %v509_v63 = vmax.bf16 %v495_v53, %v494_v31  ;;  %v354_v0 = vor.u32 %v353_v54, %v350_v51  ;;  %v365_v7 = vshll.u32 %v749_v47, 16  ;;  %v209_v31 = vld [vmem:[%s662_s17 + $0x58] sm:$0xf]  ;;  %v191_v53 = vld [vmem:[%s657_s14 + $0x6c] sm:$0x1] }
  0x2c   : > { %v496_v3 = vmax.bf16 %v332_v62, %v221_v22  ;;  %v341_v4 = vrot.slane %v340_v57, 4  ;;  %v364_v6 = vrot.slane %v362_v61, 4  ;;  %v371_v10 = vshll.u32 %v183_v59, 16  ;;  %v187_v22 = vld [vmem:[%s657_s14 + $0x5c] sm:$0x1] }
  0x2d   : > { %v355_v8 = vrot.slane %v354_v0, 4  ;;  %v376_v11 = vshrl.u32 %v759_v60, 16  ;;  %v379_v12 = vshll.u32 %v759_v60, 16  ;;  %v367_v15 = vrot.slane %v365_v7, 5  ;;  %v212_v7 = vld [vmem:[%s662_s17 + $0x70] sm:$0xf] }
  0x2e   : > { %v517_v13 = vmax.bf16 %v509_v63, %v496_v3  ;;  %v346_v14 = vsel %vm687_vm3, %v341_v4, %v345_v58  ;;  %v385_v16 = vshll.u32 %v185_v2, 16  ;;  %v224_v20 = vmax.bf16 %v207_v5, %v749_v47  ;;  %v192_v58 = vld [vmem:[%s657_s14 + $0x70] sm:$0xf]  ;;  %v211_v63 = vld [vmem:[%s662_s17 + $0x68] sm:$0xf] }
  0x2f   : > { %v360_v18 = vsel %vm687_vm3, %v355_v8, %v359_v1  ;;  %v497_v19 = vmax.bf16 %v346_v14, %v222_v49  ;;  %v378_v21 = vrot.slane %v376_v11, 4  ;;  %v225_v23 = vmax.bf16 %v208_v9, %v759_v60  ;;  %v193_v1 = vld [vmem:[%s657_s14 + $0x74] sm:$0x1]  ;;  %v194_v14 = vld [vmem:[%s657_s14 + $0x78] sm:$0xf] }
  0x30   : > { %526 = vst.msk [vmem:[%s720_s21 + $0x8] sm:$0xf] %vm523_vm2, %v517_v13  ;;  %v368_v24 = vor.u32 %v367_v15, %v364_v6  ;;  %v373_v25 = vrot.slane %v371_v10, 5  ;;  %v381_v26 = vrot.slane %v379_v12, 5  ;;  %v498_v28 = vmax.bf16 %v360_v18, %v223_v56 }
  0x31   : > { %v510_v29 = vmax.bf16 %v497_v19, %v496_v3  ;;  %v387_v30 = vrot.slane %v385_v16, 5  ;;  %v390_v32 = vshrl.u32 %v773_v17, 16  ;;  %v393_v37 = vshll.u32 %v773_v17, 16  ;;  %v195_v19 = vld [vmem:[%s657_s14 + $0x7c] sm:$0x1] }
  0x32   : > { %v369_v33 = vrot.slane %v368_v24, 4  ;;  %v382_v35 = vor.u32 %v381_v26, %v378_v21  ;;  %v399_v38 = vshll.u32 %v187_v22, 16  ;;  %v404_v42 = vshrl.u32 %v783_v27, 16  ;;  %v196_v24 = vld [vmem:[%s657_s14 + $0x80] sm:$0xf] }
  0x33   : > { %v518_v39 = vmax.bf16 %v510_v29, %v498_v28  ;;  %v392_v41 = vrot.slane %v390_v32, 4  ;;  %v407_v43 = vshll.u32 %v783_v27, 16  ;;  %v226_v46 = vmax.bf16 %v209_v31, %v773_v17  ;;  %v197_v31 = vld [vmem:[%s657_s14 + $0x84] sm:$0x1] }
  0x34   : > { %v374_v44 = vsel %vm687_vm3, %v369_v33, %v373_v25  ;;  %v383_v45 = vrot.slane %v382_v35, 4  ;;  %v395_v47 = vrot.slane %v393_v37, 5  ;;  %v406_v50 = vrot.slane %v404_v42, 4 }
  0x35   : > { %527 = vst.msk [vmem:[%s720_s21 + $0xc] sm:$0xf] %vm523_vm2, %v518_v39  ;;  %v499_v49 = vmax.bf16 %v374_v44, %v224_v20  ;;  %v409_v51 = vrot.slane %v407_v43, 5  ;;  %v413_v52 = vshll.u32 %v189_v36, 16  ;;  %v227_v55 = vmax.bf16 %v210_v40, %v783_v27  ;;  %v213_v40 = vld [vmem:[%s662_s17 + $0x78] sm:$0xf] }
  0x36   : > { %v388_v54 = vsel %vm687_vm3, %v383_v45, %v387_v30  ;;  %v396_v56 = vor.u32 %v395_v47, %v392_v41  ;;  %v401_v57 = vrot.slane %v399_v38, 5  ;;  %v418_v2 = vshrl.u32 %v796_v48, 16  ;;  %v214_v47 = vld [vmem:[%s662_s17 + $0x80] sm:$0xf] }
  0x37   : > { %v500_v59 = vmax.bf16 %v388_v54, %v225_v23  ;;  %v511_v60 = vmax.bf16 %v499_v49, %v498_v28  ;;  %v410_v61 = vor.u32 %v409_v51, %v406_v50  ;;  %v415_v62 = vrot.slane %v413_v52, 5 }
  0x38   : > { %v397_v0 = vrot.slane %v396_v56, 4  ;;  %v421_v3 = vshll.u32 %v796_v48, 16  ;;  %v427_v4 = vshll.u32 %v191_v53, 16  ;;  %v432_v8 = vshrl.u32 %v192_v58, 16 }
  0x39   : > { %v519_v5 = vmax.bf16 %v511_v60, %v500_v59  ;;  %v411_v6 = vrot.slane %v410_v61, 4  ;;  %v435_v9 = vshll.u32 %v192_v58, 16  ;;  %v228_v11 = vmax.bf16 %v211_v63, %v796_v48 }
  0x3a   : > { %v402_v10 = vsel %vm687_vm3, %v397_v0, %v401_v57  ;;  %v420_v12 = vrot.slane %v418_v2, 4  ;;  %v423_v13 = vrot.slane %v421_v3, 5  ;;  %v434_v17 = vrot.slane %v432_v8, 4 }
  0x3b   : > { %528 = vst.msk [vmem:[%s720_s21 + $0x10] sm:$0xf] %vm523_vm2, %v519_v5  ;;  %v416_v15 = vsel %vm687_vm3, %v411_v6, %v415_v62  ;;  %v501_v16 = vmax.bf16 %v402_v10, %v226_v46  ;;  %v437_v18 = vrot.slane %v435_v9, 5  ;;  %v229_v20 = vmax.bf16 %v212_v7, %v192_v58 }
  0x3c   : > { %v424_v21 = vor.u32 %v423_v13, %v420_v12  ;;  %v429_v22 = vrot.slane %v427_v4, 5  ;;  %v441_v23 = vshll.u32 %v193_v1, 16  ;;  %v502_v25 = vmax.bf16 %v416_v15, %v227_v55 }
  0x3d   : > { %v512_v26 = vmax.bf16 %v501_v16, %v500_v59  ;;  %v438_v27 = vor.u32 %v437_v18, %v434_v17  ;;  %v446_v28 = vshrl.u32 %v194_v14, 16  ;;  %v449_v32 = vshll.u32 %v194_v14, 16 }
  0x3e   : > { %v425_v29 = vrot.slane %v424_v21, 4  ;;  %v443_v30 = vrot.slane %v441_v23, 5  ;;  %v455_v33 = vshll.u32 %v195_v19, 16  ;;  %v460_v38 = vshrl.u32 %v196_v24, 16 }
  0x3f   : > { %v520_v35 = vmax.bf16 %v512_v26, %v502_v25  ;;  %v439_v36 = vrot.slane %v438_v27, 4  ;;  %v448_v37 = vrot.slane %v446_v28, 4  ;;  %v451_v41 = vrot.slane %v449_v32, 5 }
  0x40   : > { %v430_v39 = vsel %vm687_vm3, %v425_v29, %v429_v22  ;;  %v463_v42 = vshll.u32 %v196_v24, 16  ;;  %v462_v45 = vrot.slane %v460_v38, 4  ;;  %v469_v46 = vshll.u32 %v197_v31, 16 }
  0x41   : > { %529 = vst.msk [vmem:[%s720_s21 + $0x14] sm:$0xf] %vm523_vm2, %v520_v35  ;;  %v444_v43 = vsel %vm687_vm3, %v439_v36, %v443_v30  ;;  %v503_v44 = vmax.bf16 %v430_v39, %v228_v11  ;;  %v452_v48 = vor.u32 %v451_v41, %v448_v37  ;;  %v457_v49 = vrot.slane %v455_v33, 5 }
  0x42   : > { %v465_v50 = vrot.slane %v463_v42, 5  ;;  %v504_v51 = vmax.bf16 %v444_v43, %v229_v20  ;;  %v230_v53 = vmax.bf16 %v213_v40, %v194_v14  ;;  %v471_v56 = vrot.slane %v469_v46, 5 }
  0x43   : > { %v513_v52 = vmax.bf16 %v503_v44, %v502_v25  ;;  %v453_v54 = vrot.slane %v452_v48, 4  ;;  %v231_v58 = vmax.bf16 %v214_v47, %v196_v24 }
  0x44   : > { %v466_v55 = vor.u32 %v465_v50, %v462_v45 }
  0x45   : > { %v521_v57 = vmax.bf16 %v513_v52, %v504_v51  ;;  %v458_v59 = vsel %vm687_vm3, %v453_v54, %v457_v49 }
  0x46   : > { %v467_v60 = vrot.slane %v466_v55, 4  ;;  %v505_v61 = vmax.bf16 %v458_v59, %v230_v53 }
  0x47   : > { %530 = vst.msk [vmem:[%s720_s21 + $0x18] sm:$0xf] %vm523_vm2, %v521_v57 }
  0x48   : > { %v472_v62 = vsel %vm687_vm3, %v467_v60, %v471_v56  ;;  %v514_v0 = vmax.bf16 %v505_v61, %v504_v51 }
  0x49   : > { %v506_v63 = vmax.bf16 %v472_v62, %v231_v58 }
  0x4b   : > { %v522_v1 = vmax.bf16 %v514_v0, %v506_v63 }
  0x4d   : > { %531 = vst.msk [vmem:[%s720_s21 + $0x1c] sm:$0xf] %vm523_vm2, %v522_v1 }
  0x4e PF: > { %s12_s9 = sadd.s32 1, %s626_s9  }
  0x4f   : > { %p9_p4 = scmp.ge.s32.totalorder %s12_s9, 4  }
  0x51   :  { %11 = sbr.rel (!%p9_p4) target bundleno = 1 (0x1), region = 61 }

// kernel: custom_densenet_forward.25
= control target key start
LH: loop header
LB: loop body
LE: loop exit
PB: predicated region body
PF: predicated region fallthrough
CT: control target
= control target key end

     0   :  { %v1734_v0 = vmov 0   ;;  %vm446_vm0 = vcmask 154624   ;;  %vm543_vm1 = vcmask 1040384   ;;  %vm544_vm2 = vcmask 1041408   ;;  %s2409_s1 = inlined_call_operand.vmem [shape: bf16[147,16], index: 1, kind: input, shape index: {}]   ;;  %s2410_s0 = inlined_call_operand.vmem [shape: bf16[512,147], index: 0, kind: input, shape index: {}]   ;;  %s2411_s2 = inlined_call_operand.vmem [shape: f32[1,16], index: 2, kind: input, shape index: {}]   ;;  %s2412_s3 = inlined_call_operand.vmem [shape: f32[1,16], index: 3, kind: input, shape index: {}]   ;;  %s2413_s4 = inlined_call_operand.vmem [shape: bf16[512,16], index: 4, kind: output, shape index: {}]  }
   0x1   :  { %550 = vmatprep.subr.bf16.mxu0 %v1734_v0  ;;  %1606 = vmatprep.subr.bf16.mxu1 %v1734_v0  ;;  %v1628_v1 = vld [vmem:[%s2409_s1] sm:$0xff]   ;;  %v1629_v2 = vld [vmem:[%s2409_s1 + $0x8] sm:$0xff]   ;;  %v1630_v3 = vld [vmem:[%s2409_s1 + $0x10] sm:$0xff]   ;;  %v1735_v11 = vmov 65535   ;;  %vm1301_vm3 = vcmask 125952  }
   0x2   :  { %551 = vmatpush1.bf16.msra.mxu0 %v1628_v1  ;;  %1616 = vmatpush1.bf16.msra.mxu1 %v1628_v1  ;;  %v1631_v4 = vld [vmem:[%s2409_s1 + $0x18] sm:$0xff]   ;;  %v1640_v5 = vld [vmem:[%s2410_s0 + $0x4] ss:$8 sps:$4 sm:$0xff]   ;;  %v1634_v9 = vld [vmem:[%s2409_s1 + $0x30] sm:$0xff]   ;;  %v545_v12 = vsel %vm543_vm1, 4294967295, %v1735_v11 }
   0x3   :  { %552 = vmatprep.subr.bf16.mxu0 %v1734_v0  ;;  %1607 = vmatprep.subr.bf16.mxu1 %v1734_v0  ;;  %v1643_v6 = vld [vmem:[%s2410_s0 + $0x104] ss:$8 sps:$4 sm:$0xff]   ;;  %v1635_v10 = vld [vmem:[%s2409_s1 + $0x38] sm:$0xff]   ;;  %v1637_v14 = vld [vmem:[%s2409_s1 + $0x48] ss:$0 sps:$4 sm:$0x33]  }
   0x4   :  { %1444 = vmatprep.mubr.msk.bf16.mxu0 %vm446_vm0, %v1640_v5  ;;  %v1632_v7 = vld [vmem:[%s2409_s1 + $0x20] sm:$0xff]   ;;  %1460 = vmatprep.mubr.msk.bf16.mxu1 %vm446_vm0, %v1643_v6  ;;  %v1633_v8 = vld [vmem:[%s2409_s1 + $0x28] sm:$0xff]   ;;  %v546_v15 = vsel %vm544_vm2, %v545_v12, 0  ;;  %v1644_v19 = vld [vmem:[%s2410_s0 + $0x14] ss:$8 sps:$4 sm:$0xff]  }
   0x5   :  { %v1636_v13 = vld [vmem:[%s2409_s1 + $0x40] sm:$0xff]   ;;  %v548_v16 = vand.u32 %v1637_v14, %v546_v15  ;;  %v1646_v20 = vld [vmem:[%s2410_s0 + $0x114] ss:$8 sps:$4 sm:$0xff]   ;;  %v1648_v21 = vld [vmem:[%s2410_s0 + $0x10] ss:$8 sps:$4 sm:$0xff]  }
   0x6   :  { %553 = vmatpush1.bf16.msra.mxu0 %v1629_v2  ;;  %1617 = vmatpush1.bf16.msra.mxu1 %v1629_v2  ;;  %v1638_v17 = vld [vmem:[%s2410_s0] ss:$8 sps:$4 sm:$0xff]   ;;  %v1649_v22 = vld [vmem:[%s2410_s0 + $0x110] ss:$8 sps:$4 sm:$0xff]   ;;  %v1650_v23 = vld [vmem:[%s2410_s0 + $0x24] ss:$8 sps:$4 sm:$0xff]  }
   0x7   :  { %554 = vmatprep.subr.bf16.mxu0 %v1734_v0  ;;  %1608 = vmatprep.subr.bf16.mxu1 %v1734_v0  ;;  %v1641_v18 = vld [vmem:[%s2410_s0 + $0x100] ss:$8 sps:$4 sm:$0xff]   ;;  %v1652_v24 = vld [vmem:[%s2410_s0 + $0x124] ss:$8 sps:$4 sm:$0xff]   ;;  %v1656_v27 = vld [vmem:[%s2410_s0 + $0x34] ss:$8 sps:$4 sm:$0xff]  }
   0x8   :  { %v1654_v25 = vld [vmem:[%s2410_s0 + $0x20] ss:$8 sps:$4 sm:$0xff]   ;;  %v1658_v28 = vld [vmem:[%s2410_s0 + $0x134] ss:$8 sps:$4 sm:$0xff]   ;;  %v1660_v29 = vld [vmem:[%s2410_s0 + $0x30] ss:$8 sps:$4 sm:$0xff]  }
   0x9   :  { %v1655_v26 = vld [vmem:[%s2410_s0 + $0x120] ss:$8 sps:$4 sm:$0xff]   ;;  %v1661_v30 = vld [vmem:[%s2410_s0 + $0x130] ss:$8 sps:$4 sm:$0xff]   ;;  %v1662_v31 = vld [vmem:[%s2410_s0 + $0x44] ss:$8 sps:$4 sm:$0xff]  }
   0xa   :  { %555 = vmatpush1.bf16.msra.mxu0 %v1630_v3  ;;  %1618 = vmatpush1.bf16.msra.mxu1 %v1630_v3  ;;  %v1664_v32 = vld [vmem:[%s2410_s0 + $0x144] ss:$8 sps:$4 sm:$0xff]   ;;  %v1666_v33 = vld [vmem:[%s2410_s0 + $0x40] ss:$8 sps:$4 sm:$0xff]   ;;  %v1668_v35 = vld [vmem:[%s2410_s0 + $0x54] ss:$8 sps:$4 sm:$0xff]  }
   0xb   :  { %556 = vmatprep.subr.bf16.mxu0 %v1734_v0  ;;  %1609 = vmatprep.subr.bf16.mxu1 %v1734_v0  ;;  %v1667_v34 = vld [vmem:[%s2410_s0 + $0x140] ss:$8 sps:$4 sm:$0xff]   ;;  %v1670_v36 = vld [vmem:[%s2410_s0 + $0x154] ss:$8 sps:$4 sm:$0xff]   ;;  %v1672_v37 = vld [vmem:[%s2410_s0 + $0x50] ss:$8 sps:$4 sm:$0xff]  }
   0xc   :  { %v1673_v38 = vld [vmem:[%s2410_s0 + $0x150] ss:$8 sps:$4 sm:$0xff]   ;;  %v1674_v39 = vld [vmem:[%s2410_s0 + $0x64] ss:$8 sps:$4 sm:$0xff]   ;;  %v1678_v41 = vld [vmem:[%s2410_s0 + $0x60] ss:$8 sps:$4 sm:$0xff]  }
   0xd   :  { %v1676_v40 = vld [vmem:[%s2410_s0 + $0x164] ss:$8 sps:$4 sm:$0xff]   ;;  %v1679_v42 = vld [vmem:[%s2410_s0 + $0x160] ss:$8 sps:$4 sm:$0xff]   ;;  %v1680_v43 = vld [vmem:[%s2410_s0 + $0x74] ss:$8 sps:$4 sm:$0xff]  }
   0xe   :  { %557 = vmatpush1.bf16.msra.mxu0 %v1631_v4  ;;  %1619 = vmatpush1.bf16.msra.mxu1 %v1631_v4  ;;  %v1682_v44 = vld [vmem:[%s2410_s0 + $0x174] ss:$8 sps:$4 sm:$0xff]   ;;  %v1684_v45 = vld [vmem:[%s2410_s0 + $0x70] ss:$8 sps:$4 sm:$0xff]   ;;  %v1686_v47 = vld [vmem:[%s2410_s0 + $0x84] ss:$8 sps:$4 sm:$0xff]  }
   0xf   :  { %558 = vmatprep.subr.bf16.mxu0 %v1734_v0  ;;  %1610 = vmatprep.subr.bf16.mxu1 %v1734_v0  ;;  %v1685_v46 = vld [vmem:[%s2410_s0 + $0x170] ss:$8 sps:$4 sm:$0xff]   ;;  %v1688_v48 = vld [vmem:[%s2410_s0 + $0x184] ss:$8 sps:$4 sm:$0xff]   ;;  %v1690_v49 = vld [vmem:[%s2410_s0 + $0x80] ss:$8 sps:$4 sm:$0xff]  }
  0x10   :  { %v1691_v50 = vld [vmem:[%s2410_s0 + $0x180] ss:$8 sps:$4 sm:$0xff]   ;;  %v1692_v51 = vld [vmem:[%s2410_s0 + $0x94] ss:$8 sps:$4 sm:$0xff]   ;;  %v1696_v53 = vld [vmem:[%s2410_s0 + $0x90] ss:$8 sps:$4 sm:$0xff]  }
  0x11   :  { %v1694_v52 = vld [vmem:[%s2410_s0 + $0x194] ss:$8 sps:$4 sm:$0xff]   ;;  %v1697_v54 = vld [vmem:[%s2410_s0 + $0x190] ss:$8 sps:$4 sm:$0xff]   ;;  %v1698_v55 = vld [vmem:[%s2410_s0 + $0xa4] ss:$8 sps:$4 sm:$0xff]  }
  0x12   :  { %559 = vmatpush1.bf16.msra.mxu0 %v1632_v7  ;;  %1620 = vmatpush1.bf16.msra.mxu1 %v1632_v7  ;;  %v1700_v56 = vld [vmem:[%s2410_s0 + $0x1a4] ss:$8 sps:$4 sm:$0xff]   ;;  %v1702_v57 = vld [vmem:[%s2410_s0 + $0xa0] ss:$8 sps:$4 sm:$0xff]   ;;  %v1704_v59 = vld [vmem:[%s2410_s0 + $0xb4] ss:$8 sps:$4 sm:$0xff]  }
  0x13   :  { %560 = vmatprep.subr.bf16.mxu0 %v1734_v0  ;;  %1611 = vmatprep.subr.bf16.mxu1 %v1734_v0  ;;  %v1703_v58 = vld [vmem:[%s2410_s0 + $0x1a0] ss:$8 sps:$4 sm:$0xff]   ;;  %v1706_v60 = vld [vmem:[%s2410_s0 + $0x1b4] ss:$8 sps:$4 sm:$0xff]   ;;  %v1708_v61 = vld [vmem:[%s2410_s0 + $0xb0] ss:$8 sps:$4 sm:$0xff]  }
  0x14   :  { %v1709_v62 = vld [vmem:[%s2410_s0 + $0x1b0] ss:$8 sps:$4 sm:$0xff]   ;;  %v1710_v63 = vld [vmem:[%s2410_s0 + $0xc4] ss:$8 sps:$4 sm:$0xff]   ;;  %v1714_v1 = vld [vmem:[%s2410_s0 + $0xc0] ss:$8 sps:$4 sm:$0xff]  }
  0x15   :  { %v1715_v2 = vld [vmem:[%s2410_s0 + $0x1c0] ss:$8 sps:$4 sm:$0xff]   ;;  %v1716_v3 = vld [vmem:[%s2410_s0 + $0xd4] ss:$8 sps:$4 sm:$0xff]   ;;  %v1720_v5 = vld [vmem:[%s2410_s0 + $0xd0] ss:$8 sps:$4 sm:$0xff]  }
  0x16   :  { %561 = vmatpush1.bf16.msra.mxu0 %v1633_v8  ;;  %1621 = vmatpush1.bf16.msra.mxu1 %v1633_v8  ;;  %v1718_v4 = vld [vmem:[%s2410_s0 + $0x1d4] ss:$8 sps:$4 sm:$0xff]   ;;  %v1721_v6 = vld [vmem:[%s2410_s0 + $0x1d0] ss:$8 sps:$4 sm:$0xff]   ;;  %v1722_v7 = vld [vmem:[%s2410_s0 + $0xe4] ss:$8 sps:$4 sm:$0xff]  }
  0x17   :  { %562 = vmatprep.subr.bf16.mxu0 %v1734_v0  ;;  %1612 = vmatprep.subr.bf16.mxu1 %v1734_v0  ;;  %v1724_v8 = vld [vmem:[%s2410_s0 + $0x1e4] ss:$8 sps:$4 sm:$0xff]   ;;  %v1728_v11 = vld [vmem:[%s2410_s0 + $0xf4] ss:$8 sps:$4 sm:$0xff]   ;;  %v1733_v14 = vld [vmem:[%s2410_s0 + $0x1f0] ss:$8 sps:$4 sm:$0xff]  }
  0x18   :  { %v1730_v12 = vld [vmem:[%s2410_s0 + $0x1f4] ss:$8 sps:$4 sm:$0xff]   ;;  %v2018_v15 = vld [vmem:[%s2411_s2] ss:$0 sm:$0xff] }
  0x1a   :  { %563 = vmatpush1.bf16.msra.mxu0 %v1634_v9  ;;  %1622 = vmatpush1.bf16.msra.mxu1 %v1634_v9  ;;  %v1726_v9 = vld [vmem:[%s2410_s0 + $0xe0] ss:$8 sps:$4 sm:$0xff]  }
  0x1b   :  { %564 = vmatprep.subr.bf16.mxu0 %v1734_v0  ;;  %1613 = vmatprep.subr.bf16.mxu1 %v1734_v0 }
  0x1e   :  { %565 = vmatpush1.bf16.msra.mxu0 %v1635_v10  ;;  %1623 = vmatpush1.bf16.msra.mxu1 %v1635_v10  ;;  %v1727_v10 = vld [vmem:[%s2410_s0 + $0x1e0] ss:$8 sps:$4 sm:$0xff]  }
  0x1f   :  { %566 = vmatprep.subr.bf16.mxu0 %v1734_v0  ;;  %1614 = vmatprep.subr.bf16.mxu1 %v1734_v0 }
  0x22   :  { %567 = vmatpush1.bf16.msra.mxu0 %v1636_v13  ;;  %1624 = vmatpush1.bf16.msra.mxu1 %v1636_v13  ;;  %v1732_v13 = vld [vmem:[%s2410_s0 + $0xf0] ss:$8 sps:$4 sm:$0xff]  }
  0x23   :  { %568 = vmatprep.subr.bf16.mxu0 %v1734_v0  ;;  %1615 = vmatprep.subr.bf16.mxu1 %v1734_v0  ;;  %v1712_v0 = vld [vmem:[%s2410_s0 + $0x1c4] ss:$8 sps:$4 sm:$0xff]  }
  0x26   :  { %569 = vmatpush1.bf16.msra.mxu0 %v548_v16  ;;  %1625 = vmatpush1.bf16.msra.mxu1 %v548_v16 }
  0x29   :  { %583 = vmatmul.mubr.bf16.vlgmr.msra.gmra.mrb[0].mxu0 %v1638_v17  ;;  %711 = vmatmul.mubr.bf16.vlgmr.msra.gmra.mrb[0].mxu1 %v1641_v18  ;;  %v2023_v17 = vld [vmem:[%s2412_s3] ss:$0 sm:$0xff] }
  0x2a   :  { %1445 = vmatprep.mubr.msk.bf16.mxu0 %vm446_vm0, %v1644_v19  ;;  %1461 = vmatprep.mubr.msk.bf16.mxu1 %vm446_vm0, %v1646_v20 }
  0x31   :  { %591 = vmatmul.mubr.bf16.gmra.mrb[4].mxu0 %v1648_v21  ;;  %719 = vmatmul.mubr.bf16.gmra.mrb[4].mxu1 %v1649_v22 }
  0x32   :  { %1446 = vmatprep.mubr.msk.bf16.mxu0 %vm446_vm0, %v1650_v23  ;;  %1462 = vmatprep.mubr.msk.bf16.mxu1 %vm446_vm0, %v1652_v24 }
  0x39   :  { %599 = vmatmul.mubr.bf16.gmra.mrb[8].mxu0 %v1654_v25  ;;  %727 = vmatmul.mubr.bf16.gmra.mrb[8].mxu1 %v1655_v26 }
  0x3a   :  { %1447 = vmatprep.mubr.msk.bf16.mxu0 %vm446_vm0, %v1656_v27  ;;  %1463 = vmatprep.mubr.msk.bf16.mxu1 %vm446_vm0, %v1658_v28 }
  0x41   :  { %607 = vmatmul.mubr.bf16.gmra.mrb[12].mxu0 %v1660_v29  ;;  %735 = vmatmul.mubr.bf16.gmra.mrb[12].mxu1 %v1661_v30 }
  0x42   :  { %1448 = vmatprep.mubr.msk.bf16.mxu0 %vm446_vm0, %v1662_v31  ;;  %1464 = vmatprep.mubr.msk.bf16.mxu1 %vm446_vm0, %v1664_v32 }
  0x49   :  { %615 = vmatmul.mubr.bf16.gmra.mrb[16].mxu0 %v1666_v33  ;;  %743 = vmatmul.mubr.bf16.gmra.mrb[16].mxu1 %v1667_v34 }
  0x4a   :  { %1449 = vmatprep.mubr.msk.bf16.mxu0 %vm446_vm0, %v1668_v35  ;;  %1465 = vmatprep.mubr.msk.bf16.mxu1 %vm446_vm0, %v1670_v36 }
  0x51   :  { %623 = vmatmul.mubr.bf16.gmra.mrb[20].mxu0 %v1672_v37  ;;  %751 = vmatmul.mubr.bf16.gmra.mrb[20].mxu1 %v1673_v38 }
  0x52   :  { %1450 = vmatprep.mubr.msk.bf16.mxu0 %vm446_vm0, %v1674_v39  ;;  %1466 = vmatprep.mubr.msk.bf16.mxu1 %vm446_vm0, %v1676_v40 }
  0x59   :  { %631 = vmatmul.mubr.bf16.gmra.mrb[24].mxu0 %v1678_v41  ;;  %759 = vmatmul.mubr.bf16.gmra.mrb[24].mxu1 %v1679_v42 }
  0x5a   :  { %1451 = vmatprep.mubr.msk.bf16.mxu0 %vm446_vm0, %v1680_v43  ;;  %1467 = vmatprep.mubr.msk.bf16.mxu1 %vm446_vm0, %v1682_v44 }
  0x61   :  { %639 = vmatmul.mubr.bf16.gmra.mrb[28].mxu0 %v1684_v45  ;;  %767 = vmatmul.mubr.bf16.gmra.mrb[28].mxu1 %v1685_v46 }
  0x62   :  { %1452 = vmatprep.mubr.msk.bf16.mxu0 %vm446_vm0, %v1686_v47  ;;  %1468 = vmatprep.mubr.msk.bf16.mxu1 %vm446_vm0, %v1688_v48 }
  0x69   :  { %647 = vmatmul.mubr.bf16.gmra.mrb[32].mxu0 %v1690_v49  ;;  %775 = vmatmul.mubr.bf16.gmra.mrb[32].mxu1 %v1691_v50 }
  0x6a   :  { %1453 = vmatprep.mubr.msk.bf16.mxu0 %vm446_vm0, %v1692_v51  ;;  %1469 = vmatprep.mubr.msk.bf16.mxu1 %vm446_vm0, %v1694_v52 }
  0x71   :  { %655 = vmatmul.mubr.bf16.gmra.mrb[36].mxu0 %v1696_v53  ;;  %783 = vmatmul.mubr.bf16.gmra.mrb[36].mxu1 %v1697_v54 }
  0x72   :  { %1454 = vmatprep.mubr.msk.bf16.mxu0 %vm446_vm0, %v1698_v55  ;;  %1470 = vmatprep.mubr.msk.bf16.mxu1 %vm446_vm0, %v1700_v56 }
  0x79   :  { %663 = vmatmul.mubr.bf16.gmra.mrb[40].mxu0 %v1702_v57  ;;  %791 = vmatmul.mubr.bf16.gmra.mrb[40].mxu1 %v1703_v58 }
  0x7a   :  { %1455 = vmatprep.mubr.msk.bf16.mxu0 %vm446_vm0, %v1704_v59  ;;  %1471 = vmatprep.mubr.msk.bf16.mxu1 %vm446_vm0, %v1706_v60 }
  0x81   :  { %671 = vmatmul.mubr.bf16.gmra.mrb[44].mxu0 %v1708_v61  ;;  %799 = vmatmul.mubr.bf16.gmra.mrb[44].mxu1 %v1709_v62 }
  0x82   :  { %1456 = vmatprep.mubr.msk.bf16.mxu0 %vm446_vm0, %v1710_v63  ;;  %1472 = vmatprep.mubr.msk.bf16.mxu1 %vm446_vm0, %v1712_v0 }
  0x89   :  { %679 = vmatmul.mubr.bf16.gmra.mrb[48].mxu0 %v1714_v1  ;;  %807 = vmatmul.mubr.bf16.gmra.mrb[48].mxu1 %v1715_v2 }
  0x8a   :  { %1457 = vmatprep.mubr.msk.bf16.mxu0 %vm446_vm0, %v1716_v3  ;;  %1473 = vmatprep.mubr.msk.bf16.mxu1 %vm446_vm0, %v1718_v4 }
  0x91   :  { %687 = vmatmul.mubr.bf16.gmra.mrb[52].mxu0 %v1720_v5  ;;  %815 = vmatmul.mubr.bf16.gmra.mrb[52].mxu1 %v1721_v6 }
  0x92   :  { %1458 = vmatprep.mubr.msk.bf16.mxu0 %vm446_vm0, %v1722_v7  ;;  %1474 = vmatprep.mubr.msk.bf16.mxu1 %vm446_vm0, %v1724_v8 }
  0x99   :  { %695 = vmatmul.mubr.bf16.gmra.mrb[56].mxu0 %v1726_v9  ;;  %823 = vmatmul.mubr.bf16.gmra.mrb[56].mxu1 %v1727_v10 }
  0x9a   :  { %1459 = vmatprep.mubr.msk.bf16.mxu0 %vm446_vm0, %v1728_v11  ;;  %1475 = vmatprep.mubr.msk.bf16.mxu1 %vm446_vm0, %v1730_v12 }
  0xa1   :  { %703 = vmatmul.mubr.bf16.gmra.mrb[60].mxu0 %v1732_v13  ;;  %831 = vmatmul.mubr.bf16.gmra.mrb[60].mxu1 %v1733_v14 }
  0xfc   :  { %v584_v16 = vpop.f32.mrb[0].mxu0  ;;  %v712_v18 = vpop.f32.mrb[0].mxu1 }
  0xfd   :  { %v846_v19 = vmul.f32 %v2018_v15, %v584_v16  ;;  %v878_v20 = vmul.f32 %v2018_v15, %v712_v18  ;;  %v586_v21 = vpop.f32.mrb[1].mxu0  ;;  %v714_v22 = vpop.f32.mrb[1].mxu1 }
  0xfe   :  { %v587_v23 = vpop.f32.mrb[2].mxu0  ;;  %v715_v24 = vpop.f32.mrb[2].mxu1 }
  0xff   :  { %v917_v25 = vadd.f32 %v2023_v17, %v846_v19  ;;  %v949_v26 = vadd.f32 %v2023_v17, %v878_v20  ;;  %v847_v27 = vmul.f32 %v2018_v15, %v587_v23  ;;  %v879_v28 = vmul.f32 %v2018_v15, %v715_v24  ;;  %v589_v29 = vpop.f32.mrb[3].mxu0  ;;  %v717_v30 = vpop.f32.mrb[3].mxu1 }
 0x101   :  { %v981_v31 = vmax.f32 %v917_v25, 0.0  ;;  %v1013_v32 = vmax.f32 %v949_v26, 0.0  ;;  %v918_v33 = vadd.f32 %v2023_v17, %v847_v27  ;;  %v950_v34 = vadd.f32 %v2023_v17, %v879_v28 }
 0x103   :  { %v1542_v35 = vpack.c.bf16 %v981_v31, %v981_v31  ;;  %v1574_v36 = vpack.c.bf16 %v1013_v32, %v1013_v32  ;;  %v982_v37 = vmax.f32 %v918_v33, 0.0  ;;  %v1014_v38 = vmax.f32 %v950_v34, 0.0 }
 0x104   :  { %v592_v39 = vpop.f32.mrb[4].mxu0  ;;  %v720_v40 = vpop.f32.mrb[4].mxu1 }
 0x105   :  { %1302 = vst.msk [vmem:[%s2413_s4] sm:$0xf] %vm1301_vm3, %v1542_v35  ;;  %1334 = vst.msk [vmem:[%s2413_s4 + $0x80] sm:$0xf] %vm1301_vm3, %v1574_v36  ;;  %v1543_v41 = vpack.c.bf16 %v982_v37, %v982_v37  ;;  %v1575_v42 = vpack.c.bf16 %v1014_v38, %v1014_v38  ;;  %v848_v43 = vmul.f32 %v2018_v15, %v592_v39  ;;  %v594_v45 = vpop.f32.mrb[5].mxu0  ;;  %v722_v46 = vpop.f32.mrb[5].mxu1 }
 0x106   :  { %v880_v44 = vmul.f32 %v2018_v15, %v720_v40  ;;  %v595_v47 = vpop.f32.mrb[6].mxu0  ;;  %v723_v48 = vpop.f32.mrb[6].mxu1 }
 0x107   :  { %1303 = vst.msk [vmem:[%s2413_s4 + $0x4] sm:$0xf] %vm1301_vm3, %v1543_v41  ;;  %1335 = vst.msk [vmem:[%s2413_s4 + $0x84] sm:$0xf] %vm1301_vm3, %v1575_v42  ;;  %v919_v49 = vadd.f32 %v2023_v17, %v848_v43  ;;  %v849_v51 = vmul.f32 %v2018_v15, %v595_v47  ;;  %v881_v52 = vmul.f32 %v2018_v15, %v723_v48  ;;  %v597_v53 = vpop.f32.mrb[7].mxu0  ;;  %v725_v54 = vpop.f32.mrb[7].mxu1 }
 0x108   :  { %v951_v50 = vadd.f32 %v2023_v17, %v880_v44 }
 0x109   :  { %v983_v55 = vmax.f32 %v919_v49, 0.0  ;;  %v920_v57 = vadd.f32 %v2023_v17, %v849_v51  ;;  %v952_v58 = vadd.f32 %v2023_v17, %v881_v52 }
 0x10a   :  { %v1015_v56 = vmax.f32 %v951_v50, 0.0 }
 0x10b   :  { %v1544_v59 = vpack.c.bf16 %v983_v55, %v983_v55  ;;  %v984_v61 = vmax.f32 %v920_v57, 0.0  ;;  %v1016_v62 = vmax.f32 %v952_v58, 0.0 }
 0x10c   :  { %v1576_v60 = vpack.c.bf16 %v1015_v56, %v1015_v56  ;;  %v600_v63 = vpop.f32.mrb[8].mxu0  ;;  %v728_v0 = vpop.f32.mrb[8].mxu1 }
 0x10d   :  { %1304 = vst.msk [vmem:[%s2413_s4 + $0x8] sm:$0xf] %vm1301_vm3, %v1544_v59  ;;  %v1545_v1 = vpack.c.bf16 %v984_v61, %v984_v61  ;;  %v1577_v2 = vpack.c.bf16 %v1016_v62, %v1016_v62  ;;  %v850_v3 = vmul.f32 %v2018_v15, %v600_v63  ;;  %v882_v4 = vmul.f32 %v2018_v15, %v728_v0  ;;  %v602_v5 = vpop.f32.mrb[9].mxu0  ;;  %v730_v6 = vpop.f32.mrb[9].mxu1 }
 0x10e   :  { %1336 = vst.msk [vmem:[%s2413_s4 + $0x88] sm:$0xf] %vm1301_vm3, %v1576_v60  ;;  %v603_v7 = vpop.f32.mrb[10].mxu0  ;;  %v731_v8 = vpop.f32.mrb[10].mxu1 }
 0x10f   :  { %1305 = vst.msk [vmem:[%s2413_s4 + $0xc] sm:$0xf] %vm1301_vm3, %v1545_v1  ;;  %1337 = vst.msk [vmem:[%s2413_s4 + $0x8c] sm:$0xf] %vm1301_vm3, %v1577_v2  ;;  %v921_v9 = vadd.f32 %v2023_v17, %v850_v3  ;;  %v953_v10 = vadd.f32 %v2023_v17, %v882_v4  ;;  %v851_v11 = vmul.f32 %v2018_v15, %v603_v7  ;;  %v605_v13 = vpop.f32.mrb[11].mxu0  ;;  %v733_v14 = vpop.f32.mrb[11].mxu1 }
 0x110   :  { %v883_v12 = vmul.f32 %v2018_v15, %v731_v8 }
 0x111   :  { %v985_v16 = vmax.f32 %v921_v9, 0.0  ;;  %v1017_v18 = vmax.f32 %v953_v10, 0.0  ;;  %v922_v19 = vadd.f32 %v2023_v17, %v851_v11 }
 0x112   :  { %v954_v20 = vadd.f32 %v2023_v17, %v883_v12 }
 0x113   :  { %v1546_v21 = vpack.c.bf16 %v985_v16, %v985_v16  ;;  %v1578_v22 = vpack.c.bf16 %v1017_v18, %v1017_v18  ;;  %v986_v23 = vmax.f32 %v922_v19, 0.0 }
 0x114   :  { %v1018_v24 = vmax.f32 %v954_v20, 0.0  ;;  %v608_v25 = vpop.f32.mrb[12].mxu0  ;;  %v736_v26 = vpop.f32.mrb[12].mxu1 }
 0x115   :  { %1306 = vst.msk [vmem:[%s2413_s4 + $0x10] sm:$0xf] %vm1301_vm3, %v1546_v21  ;;  %1338 = vst.msk [vmem:[%s2413_s4 + $0x90] sm:$0xf] %vm1301_vm3, %v1578_v22  ;;  %v1547_v27 = vpack.c.bf16 %v986_v23, %v986_v23  ;;  %v852_v29 = vmul.f32 %v2018_v15, %v608_v25  ;;  %v884_v30 = vmul.f32 %v2018_v15, %v736_v26  ;;  %v610_v31 = vpop.f32.mrb[13].mxu0  ;;  %v738_v32 = vpop.f32.mrb[13].mxu1 }
 0x116   :  { %v1579_v28 = vpack.c.bf16 %v1018_v24, %v1018_v24  ;;  %v611_v33 = vpop.f32.mrb[14].mxu0  ;;  %v739_v34 = vpop.f32.mrb[14].mxu1 }
 0x117   :  { %1307 = vst.msk [vmem:[%s2413_s4 + $0x14] sm:$0xf] %vm1301_vm3, %v1547_v27  ;;  %v923_v35 = vadd.f32 %v2023_v17, %v852_v29  ;;  %v955_v36 = vadd.f32 %v2023_v17, %v884_v30  ;;  %v853_v37 = vmul.f32 %v2018_v15, %v611_v33  ;;  %v885_v38 = vmul.f32 %v2018_v15, %v739_v34  ;;  %v613_v39 = vpop.f32.mrb[15].mxu0  ;;  %v741_v40 = vpop.f32.mrb[15].mxu1 }
 0x118   :  { %1339 = vst.msk [vmem:[%s2413_s4 + $0x94] sm:$0xf] %vm1301_vm3, %v1579_v28 }
 0x119   :  { %v987_v41 = vmax.f32 %v923_v35, 0.0  ;;  %v1019_v42 = vmax.f32 %v955_v36, 0.0  ;;  %v924_v43 = vadd.f32 %v2023_v17, %v853_v37  ;;  %v956_v44 = vadd.f32 %v2023_v17, %v885_v38 }
 0x11b   :  { %v1548_v45 = vpack.c.bf16 %v987_v41, %v987_v41  ;;  %v1580_v46 = vpack.c.bf16 %v1019_v42, %v1019_v42  ;;  %v988_v47 = vmax.f32 %v924_v43, 0.0  ;;  %v1020_v48 = vmax.f32 %v956_v44, 0.0 }
 0x11c   :  { %v616_v49 = vpop.f32.mrb[16].mxu0  ;;  %v744_v50 = vpop.f32.mrb[16].mxu1 }
 0x11d   :  { %1308 = vst.msk [vmem:[%s2413_s4 + $0x18] sm:$0xf] %vm1301_vm3, %v1548_v45  ;;  %1340 = vst.msk [vmem:[%s2413_s4 + $0x98] sm:$0xf] %vm1301_vm3, %v1580_v46  ;;  %v1549_v51 = vpack.c.bf16 %v988_v47, %v988_v47  ;;  %v1581_v52 = vpack.c.bf16 %v1020_v48, %v1020_v48  ;;  %v854_v53 = vmul.f32 %v2018_v15, %v616_v49  ;;  %v618_v55 = vpop.f32.mrb[17].mxu0  ;;  %v746_v56 = vpop.f32.mrb[17].mxu1 }
 0x11e   :  { %v886_v54 = vmul.f32 %v2018_v15, %v744_v50  ;;  %v619_v57 = vpop.f32.mrb[18].mxu0  ;;  %v747_v58 = vpop.f32.mrb[18].mxu1 }
 0x11f   :  { %1309 = vst.msk [vmem:[%s2413_s4 + $0x1c] sm:$0xf] %vm1301_vm3, %v1549_v51  ;;  %1341 = vst.msk [vmem:[%s2413_s4 + $0x9c] sm:$0xf] %vm1301_vm3, %v1581_v52  ;;  %v925_v59 = vadd.f32 %v2023_v17, %v854_v53  ;;  %v855_v61 = vmul.f32 %v2018_v15, %v619_v57  ;;  %v887_v62 = vmul.f32 %v2018_v15, %v747_v58  ;;  %v621_v63 = vpop.f32.mrb[19].mxu0  ;;  %v749_v0 = vpop.f32.mrb[19].mxu1 }
 0x120   :  { %v957_v60 = vadd.f32 %v2023_v17, %v886_v54 }
 0x121   :  { %v989_v1 = vmax.f32 %v925_v59, 0.0  ;;  %v926_v3 = vadd.f32 %v2023_v17, %v855_v61  ;;  %v958_v4 = vadd.f32 %v2023_v17, %v887_v62 }
 0x122   :  { %v1021_v2 = vmax.f32 %v957_v60, 0.0 }
 0x123   :  { %v1550_v5 = vpack.c.bf16 %v989_v1, %v989_v1  ;;  %v990_v7 = vmax.f32 %v926_v3, 0.0  ;;  %v1022_v8 = vmax.f32 %v958_v4, 0.0 }
 0x124   :  { %v1582_v6 = vpack.c.bf16 %v1021_v2, %v1021_v2  ;;  %v624_v9 = vpop.f32.mrb[20].mxu0  ;;  %v752_v10 = vpop.f32.mrb[20].mxu1 }
 0x125   :  { %1310 = vst.msk [vmem:[%s2413_s4 + $0x20] sm:$0xf] %vm1301_vm3, %v1550_v5  ;;  %v1551_v11 = vpack.c.bf16 %v990_v7, %v990_v7  ;;  %v1583_v12 = vpack.c.bf16 %v1022_v8, %v1022_v8  ;;  %v856_v13 = vmul.f32 %v2018_v15, %v624_v9  ;;  %v888_v14 = vmul.f32 %v2018_v15, %v752_v10  ;;  %v626_v16 = vpop.f32.mrb[21].mxu0  ;;  %v754_v18 = vpop.f32.mrb[21].mxu1 }
 0x126   :  { %1342 = vst.msk [vmem:[%s2413_s4 + $0xa0] sm:$0xf] %vm1301_vm3, %v1582_v6  ;;  %v627_v19 = vpop.f32.mrb[22].mxu0  ;;  %v755_v20 = vpop.f32.mrb[22].mxu1 }
 0x127   :  { %1311 = vst.msk [vmem:[%s2413_s4 + $0x24] sm:$0xf] %vm1301_vm3, %v1551_v11  ;;  %1343 = vst.msk [vmem:[%s2413_s4 + $0xa4] sm:$0xf] %vm1301_vm3, %v1583_v12  ;;  %v927_v21 = vadd.f32 %v2023_v17, %v856_v13  ;;  %v959_v22 = vadd.f32 %v2023_v17, %v888_v14  ;;  %v857_v23 = vmul.f32 %v2018_v15, %v627_v19  ;;  %v629_v25 = vpop.f32.mrb[23].mxu0  ;;  %v757_v26 = vpop.f32.mrb[23].mxu1 }
 0x128   :  { %v889_v24 = vmul.f32 %v2018_v15, %v755_v20 }
 0x129   :  { %v991_v27 = vmax.f32 %v927_v21, 0.0  ;;  %v1023_v28 = vmax.f32 %v959_v22, 0.0  ;;  %v928_v29 = vadd.f32 %v2023_v17, %v857_v23 }
 0x12a   :  { %v960_v30 = vadd.f32 %v2023_v17, %v889_v24 }
 0x12b   :  { %v1552_v31 = vpack.c.bf16 %v991_v27, %v991_v27  ;;  %v1584_v32 = vpack.c.bf16 %v1023_v28, %v1023_v28  ;;  %v992_v33 = vmax.f32 %v928_v29, 0.0 }
 0x12c   :  { %v1024_v34 = vmax.f32 %v960_v30, 0.0  ;;  %v632_v35 = vpop.f32.mrb[24].mxu0  ;;  %v760_v36 = vpop.f32.mrb[24].mxu1 }
 0x12d   :  { %1312 = vst.msk [vmem:[%s2413_s4 + $0x28] sm:$0xf] %vm1301_vm3, %v1552_v31  ;;  %1344 = vst.msk [vmem:[%s2413_s4 + $0xa8] sm:$0xf] %vm1301_vm3, %v1584_v32  ;;  %v1553_v37 = vpack.c.bf16 %v992_v33, %v992_v33  ;;  %v858_v39 = vmul.f32 %v2018_v15, %v632_v35  ;;  %v890_v40 = vmul.f32 %v2018_v15, %v760_v36  ;;  %v634_v41 = vpop.f32.mrb[25].mxu0  ;;  %v762_v42 = vpop.f32.mrb[25].mxu1 }
 0x12e   :  { %v1585_v38 = vpack.c.bf16 %v1024_v34, %v1024_v34  ;;  %v635_v43 = vpop.f32.mrb[26].mxu0  ;;  %v763_v44 = vpop.f32.mrb[26].mxu1 }
 0x12f   :  { %1313 = vst.msk [vmem:[%s2413_s4 + $0x2c] sm:$0xf] %vm1301_vm3, %v1553_v37  ;;  %v929_v45 = vadd.f32 %v2023_v17, %v858_v39  ;;  %v961_v46 = vadd.f32 %v2023_v17, %v890_v40  ;;  %v859_v47 = vmul.f32 %v2018_v15, %v635_v43  ;;  %v891_v48 = vmul.f32 %v2018_v15, %v763_v44  ;;  %v637_v49 = vpop.f32.mrb[27].mxu0  ;;  %v765_v50 = vpop.f32.mrb[27].mxu1 }
 0x130   :  { %1345 = vst.msk [vmem:[%s2413_s4 + $0xac] sm:$0xf] %vm1301_vm3, %v1585_v38 }
 0x131   :  { %v993_v51 = vmax.f32 %v929_v45, 0.0  ;;  %v1025_v52 = vmax.f32 %v961_v46, 0.0  ;;  %v930_v53 = vadd.f32 %v2023_v17, %v859_v47  ;;  %v962_v54 = vadd.f32 %v2023_v17, %v891_v48 }
 0x133   :  { %v1554_v55 = vpack.c.bf16 %v993_v51, %v993_v51  ;;  %v1586_v56 = vpack.c.bf16 %v1025_v52, %v1025_v52  ;;  %v994_v57 = vmax.f32 %v930_v53, 0.0  ;;  %v1026_v58 = vmax.f32 %v962_v54, 0.0 }
 0x134   :  { %v640_v59 = vpop.f32.mrb[28].mxu0  ;;  %v768_v60 = vpop.f32.mrb[28].mxu1 }
 0x135   :  { %1314 = vst.msk [vmem:[%s2413_s4 + $0x30] sm:$0xf] %vm1301_vm3, %v1554_v55  ;;  %1346 = vst.msk [vmem:[%s2413_s4 + $0xb0] sm:$0xf] %vm1301_vm3, %v1586_v56  ;;  %v1555_v61 = vpack.c.bf16 %v994_v57, %v994_v57  ;;  %v1587_v62 = vpack.c.bf16 %v1026_v58, %v1026_v58  ;;  %v860_v63 = vmul.f32 %v2018_v15, %v640_v59  ;;  %v642_v1 = vpop.f32.mrb[29].mxu0  ;;  %v770_v2 = vpop.f32.mrb[29].mxu1 }
 0x136   :  { %v892_v0 = vmul.f32 %v2018_v15, %v768_v60  ;;  %v643_v3 = vpop.f32.mrb[30].mxu0  ;;  %v771_v4 = vpop.f32.mrb[30].mxu1 }
 0x137   :  { %1315 = vst.msk [vmem:[%s2413_s4 + $0x34] sm:$0xf] %vm1301_vm3, %v1555_v61  ;;  %1347 = vst.msk [vmem:[%s2413_s4 + $0xb4] sm:$0xf] %vm1301_vm3, %v1587_v62  ;;  %v931_v5 = vadd.f32 %v2023_v17, %v860_v63  ;;  %v861_v7 = vmul.f32 %v2018_v15, %v643_v3  ;;  %v893_v8 = vmul.f32 %v2018_v15, %v771_v4  ;;  %v645_v9 = vpop.f32.mrb[31].mxu0  ;;  %v773_v10 = vpop.f32.mrb[31].mxu1 }
 0x138   :  { %v963_v6 = vadd.f32 %v2023_v17, %v892_v0 }
 0x139   :  { %v995_v11 = vmax.f32 %v931_v5, 0.0  ;;  %v932_v13 = vadd.f32 %v2023_v17, %v861_v7  ;;  %v964_v14 = vadd.f32 %v2023_v17, %v893_v8 }
 0x13a   :  { %v1027_v12 = vmax.f32 %v963_v6, 0.0 }
 0x13b   :  { %v1556_v16 = vpack.c.bf16 %v995_v11, %v995_v11  ;;  %v996_v19 = vmax.f32 %v932_v13, 0.0  ;;  %v1028_v20 = vmax.f32 %v964_v14, 0.0 }
 0x13c   :  { %v1588_v18 = vpack.c.bf16 %v1027_v12, %v1027_v12  ;;  %v648_v21 = vpop.f32.mrb[32].mxu0  ;;  %v776_v22 = vpop.f32.mrb[32].mxu1 }
 0x13d   :  { %1316 = vst.msk [vmem:[%s2413_s4 + $0x38] sm:$0xf] %vm1301_vm3, %v1556_v16  ;;  %v1557_v23 = vpack.c.bf16 %v996_v19, %v996_v19  ;;  %v1589_v24 = vpack.c.bf16 %v1028_v20, %v1028_v20  ;;  %v862_v25 = vmul.f32 %v2018_v15, %v648_v21  ;;  %v894_v26 = vmul.f32 %v2018_v15, %v776_v22  ;;  %v650_v27 = vpop.f32.mrb[33].mxu0  ;;  %v778_v28 = vpop.f32.mrb[33].mxu1 }
 0x13e   :  { %1348 = vst.msk [vmem:[%s2413_s4 + $0xb8] sm:$0xf] %vm1301_vm3, %v1588_v18  ;;  %v651_v29 = vpop.f32.mrb[34].mxu0  ;;  %v779_v30 = vpop.f32.mrb[34].mxu1 }
 0x13f   :  { %1317 = vst.msk [vmem:[%s2413_s4 + $0x3c] sm:$0xf] %vm1301_vm3, %v1557_v23  ;;  %1349 = vst.msk [vmem:[%s2413_s4 + $0xbc] sm:$0xf] %vm1301_vm3, %v1589_v24  ;;  %v933_v31 = vadd.f32 %v2023_v17, %v862_v25  ;;  %v965_v32 = vadd.f32 %v2023_v17, %v894_v26  ;;  %v863_v33 = vmul.f32 %v2018_v15, %v651_v29  ;;  %v653_v35 = vpop.f32.mrb[35].mxu0  ;;  %v781_v36 = vpop.f32.mrb[35].mxu1 }
 0x140   :  { %v895_v34 = vmul.f32 %v2018_v15, %v779_v30 }
 0x141   :  { %v997_v37 = vmax.f32 %v933_v31, 0.0  ;;  %v1029_v38 = vmax.f32 %v965_v32, 0.0  ;;  %v934_v39 = vadd.f32 %v2023_v17, %v863_v33 }
 0x142   :  { %v966_v40 = vadd.f32 %v2023_v17, %v895_v34 }
 0x143   :  { %v1558_v41 = vpack.c.bf16 %v997_v37, %v997_v37  ;;  %v1590_v42 = vpack.c.bf16 %v1029_v38, %v1029_v38  ;;  %v998_v43 = vmax.f32 %v934_v39, 0.0 }
 0x144   :  { %v1030_v44 = vmax.f32 %v966_v40, 0.0  ;;  %v656_v45 = vpop.f32.mrb[36].mxu0  ;;  %v784_v46 = vpop.f32.mrb[36].mxu1 }
 0x145   :  { %1318 = vst.msk [vmem:[%s2413_s4 + $0x40] sm:$0xf] %vm1301_vm3, %v1558_v41  ;;  %1350 = vst.msk [vmem:[%s2413_s4 + $0xc0] sm:$0xf] %vm1301_vm3, %v1590_v42  ;;  %v1559_v47 = vpack.c.bf16 %v998_v43, %v998_v43  ;;  %v864_v49 = vmul.f32 %v2018_v15, %v656_v45  ;;  %v896_v50 = vmul.f32 %v2018_v15, %v784_v46  ;;  %v658_v51 = vpop.f32.mrb[37].mxu0  ;;  %v786_v52 = vpop.f32.mrb[37].mxu1 }
 0x146   :  { %v1591_v48 = vpack.c.bf16 %v1030_v44, %v1030_v44  ;;  %v659_v53 = vpop.f32.mrb[38].mxu0  ;;  %v787_v54 = vpop.f32.mrb[38].mxu1 }
 0x147   :  { %1319 = vst.msk [vmem:[%s2413_s4 + $0x44] sm:$0xf] %vm1301_vm3, %v1559_v47  ;;  %v935_v55 = vadd.f32 %v2023_v17, %v864_v49  ;;  %v967_v56 = vadd.f32 %v2023_v17, %v896_v50  ;;  %v865_v57 = vmul.f32 %v2018_v15, %v659_v53  ;;  %v897_v58 = vmul.f32 %v2018_v15, %v787_v54  ;;  %v661_v59 = vpop.f32.mrb[39].mxu0  ;;  %v789_v60 = vpop.f32.mrb[39].mxu1 }
 0x148   :  { %1351 = vst.msk [vmem:[%s2413_s4 + $0xc4] sm:$0xf] %vm1301_vm3, %v1591_v48 }
 0x149   :  { %v999_v61 = vmax.f32 %v935_v55, 0.0  ;;  %v1031_v62 = vmax.f32 %v967_v56, 0.0  ;;  %v936_v63 = vadd.f32 %v2023_v17, %v865_v57  ;;  %v968_v0 = vadd.f32 %v2023_v17, %v897_v58 }
 0x14b   :  { %v1560_v1 = vpack.c.bf16 %v999_v61, %v999_v61  ;;  %v1592_v2 = vpack.c.bf16 %v1031_v62, %v1031_v62  ;;  %v1000_v3 = vmax.f32 %v936_v63, 0.0  ;;  %v1032_v4 = vmax.f32 %v968_v0, 0.0 }
 0x14c   :  { %v664_v5 = vpop.f32.mrb[40].mxu0  ;;  %v792_v6 = vpop.f32.mrb[40].mxu1 }
 0x14d   :  { %1320 = vst.msk [vmem:[%s2413_s4 + $0x48] sm:$0xf] %vm1301_vm3, %v1560_v1  ;;  %1352 = vst.msk [vmem:[%s2413_s4 + $0xc8] sm:$0xf] %vm1301_vm3, %v1592_v2  ;;  %v1561_v7 = vpack.c.bf16 %v1000_v3, %v1000_v3  ;;  %v1593_v8 = vpack.c.bf16 %v1032_v4, %v1032_v4  ;;  %v866_v9 = vmul.f32 %v2018_v15, %v664_v5  ;;  %v666_v11 = vpop.f32.mrb[41].mxu0  ;;  %v794_v12 = vpop.f32.mrb[41].mxu1 }
 0x14e   :  { %v898_v10 = vmul.f32 %v2018_v15, %v792_v6  ;;  %v667_v13 = vpop.f32.mrb[42].mxu0  ;;  %v795_v14 = vpop.f32.mrb[42].mxu1 }
 0x14f   :  { %1321 = vst.msk [vmem:[%s2413_s4 + $0x4c] sm:$0xf] %vm1301_vm3, %v1561_v7  ;;  %1353 = vst.msk [vmem:[%s2413_s4 + $0xcc] sm:$0xf] %vm1301_vm3, %v1593_v8  ;;  %v937_v16 = vadd.f32 %v2023_v17, %v866_v9  ;;  %v867_v19 = vmul.f32 %v2018_v15, %v667_v13  ;;  %v899_v20 = vmul.f32 %v2018_v15, %v795_v14  ;;  %v669_v21 = vpop.f32.mrb[43].mxu0  ;;  %v797_v22 = vpop.f32.mrb[43].mxu1 }
 0x150   :  { %v969_v18 = vadd.f32 %v2023_v17, %v898_v10 }
 0x151   :  { %v1001_v23 = vmax.f32 %v937_v16, 0.0  ;;  %v938_v25 = vadd.f32 %v2023_v17, %v867_v19  ;;  %v970_v26 = vadd.f32 %v2023_v17, %v899_v20 }
 0x152   :  { %v1033_v24 = vmax.f32 %v969_v18, 0.0 }
 0x153   :  { %v1562_v27 = vpack.c.bf16 %v1001_v23, %v1001_v23  ;;  %v1002_v29 = vmax.f32 %v938_v25, 0.0  ;;  %v1034_v30 = vmax.f32 %v970_v26, 0.0 }
 0x154   :  { %v1594_v28 = vpack.c.bf16 %v1033_v24, %v1033_v24  ;;  %v672_v31 = vpop.f32.mrb[44].mxu0  ;;  %v800_v32 = vpop.f32.mrb[44].mxu1 }
 0x155   :  { %1322 = vst.msk [vmem:[%s2413_s4 + $0x50] sm:$0xf] %vm1301_vm3, %v1562_v27  ;;  %v1563_v33 = vpack.c.bf16 %v1002_v29, %v1002_v29  ;;  %v1595_v34 = vpack.c.bf16 %v1034_v30, %v1034_v30  ;;  %v868_v35 = vmul.f32 %v2018_v15, %v672_v31  ;;  %v900_v36 = vmul.f32 %v2018_v15, %v800_v32  ;;  %v674_v37 = vpop.f32.mrb[45].mxu0  ;;  %v802_v38 = vpop.f32.mrb[45].mxu1 }
 0x156   :  { %1354 = vst.msk [vmem:[%s2413_s4 + $0xd0] sm:$0xf] %vm1301_vm3, %v1594_v28  ;;  %v675_v39 = vpop.f32.mrb[46].mxu0  ;;  %v803_v40 = vpop.f32.mrb[46].mxu1 }
 0x157   :  { %1323 = vst.msk [vmem:[%s2413_s4 + $0x54] sm:$0xf] %vm1301_vm3, %v1563_v33  ;;  %1355 = vst.msk [vmem:[%s2413_s4 + $0xd4] sm:$0xf] %vm1301_vm3, %v1595_v34  ;;  %v939_v41 = vadd.f32 %v2023_v17, %v868_v35  ;;  %v971_v42 = vadd.f32 %v2023_v17, %v900_v36  ;;  %v869_v43 = vmul.f32 %v2018_v15, %v675_v39  ;;  %v677_v45 = vpop.f32.mrb[47].mxu0  ;;  %v805_v46 = vpop.f32.mrb[47].mxu1 }
 0x158   :  { %v901_v44 = vmul.f32 %v2018_v15, %v803_v40 }
 0x159   :  { %v1003_v47 = vmax.f32 %v939_v41, 0.0  ;;  %v1035_v48 = vmax.f32 %v971_v42, 0.0  ;;  %v940_v49 = vadd.f32 %v2023_v17, %v869_v43 }
 0x15a   :  { %v972_v50 = vadd.f32 %v2023_v17, %v901_v44 }
 0x15b   :  { %v1564_v51 = vpack.c.bf16 %v1003_v47, %v1003_v47  ;;  %v1596_v52 = vpack.c.bf16 %v1035_v48, %v1035_v48  ;;  %v1004_v53 = vmax.f32 %v940_v49, 0.0 }
 0x15c   :  { %v1036_v54 = vmax.f32 %v972_v50, 0.0  ;;  %v680_v55 = vpop.f32.mrb[48].mxu0  ;;  %v808_v56 = vpop.f32.mrb[48].mxu1 }
 0x15d   :  { %1324 = vst.msk [vmem:[%s2413_s4 + $0x58] sm:$0xf] %vm1301_vm3, %v1564_v51  ;;  %1356 = vst.msk [vmem:[%s2413_s4 + $0xd8] sm:$0xf] %vm1301_vm3, %v1596_v52  ;;  %v1565_v57 = vpack.c.bf16 %v1004_v53, %v1004_v53  ;;  %v870_v59 = vmul.f32 %v2018_v15, %v680_v55  ;;  %v902_v60 = vmul.f32 %v2018_v15, %v808_v56  ;;  %v682_v61 = vpop.f32.mrb[49].mxu0  ;;  %v810_v62 = vpop.f32.mrb[49].mxu1 }
 0x15e   :  { %v1597_v58 = vpack.c.bf16 %v1036_v54, %v1036_v54  ;;  %v683_v63 = vpop.f32.mrb[50].mxu0  ;;  %v811_v0 = vpop.f32.mrb[50].mxu1 }
 0x15f   :  { %1325 = vst.msk [vmem:[%s2413_s4 + $0x5c] sm:$0xf] %vm1301_vm3, %v1565_v57  ;;  %v941_v1 = vadd.f32 %v2023_v17, %v870_v59  ;;  %v973_v2 = vadd.f32 %v2023_v17, %v902_v60  ;;  %v871_v3 = vmul.f32 %v2018_v15, %v683_v63  ;;  %v903_v4 = vmul.f32 %v2018_v15, %v811_v0  ;;  %v685_v5 = vpop.f32.mrb[51].mxu0  ;;  %v813_v6 = vpop.f32.mrb[51].mxu1 }
 0x160   :  { %1357 = vst.msk [vmem:[%s2413_s4 + $0xdc] sm:$0xf] %vm1301_vm3, %v1597_v58 }
 0x161   :  { %v1005_v7 = vmax.f32 %v941_v1, 0.0  ;;  %v1037_v8 = vmax.f32 %v973_v2, 0.0  ;;  %v942_v9 = vadd.f32 %v2023_v17, %v871_v3  ;;  %v974_v10 = vadd.f32 %v2023_v17, %v903_v4 }
 0x163   :  { %v1566_v11 = vpack.c.bf16 %v1005_v7, %v1005_v7  ;;  %v1598_v12 = vpack.c.bf16 %v1037_v8, %v1037_v8  ;;  %v1006_v13 = vmax.f32 %v942_v9, 0.0  ;;  %v1038_v14 = vmax.f32 %v974_v10, 0.0 }
 0x164   :  { %v688_v16 = vpop.f32.mrb[52].mxu0  ;;  %v816_v18 = vpop.f32.mrb[52].mxu1 }
 0x165   :  { %1326 = vst.msk [vmem:[%s2413_s4 + $0x60] sm:$0xf] %vm1301_vm3, %v1566_v11  ;;  %1358 = vst.msk [vmem:[%s2413_s4 + $0xe0] sm:$0xf] %vm1301_vm3, %v1598_v12  ;;  %v1567_v19 = vpack.c.bf16 %v1006_v13, %v1006_v13  ;;  %v1599_v20 = vpack.c.bf16 %v1038_v14, %v1038_v14  ;;  %v872_v21 = vmul.f32 %v2018_v15, %v688_v16  ;;  %v690_v23 = vpop.f32.mrb[53].mxu0  ;;  %v818_v24 = vpop.f32.mrb[53].mxu1 }
 0x166   :  { %v904_v22 = vmul.f32 %v2018_v15, %v816_v18  ;;  %v691_v25 = vpop.f32.mrb[54].mxu0  ;;  %v819_v26 = vpop.f32.mrb[54].mxu1 }
 0x167   :  { %1327 = vst.msk [vmem:[%s2413_s4 + $0x64] sm:$0xf] %vm1301_vm3, %v1567_v19  ;;  %1359 = vst.msk [vmem:[%s2413_s4 + $0xe4] sm:$0xf] %vm1301_vm3, %v1599_v20  ;;  %v943_v27 = vadd.f32 %v2023_v17, %v872_v21  ;;  %v873_v29 = vmul.f32 %v2018_v15, %v691_v25  ;;  %v905_v30 = vmul.f32 %v2018_v15, %v819_v26  ;;  %v693_v31 = vpop.f32.mrb[55].mxu0  ;;  %v821_v32 = vpop.f32.mrb[55].mxu1 }
 0x168   :  { %v975_v28 = vadd.f32 %v2023_v17, %v904_v22 }
 0x169   :  { %v1007_v33 = vmax.f32 %v943_v27, 0.0  ;;  %v944_v35 = vadd.f32 %v2023_v17, %v873_v29  ;;  %v976_v36 = vadd.f32 %v2023_v17, %v905_v30 }
 0x16a   :  { %v1039_v34 = vmax.f32 %v975_v28, 0.0 }
 0x16b   :  { %v1568_v37 = vpack.c.bf16 %v1007_v33, %v1007_v33  ;;  %v1008_v39 = vmax.f32 %v944_v35, 0.0  ;;  %v1040_v40 = vmax.f32 %v976_v36, 0.0 }
 0x16c   :  { %v1600_v38 = vpack.c.bf16 %v1039_v34, %v1039_v34  ;;  %v696_v41 = vpop.f32.mrb[56].mxu0  ;;  %v824_v42 = vpop.f32.mrb[56].mxu1 }
 0x16d   :  { %1328 = vst.msk [vmem:[%s2413_s4 + $0x68] sm:$0xf] %vm1301_vm3, %v1568_v37  ;;  %v1569_v43 = vpack.c.bf16 %v1008_v39, %v1008_v39  ;;  %v1601_v44 = vpack.c.bf16 %v1040_v40, %v1040_v40  ;;  %v874_v45 = vmul.f32 %v2018_v15, %v696_v41  ;;  %v906_v46 = vmul.f32 %v2018_v15, %v824_v42  ;;  %v698_v47 = vpop.f32.mrb[57].mxu0  ;;  %v826_v48 = vpop.f32.mrb[57].mxu1 }
 0x16e   :  { %1360 = vst.msk [vmem:[%s2413_s4 + $0xe8] sm:$0xf] %vm1301_vm3, %v1600_v38  ;;  %v699_v49 = vpop.f32.mrb[58].mxu0  ;;  %v827_v50 = vpop.f32.mrb[58].mxu1 }
 0x16f   :  { %1329 = vst.msk [vmem:[%s2413_s4 + $0x6c] sm:$0xf] %vm1301_vm3, %v1569_v43  ;;  %1361 = vst.msk [vmem:[%s2413_s4 + $0xec] sm:$0xf] %vm1301_vm3, %v1601_v44  ;;  %v945_v51 = vadd.f32 %v2023_v17, %v874_v45  ;;  %v977_v52 = vadd.f32 %v2023_v17, %v906_v46  ;;  %v875_v53 = vmul.f32 %v2018_v15, %v699_v49  ;;  %v701_v55 = vpop.f32.mrb[59].mxu0  ;;  %v829_v56 = vpop.f32.mrb[59].mxu1 }
 0x170   :  { %v907_v54 = vmul.f32 %v2018_v15, %v827_v50 }
 0x171   :  { %v1009_v57 = vmax.f32 %v945_v51, 0.0  ;;  %v1041_v58 = vmax.f32 %v977_v52, 0.0  ;;  %v946_v59 = vadd.f32 %v2023_v17, %v875_v53 }
 0x172   :  { %v978_v60 = vadd.f32 %v2023_v17, %v907_v54 }
 0x173   :  { %v1570_v61 = vpack.c.bf16 %v1009_v57, %v1009_v57  ;;  %v1602_v62 = vpack.c.bf16 %v1041_v58, %v1041_v58  ;;  %v1010_v63 = vmax.f32 %v946_v59, 0.0 }
 0x174   :  { %v1042_v0 = vmax.f32 %v978_v60, 0.0  ;;  %v704_v1 = vpop.f32.mrb[60].mxu0  ;;  %v832_v2 = vpop.f32.mrb[60].mxu1 }
 0x175   :  { %1330 = vst.msk [vmem:[%s2413_s4 + $0x70] sm:$0xf] %vm1301_vm3, %v1570_v61  ;;  %1362 = vst.msk [vmem:[%s2413_s4 + $0xf0] sm:$0xf] %vm1301_vm3, %v1602_v62  ;;  %v1571_v3 = vpack.c.bf16 %v1010_v63, %v1010_v63  ;;  %v876_v5 = vmul.f32 %v2018_v15, %v704_v1  ;;  %v908_v6 = vmul.f32 %v2018_v15, %v832_v2  ;;  %v706_v7 = vpop.f32.mrb[61].mxu0  ;;  %v834_v8 = vpop.f32.mrb[61].mxu1 }
 0x176   :  { %v1603_v4 = vpack.c.bf16 %v1042_v0, %v1042_v0  ;;  %v707_v9 = vpop.f32.mrb[62].mxu0  ;;  %v835_v10 = vpop.f32.mrb[62].mxu1 }
 0x177   :  { %1331 = vst.msk [vmem:[%s2413_s4 + $0x74] sm:$0xf] %vm1301_vm3, %v1571_v3  ;;  %v947_v11 = vadd.f32 %v2023_v17, %v876_v5  ;;  %v979_v12 = vadd.f32 %v2023_v17, %v908_v6  ;;  %v877_v13 = vmul.f32 %v2018_v15, %v707_v9  ;;  %v909_v14 = vmul.f32 %v2018_v15, %v835_v10  ;;  %v709_v16 = vpop.f32.mrb[63].mxu0  ;;  %v837_v18 = vpop.f32.mrb[63].mxu1 }
 0x178   :  { %1363 = vst.msk [vmem:[%s2413_s4 + $0xf4] sm:$0xf] %vm1301_vm3, %v1603_v4 }
 0x179   :  { %v1011_v19 = vmax.f32 %v947_v11, 0.0  ;;  %v1043_v20 = vmax.f32 %v979_v12, 0.0  ;;  %v948_v21 = vadd.f32 %v2023_v17, %v877_v13  ;;  %v980_v22 = vadd.f32 %v2023_v17, %v909_v14 }
 0x17b   :  { %v1572_v23 = vpack.c.bf16 %v1011_v19, %v1011_v19  ;;  %v1604_v24 = vpack.c.bf16 %v1043_v20, %v1043_v20  ;;  %v1012_v25 = vmax.f32 %v948_v21, 0.0  ;;  %v1044_v26 = vmax.f32 %v980_v22, 0.0 }
 0x17d   :  { %1332 = vst.msk [vmem:[%s2413_s4 + $0x78] sm:$0xf] %vm1301_vm3, %v1572_v23  ;;  %1364 = vst.msk [vmem:[%s2413_s4 + $0xf8] sm:$0xf] %vm1301_vm3, %v1604_v24  ;;  %v1573_v15 = vpack.c.bf16 %v1012_v25, %v1012_v25  ;;  %v1605_v27 = vpack.c.bf16 %v1044_v26, %v1044_v26 }
 0x17f   :  { %1333 = vst.msk [vmem:[%s2413_s4 + $0x7c] sm:$0xf] %vm1301_vm3, %v1573_v15  ;;  %1365 = vst.msk [vmem:[%s2413_s4 + $0xfc] sm:$0xf] %vm1301_vm3, %v1605_v27 }

// kernel: custom_densenet_forward.28
= control target key start
LH: loop header
LB: loop body
LE: loop exit
PB: predicated region body
PF: predicated region fallthrough
CT: control target
= control target key end

     0   :  { %s1838_s9 = smov 0   ;;  %s2212_s0 = inlined_call_operand.vmem [shape: bf16[2,10,10,32], index: 0, kind: input, shape index: {}]   ;;  %s2213_s1 = inlined_call_operand.vmem [shape: bf16[9,32,8], index: 1, kind: input, shape index: {}]   ;;  %s2214_s2 = inlined_call_operand.vmem [shape: bf16[2,64,8], index: 2, kind: output, shape index: {}]  }
   0x1 LB: > { %s1399_s10 = sadd.s32 4294967295, %s1821_s9   ;;  %p1403_p0 = scmp.ge.s32.totalorder %s1821_s9, 1  ;;  %s1821_s9 = sphi %s1838_s9, %s12_s9  }
   0x2   : > { %p112_p1 = scmp.lt.s32.totalorder %s1821_s9, 3 }
   0x4   : > { %p113_p2 = pnand %p1403_p0, %p112_p1 }
   0x5   : > { %v1788_v0 = vld [vmem:[%s2213_s1 + $0x10] sm:$0xff] (!%p113_p2)   ;;  %p134_p3 = scmp.lt.s32.totalorder (!%p113_p2), %s1399_s10, 1  ;;  %v1852_v1 = vld [vmem:[%s2213_s1 + $0x40] sm:$0xff] (!%p113_p2)   ;;  %v1790_v2 = vld [vmem:[%s2213_s1 + $0x18] sm:$0xff] (!%p113_p2)   ;;  %vm169_vm0 = vsmask.f32 (!%p113_p2), 3328 }
   0x6   : > { %116 = sbr.rel (%p113_p2) target bundleno = 326 (0x146), region = 28  ;;  %1603 = vmatprep.subr.bf16.mxu1 (!%p113_p2), %v1788_v0  ;;  %1651 = vmatprep.subr.bf16.mxu0 (!%p113_p2), %v1852_v1  ;;  %v1863_v3 = vld [vmem:[%s2213_s1 + $0x48] sm:$0xff] (!%p113_p2)   ;;  %v1870_v4 = vld [vmem:[%s2213_s1] sm:$0xff] (!%p113_p2)   ;;  %vm170_vm1 = vsmask.f32 (!%p113_p2), 7440  ;;  %v1881_v5 = vld [vmem:[%s2213_s1 + $0x50] sm:$0xff] (!%p113_p2)  }
   0x7   : > { %1604 = vmatpush3.bf16.msra.mxu1 (!%p113_p2), %v1788_v0  ;;  %1652 = vmatpush3.bf16.msra.mxu0 (!%p113_p2), %v1852_v1  ;;  %vm313_vm2 = vcmask (!%p113_p2), 261120   ;;  %vm1927_vm3 = vmor (!%p113_p2), %vm169_vm0, %vm170_vm1  ;;  %vm508_vm4 = vcmask (!%p113_p2), 1042432   ;;  %vm509_vm5 = vcmask (!%p113_p2), 1046532   ;;  %vm1335_vm7 = vcmask (!%p113_p2), 60416  }
   0x8   : > { %1605 = vmatprep.subr.bf16.mxu1 (!%p113_p2), %v1790_v2  ;;  %1653 = vmatprep.subr.bf16.mxu0 (!%p113_p2), %v1863_v3  ;;  %vm1993_vm6 = vmor (!%p113_p2), %vm508_vm4, %vm509_vm5 }
   0xb   : > { %1606 = vmatpush3.bf16.msra.mxu1 (!%p113_p2), %v1790_v2  ;;  %1654 = vmatpush3.bf16.msra.mxu0 (!%p113_p2), %v1863_v3 }
   0xc   : > { %1615 = vmatprep.subr.bf16.mxu1 (!%p113_p2), %v1870_v4  ;;  %1663 = vmatprep.subr.bf16.mxu0 (!%p113_p2), %v1881_v5 }
   0xd   : > { %s2220_s10 = smov (!%p134_p3, %s1399_s10), 1 }
   0xe   : > { %s1779_s19 = smul.u32 80, %s2220_s10  ;;  %s1540_s25 = sshll.u32 %s2220_s10, 5 }
   0xf   : > { %s2191_s28 = scalar_lea.vmem %s2214_s2, %s1540_s25 }
  0x10   : > { %s1876_s24 = scalar_lea.vmem %s2212_s0, %s1779_s19 }
  0x11   : > { %v1884_v6 = vld [vmem:[%s1876_s24] sm:$0xf]  ;;  %v1887_v7 = vld [vmem:[%s1876_s24 + $0x4] sm:$0x1]  ;;  %v1890_v8 = vld [vmem:[%s1876_s24 + $0x8] sm:$0xf] }
  0x12   : > { %v1894_v9 = vld [vmem:[%s1876_s24 + $0xc] sm:$0x1]  ;;  %v173_v10 = vshrl.u32 %v1884_v6, 16  ;;  %v176_v11 = vshll.u32 %v1884_v6, 16  ;;  %v182_v12 = vshll.u32 %v1887_v7, 16  ;;  %v187_v13 = vshrl.u32 %v1890_v8, 16 }
  0x13   : > { %v190_v14 = vshll.u32 %v1890_v8, 16  ;;  %v196_v15 = vshll.u32 %v1894_v9, 16  ;;  %v517_v16 = vrot.slane %v1894_v9, 5  ;;  %v1905_v17 = vld [vmem:[%s1876_s24 + $0x10] sm:$0xf] }
  0x14   : > { %v175_v18 = vrot.slane %v173_v10, 4  ;;  %v178_v19 = vrot.slane %v176_v11, 5  ;;  %v184_v20 = vrot.slane %v182_v12, 5  ;;  %v189_v21 = vrot.slane %v187_v13, 4  ;;  %v1909_v22 = vld [vmem:[%s1876_s24 + $0x14] sm:$0x1] }
  0x15   : > { %v192_v23 = vrot.slane %v190_v14, 5  ;;  %v198_v24 = vrot.slane %v196_v15, 5  ;;  %v1912_v25 = vld [vmem:[%s1876_s24 + $0x18] sm:$0xf]  ;;  %v1915_v26 = vld [vmem:[%s1876_s24 + $0x1c] sm:$0x1] }
  0x16   : > { %v179_v27 = vor.u32 %v178_v19, %v175_v18  ;;  %v1918_v28 = vld [vmem:[%s1876_s24 + $0x20] sm:$0xf]  ;;  %v1921_v29 = vld [vmem:[%s1876_s24 + $0x24] sm:$0x1]  ;;  %v201_v30 = vshrl.u32 %v1905_v17, 16  ;;  %v204_v31 = vshll.u32 %v1905_v17, 16 }
  0x17   : > { %v193_v33 = vor.u32 %v192_v23, %v189_v21  ;;  %v210_v34 = vshll.u32 %v1909_v22, 16  ;;  %v215_v35 = vshrl.u32 %v1912_v25, 16  ;;  %v218_v36 = vshll.u32 %v1912_v25, 16  ;;  %v1939_v49 = vld [vmem:[%s1876_s24 + $0x28] sm:$0xf] }
  0x18   : > { %v180_v37 = vrot.slane %v179_v27, 4  ;;  %v203_v38 = vrot.slane %v201_v30, 4  ;;  %v206_v39 = vrot.slane %v204_v31, 5  ;;  %v224_v40 = vshll.u32 %v1915_v26, 16  ;;  %v1946_v54 = vld [vmem:[%s1876_s24 + $0x2c] sm:$0x1] }
  0x19   : > { %v194_v41 = vrot.slane %v193_v33, 4  ;;  %v212_v42 = vrot.slane %v210_v34, 5  ;;  %v217_v43 = vrot.slane %v215_v35, 4  ;;  %v220_v44 = vrot.slane %v218_v36, 5  ;;  %v1950_v59 = vld [vmem:[%s1876_s24 + $0x30] sm:$0xf] }
  0x1a   : > { %v185_v45 = vsel %vm1927_vm3, %v180_v37, %v184_v20  ;;  %v207_v46 = vor.u32 %v206_v39, %v203_v38  ;;  %v226_v47 = vrot.slane %v224_v40, 5  ;;  %v229_v48 = vshrl.u32 %v1918_v28, 16  ;;  %v1954_v0 = vld [vmem:[%s1876_s24 + $0x34] sm:$0x1]  ;;  %v1963_v13 = vld [vmem:[%s1876_s24 + $0x38] sm:$0xf] }
  0x1b   : > { %v199_v50 = vsel %vm1927_vm3, %v194_v41, %v198_v24  ;;  %v221_v51 = vor.u32 %v220_v44, %v217_v43  ;;  %v232_v52 = vshll.u32 %v1918_v28, 16  ;;  %v238_v53 = vshll.u32 %v1921_v29, 16  ;;  %v1969_v20 = vld [vmem:[%s1876_s24 + $0x3c] sm:$0x1]  ;;  %v1795_v24 = vld [vmem:[%s2213_s1 + $0x8] sm:$0xff]  }
  0x1c   : > { %v1411_v55 = vcombine.low %v185_v45, %v199_v50  ;;  %v208_v56 = vrot.slane %v207_v46, 4  ;;  %v231_v57 = vrot.slane %v229_v48, 4  ;;  %v521_v58 = vrot.slane %v1909_v22, 5  ;;  %v1794_v40 = vld [vmem:[%s2213_s1 + $0x58] sm:$0xff]  }
  0x1d   : > { %v222_v60 = vrot.slane %v221_v51, 4  ;;  %v234_v61 = vrot.slane %v232_v52, 5  ;;  %v240_v62 = vrot.slane %v238_v53, 5  ;;  %v525_v63 = vrot.slane %v1915_v26, 5  ;;  %v1806_v48 = vld [vmem:[%s2213_s1 + $0x78] sm:$0xff]  }
  0x1e   : > { %1607 = vmatprep.mubr.msk.bf16.mxu1 %vm313_vm2, %v1411_v55  ;;  %v213_v2 = vsel %vm1927_vm3, %v208_v56, %v212_v42  ;;  %v529_v10 = vrot.slane %v1921_v29, 5  ;;  %v243_v11 = vshrl.u32 %v1939_v49, 16  ;;  %v246_v12 = vshll.u32 %v1939_v49, 16 }
  0x1f   : > { %v227_v14 = vsel %vm1927_vm3, %v222_v60, %v226_v47  ;;  %v235_v15 = vor.u32 %v234_v61, %v231_v57  ;;  %v1471_v18 = vcombine.low %v199_v50, %v213_v2  ;;  %v252_v19 = vshll.u32 %v1946_v54, 16 }
  0x20   : > { %v1971_v21 = vcombine.low %v213_v2, %v227_v14  ;;  %v245_v22 = vrot.slane %v243_v11, 4  ;;  %v248_v23 = vrot.slane %v246_v12, 5  ;;  %v257_v27 = vshrl.u32 %v1950_v59, 16 }
  0x21   : > { %v236_v30 = vrot.slane %v235_v15, 4  ;;  %1655 = vmatprep.mubr.msk.bf16.mxu0 %vm313_vm2, %v1471_v18  ;;  %v254_v31 = vrot.slane %v252_v19, 5  ;;  %v260_v33 = vshll.u32 %v1950_v59, 16  ;;  %v266_v34 = vshll.u32 %v1954_v0, 16 }
  0x22   : > { %1608 = vmatmul.mubr.msk.bf16.vlgmr.msra.gmra.mrb[0].mxu1 %vm313_vm2, %v1971_v21  ;;  %v249_v35 = vor.u32 %v248_v23, %v245_v22  ;;  %v259_v36 = vrot.slane %v257_v27, 4  ;;  %v271_v37 = vshrl.u32 %v1963_v13, 16  ;;  %v274_v38 = vshll.u32 %v1963_v13, 16 }
  0x23   : > { %v241_v39 = vsel %vm1927_vm3, %v236_v30, %v240_v62  ;;  %1616 = vmatpush3.bf16.msra.mxu1 %v1870_v4  ;;  %v262_v41 = vrot.slane %v260_v33, 5  ;;  %v268_v42 = vrot.slane %v266_v34, 5  ;;  %v280_v43 = vshll.u32 %v1969_v20, 16  ;;  %v2000_v4 = vld [vmem:[%s2213_s1 + $0x20] sm:$0xff]  }
  0x24   : > { %v1472_v44 = vcombine.low %v227_v14, %v241_v39  ;;  %v250_v45 = vrot.slane %v249_v35, 4  ;;  %1617 = vmatprep.subr.bf16.mxu1 %v1795_v24  ;;  %v273_v46 = vrot.slane %v271_v37, 4  ;;  %v276_v47 = vrot.slane %v274_v38, 5  ;;  %v1796_v14 = vld [vmem:[%s2213_s1 + $0x60] sm:$0xff]   ;;  %v1800_v35 = vld [vmem:[%s2213_s1 + $0x68] sm:$0xff]  }
  0x25   : > { %v263_v50 = vor.u32 %v262_v41, %v259_v36  ;;  %v282_v51 = vrot.slane %v280_v43, 5  ;;  %v1432_v52 = vrot.slane %v1890_v8, 9  ;;  %v1433_v53 = vrot.slane %v1905_v17, 9  ;;  %v163_v41 = vld [vmem:[%s1876_s24 + $0x48] sm:$0xf]  ;;  %v1804_v43 = vld [vmem:[%s2213_s1 + $0x70] sm:$0xff]  }
  0x26   : > { %1656 = vmatmul.mubr.msk.bf16.vlgmr.msra.gmra.mrb[0].mxu0 %vm313_vm2, %v1472_v44  ;;  %v2007_v55 = vsel %vm1927_vm3, %v250_v45, %v254_v31  ;;  %v277_v56 = vor.u32 %v276_v47, %v273_v46  ;;  %v1434_v57 = vrot.slane %v1912_v25, 9  ;;  %v1435_v60 = vrot.slane %v1918_v28, 9  ;;  %v2070_v31 = vld [vmem:[%s1876_s24 + $0x44] sm:$0x1] }
  0x27   : > { %1664 = vmatpush3.bf16.msra.mxu0 %v1881_v5  ;;  %v2013_v61 = vcombine.low %v241_v39, %v2007_v55  ;;  %v264_v62 = vrot.slane %v263_v50, 4  ;;  %1618 = vmatpush3.bf16.msra.mxu1 %v1795_v24  ;;  %v2019_v2 = vsel %vm1993_vm6, %v1432_v52, %v517_v16  ;;  %v2023_v11 = vsel %vm1993_vm6, %v1433_v53, %v521_v58  ;;  %v1805_v50 = vld [vmem:[%s2213_s1 + $0x30] sm:$0xff]  }
  0x28   : > { %1665 = vmatprep.subr.bf16.mxu0 %v1794_v40  ;;  %v278_v12 = vrot.slane %v277_v56, 4  ;;  %v1486_v5 = vcombine.low %v2019_v2, %v2023_v11  ;;  %1627 = vmatprep.subr.bf16.mxu1 %v2000_v4  ;;  %v1421_v16 = vcombine.low %v1884_v6, %v1890_v8  ;;  %v1436_v58 = vrot.slane %v1939_v49, 9 }
  0x29   : > { %1611 = vmatprep.mubr.msk.bf16.mxu1 %vm313_vm2, %v2013_v61  ;;  %v2035_v9 = vsel %vm1927_vm3, %v264_v62, %v268_v42  ;;  %v533_v18 = vrot.slane %v1946_v54, 5  ;;  %v1437_v19 = vrot.slane %v1950_v59, 9  ;;  %v537_v22 = vrot.slane %v1954_v0, 5  ;;  %v2061_v54 = vld [vmem:[%s1876_s24 + $0x40] sm:$0xf] }
  0x2a   : > { %v2042_v15 = vsel %vm1927_vm3, %v278_v12, %v282_v51  ;;  %1667 = vmatprep.mubr.msk.bf16.mxu0 %vm313_vm2, %v1486_v5  ;;  %v526_v24 = vsel %vm1993_vm6, %v1434_v57, %v525_v63  ;;  %v530_v27 = vsel %vm1993_vm6, %v1435_v60, %v529_v10  ;;  %v1438_v29 = vrot.slane %v1963_v13, 9  ;;  %v164_v42 = vld [vmem:[%s1876_s24 + $0x4c] sm:$0x1]  ;;  %v1808_v60 = vld [vmem:[%s2213_s1 + $0x38] sm:$0xff]  }
  0x2b   : > { %1666 = vmatpush3.bf16.msra.mxu0 %v1794_v40  ;;  %v2050_v23 = vcombine.low %v2035_v9, %v2042_v15  ;;  %v534_v0 = vsel %vm1993_vm6, %v1436_v58, %v533_v18  ;;  %v2067_v30 = vsel %vm1993_vm6, %v1437_v19, %v537_v22  ;;  %v1487_v26 = vcombine.low %v526_v24, %v530_v27  ;;  %v1802_v40 = vld [vmem:[%s2213_s1 + $0x28] sm:$0xff]  }
  0x2c   : > { %1675 = vmatprep.subr.bf16.mxu0 %v1796_v14  ;;  %v1488_v63 = vcombine.low %v534_v0, %v2067_v30  ;;  %v541_v10 = vrot.slane %v1969_v20, 5  ;;  %v1481_v33 = vrot.slane %v2061_v54, 9  ;;  %v889_v34 = vrot.slane %v2070_v31, 5 }
  0x2d   : > { %1612 = vmatmul.mubr.msk.bf16.gmra.mrb[4].mxu1 %vm313_vm2, %v2050_v23  ;;  %v1422_v36 = vcombine.low %v1905_v17, %v1912_v25  ;;  %v513_v37 = vrot.slane %v1887_v7, 5  ;;  %v1423_v38 = vcombine.low %v1918_v28, %v1939_v49  ;;  %v1431_v7 = vrot.slane %v1884_v6, 9 }
  0x2e   : > { %1619 = vmatprep.mubr.msk.bf16.mxu1 %vm313_vm2, %v1421_v16  ;;  %v542_v20 = vsel %vm1993_vm6, %v1438_v29, %v541_v10  ;;  %v2094_v39 = vsel %vm1993_vm6, %v1481_v33, %v889_v34  ;;  %v1518_v44 = vrot.slane %v163_v41, 9  ;;  %v1206_v45 = vrot.slane %v164_v42, 5 }
  0x2f   : > { %v1489_v46 = vcombine.low %v542_v20, %v2094_v39  ;;  %v514_v47 = vsel %vm1993_vm6, %v1431_v7, %v513_v37  ;;  %v1444_v52 = vcombine.low %v2023_v11, %v526_v24  ;;  %v1445_v53 = vcombine.low %v530_v27, %v534_v0  ;;  %v1809_v11 = vld [vmem:[%s2213_s1 + $0x80] sm:$0xff]  }
  0x30   : > { %v2111_v6 = vsel %vm1993_vm6, %v1518_v44, %v1206_v45  ;;  %v1443_v51 = vcombine.low %v514_v47, %v2019_v2  ;;  %v1095_v56 = vshrl.u32 %v163_v41, 16  ;;  %v1098_v57 = vshll.u32 %v163_v41, 16 }
  0x31   : > { %v766_v62 = vshrl.u32 %v2061_v54, 16  ;;  %v769_v2 = vshll.u32 %v2061_v54, 16  ;;  %v1500_v12 = vcombine.low %v2061_v54, %v163_v41  ;;  %v1446_v18 = vcombine.low %v2067_v30, %v542_v20 }
  0x32   : > { %1668 = vmatmul.mubr.msk.bf16.vlgmr.msra.gmra.mrb[0].mxu0 %vm313_vm2, %v1487_v26  ;;  %v1097_v16 = vrot.slane %v1095_v56, 4  ;;  %v1100_v58 = vrot.slane %v1098_v57, 5  ;;  %v1457_v19 = vcombine.low %v1890_v8, %v1905_v17  ;;  %v775_v24 = vshll.u32 %v2070_v31, 16  ;;  %v1812_v8 = vld [vmem:[%s2213_s1 + $0x88] sm:$0xff]  }
  0x33   : > { %1676 = vmatpush3.bf16.msra.mxu0 %v1796_v14  ;;  %1671 = vmatprep.mubr.msk.bf16.mxu0 %vm313_vm2, %v1488_v63  ;;  %v768_v5 = vrot.slane %v766_v62, 4  ;;  %v771_v14 = vrot.slane %v769_v2, 5  ;;  %v1104_v0 = vshll.u32 %v164_v42, 16  ;;  %v1458_v17 = vcombine.low %v1912_v25, %v1918_v28 }
  0x34   : > { %1677 = vmatprep.subr.bf16.mxu0 %v1800_v35  ;;  %v1101_v27 = vor.u32 %v1100_v58, %v1097_v16  ;;  %v777_v26 = vrot.slane %v775_v24, 5  ;;  %v1460_v28 = vcombine.low %v1963_v13, %v2061_v54  ;;  %v1473_v32 = vcombine.low %v2007_v55, %v2035_v9 }
  0x35   : > { %1620 = vmatmul.mubr.msk.bf16.vlgmr.msra.gmra.mrb[0].mxu1 %vm313_vm2, %v1422_v36  ;;  %v772_v22 = vor.u32 %v771_v14, %v768_v5  ;;  %v1106_v63 = vrot.slane %v1104_v0, 5 }
  0x36   : > { %1628 = vmatpush3.bf16.msra.mxu1 %v2000_v4  ;;  %1623 = vmatprep.mubr.msk.bf16.mxu1 %vm313_vm2, %v1423_v38  ;;  %v1424_v4 = vcombine.low %v1950_v59, %v1963_v13  ;;  %v1102_v29 = vrot.slane %v1101_v27, 4 }
  0x37   : > { %1678 = vmatpush3.bf16.msra.mxu0 %v1800_v35  ;;  %1629 = vmatprep.subr.bf16.mxu1 %v1802_v40  ;;  %v773_v30 = vrot.slane %v772_v22, 4 }
  0x38   : > { %1687 = vmatprep.subr.bf16.mxu0 %v1804_v43  ;;  %v1107_v10 = vsel %vm1927_vm3, %v1102_v29, %v1106_v63 }
  0x39   : > { %v778_v31 = vsel %vm1927_vm3, %v773_v30, %v777_v26 }
  0x3a   : > { %1672 = vmatmul.mubr.msk.bf16.gmra.mrb[4].mxu0 %vm313_vm2, %v1489_v46  ;;  %1630 = vmatpush3.bf16.msra.mxu1 %v1802_v40  ;;  %v1511_v25 = vcombine.low %v778_v31, %v1107_v10 }
  0x3b   : > { %1679 = vmatprep.mubr.msk.bf16.mxu0 %vm313_vm2, %v1422_v36  ;;  %1639 = vmatprep.subr.bf16.mxu1 %v1805_v50 }
  0x3d   : > { %1624 = vmatmul.mubr.msk.bf16.gmra.mrb[4].mxu1 %vm313_vm2, %v1424_v4 }
  0x3e   : > { %1631 = vmatprep.mubr.msk.bf16.mxu1 %vm313_vm2, %v1443_v51 }
  0x42   : > { %1680 = vmatmul.mubr.msk.bf16.vlgmr.msra.gmra.mrb[0].mxu0 %vm313_vm2, %v1423_v38 }
  0x43   : > { %1688 = vmatpush3.bf16.msra.mxu0 %v1804_v43  ;;  %1683 = vmatprep.mubr.msk.bf16.mxu0 %vm313_vm2, %v1424_v4 }
  0x44   : > { %1689 = vmatprep.subr.bf16.mxu0 %v1806_v48 }
  0x45   : > { %1632 = vmatmul.mubr.msk.bf16.vlgmr.msra.gmra.mrb[0].mxu1 %vm313_vm2, %v1444_v52 }
  0x46   : > { %1640 = vmatpush3.bf16.msra.mxu1 %v1805_v50  ;;  %1635 = vmatprep.mubr.msk.bf16.mxu1 %vm313_vm2, %v1445_v53 }
  0x47   : > { %1690 = vmatpush3.bf16.msra.mxu0 %v1806_v48  ;;  %1641 = vmatprep.subr.bf16.mxu1 %v1808_v60 }
  0x48   : > { %1699 = vmatprep.subr.bf16.mxu0 %v1809_v11 }
  0x4a   : > { %1684 = vmatmul.mubr.msk.bf16.gmra.mrb[4].mxu0 %vm313_vm2, %v1500_v12  ;;  %1642 = vmatpush3.bf16.msra.mxu1 %v1808_v60 }
  0x4b   : > { %1691 = vmatprep.mubr.msk.bf16.mxu0 %vm313_vm2, %v1971_v21  ;;  %1711 = vmatprep.subr.bf16.mxu1 %v1852_v1  ;;  %v1459_v21 = vcombine.low %v1939_v49, %v1950_v59  ;;  %v1523_v49 = vcombine.low %v2094_v39, %v2111_v6 }
  0x4d   : > { %1636 = vmatmul.mubr.msk.bf16.gmra.mrb[4].mxu1 %vm313_vm2, %v1446_v18 }
  0x4e   : > { %1643 = vmatprep.mubr.msk.bf16.mxu1 %vm313_vm2, %v1457_v19 }
  0x52   : > { %1692 = vmatmul.mubr.msk.bf16.vlgmr.msra.gmra.mrb[0].mxu0 %vm313_vm2, %v2013_v61 }
  0x53   : > { %1700 = vmatpush3.bf16.msra.mxu0 %v1809_v11  ;;  %1695 = vmatprep.mubr.msk.bf16.mxu0 %vm313_vm2, %v2050_v23 }
  0x54   : > { %1701 = vmatprep.subr.bf16.mxu0 %v1812_v8 }
  0x55   : > { %1644 = vmatmul.mubr.msk.bf16.vlgmr.msra.gmra.mrb[0].mxu1 %vm313_vm2, %v1458_v17 }
  0x56   : > { %1713 = vmatpush3.bf16.msra.mxu1 %v1852_v1  ;;  %1647 = vmatprep.mubr.msk.bf16.mxu1 %vm313_vm2, %v1459_v21  ;;  %v1474_v1 = vcombine.low %v2042_v15, %v778_v31 }
  0x57   : > { %1702 = vmatpush3.bf16.msra.mxu0 %v1812_v8  ;;  %1712 = vmatprep.subr.bf16.mxu1 %v1863_v3 }
  0x5a   : > { %1696 = vmatmul.mubr.msk.bf16.gmra.mrb[4].mxu0 %vm313_vm2, %v1511_v25  ;;  %1714 = vmatpush3.bf16.msra.mxu1 %v1863_v3 }
  0x5b   : > { %1703 = vmatprep.mubr.msk.bf16.mxu0 %vm313_vm2, %v1444_v52 }
  0x5d   : > { %1648 = vmatmul.mubr.msk.bf16.gmra.mrb[4].mxu1 %vm313_vm2, %v1460_v28 }
  0x5e   : > { %1659 = vmatprep.mubr.msk.bf16.mxu1 %vm313_vm2, %v1473_v32 }
  0x62   : > { %1704 = vmatmul.mubr.msk.bf16.vlgmr.msra.gmra.mrb[0].mxu0 %vm313_vm2, %v1445_v53 }
  0x63   : > { %1707 = vmatprep.mubr.msk.bf16.mxu0 %vm313_vm2, %v1446_v18 }
  0x69   : > { %1660 = vmatmul.mubr.msk.bf16.vlgmr.msra.gmra.mrb[4].mxu1 %vm313_vm2, %v1474_v1 }
  0x6a   : > { %1708 = vmatmul.mubr.msk.bf16.gmra.mrb[4].mxu0 %vm313_vm2, %v1523_v49 }
 0x128   : > { %v1645_v3 = vpop.f32.mrb[0].mxu1 }
 0x129   : > { %v726_v59 = vpop.f32.mrb[1].mxu1 }
 0x12a   : > { %v1646_v13 = vpop.f32.mrb[2].mxu1 }
 0x12b   : > { %v729_v55 = vpop.f32.mrb[3].mxu1 }
 0x135   : > { %v1705_v61 = vpop.f32.mrb[0].mxu0 }
 0x136   : > { %v1715_v9 = vadd.f32 %v1705_v61, %v1645_v3  ;;  %v1264_v23 = vpop.f32.mrb[1].mxu0 }
 0x137   : > { %v1716_v15 = vadd.f32 %v1264_v23, %v726_v59  ;;  %v1706_v54 = vpop.f32.mrb[2].mxu0 }
 0x138   : > { %v1543_v33 = vpack.c.bf16 %v1715_v9, %v1715_v9  ;;  %v1717_v34 = vadd.f32 %v1706_v54, %v1646_v13  ;;  %v1267_v35 = vpop.f32.mrb[3].mxu0 }
 0x139   : > { %v1541_v36 = vpack.c.bf16 %v1716_v15, %v1716_v15  ;;  %v1718_v37 = vadd.f32 %v1267_v35, %v729_v55 }
 0x13a   : > { %1338 = vst.msk [vmem:[%s2191_s28 + $0x8] sm:$0xf] %vm1335_vm7, %v1543_v33  ;;  %v1544_v38 = vpack.c.bf16 %v1717_v34, %v1717_v34 }
 0x13b   : > { %1336 = vst.msk [vmem:[%s2191_s28] sm:$0xf] %vm1335_vm7, %v1541_v36  ;;  %v1542_v20 = vpack.c.bf16 %v1718_v37, %v1718_v37 }
 0x13c   : > { %1339 = vst.msk [vmem:[%s2191_s28 + $0xc] sm:$0xf] %vm1335_vm7, %v1544_v38  ;;  %v1661_v39 = vpop.f32.mrb[4].mxu1 }
 0x13d   : > { %1337 = vst.msk [vmem:[%s2191_s28 + $0x4] sm:$0xf] %vm1335_vm7, %v1542_v20  ;;  %v1709_v40 = vpop.f32.mrb[4].mxu0  ;;  %v863_v7 = vpop.f32.mrb[5].mxu1 }
 0x13e   : > { %v1719_v41 = vadd.f32 %v1709_v40, %v1661_v39  ;;  %v1280_v42 = vpop.f32.mrb[5].mxu0  ;;  %v1662_v43 = vpop.f32.mrb[6].mxu1 }
 0x13f   : > { %v1720_v44 = vadd.f32 %v1280_v42, %v863_v7  ;;  %v1710_v45 = vpop.f32.mrb[6].mxu0  ;;  %v866_v46 = vpop.f32.mrb[7].mxu1 }
 0x140   : > { %v1547_v6 = vpack.c.bf16 %v1719_v41, %v1719_v41  ;;  %v1721_v47 = vadd.f32 %v1710_v45, %v1662_v43  ;;  %v1283_v50 = vpop.f32.mrb[7].mxu0 }
 0x141   : > { %v1545_v4 = vpack.c.bf16 %v1720_v44, %v1720_v44  ;;  %v1722_v51 = vadd.f32 %v1283_v50, %v866_v46 }
 0x142   : > { %1342 = vst.msk [vmem:[%s2191_s28 + $0x18] sm:$0xf] %vm1335_vm7, %v1547_v6  ;;  %v1548_v48 = vpack.c.bf16 %v1721_v47, %v1721_v47 }
 0x143   : > { %1340 = vst.msk [vmem:[%s2191_s28 + $0x10] sm:$0xf] %vm1335_vm7, %v1545_v4  ;;  %v1546_v52 = vpack.c.bf16 %v1722_v51, %v1722_v51 }
 0x144   : > { %1343 = vst.msk [vmem:[%s2191_s28 + $0x1c] sm:$0xf] %vm1335_vm7, %v1548_v48 }
 0x145   : > { %1341 = vst.msk [vmem:[%s2191_s28 + $0x14] sm:$0xf] %vm1335_vm7, %v1546_v52 }
 0x146 PF: > { %s12_s9 = sadd.s32 1, %s1821_s9  }
 0x147   : > { %p9_p4 = scmp.ge.s32.totalorder %s12_s9, 4  }
 0x149   :  { %11 = sbr.rel (!%p9_p4) target bundleno = 1 (0x1), region = 66 }

// kernel: custom_densenet_forward.31
= control target key start
LH: loop header
LB: loop body
LE: loop exit
PB: predicated region body
PF: predicated region fallthrough
CT: control target
= control target key end

     0   :  { %v38_v0 = vlaneseq  ;;  %vm162_vm0 = vcmask 261120   ;;  %v458_v39 = vmov 0   ;;  %vm348_vm1 = vcmask 125952   ;;  %s652_s1 = inlined_call_operand.vmem [shape: bf16[32,16], index: 1, kind: input, shape index: {}]   ;;  %s653_s2 = inlined_call_operand.vmem [shape: bf16[1,32], index: 2, kind: input, shape index: {}]   ;;  %s654_s3 = inlined_call_operand.vmem [shape: bf16[1,32], index: 3, kind: input, shape index: {}]   ;;  %s655_s0 = inlined_call_operand.vmem [shape: bf16[128,32], index: 0, kind: input, shape index: {}]   ;;  %s656_s4 = inlined_call_operand.vmem [shape: bf16[128,16], index: 4, kind: output, shape index: {}]  }
   0x1   :  { %v456_v1 = vld [vmem:[%s652_s1] sm:$0xff]   ;;  %v457_v2 = vld [vmem:[%s652_s1 + $0x8] sm:$0xff]   ;;  %v22_v37 = vld [vmem:[%s655_s0 + $0x10] sm:$0xf] }
   0x2   :  { %v39_v3 = vshrl.u32 %v38_v0, 7  ;;  %431 = vmatprep.subr.bf16.mxu0 %v456_v1  ;;  %451 = vmatprep.subr.bf16.mxu1 %v456_v1  ;;  %v34_v4 = vld [vmem:[%s653_s2] sm:$0x1]  ;;  %v19_v10 = vld [vmem:[%s655_s0 + $0x4] sm:$0xf] }
   0x3   :  { %432 = vmatpush3.bf16.msra.mxu0 %v456_v1  ;;  %453 = vmatpush3.bf16.msra.mxu1 %v456_v1  ;;  %v36_v5 = vpack.i.b16 %v34_v4, %v34_v4  ;;  %v62_v7 = vld [vmem:[%s654_s3] sm:$0x1]  ;;  %v27_v14 = vld [vmem:[%s655_s0 + $0x24] sm:$0xf]  ;;  %v20_v15 = vld [vmem:[%s655_s0 + $0x8] sm:$0xf] }
   0x4   :  { %v40_v6 = vsub.s32 0, %v39_v3  ;;  %433 = vmatprep.subr.bf16.mxu0 %v457_v2  ;;  %452 = vmatprep.subr.bf16.mxu1 %v457_v2  ;;  %v64_v8 = vpack.i.b16 %v62_v7, %v62_v7  ;;  %v18_v9 = vld [vmem:[%s655_s0] sm:$0xf]  ;;  %v21_v17 = vld [vmem:[%s655_s0 + $0xc] sm:$0xf] }
   0x5   :  { %v26_v13 = vld [vmem:[%s655_s0 + $0x20] sm:$0xf]  ;;  %v28_v18 = vld [vmem:[%s655_s0 + $0x28] sm:$0xf]  ;;  %v29_v19 = vld [vmem:[%s655_s0 + $0x2c] sm:$0xf] }
   0x6   :  { %v41_v11 = vrot.slane %v36_v5, %v40_v6  ;;  %v69_v12 = vrot.slane %v64_v8, %v40_v6  ;;  %v23_v38 = vld [vmem:[%s655_s0 + $0x14] sm:$0xf]  ;;  %v30_v44 = vld [vmem:[%s655_s0 + $0x30] sm:$0xf]  ;;  %v24_v50 = vld [vmem:[%s655_s0 + $0x18] sm:$0xf] }
   0x7   :  { %434 = vmatpush3.bf16.msra.mxu0 %v457_v2  ;;  %454 = vmatpush3.bf16.msra.mxu1 %v457_v2  ;;  %v31_v45 = vld [vmem:[%s655_s0 + $0x34] sm:$0xf]  ;;  %v25_v55 = vld [vmem:[%s655_s0 + $0x1c] sm:$0xf]  ;;  %v32_v60 = vld [vmem:[%s655_s0 + $0x38] sm:$0xf] }
   0x8   :  { %v511_v16 = vcombine.low %v41_v11, %v41_v11  ;;  %v522_v20 = vcombine.low %v69_v12, %v69_v12  ;;  %v33_v0 = vld [vmem:[%s655_s0 + $0x3c] sm:$0xf] }
   0xa   :  { %v46_v21 = vmul.bf16 %v511_v16, %v18_v9  ;;  %v47_v22 = vmul.bf16 %v511_v16, %v19_v10  ;;  %v54_v23 = vmul.bf16 %v511_v16, %v26_v13  ;;  %v55_v24 = vmul.bf16 %v511_v16, %v27_v14 }
   0xb   :  { %v48_v25 = vmul.bf16 %v511_v16, %v20_v15  ;;  %v49_v26 = vmul.bf16 %v511_v16, %v21_v17  ;;  %v56_v27 = vmul.bf16 %v511_v16, %v28_v18  ;;  %v57_v28 = vmul.bf16 %v511_v16, %v29_v19 }
   0xc   :  { %v74_v29 = vadd.bf16 %v522_v20, %v46_v21  ;;  %v75_v30 = vadd.bf16 %v522_v20, %v47_v22  ;;  %v82_v31 = vadd.bf16 %v522_v20, %v54_v23  ;;  %v83_v32 = vadd.bf16 %v522_v20, %v55_v24 }
   0xd   :  { %v76_v33 = vadd.bf16 %v522_v20, %v48_v25  ;;  %v77_v34 = vadd.bf16 %v522_v20, %v49_v26  ;;  %v84_v35 = vadd.bf16 %v522_v20, %v56_v27  ;;  %v85_v36 = vadd.bf16 %v522_v20, %v57_v28 }
   0xe   :  { %v90_v40 = vmax.bf16 %v458_v39, %v74_v29  ;;  %v91_v41 = vmax.bf16 %v458_v39, %v75_v30  ;;  %v98_v42 = vmax.bf16 %v458_v39, %v82_v31  ;;  %v99_v43 = vmax.bf16 %v458_v39, %v83_v32 }
   0xf   :  { %v92_v46 = vmax.bf16 %v458_v39, %v76_v33  ;;  %v93_v47 = vmax.bf16 %v458_v39, %v77_v34  ;;  %v100_v48 = vmax.bf16 %v458_v39, %v84_v35  ;;  %v101_v49 = vmax.bf16 %v458_v39, %v85_v36 }
  0x10   :  { %v371_v51 = vcombine.low %v90_v40, %v91_v41  ;;  %v375_v52 = vcombine.low %v98_v42, %v99_v43  ;;  %v50_v53 = vmul.bf16 %v511_v16, %v22_v37  ;;  %v51_v54 = vmul.bf16 %v511_v16, %v23_v38 }
  0x11   :  { %v372_v56 = vcombine.low %v92_v46, %v93_v47  ;;  %v376_v57 = vcombine.low %v100_v48, %v101_v49  ;;  %v58_v58 = vmul.bf16 %v511_v16, %v30_v44  ;;  %v59_v59 = vmul.bf16 %v511_v16, %v31_v45 }
  0x12   :  { %435 = vmatprep.mubr.msk.bf16.mxu0 %vm162_vm0, %v371_v51  ;;  %443 = vmatprep.mubr.msk.bf16.mxu1 %vm162_vm0, %v375_v52  ;;  %v78_v61 = vadd.bf16 %v522_v20, %v50_v53  ;;  %v79_v62 = vadd.bf16 %v522_v20, %v51_v54  ;;  %v52_v63 = vmul.bf16 %v511_v16, %v24_v50 }
  0x13   :  { %436 = vmatmul.mubr.msk.bf16.vlgmr.msra.gmra.mrb[0].mxu0 %vm162_vm0, %v372_v56  ;;  %444 = vmatmul.mubr.msk.bf16.vlgmr.msra.gmra.mrb[0].mxu1 %vm162_vm0, %v376_v57  ;;  %v86_v1 = vadd.bf16 %v522_v20, %v58_v58  ;;  %v87_v2 = vadd.bf16 %v522_v20, %v59_v59  ;;  %v53_v3 = vmul.bf16 %v511_v16, %v25_v55 }
  0x14   :  { %v94_v4 = vmax.bf16 %v458_v39, %v78_v61  ;;  %v95_v5 = vmax.bf16 %v458_v39, %v79_v62  ;;  %v80_v6 = vadd.bf16 %v522_v20, %v52_v63  ;;  %v60_v7 = vmul.bf16 %v511_v16, %v32_v60 }
  0x15   :  { %v102_v8 = vmax.bf16 %v458_v39, %v86_v1  ;;  %v103_v9 = vmax.bf16 %v458_v39, %v87_v2  ;;  %v81_v10 = vadd.bf16 %v522_v20, %v53_v3  ;;  %v61_v11 = vmul.bf16 %v511_v16, %v33_v0 }
  0x16   :  { %v373_v12 = vcombine.low %v94_v4, %v95_v5  ;;  %v96_v13 = vmax.bf16 %v458_v39, %v80_v6  ;;  %v88_v14 = vadd.bf16 %v522_v20, %v60_v7 }
  0x17   :  { %v377_v15 = vcombine.low %v102_v8, %v103_v9  ;;  %v97_v17 = vmax.bf16 %v458_v39, %v81_v10  ;;  %v89_v18 = vadd.bf16 %v522_v20, %v61_v11 }
  0x18   :  { %439 = vmatprep.mubr.msk.bf16.mxu0 %vm162_vm0, %v373_v12  ;;  %v104_v19 = vmax.bf16 %v458_v39, %v88_v14 }
  0x19   :  { %447 = vmatprep.mubr.msk.bf16.mxu1 %vm162_vm0, %v377_v15  ;;  %v374_v21 = vcombine.low %v96_v13, %v97_v17  ;;  %v105_v22 = vmax.bf16 %v458_v39, %v89_v18 }
  0x1b   :  { %440 = vmatmul.mubr.msk.bf16.gmra.mrb[4].mxu0 %vm162_vm0, %v374_v21  ;;  %v378_v23 = vcombine.low %v104_v19, %v105_v22 }
  0x1d   :  { %448 = vmatmul.mubr.msk.bf16.gmra.mrb[4].mxu1 %vm162_vm0, %v378_v23 }
  0xe6   :  { %v437_v16 = vpop.f32.mrb[0].mxu0  ;;  %v445_v24 = vpop.f32.mrb[0].mxu1 }
  0xe7   :  { %v407_v25 = vpack.c.bf16 %v437_v16, %v437_v16  ;;  %v415_v26 = vpack.c.bf16 %v445_v24, %v445_v24  ;;  %v221_v27 = vpop.f32.mrb[1].mxu0  ;;  %v253_v28 = vpop.f32.mrb[1].mxu1 }
  0xe8   :  { %v405_v20 = vpack.c.bf16 %v221_v27, %v221_v27  ;;  %v413_v29 = vpack.c.bf16 %v253_v28, %v253_v28  ;;  %v438_v30 = vpop.f32.mrb[2].mxu0  ;;  %v446_v31 = vpop.f32.mrb[2].mxu1 }
  0xe9   :  { %351 = vst.msk [vmem:[%s656_s4 + $0x8] sm:$0xf] %vm348_vm1, %v407_v25  ;;  %359 = vst.msk [vmem:[%s656_s4 + $0x28] sm:$0xf] %vm348_vm1, %v415_v26  ;;  %v408_v32 = vpack.c.bf16 %v438_v30, %v438_v30  ;;  %v416_v33 = vpack.c.bf16 %v446_v31, %v446_v31  ;;  %v224_v34 = vpop.f32.mrb[3].mxu0  ;;  %v256_v35 = vpop.f32.mrb[3].mxu1 }
  0xea   :  { %349 = vst.msk [vmem:[%s656_s4] sm:$0xf] %vm348_vm1, %v405_v20  ;;  %357 = vst.msk [vmem:[%s656_s4 + $0x20] sm:$0xf] %vm348_vm1, %v413_v29  ;;  %v406_v36 = vpack.c.bf16 %v224_v34, %v224_v34  ;;  %v414_v37 = vpack.c.bf16 %v256_v35, %v256_v35 }
  0xeb   :  { %352 = vst.msk [vmem:[%s656_s4 + $0xc] sm:$0xf] %vm348_vm1, %v408_v32  ;;  %360 = vst.msk [vmem:[%s656_s4 + $0x2c] sm:$0xf] %vm348_vm1, %v416_v33 }
  0xec   :  { %350 = vst.msk [vmem:[%s656_s4 + $0x4] sm:$0xf] %vm348_vm1, %v406_v36  ;;  %358 = vst.msk [vmem:[%s656_s4 + $0x24] sm:$0xf] %vm348_vm1, %v414_v37 }
  0xee   :  { %v441_v38 = vpop.f32.mrb[4].mxu0 }
  0xef   :  { %v411_v39 = vpack.c.bf16 %v441_v38, %v441_v38  ;;  %v237_v40 = vpop.f32.mrb[5].mxu0 }
  0xf0   :  { %v449_v41 = vpop.f32.mrb[4].mxu1  ;;  %v409_v42 = vpack.c.bf16 %v237_v40, %v237_v40  ;;  %v442_v43 = vpop.f32.mrb[6].mxu0 }
  0xf1   :  { %355 = vst.msk [vmem:[%s656_s4 + $0x18] sm:$0xf] %vm348_vm1, %v411_v39  ;;  %v419_v44 = vpack.c.bf16 %v449_v41, %v449_v41  ;;  %v269_v45 = vpop.f32.mrb[5].mxu1  ;;  %v412_v46 = vpack.c.bf16 %v442_v43, %v442_v43  ;;  %v240_v47 = vpop.f32.mrb[7].mxu0 }
  0xf2   :  { %353 = vst.msk [vmem:[%s656_s4 + $0x10] sm:$0xf] %vm348_vm1, %v409_v42  ;;  %v417_v48 = vpack.c.bf16 %v269_v45, %v269_v45  ;;  %v450_v49 = vpop.f32.mrb[6].mxu1  ;;  %v410_v50 = vpack.c.bf16 %v240_v47, %v240_v47 }
  0xf3   :  { %363 = vst.msk [vmem:[%s656_s4 + $0x38] sm:$0xf] %vm348_vm1, %v419_v44  ;;  %356 = vst.msk [vmem:[%s656_s4 + $0x1c] sm:$0xf] %vm348_vm1, %v412_v46  ;;  %v420_v51 = vpack.c.bf16 %v450_v49, %v450_v49  ;;  %v272_v52 = vpop.f32.mrb[7].mxu1 }
  0xf4   :  { %361 = vst.msk [vmem:[%s656_s4 + $0x30] sm:$0xf] %vm348_vm1, %v417_v48  ;;  %354 = vst.msk [vmem:[%s656_s4 + $0x14] sm:$0xf] %vm348_vm1, %v410_v50  ;;  %v418_v53 = vpack.c.bf16 %v272_v52, %v272_v52 }
  0xf5   :  { %364 = vst.msk [vmem:[%s656_s4 + $0x3c] sm:$0xf] %vm348_vm1, %v420_v51 }
  0xf6   :  { %362 = vst.msk [vmem:[%s656_s4 + $0x34] sm:$0xf] %vm348_vm1, %v418_v53 }

// kernel: custom_densenet_forward.32
= control target key start
LH: loop header
LB: loop body
LE: loop exit
PB: predicated region body
PF: predicated region fallthrough
CT: control target
= control target key end

     0   :  { %v1169_v10 = vmov 1983009808   ;;  %vm136_vm0 = vcmask 123904   ;;  %vm1034_vm1 = vcmask 1041409   ;;  %vm1037_vm2 = vcmask 1042434   ;;  %s2291_s0 = inlined_call_operand.vmem [shape: bf16[8,2,4,2,16], index: 0, kind: input, shape index: {}]   ;;  %s2292_s1 = inlined_call_operand.vmem [shape: bf16[8,4,16], index: 1, kind: output, shape index: {}]  }
   0x1   :  { %v1183_v0 = vld [vmem:[%s2291_s0] sm:$0x1]  ;;  %v1188_v1 = vld [vmem:[%s2291_s0 + $0x1] sm:$0x1]  ;;  %v1193_v2 = vld [vmem:[%s2291_s0 + $0x2] sm:$0x1]  ;;  %v1230_v11 = vunpack.c.l.s4 %v1169_v10 }
   0x2   :  { %v1198_v3 = vld [vmem:[%s2291_s0 + $0x3] sm:$0x1]  ;;  %v1203_v4 = vld [vmem:[%s2291_s0 + $0x4] sm:$0x1]  ;;  %v1208_v5 = vld [vmem:[%s2291_s0 + $0x5] sm:$0x1]  ;;  %v2319_v40 = vunpack.c.l.bf16 %v1188_v1 }
   0x3   :  { %v1213_v6 = vld [vmem:[%s2291_s0 + $0x6] sm:$0x1]  ;;  %v1218_v7 = vld [vmem:[%s2291_s0 + $0x7] sm:$0x1]  ;;  %v1223_v8 = vld [vmem:[%s2291_s0 + $0x8] sm:$0x1]  ;;  %v2323_v1 = vunpack.c.l.bf16 %v1198_v3 }
   0x4   :  { %v1228_v9 = vld [vmem:[%s2291_s0 + $0x9] sm:$0x1]  ;;  %2305 = vst [vmem:[#allocation2_spill] sm:$0xff] %v1230_v11  ;;  %v1235_v12 = vld [vmem:[%s2291_s0 + $0xa] sm:$0x1]  ;;  %v140_v25 = vsel %vm136_vm0, %v2319_v40, 0.0  ;;  %v2320_v11 = vunpack.c.l.bf16 %v1208_v5  ;;  %v2324_v5 = vunpack.c.l.bf16 %v1218_v7 }
   0x5   :  { %v1240_v13 = vld [vmem:[%s2291_s0 + $0xb] sm:$0x1]  ;;  %v1245_v14 = vld [vmem:[%s2291_s0 + $0xc] sm:$0x1]  ;;  %v1250_v15 = vld [vmem:[%s2291_s0 + $0xd] sm:$0x1]  ;;  %v2329_v7 = vunpack.c.l.bf16 %v1235_v12 }
   0x6   :  { %v1255_v16 = vld [vmem:[%s2291_s0 + $0xe] sm:$0x1]  ;;  %v1260_v17 = vld [vmem:[%s2291_s0 + $0xf] sm:$0x1]  ;;  %v1265_v18 = vld [vmem:[%s2291_s0 + $0x10] sm:$0x1]  ;;  %v2328_v3 = vunpack.c.l.bf16 %v1250_v15 }
   0x7   :  { %v1270_v19 = vld [vmem:[%s2291_s0 + $0x11] sm:$0x1]  ;;  %v1275_v20 = vld [vmem:[%s2291_s0 + $0x12] sm:$0x1]  ;;  %v1280_v21 = vld [vmem:[%s2291_s0 + $0x13] sm:$0x1]  ;;  %v2333_v15 = vunpack.c.l.bf16 %v1265_v18 }
   0x8   :  { %v1285_v22 = vld [vmem:[%s2291_s0 + $0x14] sm:$0x1]  ;;  %v1290_v23 = vld [vmem:[%s2291_s0 + $0x15] sm:$0x1]  ;;  %v1298_v28 = vld [vmem:[%s2291_s0 + $0x16] sm:$0x1] }
   0x9   :  { %v1303_v29 = vld [vmem:[%s2291_s0 + $0x17] sm:$0x1]  ;;  %v1308_v30 = vld [vmem:[%s2291_s0 + $0x18] sm:$0x1]  ;;  %v1313_v31 = vld [vmem:[%s2291_s0 + $0x19] sm:$0x1]  ;;  %v2334_v12 = vunpack.c.l.bf16 %v1285_v22  ;;  %v2338_v18 = vunpack.c.l.bf16 %v1298_v28  ;;  %v2339_v22 = vunpack.c.l.bf16 %v1280_v21 }
   0xa   :  { %v1322_v36 = vld [vmem:[%s2291_s0 + $0x1a] sm:$0x1]  ;;  %v1327_v37 = vld [vmem:[%s2291_s0 + $0x1b] sm:$0x1]  ;;  %v1332_v38 = vld [vmem:[%s2291_s0 + $0x1c] sm:$0x1]  ;;  %v2343_v28 = vunpack.c.l.bf16 %v1313_v31 }
   0xb   :  { %v1337_v39 = vld [vmem:[%s2291_s0 + $0x1d] sm:$0x1]  ;;  %v1346_v44 = vld [vmem:[%s2291_s0 + $0x1e] sm:$0x1]  ;;  %v1351_v45 = vld [vmem:[%s2291_s0 + $0x1f] sm:$0x1] }
   0xc   :  { %v1356_v46 = vld [vmem:[%s2291_s0 + $0x20] sm:$0x1]  ;;  %v1365_v51 = vld [vmem:[%s2291_s0 + $0x21] sm:$0x1]  ;;  %v1370_v52 = vld [vmem:[%s2291_s0 + $0x22] sm:$0x1]  ;;  %v2344_v21 = vunpack.c.l.bf16 %v1337_v39 }
   0xd   :  { %v1375_v53 = vld [vmem:[%s2291_s0 + $0x23] sm:$0x1]  ;;  %v1384_v58 = vld [vmem:[%s2291_s0 + $0x24] sm:$0x1]  ;;  %v1389_v59 = vld [vmem:[%s2291_s0 + $0x25] sm:$0x1] }
   0xe   :  { %v1394_v60 = vld [vmem:[%s2291_s0 + $0x26] sm:$0x1]  ;;  %v1403_v35 = vld [vmem:[%s2291_s0 + $0x27] sm:$0x1]  ;;  %v1408_v27 = vld [vmem:[%s2291_s0 + $0x28] sm:$0x1] }
   0xf   :  { %v1413_v61 = vld [vmem:[%s2291_s0 + $0x29] sm:$0x1]  ;;  %v1422_v56 = vld [vmem:[%s2291_s0 + $0x2a] sm:$0x1]  ;;  %v1427_v55 = vld [vmem:[%s2291_s0 + $0x2b] sm:$0x1] }
  0x10   :  { %2306 = vst [vmem:[#allocation3_spill] sm:$0xff] %v1413_v61  ;;  %2307 = vst [vmem:[#allocation4_spill] sm:$0xff] %v1422_v56  ;;  %v1432_v62 = vld [vmem:[%s2291_s0 + $0x2c] sm:$0x1]  ;;  %v1441_v54 = vld [vmem:[%s2291_s0 + $0x2d] sm:$0x1] }
  0x11   :  { %2308 = vst [vmem:[#allocation5_spill] sm:$0xff] %v1427_v55  ;;  %2309 = vst [vmem:[#allocation6_spill] sm:$0xff] %v1441_v54  ;;  %v1446_v47 = vld [vmem:[%s2291_s0 + $0x2e] sm:$0x1]  ;;  %v1451_v57 = vld [vmem:[%s2291_s0 + $0x2f] sm:$0x1]  ;;  %v2318_v54 = vunpack.c.l.bf16 %v1203_v4  ;;  %v2322_v4 = vunpack.c.l.bf16 %v1213_v6  ;;  %v2327_v6 = vunpack.c.l.bf16 %v1228_v9  ;;  %v2332_v9 = vunpack.c.l.bf16 %v1260_v17 }
  0x12   :  { %2310 = vst [vmem:[#allocation7_spill] sm:$0xff] %v1446_v47  ;;  %2311 = vst [vmem:[#allocation8_spill] sm:$0xff] %v1451_v57  ;;  %v1460_v43 = vld [vmem:[%s2291_s0 + $0x30] sm:$0x1]  ;;  %v1465_v49 = vld [vmem:[%s2291_s0 + $0x31] sm:$0x1]  ;;  %v2317_v57 = vunpack.c.l.bf16 %v1183_v0  ;;  %v2321_v0 = vunpack.c.l.bf16 %v1193_v2  ;;  %v2326_v2 = vunpack.c.l.bf16 %v1245_v14  ;;  %v2331_v14 = vunpack.c.l.bf16 %v1240_v13 }
  0x13   :  { %2312 = vst [vmem:[#allocation9_spill] sm:$0xff] %v1460_v43  ;;  %2313 = vst [vmem:[#allocation10_spill] sm:$0xff] %v1465_v49  ;;  %v1470_v10 = vld [vmem:[%s2291_s0 + $0x32] sm:$0x1]  ;;  %v1479_v41 = vld [vmem:[%s2291_s0 + $0x33] sm:$0x1]  ;;  %v2336_v13 = vunpack.c.l.bf16 %v1290_v23  ;;  %v2337_v17 = vunpack.c.l.bf16 %v1275_v20  ;;  %v2341_v23 = vunpack.c.l.bf16 %v1308_v30  ;;  %v2342_v20 = vunpack.c.l.bf16 %v1332_v38 }
  0x14   :  { %2314 = vst [vmem:[#allocation11_spill] sm:$0xff] %v1470_v10  ;;  %2315 = vst [vmem:[#allocation12_spill] sm:$0xff] %v1479_v41  ;;  %v1484_v32 = vld [vmem:[%s2291_s0 + $0x34] sm:$0x1]  ;;  %v1489_v63 = vld [vmem:[%s2291_s0 + $0x35] sm:$0x1] }
  0x15   :  { %2316 = vst [vmem:[#allocation13_spill] sm:$0xff] %v1489_v63  ;;  %v1498_v26 = vld [vmem:[%s2291_s0 + $0x36] sm:$0x1]  ;;  %v1503_v34 = vld [vmem:[%s2291_s0 + $0x37] sm:$0x1]  ;;  %v137_v47 = vsel %vm136_vm0, %v2317_v57, 0.0 }
  0x16   :  { %v1508_v48 = vld [vmem:[%s2291_s0 + $0x38] sm:$0x1]  ;;  %v1517_v33 = vld [vmem:[%s2291_s0 + $0x39] sm:$0x1]  ;;  %v1522_v24 = vld [vmem:[%s2291_s0 + $0x3a] sm:$0x1] }
  0x17   :  { %v1527_v50 = vld [vmem:[%s2291_s0 + $0x3b] sm:$0x1]  ;;  %v1536_v55 = vld [vmem:[%s2291_s0 + $0x3c] sm:$0x1]  ;;  %v1541_v56 = vld [vmem:[%s2291_s0 + $0x3d] sm:$0x1] }
  0x18   :  { %v1546_v42 = vld [vmem:[%s2291_s0 + $0x3e] sm:$0x1]  ;;  %v1555_v43 = vld [vmem:[%s2291_s0 + $0x3f] sm:$0x1]  ;;  %v138_v61 = vsel %vm136_vm0, %v2318_v54, 0.0  ;;  %v141_v49 = vsel %vm136_vm0, %v2320_v11, 0.0 }
  0x19   :  { %v1579_v63 = vadd.f32 %v138_v61, %v137_v47  ;;  %v1581_v41 = vadd.f32 %v141_v49, %v140_v25  ;;  %v143_v57 = vsel %vm136_vm0, %v2321_v0, 0.0  ;;  %v144_v54 = vsel %vm136_vm0, %v2322_v4, 0.0 }
  0x1a   :  { %v146_v40 = vsel %vm136_vm0, %v2323_v1, 0.0  ;;  %v147_v11 = vsel %vm136_vm0, %v2324_v5, 0.0  ;;  %v2325_v47 = vunpack.c.l.bf16 %v1223_v8  ;;  %v150_v49 = vsel %vm136_vm0, %v2326_v2, 0.0 }
  0x1b   :  { %v152_v61 = vsel %vm136_vm0, %v2327_v6, 0.0  ;;  %v153_v0 = vsel %vm136_vm0, %v2328_v3, 0.0  ;;  %v155_v4 = vsel %vm136_vm0, %v2329_v7, 0.0  ;;  %v2330_v8 = vunpack.c.l.bf16 %v1255_v16 }
  0x1c   :  { %v149_v25 = vsel %vm136_vm0, %v2325_v47, 0.0  ;;  %v158_v5 = vsel %vm136_vm0, %v2331_v14, 0.0  ;;  %v159_v47 = vsel %vm136_vm0, %v2332_v9, 0.0  ;;  %v161_v2 = vsel %vm136_vm0, %v2333_v15, 0.0 }
  0x1d   :  { %v156_v1 = vsel %vm136_vm0, %v2330_v8, 0.0  ;;  %v162_v6 = vsel %vm136_vm0, %v2334_v12, 0.0  ;;  %v2335_v16 = vunpack.c.l.bf16 %v1270_v19  ;;  %v165_v7 = vsel %vm136_vm0, %v2336_v13, 0.0 }
  0x1e   :  { %v167_v8 = vsel %vm136_vm0, %v2337_v17, 0.0  ;;  %v168_v14 = vsel %vm136_vm0, %v2338_v18, 0.0  ;;  %v170_v9 = vsel %vm136_vm0, %v2339_v22, 0.0  ;;  %v2340_v19 = vunpack.c.l.bf16 %v1303_v29 }
  0x1f   :  { %v164_v3 = vsel %vm136_vm0, %v2335_v16, 0.0  ;;  %v173_v12 = vsel %vm136_vm0, %v2341_v23, 0.0  ;;  %v174_v16 = vsel %vm136_vm0, %v2342_v20, 0.0  ;;  %v176_v13 = vsel %vm136_vm0, %v2343_v28, 0.0 }
  0x20   :  { %v171_v15 = vsel %vm136_vm0, %v2340_v19, 0.0  ;;  %v177_v17 = vsel %vm136_vm0, %v2344_v21, 0.0  ;;  %v145_v18 = vadd.f32 %v144_v54, %v143_v57  ;;  %v148_v29 = vadd.f32 %v147_v11, %v146_v40  ;;  %v2363_v21 = vld [vmem:[#allocation4_spill] sm:$0xff] }
  0x21   :  { %v151_v22 = vadd.f32 %v150_v49, %v149_v25  ;;  %v154_v19 = vadd.f32 %v153_v0, %v152_v61  ;;  %v1655_v10 = vadd.f32 %v156_v1, %v155_v4  ;;  %v1657_v30 = vadd.f32 %v159_v47, %v158_v5 }
  0x22   :  { %v1659_v23 = vadd.f32 %v162_v6, %v161_v2  ;;  %v1661_v38 = vadd.f32 %v165_v7, %v164_v3  ;;  %v1663_v20 = vadd.f32 %v168_v14, %v167_v8  ;;  %v1665_v31 = vadd.f32 %v171_v15, %v170_v9  ;;  %v2359_v15 = vld [vmem:[#allocation3_spill] sm:$0xff] }
  0x23   :  { %v1667_v28 = vadd.f32 %v174_v16, %v173_v12  ;;  %v1669_v39 = vadd.f32 %v177_v17, %v176_v13  ;;  %v2345_v57 = vunpack.c.l.bf16 %v1322_v36  ;;  %v2346_v40 = vunpack.c.l.bf16 %v1346_v44  ;;  %v2361_v16 = vld [vmem:[#allocation6_spill] sm:$0xff] }
  0x24   :  { %v2347_v25 = vunpack.c.l.bf16 %v1327_v37  ;;  %v2348_v61 = vunpack.c.l.bf16 %v1351_v45  ;;  %v2349_v4 = vunpack.c.l.bf16 %v1356_v46  ;;  %v2350_v36 = vunpack.c.l.bf16 %v1384_v58 }
  0x25   :  { %v179_v54 = vsel %vm136_vm0, %v2345_v57, 0.0  ;;  %v180_v11 = vsel %vm136_vm0, %v2346_v40, 0.0  ;;  %v2351_v44 = vunpack.c.l.bf16 %v1365_v51  ;;  %v2352_v37 = vunpack.c.l.bf16 %v1389_v59  ;;  %v2365_v57 = vld [vmem:[#allocation7_spill] sm:$0xff] }
  0x26   :  { %v182_v49 = vsel %vm136_vm0, %v2347_v25, 0.0  ;;  %v183_v0 = vsel %vm136_vm0, %v2348_v61, 0.0  ;;  %v185_v1 = vsel %vm136_vm0, %v2349_v4, 0.0  ;;  %v186_v5 = vsel %vm136_vm0, %v2350_v36, 0.0  ;;  %v2367_v25 = vld [vmem:[#allocation5_spill] sm:$0xff]  ;;  %v2369_v4 = vld [vmem:[#allocation8_spill] sm:$0xff] }
  0x27   :  { %v188_v47 = vsel %vm136_vm0, %v2351_v44, 0.0  ;;  %v189_v2 = vsel %vm136_vm0, %v2352_v37, 0.0  ;;  %v2353_v45 = vunpack.c.l.bf16 %v1370_v52  ;;  %v2354_v46 = vunpack.c.l.bf16 %v1394_v60 }
  0x28   :  { %v2355_v58 = vunpack.c.l.bf16 %v1375_v53  ;;  %v2356_v51 = vunpack.c.l.bf16 %v1403_v35  ;;  %v2357_v59 = vunpack.c.l.bf16 %v1408_v27  ;;  %v2358_v52 = vunpack.c.l.bf16 %v1432_v62 }
  0x29   :  { %v191_v6 = vsel %vm136_vm0, %v2353_v45, 0.0  ;;  %v192_v3 = vsel %vm136_vm0, %v2354_v46, 0.0  ;;  %v2360_v60 = vunpack.c.l.bf16 %v2359_v15  ;;  %v2362_v53 = vunpack.c.l.bf16 %v2361_v16  ;;  %v2371_v46 = vld [vmem:[#allocation9_spill] sm:$0xff] }
  0x2a   :  { %v194_v7 = vsel %vm136_vm0, %v2355_v58, 0.0  ;;  %v195_v8 = vsel %vm136_vm0, %v2356_v51, 0.0  ;;  %v197_v14 = vsel %vm136_vm0, %v2357_v59, 0.0  ;;  %v198_v9 = vsel %vm136_vm0, %v2358_v52, 0.0 }
  0x2b   :  { %v200_v12 = vsel %vm136_vm0, %v2360_v60, 0.0  ;;  %v201_v13 = vsel %vm136_vm0, %v2362_v53, 0.0  ;;  %v2364_v35 = vunpack.c.l.bf16 %v2363_v21  ;;  %v2366_v27 = vunpack.c.l.bf16 %v2365_v57 }
  0x2c   :  { %v2368_v62 = vunpack.c.l.bf16 %v2367_v25  ;;  %v2370_v36 = vunpack.c.l.bf16 %v2369_v4  ;;  %v1731_v37 = vadd.f32 %v180_v11, %v179_v54  ;;  %v1733_v45 = vadd.f32 %v183_v0, %v182_v49 }
  0x2d   :  { %v203_v17 = vsel %vm136_vm0, %v2364_v35, 0.0  ;;  %v204_v40 = vsel %vm136_vm0, %v2366_v27, 0.0  ;;  %v2372_v58 = vunpack.c.l.bf16 %v2371_v46  ;;  %v2373_v59 = vunpack.c.l.bf16 %v1484_v32  ;;  %v2374_v32 = vld [vmem:[#allocation10_spill] sm:$0xff] }
  0x2e   :  { %v206_v61 = vsel %vm136_vm0, %v2368_v62, 0.0  ;;  %v207_v44 = vsel %vm136_vm0, %v2370_v36, 0.0  ;;  %v1741_v15 = vadd.f32 %v186_v5, %v185_v1  ;;  %v1743_v60 = vadd.f32 %v189_v2, %v188_v47  ;;  %v2376_v5 = vld [vmem:[#allocation13_spill] sm:$0xff] }
  0x2f   :  { %v209_v51 = vsel %vm136_vm0, %v2372_v58, 0.0  ;;  %v210_v52 = vsel %vm136_vm0, %v2373_v59, 0.0  ;;  %v1745_v16 = vadd.f32 %v192_v3, %v191_v6  ;;  %v1747_v53 = vadd.f32 %v195_v8, %v194_v7  ;;  %v2378_v6 = vld [vmem:[#allocation11_spill] sm:$0xff] }
  0x30   :  { %v1749_v54 = vadd.f32 %v198_v9, %v197_v14  ;;  %v1751_v11 = vadd.f32 %v201_v13, %v200_v12  ;;  %v1753_v49 = vadd.f32 %v204_v40, %v203_v17  ;;  %v1755_v0 = vadd.f32 %v207_v44, %v206_v61  ;;  %v2381_v9 = vld [vmem:[#allocation12_spill] sm:$0xff] }
  0x31   :  { %v1757_v21 = vadd.f32 %v210_v52, %v209_v51  ;;  %v2375_v35 = vunpack.c.l.bf16 %v2374_v32  ;;  %v2377_v47 = vunpack.c.l.bf16 %v2376_v5  ;;  %v2379_v3 = vunpack.c.l.bf16 %v2378_v6 }
  0x32   :  { %v2380_v8 = vunpack.c.l.bf16 %v1498_v26  ;;  %v2382_v12 = vunpack.c.l.bf16 %v2381_v9  ;;  %v2383_v17 = vunpack.c.l.bf16 %v1503_v34  ;;  %v233_v27 = vsel %vm136_vm0, %v1579_v63, 0.0 }
  0x33   :  { %v212_v1 = vsel %vm136_vm0, %v2375_v35, 0.0  ;;  %v213_v2 = vsel %vm136_vm0, %v2377_v47, 0.0  ;;  %v215_v7 = vsel %vm136_vm0, %v2379_v3, 0.0  ;;  %v2384_v40 = vunpack.c.l.bf16 %v1508_v48 }
  0x34   :  { %v216_v14 = vsel %vm136_vm0, %v2380_v8, 0.0  ;;  %v218_v13 = vsel %vm136_vm0, %v2382_v12, 0.0  ;;  %v219_v57 = vsel %vm136_vm0, %v2383_v17, 0.0  ;;  %v234_v62 = vrot.slane %v233_v27, 4 }
  0x35   :  { %v221_v25 = vsel %vm136_vm0, %v2384_v40, 0.0  ;;  %v240_v26 = vsel %vm136_vm0, %v1581_v41, 0.0  ;;  %v247_v61 = vsel %vm136_vm0, %v145_v18, 0.0  ;;  %v254_v44 = vsel %vm136_vm0, %v148_v29, 0.0 }
  0x36   :  { %v241_v4 = vrot.slane %v240_v26, 4  ;;  %v248_v36 = vrot.slane %v247_v61, 4  ;;  %v261_v34 = vsel %vm136_vm0, %v151_v22, 0.0  ;;  %v235_v46 = vadd.f32 %v234_v62, %v233_v27 }
  0x37   :  { %v255_v58 = vrot.slane %v254_v44, 4  ;;  %v262_v51 = vrot.slane %v261_v34, 4  ;;  %v268_v63 = vsel %vm136_vm0, %v154_v19, 0.0  ;;  %v275_v32 = vsel %vm136_vm0, %v1655_v10, 0.0 }
  0x38   :  { %v242_v48 = vadd.f32 %v241_v4, %v240_v26  ;;  %v249_v59 = vadd.f32 %v248_v36, %v247_v61  ;;  %v269_v52 = vrot.slane %v268_v63, 4  ;;  %v236_v41 = vrot.slane %v235_v46, 2 }
  0x39   :  { %v256_v35 = vadd.f32 %v255_v58, %v254_v44  ;;  %v263_v18 = vadd.f32 %v262_v51, %v261_v34  ;;  %v276_v5 = vrot.slane %v275_v32, 4  ;;  %v2385_v47 = vunpack.c.l.bf16 %v1536_v55 }
  0x3a   :  { %v2386_v22 = vunpack.c.l.bf16 %v1517_v33  ;;  %v243_v3 = vrot.slane %v242_v48, 2  ;;  %v282_v19 = vsel %vm136_vm0, %v1657_v30, 0.0  ;;  %v2387_v8 = vunpack.c.l.bf16 %v1541_v56 }
  0x3b   :  { %v222_v29 = vsel %vm136_vm0, %v2385_v47, 0.0  ;;  %v2388_v9 = vunpack.c.l.bf16 %v1522_v24  ;;  %v2389_v55 = vunpack.c.l.bf16 %v1546_v42  ;;  %v250_v27 = vrot.slane %v249_v59, 2 }
  0x3c   :  { %v224_v6 = vsel %vm136_vm0, %v2386_v22, 0.0  ;;  %v225_v10 = vsel %vm136_vm0, %v2387_v8, 0.0  ;;  %v2390_v33 = vunpack.c.l.bf16 %v1527_v50  ;;  %v237_v62 = vadd.f32 %v236_v41, %v235_v46 }
  0x3d   :  { %v227_v12 = vsel %vm136_vm0, %v2388_v9, 0.0  ;;  %v228_v17 = vsel %vm136_vm0, %v2389_v55, 0.0  ;;  %v270_v26 = vadd.f32 %v269_v52, %v268_v63  ;;  %v283_v30 = vrot.slane %v282_v19, 4 }
  0x3e   :  { %v230_v40 = vsel %vm136_vm0, %v2390_v33, 0.0  ;;  %v2391_v56 = vunpack.c.l.bf16 %v1555_v43  ;;  %v257_v4 = vrot.slane %v256_v35, 2  ;;  %v264_v24 = vrot.slane %v263_v18, 2 }
  0x3f   :  { %v277_v36 = vadd.f32 %v276_v5, %v275_v32  ;;  %v1813_v44 = vadd.f32 %v213_v2, %v212_v1  ;;  %v1815_v42 = vadd.f32 %v216_v14, %v215_v7  ;;  %v244_v34 = vadd.f32 %v243_v3, %v242_v48 }
  0x40   :  { %v231_v61 = vsel %vm136_vm0, %v2391_v56, 0.0  ;;  %v284_v58 = vadd.f32 %v283_v30, %v282_v19  ;;  %v1817_v51 = vadd.f32 %v219_v57, %v218_v13  ;;  %v1819_v50 = vadd.f32 %v222_v29, %v221_v25 }
  0x41   :  { %v1821_v46 = vadd.f32 %v225_v10, %v224_v6  ;;  %v251_v63 = vadd.f32 %v250_v27, %v249_v59  ;;  %v1823_v52 = vadd.f32 %v228_v17, %v227_v12  ;;  %v1825_v43 = vadd.f32 %v231_v61, %v230_v40 }
  0x42   :  { %v238_v41 = vrot.slane %v237_v62, 1  ;;  %v271_v47 = vrot.slane %v270_v26, 2  ;;  %v258_v32 = vadd.f32 %v257_v4, %v256_v35  ;;  %v265_v1 = vadd.f32 %v264_v24, %v263_v18 }
  0x43   :  { %v278_v2 = vrot.slane %v277_v36, 2  ;;  %v289_v7 = vsel %vm136_vm0, %v1659_v23, 0.0  ;;  %v245_v14 = vrot.slane %v244_v34, 1  ;;  %v285_v13 = vrot.slane %v284_v58, 2 }
  0x44   :  { %v290_v57 = vrot.slane %v289_v7, 4  ;;  %v296_v25 = vsel %vm136_vm0, %v1661_v38, 0.0  ;;  %v252_v48 = vrot.slane %v251_v63, 1  ;;  %v303_v5 = vsel %vm136_vm0, %v1663_v20, 0.0 }
  0x45   :  { %v297_v59 = vrot.slane %v296_v25, 4  ;;  %v310_v29 = vsel %vm136_vm0, %v1665_v31, 0.0  ;;  %v272_v35 = vadd.f32 %v271_v47, %v270_v26  ;;  %v304_v22 = vrot.slane %v303_v5, 4 }
  0x46   :  { %v291_v18 = vadd.f32 %v290_v57, %v289_v7  ;;  %v311_v6 = vrot.slane %v310_v29, 4  ;;  %v317_v23 = vsel %vm136_vm0, %v1667_v28, 0.0  ;;  %v324_v19 = vsel %vm136_vm0, %v1669_v39, 0.0 }
  0x47   :  { %v298_v3 = vadd.f32 %v297_v59, %v296_v25  ;;  %v331_v38 = vsel %vm136_vm0, %v1731_v37, 0.0  ;;  %v279_v8 = vadd.f32 %v278_v2, %v277_v36  ;;  %v286_v10 = vadd.f32 %v285_v13, %v284_v58 }
  0x48   :  { %v292_v20 = vrot.slane %v291_v18, 2  ;;  %v305_v9 = vadd.f32 %v304_v22, %v303_v5  ;;  %v312_v12 = vadd.f32 %v311_v6, %v310_v29  ;;  %v318_v31 = vrot.slane %v317_v23, 4 }
  0x49   :  { %v325_v55 = vrot.slane %v324_v19, 4  ;;  %v332_v17 = vrot.slane %v331_v38, 4  ;;  %v1841_v27 = vadd.f32 %v238_v41, %v237_v62  ;;  %v259_v33 = vrot.slane %v258_v32, 1 }
  0x4a   :  { %v266_v40 = vrot.slane %v265_v1, 1  ;;  %v338_v28 = vsel %vm136_vm0, %v1733_v45, 0.0  ;;  %v273_v26 = vrot.slane %v272_v35, 1  ;;  %v299_v39 = vrot.slane %v298_v3, 2 }
  0x4b   :  { %v306_v30 = vrot.slane %v305_v9, 2  ;;  %v319_v56 = vadd.f32 %v318_v31, %v317_v23  ;;  %v280_v37 = vrot.slane %v279_v8, 1  ;;  %v287_v61 = vrot.slane %v286_v10, 1 }
  0x4c   :  { %v326_v4 = vadd.f32 %v325_v55, %v324_v19  ;;  %v339_v24 = vrot.slane %v338_v28, 4  ;;  %v1845_v36 = vadd.f32 %v245_v14, %v244_v34  ;;  %v293_v58 = vadd.f32 %v292_v20, %v291_v18 }
  0x4d   :  { %v313_v47 = vrot.slane %v312_v12, 2  ;;  %v333_v2 = vadd.f32 %v332_v17, %v331_v38  ;;  %v1847_v62 = vadd.f32 %v252_v48, %v251_v63  ;;  %v1849_v41 = vadd.f32 %v259_v33, %v258_v32 }
  0x4e   :  { %v1851_v7 = vadd.f32 %v266_v40, %v265_v1  ;;  %v340_v45 = vadd.f32 %v339_v24, %v338_v28  ;;  %v1853_v13 = vadd.f32 %v273_v26, %v272_v35  ;;  %v300_v57 = vadd.f32 %v299_v39, %v298_v3 }
  0x4f   :  { %v307_v25 = vadd.f32 %v306_v30, %v305_v9  ;;  %v320_v59 = vrot.slane %v319_v56, 2  ;;  %v1855_v5 = vadd.f32 %v280_v37, %v279_v8  ;;  %v1857_v29 = vadd.f32 %v287_v61, %v286_v10 }
  0x50   :  { %v327_v34 = vrot.slane %v326_v4, 2  ;;  %v345_v14 = vsel %vm136_vm0, %v1741_v15, 0.0  ;;  %v294_v63 = vrot.slane %v293_v58, 1  ;;  %v314_v48 = vadd.f32 %v313_v47, %v312_v12 }
  0x51   :  { %v334_v32 = vrot.slane %v333_v2, 2  ;;  %v346_v18 = vrot.slane %v345_v14, 4  ;;  %v341_v1 = vrot.slane %v340_v45, 2  ;;  %v352_v35 = vsel %vm136_vm0, %v1743_v60, 0.0 }
  0x52   :  { %v359_v22 = vsel %vm136_vm0, %v1745_v16, 0.0  ;;  %v366_v6 = vsel %vm136_vm0, %v1747_v53, 0.0  ;;  %v301_v3 = vrot.slane %v300_v57, 1  ;;  %v308_v23 = vrot.slane %v307_v25, 1 }
  0x53   :  { %v321_v19 = vadd.f32 %v320_v59, %v319_v56  ;;  %v347_v38 = vadd.f32 %v346_v18, %v345_v14  ;;  %v328_v8 = vadd.f32 %v327_v34, %v326_v4  ;;  %v353_v15 = vrot.slane %v352_v35, 4 }
  0x54   :  { %v360_v10 = vrot.slane %v359_v22, 4  ;;  %v367_v20 = vrot.slane %v366_v6, 4  ;;  %v373_v12 = vsel %vm136_vm0, %v1749_v54, 0.0  ;;  %v380_v60 = vsel %vm136_vm0, %v1751_v11, 0.0 }
  0x55   :  { %v348_v9 = vrot.slane %v347_v38, 2  ;;  %v387_v16 = vsel %vm136_vm0, %v1753_v49, 0.0  ;;  %v335_v31 = vadd.f32 %v334_v32, %v333_v2  ;;  %v342_v53 = vadd.f32 %v341_v1, %v340_v45 }
  0x56   :  { %v354_v55 = vadd.f32 %v353_v15, %v352_v35  ;;  %v361_v17 = vadd.f32 %v360_v10, %v359_v22  ;;  %v368_v40 = vadd.f32 %v367_v20, %v366_v6  ;;  %v374_v28 = vrot.slane %v373_v12, 4 }
  0x57   :  { %v349_v33 = vadd.f32 %v348_v9, %v347_v38  ;;  %v381_v26 = vrot.slane %v380_v60, 4  ;;  %v315_v39 = vrot.slane %v314_v48, 1  ;;  %v322_v30 = vrot.slane %v321_v19, 1 }
  0x58   :  { %v388_v56 = vrot.slane %v387_v16, 4  ;;  %v394_v54 = vsel %vm136_vm0, %v1755_v0, 0.0  ;;  %v1875_v37 = vadd.f32 %v294_v63, %v293_v58  ;;  %v355_v11 = vrot.slane %v354_v55, 2 }
  0x59   :  { %v362_v61 = vrot.slane %v361_v17, 2  ;;  %v375_v4 = vadd.f32 %v374_v28, %v373_v12  ;;  %v329_v49 = vrot.slane %v328_v8, 1  ;;  %v336_v24 = vrot.slane %v335_v31, 1 }
  0x5a   :  { %v343_v47 = vrot.slane %v342_v53, 1  ;;  %v382_v2 = vadd.f32 %v381_v26, %v380_v60  ;;  %v1877_v45 = vadd.f32 %v301_v3, %v300_v57  ;;  %v350_v59 = vrot.slane %v349_v33, 1 }
  0x5b   :  { %v369_v34 = vrot.slane %v368_v40, 2  ;;  %v395_v14 = vrot.slane %v394_v54, 4  ;;  %v1879_v32 = vadd.f32 %v308_v23, %v307_v25  ;;  %v1881_v18 = vadd.f32 %v315_v39, %v314_v48 }
  0x5c   :  { %v1883_v1 = vadd.f32 %v322_v30, %v321_v19  ;;  %v389_v0 = vadd.f32 %v388_v56, %v387_v16  ;;  %v1885_v58 = vadd.f32 %v355_v11, %v354_v55  ;;  %v1887_v63 = vadd.f32 %v362_v61, %v361_v17 }
  0x5d   :  { %v376_v35 = vrot.slane %v375_v4, 2  ;;  %v401_v22 = vsel %vm136_vm0, %v1757_v21, 0.0  ;;  %v1891_v57 = vadd.f32 %v329_v49, %v328_v8  ;;  %v1893_v6 = vadd.f32 %v336_v24, %v335_v31 }
  0x5e   :  { %v1895_v3 = vadd.f32 %v343_v47, %v342_v53  ;;  %v383_v25 = vrot.slane %v382_v2, 2  ;;  %v1897_v48 = vadd.f32 %v350_v59, %v349_v33  ;;  %v370_v23 = vadd.f32 %v369_v34, %v368_v40 }
  0x5f   :  { %v396_v19 = vadd.f32 %v395_v14, %v394_v54  ;;  %v402_v38 = vrot.slane %v401_v22, 4  ;;  %v390_v15 = vrot.slane %v389_v0, 2  ;;  %v408_v10 = vsel %vm136_vm0, %v1813_v44, 0.0 }
  0x60   :  { %v415_v20 = vsel %vm136_vm0, %v1815_v42, 0.0  ;;  %v422_v21 = vsel %vm136_vm0, %v1817_v51, 0.0  ;;  %v357_v8 = vrot.slane %v1885_v58, 1  ;;  %v364_v9 = vrot.slane %v1887_v63, 1 }
  0x61   :  { %v377_v12 = vadd.f32 %v376_v35, %v375_v4  ;;  %v403_v60 = vadd.f32 %v402_v38, %v401_v22  ;;  %v384_v16 = vadd.f32 %v383_v25, %v382_v2  ;;  %v409_v31 = vrot.slane %v408_v10, 4 }
  0x62   :  { %v416_v53 = vrot.slane %v415_v20, 4  ;;  %v423_v55 = vrot.slane %v422_v21, 4  ;;  %v397_v17 = vrot.slane %v396_v19, 2  ;;  %v429_v44 = vsel %vm136_vm0, %v1819_v50, 0.0 }
  0x63   :  { %v436_v42 = vsel %vm136_vm0, %v1821_v46, 0.0  ;;  %v443_v51 = vsel %vm136_vm0, %v1823_v52, 0.0  ;;  %v404_v33 = vrot.slane %v403_v60, 2  ;;  %v410_v40 = vadd.f32 %v409_v31, %v408_v10 }
  0x64   :  { %v417_v28 = vadd.f32 %v416_v53, %v415_v20  ;;  %v424_v26 = vadd.f32 %v423_v55, %v422_v21  ;;  %v391_v39 = vadd.f32 %v390_v15, %v389_v0  ;;  %v430_v30 = vrot.slane %v429_v44, 4 }
  0x65   :  { %v437_v56 = vrot.slane %v436_v42, 4  ;;  %v444_v54 = vrot.slane %v443_v51, 4  ;;  %v411_v11 = vrot.slane %v410_v40, 2  ;;  %v450_v50 = vsel %vm136_vm0, %v1825_v43, 0.0 }
  0x66   :  { %v418_v61 = vrot.slane %v417_v28, 2  ;;  %v425_v4 = vrot.slane %v424_v26, 2  ;;  %v398_v49 = vadd.f32 %v397_v17, %v396_v19  ;;  %v431_v24 = vadd.f32 %v430_v30, %v429_v44 }
  0x67   :  { %v438_v46 = vadd.f32 %v437_v56, %v436_v42  ;;  %v445_v47 = vadd.f32 %v444_v54, %v443_v51  ;;  %v405_v2 = vadd.f32 %v404_v33, %v403_v60  ;;  %v412_v52 = vadd.f32 %v411_v11, %v410_v40 }
  0x68   :  { %v419_v59 = vadd.f32 %v418_v61, %v417_v28  ;;  %v451_v34 = vrot.slane %v450_v50, 4  ;;  %v426_v14 = vadd.f32 %v425_v4, %v424_v26  ;;  %v432_v35 = vrot.slane %v431_v24, 2 }
  0x69   :  { %v439_v0 = vrot.slane %v438_v46, 2  ;;  %v446_v22 = vrot.slane %v445_v47, 2  ;;  %v371_v25 = vrot.slane %v370_v23, 1  ;;  %v378_v38 = vrot.slane %v377_v12, 1 }
  0x6a   :  { %v385_v15 = vrot.slane %v384_v16, 1  ;;  %v452_v10 = vadd.f32 %v451_v34, %v450_v50  ;;  %v392_v20 = vrot.slane %v391_v39, 1  ;;  %v433_v21 = vadd.f32 %v432_v35, %v431_v24 }
  0x6b   :  { %v440_v31 = vadd.f32 %v439_v0, %v438_v46  ;;  %v447_v43 = vadd.f32 %v446_v22, %v445_v47  ;;  %v399_v19 = vrot.slane %v398_v49, 1  ;;  %v406_v53 = vrot.slane %v405_v2, 1 }
  0x6c   :  { %v413_v55 = vrot.slane %v412_v52, 1  ;;  %v453_v17 = vrot.slane %v452_v10, 2  ;;  %v358_v60 = vadd.f32 %v357_v8, %v1885_v58  ;;  %v365_v44 = vadd.f32 %v364_v9, %v1887_v63 }
  0x6d   :  { %v420_v42 = vrot.slane %v419_v59, 1  ;;  %v427_v51 = vrot.slane %v426_v14, 1  ;;  %v372_v33 = vadd.f32 %v371_v25, %v370_v23  ;;  %v379_v40 = vadd.f32 %v378_v38, %v377_v12 }
  0x6e   :  { %v434_v28 = vrot.slane %v433_v21, 1  ;;  %v454_v26 = vadd.f32 %v453_v17, %v452_v10  ;;  %v386_v30 = vadd.f32 %v385_v15, %v384_v16  ;;  %v393_v56 = vadd.f32 %v392_v20, %v391_v39 }
  0x6f   :  { %v441_v54 = vrot.slane %v440_v31, 1  ;;  %v448_v11 = vrot.slane %v447_v43, 1  ;;  %v400_v61 = vadd.f32 %v399_v19, %v398_v49  ;;  %v407_v4 = vadd.f32 %v406_v53, %v405_v2 }
  0x70   :  { %v414_v50 = vadd.f32 %v413_v55, %v412_v52  ;;  %v1918_v24 = vmul.f32 0.25, %v1841_v27  ;;  %v421_v46 = vadd.f32 %v420_v42, %v419_v59  ;;  %v428_v58 = vadd.f32 %v427_v51, %v426_v14 }
  0x71   :  { %v455_v8 = vrot.slane %v454_v26, 1  ;;  %v1921_v63 = vmul.f32 0.25, %v1845_v36  ;;  %v435_v23 = vadd.f32 %v434_v28, %v433_v21  ;;  %v1924_v9 = vmul.f32 0.25, %v1847_v62 }
  0x72   :  { %v1927_v12 = vmul.f32 0.25, %v1849_v41  ;;  %v1930_v16 = vmul.f32 0.25, %v1851_v7  ;;  %v442_v39 = vadd.f32 %v441_v54, %v440_v31  ;;  %v449_v49 = vadd.f32 %v448_v11, %v447_v43 }
  0x73   :  { %v1933_v27 = vmul.f32 0.25, %v1853_v13  ;;  %v1936_v47 = vmul.f32 0.25, %v1855_v5  ;;  %v1939_v36 = vmul.f32 0.25, %v1857_v29  ;;  %v1942_v62 = vmul.f32 0.25, %v1875_v37 }
  0x74   :  { %v1945_v41 = vmul.f32 0.25, %v1877_v45  ;;  %v1948_v7 = vmul.f32 0.25, %v1879_v32  ;;  %v456_v2 = vadd.f32 %v455_v8, %v454_v26  ;;  %v1951_v52 = vmul.f32 0.25, %v1881_v18 }
  0x75   :  { %v1954_v13 = vmul.f32 0.25, %v1883_v1  ;;  %v1957_v5 = vmul.f32 0.25, %v1891_v57  ;;  %v1960_v29 = vmul.f32 0.25, %v1893_v6  ;;  %v1963_v37 = vmul.f32 0.25, %v1895_v3 }
  0x76   :  { %v1966_v45 = vmul.f32 0.25, %v1897_v48  ;;  %v1968_v32 = vmul.f32 0.25, %v358_v60  ;;  %v1970_v59 = vmul.f32 0.25, %v365_v44  ;;  %v1972_v18 = vmul.f32 0.25, %v372_v33 }
  0x77   :  { %v1974_v1 = vmul.f32 0.25, %v379_v40  ;;  %v1976_v34 = vmul.f32 0.25, %v386_v30  ;;  %v1978_v57 = vmul.f32 0.25, %v393_v56  ;;  %v1980_v6 = vmul.f32 0.25, %v400_v61 }
  0x78   :  { %v1982_v14 = vmul.f32 0.25, %v407_v4  ;;  %v1984_v3 = vmul.f32 0.25, %v414_v50  ;;  %v1986_v48 = vmul.f32 0.25, %v421_v46  ;;  %v1988_v35 = vmul.f32 0.25, %v428_v58 }
  0x79   :  { %v1990_v0 = vmul.f32 0.25, %v435_v23  ;;  %v1992_v22 = vmul.f32 0.25, %v442_v39  ;;  %v1994_v25 = vmul.f32 0.25, %v449_v49  ;;  %v1996_v38 = vmul.f32 0.25, %v456_v2  ;;  %v2393_v23 = vld [vmem:[#allocation2_spill] sm:$0xff] }
  0x7a   :  { %v489_v15 = vpack.c.bf16 %v1918_v24, %v1918_v24  ;;  %v490_v10 = vpack.c.bf16 %v1921_v63, %v1921_v63  ;;  %v491_v20 = vpack.c.bf16 %v1924_v9, %v1924_v9  ;;  %v492_v21 = vpack.c.bf16 %v1927_v12, %v1927_v12 }
  0x7b   :  { %v493_v31 = vpack.c.bf16 %v1930_v16, %v1930_v16  ;;  %v494_v43 = vpack.c.bf16 %v1933_v27, %v1933_v27  ;;  %v495_v19 = vpack.c.bf16 %v1936_v47, %v1936_v47  ;;  %v496_v53 = vpack.c.bf16 %v1939_v36, %v1939_v36 }
  0x7c   :  { %v497_v55 = vpack.c.bf16 %v1942_v62, %v1942_v62  ;;  %v498_v17 = vpack.c.bf16 %v1945_v41, %v1945_v41  ;;  %v499_v60 = vpack.c.bf16 %v1948_v7, %v1948_v7  ;;  %v500_v44 = vpack.c.bf16 %v1951_v52, %v1951_v52 }
  0x7d   :  { %v501_v42 = vpack.c.bf16 %v1954_v13, %v1954_v13  ;;  %v502_v51 = vpack.c.bf16 %v1957_v5, %v1957_v5  ;;  %v503_v33 = vpack.c.bf16 %v1960_v29, %v1960_v29  ;;  %v504_v40 = vpack.c.bf16 %v1963_v37, %v1963_v37 }
  0x7e   :  { %v505_v28 = vpack.c.bf16 %v1966_v45, %v1966_v45  ;;  %v506_v26 = vpack.c.bf16 %v1968_v32, %v1968_v32  ;;  %v507_v30 = vpack.c.bf16 %v1970_v59, %v1970_v59  ;;  %v508_v56 = vpack.c.bf16 %v1972_v18, %v1972_v18 }
  0x7f   :  { %v509_v54 = vpack.c.bf16 %v1974_v1, %v1974_v1  ;;  %v2392_v11 = vlaneseq  ;;  %v510_v4 = vpack.c.bf16 %v1976_v34, %v1976_v34  ;;  %v511_v50 = vpack.c.bf16 %v1978_v57, %v1978_v57 }
  0x80   :  { %v512_v24 = vpack.c.bf16 %v1980_v6, %v1980_v6  ;;  %v513_v46 = vpack.c.bf16 %v1982_v14, %v1982_v14  ;;  %v514_v58 = vpack.c.bf16 %v1984_v3, %v1984_v3  ;;  %v515_v8 = vpack.c.bf16 %v1986_v48, %v1986_v48 }
  0x81   :  { %v557_v61 = vshrl.u32 %v2392_v11, 7  ;;  %v516_v63 = vpack.c.bf16 %v1988_v35, %v1988_v35  ;;  %v2394_v9 = vunpack.c.0.s8 %v2393_v23  ;;  %v517_v16 = vpack.c.bf16 %v1990_v0, %v1990_v0 }
  0x82   :  { %v518_v39 = vpack.c.bf16 %v1992_v22, %v1992_v22  ;;  %v519_v49 = vpack.c.bf16 %v1994_v25, %v1994_v25  ;;  %v520_v27 = vpack.c.bf16 %v1996_v38, %v1996_v38  ;;  %vm1040_vm3 = vcmask 1043459  }
  0x83   :  { %v2057_v12 = vsub.s32 %v2394_v9, %v557_v61 }
  0x85   :  { %v2068_v47 = vrot.slane %v489_v15, %v2057_v12  ;;  %v2071_v36 = vrot.slane %v490_v10, %v2057_v12  ;;  %v2074_v62 = vrot.slane %v491_v20, %v2057_v12  ;;  %v2077_v41 = vrot.slane %v492_v21, %v2057_v12 }
  0x86   :  { %v2080_v7 = vrot.slane %v493_v31, %v2057_v12  ;;  %v2083_v2 = vrot.slane %v494_v43, %v2057_v12  ;;  %v2086_v52 = vrot.slane %v495_v19, %v2057_v12  ;;  %v2089_v13 = vrot.slane %v496_v53, %v2057_v12 }
  0x87   :  { %v2092_v5 = vrot.slane %v497_v55, %v2057_v12  ;;  %v2095_v29 = vrot.slane %v498_v17, %v2057_v12  ;;  %v2098_v37 = vrot.slane %v499_v60, %v2057_v12  ;;  %v2101_v45 = vrot.slane %v500_v44, %v2057_v12 }
  0x88   :  { %v2104_v32 = vrot.slane %v501_v42, %v2057_v12  ;;  %v2107_v59 = vrot.slane %v502_v51, %v2057_v12  ;;  %v2110_v18 = vrot.slane %v503_v33, %v2057_v12  ;;  %v2113_v1 = vrot.slane %v504_v40, %v2057_v12 }
  0x89   :  { %v2116_v34 = vrot.slane %v505_v28, %v2057_v12  ;;  %v2119_v57 = vrot.slane %v506_v26, %v2057_v12  ;;  %v2122_v6 = vrot.slane %v507_v30, %v2057_v12  ;;  %v2125_v14 = vrot.slane %v508_v56, %v2057_v12 }
  0x8a   :  { %v2128_v3 = vrot.slane %v509_v54, %v2057_v12  ;;  %v2131_v48 = vrot.slane %v510_v4, %v2057_v12  ;;  %v2134_v35 = vrot.slane %v511_v50, %v2057_v12  ;;  %v2137_v0 = vrot.slane %v512_v24, %v2057_v12 }
  0x8b   :  { %v2140_v22 = vrot.slane %v513_v46, %v2057_v12  ;;  %v2143_v25 = vrot.slane %v514_v58, %v2057_v12  ;;  %v2146_v38 = vrot.slane %v515_v8, %v2057_v12  ;;  %v2149_v15 = vrot.slane %v516_v63, %v2057_v12 }
  0x8c   :  { %v2152_v10 = vrot.slane %v517_v16, %v2057_v12  ;;  %v2155_v20 = vrot.slane %v518_v39, %v2057_v12  ;;  %v2158_v21 = vrot.slane %v519_v49, %v2057_v12  ;;  %v2161_v31 = vrot.slane %v520_v27, %v2057_v12 }
  0x8d   :  { %v783_v43 = vrot.slane %v2068_v47, %v2057_v12  ;;  %v790_v19 = vrot.slane %v2071_v36, %v2057_v12  ;;  %v797_v53 = vrot.slane %v2074_v62, %v2057_v12  ;;  %v804_v55 = vrot.slane %v2077_v41, %v2057_v12 }
  0x8e   :  { %v811_v17 = vrot.slane %v2080_v7, %v2057_v12  ;;  %v818_v60 = vrot.slane %v2083_v2, %v2057_v12  ;;  %v825_v44 = vrot.slane %v2086_v52, %v2057_v12  ;;  %v832_v42 = vrot.slane %v2089_v13, %v2057_v12 }
  0x8f   :  { %v839_v51 = vrot.slane %v2092_v5, %v2057_v12  ;;  %v846_v33 = vrot.slane %v2095_v29, %v2057_v12  ;;  %v853_v40 = vrot.slane %v2098_v37, %v2057_v12  ;;  %v860_v28 = vrot.slane %v2101_v45, %v2057_v12 }
  0x90   :  { %v867_v26 = vrot.slane %v2104_v32, %v2057_v12  ;;  %v874_v30 = vrot.slane %v2107_v59, %v2057_v12  ;;  %v881_v56 = vrot.slane %v2110_v18, %v2057_v12  ;;  %v888_v54 = vrot.slane %v2113_v1, %v2057_v12 }
  0x91   :  { %v895_v11 = vrot.slane %v2116_v34, %v2057_v12  ;;  %v902_v61 = vrot.slane %v2119_v57, %v2057_v12  ;;  %v909_v4 = vrot.slane %v2122_v6, %v2057_v12  ;;  %v916_v50 = vrot.slane %v2125_v14, %v2057_v12 }
  0x92   :  { %v923_v24 = vrot.slane %v2128_v3, %v2057_v12  ;;  %v930_v46 = vrot.slane %v2131_v48, %v2057_v12  ;;  %v937_v58 = vrot.slane %v2134_v35, %v2057_v12  ;;  %v944_v8 = vrot.slane %v2137_v0, %v2057_v12 }
  0x93   :  { %v951_v63 = vrot.slane %v2140_v22, %v2057_v12  ;;  %v958_v23 = vrot.slane %v2143_v25, %v2057_v12  ;;  %v965_v9 = vrot.slane %v2146_v38, %v2057_v12  ;;  %v972_v16 = vrot.slane %v2149_v15, %v2057_v12 }
  0x94   :  { %v979_v39 = vrot.slane %v2152_v10, %v2057_v12  ;;  %v986_v49 = vrot.slane %v2155_v20, %v2057_v12  ;;  %v993_v27 = vrot.slane %v2158_v21, %v2057_v12  ;;  %v1000_v47 = vrot.slane %v2161_v31, %v2057_v12 }
  0x95   :  { %v1001_v36 = vunpack.c.l.b16 %v783_v43  ;;  %v1002_v62 = vunpack.c.l.b16 %v790_v19  ;;  %v1003_v41 = vunpack.c.l.b16 %v797_v53  ;;  %v1004_v7 = vunpack.c.l.b16 %v804_v55 }
  0x96   :  { %v1005_v2 = vunpack.c.l.b16 %v811_v17  ;;  %v1006_v52 = vunpack.c.l.b16 %v818_v60  ;;  %v1007_v13 = vunpack.c.l.b16 %v825_v44  ;;  %v1008_v5 = vunpack.c.l.b16 %v832_v42 }
  0x97   :  { %v1009_v29 = vunpack.c.l.b16 %v839_v51  ;;  %v1010_v37 = vunpack.c.l.b16 %v846_v33  ;;  %v1011_v45 = vunpack.c.l.b16 %v853_v40  ;;  %v1012_v32 = vunpack.c.l.b16 %v860_v28 }
  0x98   :  { %v1013_v59 = vunpack.c.l.b16 %v867_v26  ;;  %v1014_v18 = vunpack.c.l.b16 %v874_v30  ;;  %v1015_v1 = vunpack.c.l.b16 %v881_v56  ;;  %v1016_v34 = vunpack.c.l.b16 %v888_v54 }
  0x99   :  { %v1017_v57 = vunpack.c.l.b16 %v895_v11  ;;  %v1018_v6 = vunpack.c.l.b16 %v902_v61  ;;  %v1019_v14 = vunpack.c.l.b16 %v909_v4  ;;  %v1020_v3 = vunpack.c.l.b16 %v916_v50 }
  0x9a   :  { %v1021_v48 = vunpack.c.l.b16 %v923_v24  ;;  %v1022_v35 = vunpack.c.l.b16 %v930_v46  ;;  %v1023_v0 = vunpack.c.l.b16 %v937_v58  ;;  %v1024_v22 = vunpack.c.l.b16 %v944_v8 }
  0x9b   :  { %v1025_v25 = vunpack.c.l.b16 %v951_v63  ;;  %v1026_v38 = vunpack.c.l.b16 %v958_v23  ;;  %v1027_v15 = vunpack.c.l.b16 %v965_v9  ;;  %v1028_v10 = vunpack.c.l.b16 %v972_v16 }
  0x9c   :  { %v1029_v20 = vunpack.c.l.b16 %v979_v39  ;;  %v1030_v21 = vunpack.c.l.b16 %v986_v49  ;;  %v1031_v31 = vunpack.c.l.b16 %v993_v27  ;;  %v1032_v43 = vunpack.c.l.b16 %v1000_v47 }
  0x9d   :  { %v1033_v19 = vrot.slane %v1002_v62, 7  ;;  %v1036_v53 = vrot.slane %v1003_v41, 6  ;;  %v1039_v55 = vrot.slane %v1004_v7, 5  ;;  %v1042_v17 = vrot.slane %v1006_v52, 7 }
  0x9e   :  { %v1044_v60 = vrot.slane %v1007_v13, 6  ;;  %v1046_v44 = vrot.slane %v1008_v5, 5  ;;  %v1048_v42 = vrot.slane %v1010_v37, 7  ;;  %v1050_v51 = vrot.slane %v1011_v45, 6 }
  0x9f   :  { %v1035_v33 = vsel %vm1034_vm1, %v1033_v19, %v1001_v36  ;;  %v1043_v40 = vsel %vm1034_vm1, %v1042_v17, %v1005_v2  ;;  %v1052_v28 = vrot.slane %v1012_v32, 5  ;;  %v1054_v26 = vrot.slane %v1014_v18, 7 }
  0xa0   :  { %v1038_v30 = vsel %vm1037_vm2, %v1036_v53, %v1035_v33  ;;  %v1045_v56 = vsel %vm1037_vm2, %v1044_v60, %v1043_v40  ;;  %v1049_v54 = vsel %vm1034_vm1, %v1048_v42, %v1009_v29  ;;  %v1056_v11 = vrot.slane %v1015_v1, 6 }
  0xa1   :  { %v1041_v61 = vsel %vm1040_vm3, %v1039_v55, %v1038_v30  ;;  %v1047_v4 = vsel %vm1040_vm3, %v1046_v44, %v1045_v56  ;;  %v1051_v50 = vsel %vm1037_vm2, %v1050_v51, %v1049_v54  ;;  %v1055_v24 = vsel %vm1034_vm1, %v1054_v26, %v1013_v59 }
  0xa2   :  { %v1053_v46 = vsel %vm1040_vm3, %v1052_v28, %v1051_v50  ;;  %v1057_v58 = vsel %vm1037_vm2, %v1056_v11, %v1055_v24  ;;  %v1058_v8 = vrot.slane %v1016_v34, 5  ;;  %v1060_v63 = vrot.slane %v1018_v6, 7 }
  0xa3   :  { %v1062_v23 = vrot.slane %v1019_v14, 6  ;;  %v1064_v9 = vrot.slane %v1020_v3, 5  ;;  %v1066_v16 = vrot.slane %v1022_v35, 7  ;;  %v1068_v39 = vrot.slane %v1023_v0, 6 }
  0xa4   :  { %v1059_v49 = vsel %vm1040_vm3, %v1058_v8, %v1057_v58  ;;  %v1061_v27 = vsel %vm1034_vm1, %v1060_v63, %v1017_v57  ;;  %v1070_v47 = vrot.slane %v1024_v22, 5  ;;  %v1072_v36 = vrot.slane %v1026_v38, 7 }
  0xa5   :  { %v1063_v62 = vsel %vm1037_vm2, %v1062_v23, %v1061_v27  ;;  %v1067_v41 = vsel %vm1034_vm1, %v1066_v16, %v1021_v48  ;;  %v1074_v7 = vrot.slane %v1027_v15, 6  ;;  %v1076_v2 = vrot.slane %v1028_v10, 5 }
  0xa6   :  { %v1065_v52 = vsel %vm1040_vm3, %v1064_v9, %v1063_v62  ;;  %v1069_v13 = vsel %vm1037_vm2, %v1068_v39, %v1067_v41  ;;  %v1073_v5 = vsel %vm1034_vm1, %v1072_v36, %v1025_v25  ;;  %v1078_v29 = vrot.slane %v1030_v21, 7 }
  0xa7   :  { %v1071_v37 = vsel %vm1040_vm3, %v1070_v47, %v1069_v13  ;;  %v1075_v45 = vsel %vm1037_vm2, %v1074_v7, %v1073_v5  ;;  %v1080_v32 = vrot.slane %v1031_v31, 6  ;;  %v1082_v59 = vrot.slane %v1032_v43, 5 }
  0xa8   :  { %v1077_v18 = vsel %vm1040_vm3, %v1076_v2, %v1075_v45  ;;  %v1079_v1 = vsel %vm1034_vm1, %v1078_v29, %v1029_v20  ;;  %v1084_v34 = vpack.c.b16 %v1041_v61, %v1041_v61  ;;  %v1085_v57 = vpack.c.b16 %v1047_v4, %v1047_v4 }
  0xa9   :  { %v1081_v6 = vsel %vm1037_vm2, %v1080_v32, %v1079_v1  ;;  %v1086_v14 = vpack.c.b16 %v1053_v46, %v1053_v46  ;;  %v1087_v3 = vpack.c.b16 %v1059_v49, %v1059_v49  ;;  %v1088_v48 = vpack.c.b16 %v1065_v52, %v1065_v52 }
  0xaa   :  { %v1083_v35 = vsel %vm1040_vm3, %v1082_v59, %v1081_v6  ;;  %v1089_v0 = vpack.c.b16 %v1071_v37, %v1071_v37  ;;  %v1090_v22 = vpack.c.b16 %v1077_v18, %v1077_v18  ;;  %v1098_v25 = vrot.slane %v1084_v34, %v2057_v12 }
  0xab   :  { %v1091_v38 = vpack.c.b16 %v1083_v35, %v1083_v35  ;;  %v1105_v15 = vrot.slane %v1085_v57, %v2057_v12  ;;  %v1112_v10 = vrot.slane %v1086_v14, %v2057_v12  ;;  %v1119_v20 = vrot.slane %v1087_v3, %v2057_v12 }
  0xac   :  { %v1126_v21 = vrot.slane %v1088_v48, %v2057_v12  ;;  %v1133_v31 = vrot.slane %v1089_v0, %v2057_v12  ;;  %v1140_v43 = vrot.slane %v1090_v22, %v2057_v12  ;;  %1156 = vst.msk [vmem:[%s2292_s1] sm:$0x3] %vm136_vm0, %v1098_v25 }
  0xad   :  { %v1147_v19 = vrot.slane %v1091_v38, %v2057_v12  ;;  %1157 = vst.msk [vmem:[%s2292_s1 + $0x2] sm:$0x3] %vm136_vm0, %v1105_v15  ;;  %1158 = vst.msk [vmem:[%s2292_s1 + $0x4] sm:$0x3] %vm136_vm0, %v1112_v10 }
  0xae   :  { %1159 = vst.msk [vmem:[%s2292_s1 + $0x6] sm:$0x3] %vm136_vm0, %v1119_v20  ;;  %1160 = vst.msk [vmem:[%s2292_s1 + $0x8] sm:$0x3] %vm136_vm0, %v1126_v21 }
  0xaf   :  { %1161 = vst.msk [vmem:[%s2292_s1 + $0xa] sm:$0x3] %vm136_vm0, %v1133_v31  ;;  %1162 = vst.msk [vmem:[%s2292_s1 + $0xc] sm:$0x3] %vm136_vm0, %v1140_v43 }
  0xb0   :  { %1163 = vst.msk [vmem:[%s2292_s1 + $0xe] sm:$0x3] %vm136_vm0, %v1147_v19 }

// kernel: custom_densenet_forward.33
= control target key start
LH: loop header
LB: loop body
LE: loop exit
PB: predicated region body
PF: predicated region fallthrough
CT: control target
= control target key end

     0   :  { %v32_v0 = vlaneseq  ;;  %v230_v25 = vmov 0   ;;  %vm90_vm0 = vcmask 261120   ;;  %vm188_vm1 = vcmask 257024   ;;  %s308_s1 = inlined_call_operand.vmem [shape: bf16[32,32], index: 1, kind: input, shape index: {}]   ;;  %s309_s2 = inlined_call_operand.vmem [shape: bf16[1,32], index: 2, kind: input, shape index: {}]   ;;  %s310_s3 = inlined_call_operand.vmem [shape: bf16[1,32], index: 3, kind: input, shape index: {}]   ;;  %s311_s0 = inlined_call_operand.vmem [shape: bf16[32,32], index: 0, kind: input, shape index: {}]   ;;  %s312_s4 = inlined_call_operand.vmem [shape: f32[1,32], index: 4, kind: input, shape index: {}]   ;;  %s313_s5 = inlined_call_operand.vmem [shape: f32[1,32], index: 5, kind: input, shape index: {}]   ;;  %s314_s6 = inlined_call_operand.vmem [shape: bf16[32,32], index: 6, kind: output, shape index: {}]  }
   0x1   :  { %v228_v1 = vld [vmem:[%s308_s1] sm:$0xff]   ;;  %v229_v2 = vld [vmem:[%s308_s1 + $0x8] sm:$0xff]  }
   0x2   :  { %v33_v3 = vshrl.u32 %v32_v0, 7  ;;  %219 = vmatprep.subr.bf16.mxu0 %v228_v1  ;;  %v28_v4 = vld [vmem:[%s309_s2] sm:$0x1]  ;;  %v25_v11 = vld [vmem:[%s311_s0 + $0x4] sm:$0xf] }
   0x3   :  { %220 = vmatpush3.bf16.msra.mxu0 %v228_v1  ;;  %v30_v5 = vpack.i.b16 %v28_v4, %v28_v4  ;;  %v44_v7 = vld [vmem:[%s310_s3] sm:$0x1]  ;;  %v26_v13 = vld [vmem:[%s311_s0 + $0x8] sm:$0xf]  ;;  %v27_v14 = vld [vmem:[%s311_s0 + $0xc] sm:$0xf] }
   0x4   :  { %v34_v6 = vsub.s32 0, %v33_v3  ;;  %221 = vmatprep.subr.bf16.mxu0 %v229_v2  ;;  %v46_v8 = vpack.i.b16 %v44_v7, %v44_v7  ;;  %v24_v9 = vld [vmem:[%s311_s0] sm:$0xf] }
   0x5   :  { %v205_v32 = vld [vmem:[%s312_s4] ss:$0 sm:$0xff] }
   0x6   :  { %v35_v10 = vrot.slane %v30_v5, %v34_v6  ;;  %v51_v12 = vrot.slane %v46_v8, %v34_v6  ;;  %v206_v34 = vld [vmem:[%s313_s5] ss:$0 sm:$0xff] }
   0x7   :  { %222 = vmatpush3.bf16.msra.mxu0 %v229_v2 }
   0x8   :  { %v197_v15 = vcombine.low %v35_v10, %v35_v10  ;;  %v198_v16 = vcombine.low %v51_v12, %v51_v12 }
   0xa   :  { %v40_v17 = vmul.bf16 %v197_v15, %v24_v9  ;;  %v41_v18 = vmul.bf16 %v197_v15, %v25_v11  ;;  %v42_v19 = vmul.bf16 %v197_v15, %v26_v13  ;;  %v43_v20 = vmul.bf16 %v197_v15, %v27_v14 }
   0xc   :  { %v56_v21 = vadd.bf16 %v198_v16, %v40_v17  ;;  %v57_v22 = vadd.bf16 %v198_v16, %v41_v18  ;;  %v58_v23 = vadd.bf16 %v198_v16, %v42_v19  ;;  %v59_v24 = vadd.bf16 %v198_v16, %v43_v20 }
   0xe   :  { %v60_v26 = vmax.bf16 %v230_v25, %v56_v21  ;;  %v61_v27 = vmax.bf16 %v230_v25, %v57_v22  ;;  %v62_v28 = vmax.bf16 %v230_v25, %v58_v23  ;;  %v63_v29 = vmax.bf16 %v230_v25, %v59_v24 }
  0x10   :  { %v199_v30 = vcombine.low %v60_v26, %v61_v27  ;;  %v200_v31 = vcombine.low %v62_v28, %v63_v29 }
  0x12   :  { %223 = vmatprep.mubr.msk.bf16.mxu0 %vm90_vm0, %v199_v30 }
  0x13   :  { %224 = vmatmul.mubr.msk.bf16.vlgmr.msra.gmra.mrb[0].mxu0 %vm90_vm0, %v200_v31 }
  0xe6   :  { %v225_v33 = vpop.f32.mrb[0].mxu0 }
  0xe7   :  { %v155_v35 = vmul.f32 %v225_v33, %v205_v32  ;;  %v131_v36 = vpop.f32.mrb[1].mxu0 }
  0xe8   :  { %v153_v37 = vmul.f32 %v205_v32, %v131_v36  ;;  %v226_v38 = vpop.f32.mrb[2].mxu0 }
  0xe9   :  { %v166_v39 = vadd.f32 %v206_v34, %v155_v35  ;;  %v156_v40 = vmul.f32 %v226_v38, %v205_v32  ;;  %v134_v41 = vpop.f32.mrb[3].mxu0 }
  0xea   :  { %v164_v42 = vadd.f32 %v206_v34, %v153_v37  ;;  %v154_v43 = vmul.f32 %v205_v32, %v134_v41 }
  0xeb   :  { %v170_v44 = vmax.f32 %v166_v39, 0.0  ;;  %v167_v45 = vadd.f32 %v206_v34, %v156_v40 }
  0xec   :  { %v168_v46 = vmax.f32 %v164_v42, 0.0  ;;  %v165_v47 = vadd.f32 %v206_v34, %v154_v43 }
  0xed   :  { %v213_v48 = vpack.c.bf16 %v170_v44, %v170_v44  ;;  %v171_v49 = vmax.f32 %v167_v45, 0.0 }
  0xee   :  { %v211_v50 = vpack.c.bf16 %v168_v46, %v168_v46  ;;  %v169_v51 = vmax.f32 %v165_v47, 0.0 }
  0xef   :  { %191 = vst.msk [vmem:[%s314_s6 + $0x8] sm:$0xf] %vm188_vm1, %v213_v48  ;;  %v214_v52 = vpack.c.bf16 %v171_v49, %v171_v49 }
  0xf0   :  { %189 = vst.msk [vmem:[%s314_s6] sm:$0xf] %vm188_vm1, %v211_v50  ;;  %v212_v53 = vpack.c.bf16 %v169_v51, %v169_v51 }
  0xf1   :  { %192 = vst.msk [vmem:[%s314_s6 + $0xc] sm:$0xf] %vm188_vm1, %v214_v52 }
  0xf2   :  { %190 = vst.msk [vmem:[%s314_s6 + $0x4] sm:$0xf] %vm188_vm1, %v212_v53 }

// kernel: custom_densenet_forward.34
= control target key start
LH: loop header
LB: loop body
LE: loop exit
PB: predicated region body
PF: predicated region fallthrough
CT: control target
= control target key end

     0   :  { %s1355_s9 = smov 0   ;;  %s1637_s0 = inlined_call_operand.vmem [shape: bf16[2,6,6,32], index: 0, kind: input, shape index: {}]   ;;  %s1638_s1 = inlined_call_operand.vmem [shape: bf16[9,32,8], index: 1, kind: input, shape index: {}]   ;;  %s1639_s2 = inlined_call_operand.vmem [shape: bf16[2,16,8], index: 2, kind: output, shape index: {}]  }
   0x1 LB: > { %s1085_s10 = sadd.s32 4294967295, %s1335_s9   ;;  %p1089_p0 = scmp.ge.s32.totalorder %s1335_s9, 1  ;;  %s1335_s9 = sphi %s1355_s9, %s12_s9  }
   0x2   : > { %p112_p1 = scmp.lt.s32.totalorder %s1335_s9, 3 }
   0x4   : > { %p113_p2 = pnand %p1089_p0, %p112_p1 }
   0x5   : > { %v1306_v0 = vld [vmem:[%s1638_s1 + $0x40] sm:$0xff] (!%p113_p2)   ;;  %v1337_v1 = vmov (!%p113_p2), 0.0   ;;  %v1307_v2 = vld [vmem:[%s1638_s1 + $0x10] sm:$0xff] (!%p113_p2)   ;;  %v162_v3 = vlaneseq (!%p113_p2)  ;;  %v1308_v4 = vld [vmem:[%s1638_s1 + $0x48] sm:$0xff] (!%p113_p2)   ;;  %vm1338_vm0 = vmmov (!%p113_p2), 0   ;;  %p134_p3 = scmp.lt.s32.totalorder (!%p113_p2), %s1085_s10, 1 }
   0x6   : > { %116 = sbr.rel (%p113_p2) target bundleno = 311 (0x137), region = 28  ;;  %1224 = vmatprep.subr.bf16.mxu0 (!%p113_p2), %v1337_v1  ;;  %1192 = vmatprep.subr.bf16.mxu1 (!%p113_p2), %v1337_v1  ;;  %v1309_v5 = vld [vmem:[%s1638_s1 + $0x18] sm:$0xff] (!%p113_p2)   ;;  %v1339_v6 = vmov (!%p113_p2), 1983009808   ;;  %vm191_vm1 = vsmask.f32 (!%p113_p2), 1280 }
   0x7   : > { %1225 = vmatpush3.bf16.msra.mxu0 (!%p113_p2), %v1306_v0  ;;  %1196 = vmatprep.mubr.msk.bf16.mxu1 (!%p113_p2), %vm1338_vm0, %v1337_v1  ;;  %v160_v7 = vunpack.c.l.s4 (!%p113_p2), %v1339_v6  ;;  %v163_v8 = vshrl.u32 (!%p113_p2), %v162_v3, 7  ;;  %vm192_vm2 = vsmask.f32 (!%p113_p2), 3336  ;;  %vm194_vm3 = vsmask.f32 (!%p113_p2), 5392 }
   0x8   : > { %1193 = vmatpush3.bf16.msra.mxu1 (!%p113_p2), %v1307_v2  ;;  %1226 = vmatprep.subr.bf16.mxu0 (!%p113_p2), %v1337_v1  ;;  %vm196_vm4 = vsmask.f32 (!%p113_p2), 7448  ;;  %vm193_vm5 = vmor (!%p113_p2), %vm191_vm1, %vm192_vm2  ;;  %vm406_vm6 = vcmask (!%p113_p2), 1040384   ;;  %vm407_vm9 = vcmask (!%p113_p2), 1042434   ;;  %vm409_vm11 = vcmask (!%p113_p2), 1044484  }
   0x9   : > { %1194 = vmatprep.subr.bf16.mxu1 (!%p113_p2), %v1337_v1  ;;  %1228 = vmatprep.mubr.msk.bf16.mxu0 (!%p113_p2), %vm1338_vm0, %v1337_v1  ;;  %v161_v9 = vunpack.c.0.s8 (!%p113_p2), %v160_v7  ;;  %vm195_vm7 = vmor (!%p113_p2), %vm193_vm5, %vm194_vm3  ;;  %vm411_vm13 = vcmask (!%p113_p2), 1046534   ;;  %vm288_vm14 = vcmask (!%p113_p2), 261120  }
   0xa   : > { %vm1460_vm8 = vmor (!%p113_p2), %vm195_vm7, %vm196_vm4 }
   0xb   : > { %1227 = vmatpush3.bf16.msra.mxu0 (!%p113_p2), %v1308_v4  ;;  %v1402_v13 = vsub.s32 (!%p113_p2), %v161_v9, %v163_v8  ;;  %vm408_vm10 = vmor (!%p113_p2), %vm406_vm6, %vm407_vm9 }
   0xc   : > { %1195 = vmatpush3.bf16.msra.mxu1 (!%p113_p2), %v1309_v5  ;;  %1232 = vmatprep.subr.bf16.mxu0 (!%p113_p2), %v1337_v1  ;;  %vm410_vm12 = vmor (!%p113_p2), %vm408_vm10, %vm409_vm11 }
   0xd   : > { %s1645_s10 = smov (!%p134_p3, %s1085_s10), 1  ;;  %1200 = vmatprep.subr.bf16.mxu1 %v1337_v1  ;;  %vm1498_vm15 = vmor %vm410_vm12, %vm411_vm13 }
   0xe   : > { %s1294_s19 = smul.u32 24, %s1645_s10  ;;  %s1162_s25 = sshll.u32 %s1645_s10, 3 }
   0xf   : > { %s143_s28 = scalar_lea.vmem %s1639_s2, %s1162_s25 }
  0x10   : > { %s1390_s22 = scalar_lea.vmem %s1637_s0, %s1294_s19 }
  0x11   : > { %v1394_v10 = vld [vmem:[%s1390_s22] sm:$0x7]  ;;  %v1397_v11 = vld [vmem:[%s1390_s22 + $0x4] sm:$0x7]  ;;  %v1400_v12 = vld [vmem:[%s1390_s22 + $0x8] sm:$0x7] }
  0x12   : > { %v1405_v14 = vld [vmem:[%s1390_s22 + $0xc] sm:$0x7]  ;;  %v1408_v15 = vld [vmem:[%s1390_s22 + $0x10] sm:$0x7]  ;;  %v1412_v16 = vrot.slane %v1394_v10, %v1402_v13  ;;  %v1416_v17 = vrot.slane %v1397_v11, %v1402_v13  ;;  %v1420_v18 = vrot.slane %v1400_v12, %v1402_v13 }
  0x13   : > { %v1424_v19 = vrot.slane %v1405_v14, %v1402_v13  ;;  %v1428_v20 = vrot.slane %v1408_v15, %v1402_v13 }
  0x14   : > { %v1432_v21 = vcombine.high %v1412_v16, %v1412_v16  ;;  %v1436_v22 = vcombine.high %v1416_v17, %v1416_v17  ;;  %v1440_v23 = vcombine.high %v1420_v18, %v1420_v18  ;;  %v199_v25 = vshrl.u32 %v1412_v16, 16 }
  0x15   : > { %v1444_v24 = vcombine.high %v1424_v19, %v1424_v19  ;;  %v202_v26 = vshll.u32 %v1412_v16, 16  ;;  %v213_v27 = vshrl.u32 %v1416_v17, 16  ;;  %v216_v28 = vshll.u32 %v1416_v17, 16 }
  0x16   : > { %v208_v29 = vshll.u32 %v1432_v21, 16  ;;  %v222_v30 = vshll.u32 %v1436_v22, 16  ;;  %v227_v31 = vshrl.u32 %v1420_v18, 16  ;;  %v230_v32 = vshll.u32 %v1420_v18, 16 }
  0x17   : > { %v201_v33 = vrot.slane %v199_v25, 6  ;;  %v204_v34 = vrot.slane %v202_v26, 7  ;;  %v215_v35 = vrot.slane %v213_v27, 6  ;;  %v218_v36 = vrot.slane %v216_v28, 7 }
  0x18   : > { %v210_v37 = vrot.slane %v208_v29, 7  ;;  %v224_v38 = vrot.slane %v222_v30, 7  ;;  %v229_v39 = vrot.slane %v227_v31, 6  ;;  %v232_v40 = vrot.slane %v230_v32, 7 }
  0x19   : > { %v205_v41 = vor.u32 %v204_v34, %v201_v33  ;;  %v219_v42 = vor.u32 %v218_v36, %v215_v35  ;;  %v236_v43 = vshll.u32 %v1440_v23, 16  ;;  %v241_v44 = vshrl.u32 %v1424_v19, 16 }
  0x1a   : > { %v233_v46 = vor.u32 %v232_v40, %v229_v39  ;;  %v244_v47 = vshll.u32 %v1424_v19, 16  ;;  %v250_v48 = vshll.u32 %v1444_v24, 16  ;;  %v597_v49 = vcombine.high %v1428_v20, %v1428_v20  ;;  %v1310_v39 = vld [vmem:[%s1638_s1 + $0x50] sm:$0xff]  }
  0x1b   : > { %v206_v50 = vrot.slane %v205_v41, 2  ;;  %v220_v51 = vrot.slane %v219_v42, 2  ;;  %v238_v52 = vrot.slane %v236_v43, 7  ;;  %v243_v53 = vrot.slane %v241_v44, 6  ;;  %v150_v42 = vld [vmem:[%s1390_s22 + $0x14] sm:$0x7] }
  0x1c   : > { %v234_v54 = vrot.slane %v233_v46, 2  ;;  %v246_v55 = vrot.slane %v244_v47, 7  ;;  %v599_v56 = vshrl.u32 %v1428_v20, 16  ;;  %v602_v59 = vshll.u32 %v1428_v20, 16  ;;  %v1313_v44 = vld [vmem:[%s1638_s1 + $0x8] sm:$0xff]  }
  0x1d   : > { %v211_v57 = vsel %vm1460_vm8, %v206_v50, %v210_v37  ;;  %v225_v58 = vsel %vm1460_vm8, %v220_v51, %v224_v38  ;;  %v608_v60 = vshll.u32 %v597_v49, 16  ;;  %v252_v62 = vrot.slane %v250_v48, 7 }
  0x1e   : > { %v247_v61 = vor.u32 %v246_v55, %v243_v53  ;;  %v601_v63 = vrot.slane %v599_v56, 6  ;;  %v239_v0 = vsel %vm1460_vm8, %v234_v54, %v238_v52  ;;  %v259_v2 = vcombine.low %v211_v57, %v225_v58 }
  0x1f   : > { %v604_v3 = vrot.slane %v602_v59, 7  ;;  %v610_v6 = vrot.slane %v608_v60, 7  ;;  %v617_v8 = vcombine.low %v225_v58, %v239_v0  ;;  %v1104_v27 = vrot.slane %v1416_v17, 9 }
  0x20   : > { %v248_v4 = vrot.slane %v247_v61, 2  ;;  %v267_v25 = vrot.slane %v259_v2, %v1402_v13  ;;  %v419_v28 = vrot.slane %v1436_v22, 7  ;;  %v1105_v29 = vrot.slane %v1420_v18, 9  ;;  %v1311_v18 = vld [vmem:[%s1638_s1] sm:$0xff]  }
  0x21   : > { %v605_v5 = vor.u32 %v604_v3, %v601_v63  ;;  %v423_v30 = vrot.slane %v1440_v23, 7  ;;  %v1106_v33 = vrot.slane %v1424_v19, 9  ;;  %v427_v34 = vrot.slane %v1444_v24, 7  ;;  %v1316_v63 = vld [vmem:[%s1638_s1 + $0x60] sm:$0xff]   ;;  %v1319_v3 = vld [vmem:[%s1638_s1 + $0x28] sm:$0xff]  }
  0x22   : > { %v253_v7 = vsel %vm1460_vm8, %v248_v4, %v252_v62  ;;  %v625_v22 = vrot.slane %v617_v8, %v1402_v13  ;;  %v1128_v19 = vrot.slane %v1428_v20, 9  ;;  %v694_v36 = vrot.slane %v597_v49, 7  ;;  %v1312_v49 = vld [vmem:[%s1638_s1 + $0x58] sm:$0xff]  }
  0x23   : > { %v260_v9 = vcombine.low %v239_v0, %v253_v7  ;;  %v606_v26 = vrot.slane %v605_v5, 2  ;;  %v333_v37 = vcombine.low %v1394_v10, %v1397_v11  ;;  %v334_v38 = vcombine.low %v1400_v12, %v1405_v14 }
  0x24   : > { %v420_v40 = vsel %vm1498_vm15, %v1104_v27, %v419_v28  ;;  %v424_v20 = vsel %vm1498_vm15, %v1105_v29, %v423_v30  ;;  %v428_v41 = vsel %vm1498_vm15, %v1106_v33, %v427_v34  ;;  %v1521_v10 = vsel %vm1498_vm15, %v1128_v19, %v694_v36  ;;  %v1322_v29 = vld [vmem:[%s1638_s1 + $0x30] sm:$0xff]  }
  0x25   : > { %v1485_v31 = vrot.slane %v260_v9, %v1402_v13  ;;  %v1489_v32 = vsel %vm1460_vm8, %v606_v26, %v610_v6  ;;  %v701_v46 = vcombine.low %v420_v40, %v424_v20  ;;  %v702_v47 = vcombine.low %v428_v41, %v1521_v10  ;;  %v1321_v34 = vld [vmem:[%s1638_s1 + $0x70] sm:$0xff]  }
  0x26   : > { %v618_v17 = vcombine.low %v253_v7, %v1489_v32  ;;  %v1533_v48 = vrot.slane %v150_v42, %v1402_v13  ;;  %v341_v50 = vrot.slane %v333_v37, %v1402_v13  ;;  %v348_v51 = vrot.slane %v334_v38, %v1402_v13  ;;  %v1318_v7 = vld [vmem:[%s1638_s1 + $0x68] sm:$0xff]  }
  0x27   : > { %v275_v35 = vcombine.low %v267_v25, %v1485_v31  ;;  %v1103_v52 = vrot.slane %v1412_v16, 9  ;;  %v415_v53 = vrot.slane %v1432_v21, 7  ;;  %v709_v54 = vrot.slane %v701_v46, %v1402_v13  ;;  %v1317_v16 = vld [vmem:[%s1638_s1 + $0x20] sm:$0xff]  }
  0x28   : > { %v632_v24 = vrot.slane %v618_v17, %v1402_v13  ;;  %v716_v55 = vrot.slane %v702_v47, %v1402_v13  ;;  %v858_v56 = vshrl.u32 %v1533_v48, 16  ;;  %v861_v57 = vshll.u32 %v1533_v48, 16 }
  0x29   : > { %1197 = vmatmul.mubr.msk.bf16.vlgmr.msra.gmra.mrb[0].mxu1 %vm288_vm14, %v275_v35  ;;  %v349_v58 = vcombine.low %v341_v50, %v348_v51  ;;  %v416_v21 = vsel %vm1498_vm15, %v1103_v52, %v415_v53  ;;  %v856_v59 = vcombine.high %v1533_v48, %v1533_v48  ;;  %v435_v2 = vcombine.low %v424_v20, %v428_v41 }
  0x2a   : > { %v633_v43 = vcombine.low %v625_v22, %v632_v24  ;;  %1201 = vmatpush3.bf16.msra.mxu1 %v1311_v18  ;;  %1204 = vmatprep.mubr.msk.bf16.mxu1 %vm1338_vm0, %v1337_v1  ;;  %v717_v60 = vcombine.low %v709_v54, %v716_v55  ;;  %v860_v61 = vrot.slane %v858_v56, 6  ;;  %v863_v62 = vrot.slane %v861_v57, 7  ;;  %v1324_v18 = vld [vmem:[%s1638_s1 + $0x38] sm:$0xff]   ;;  %v1327_v24 = vld [vmem:[%s1638_s1 + $0x80] sm:$0xff]  }
  0x2b   : > { %1202 = vmatprep.subr.bf16.mxu1 %v1337_v1  ;;  %v434_v0 = vcombine.low %v416_v21, %v420_v40  ;;  %v782_v4 = vcombine.low %v1408_v15, %v150_v42  ;;  %v867_v6 = vshll.u32 %v856_v59, 16  ;;  %v449_v9 = vrot.slane %v435_v2, %v1402_v13 }
  0x2c   : > { %1229 = vmatmul.mubr.msk.bf16.vlgmr.msra.gmra.mrb[0].mxu0 %vm288_vm14, %v633_v43  ;;  %v864_v5 = vor.u32 %v863_v62, %v860_v61  ;;  %v515_v17 = vcombine.low %v1397_v11, %v1400_v12  ;;  %v516_v22 = vcombine.low %v1405_v14, %v1408_v15  ;;  %v1323_v11 = vld [vmem:[%s1638_s1 + $0x78] sm:$0xff]   ;;  %v1150_v35 = vrot.slane %v1533_v48, 9 }
  0x2d   : > { %1233 = vmatpush3.bf16.msra.mxu0 %v1310_v39  ;;  %1236 = vmatprep.mubr.msk.bf16.mxu0 %vm1338_vm0, %v1337_v1  ;;  %v442_v8 = vrot.slane %v434_v0, %v1402_v13  ;;  %v789_v25 = vrot.slane %v782_v4, %v1402_v13  ;;  %v869_v27 = vrot.slane %v867_v6, 7  ;;  %v945_v19 = vrot.slane %v856_v59, 7  ;;  %v1328_v39 = vld [vmem:[%s1638_s1 + $0x88] sm:$0xff]  }
  0x2e   : > { %1234 = vmatprep.subr.bf16.mxu0 %v1337_v1  ;;  %1203 = vmatpush3.bf16.msra.mxu1 %v1313_v44  ;;  %v865_v26 = vrot.slane %v864_v5, 2  ;;  %v523_v12 = vrot.slane %v515_v17, %v1402_v13  ;;  %v530_v14 = vrot.slane %v516_v22, %v1402_v13 }
  0x2f   : > { %1208 = vmatprep.subr.bf16.mxu1 %v1337_v1  ;;  %v450_v28 = vcombine.low %v442_v8, %v449_v9  ;;  %v790_v30 = vcombine.low %v348_v51, %v789_v25  ;;  %v946_v37 = vsel %vm1498_vm15, %v1150_v35, %v945_v19 }
  0x30   : > { %v870_v33 = vsel %vm1460_vm8, %v865_v26, %v869_v27  ;;  %v952_v38 = vcombine.low %v1521_v10, %v946_v37 }
  0x31   : > { %1235 = vmatpush3.bf16.msra.mxu0 %v1312_v49  ;;  %v876_v45 = vcombine.low %v1489_v32, %v870_v33  ;;  %v531_v32 = vcombine.low %v523_v12, %v530_v14 }
  0x32   : > { %1240 = vmatprep.subr.bf16.mxu0 %v1337_v1 }
  0x33   : > { %v883_v15 = vrot.slane %v876_v45, %v1402_v13 }
  0x35   : > { %1205 = vmatmul.mubr.msk.bf16.vlgmr.msra.gmra.mrb[0].mxu1 %vm288_vm14, %v349_v58  ;;  %v884_v36 = vcombine.low %v1485_v31, %v883_v15  ;;  %v959_v31 = vrot.slane %v952_v38, %v1402_v13 }
  0x36   : > { %1209 = vmatpush3.bf16.msra.mxu1 %v1317_v16  ;;  %1212 = vmatprep.mubr.msk.bf16.mxu1 %vm1338_vm0, %v1337_v1 }
  0x37   : > { %1210 = vmatprep.subr.bf16.mxu1 %v1337_v1  ;;  %v960_v23 = vcombine.low %v449_v9, %v959_v31 }
  0x38   : > { %1237 = vmatmul.mubr.msk.bf16.vlgmr.msra.gmra.mrb[0].mxu0 %vm288_vm14, %v717_v60 }
  0x39   : > { %1241 = vmatpush3.bf16.msra.mxu0 %v1316_v63  ;;  %1244 = vmatprep.mubr.msk.bf16.mxu0 %vm1338_vm0, %v1337_v1 }
  0x3a   : > { %1242 = vmatprep.subr.bf16.mxu0 %v1337_v1  ;;  %1211 = vmatpush3.bf16.msra.mxu1 %v1319_v3 }
  0x3b   : > { %1216 = vmatprep.subr.bf16.mxu1 %v1337_v1 }
  0x3d   : > { %1243 = vmatpush3.bf16.msra.mxu0 %v1318_v7 }
  0x3e   : > { %1248 = vmatprep.subr.bf16.mxu0 %v1337_v1 }
  0x41   : > { %1213 = vmatmul.mubr.msk.bf16.vlgmr.msra.gmra.mrb[0].mxu1 %vm288_vm14, %v450_v28 }
  0x42   : > { %1217 = vmatpush3.bf16.msra.mxu1 %v1322_v29  ;;  %1220 = vmatprep.mubr.msk.bf16.mxu1 %vm1338_vm0, %v1337_v1 }
  0x43   : > { %1218 = vmatprep.subr.bf16.mxu1 %v1337_v1 }
  0x44   : > { %1245 = vmatmul.mubr.msk.bf16.vlgmr.msra.gmra.mrb[0].mxu0 %vm288_vm14, %v790_v30 }
  0x45   : > { %1249 = vmatpush3.bf16.msra.mxu0 %v1321_v34  ;;  %1252 = vmatprep.mubr.msk.bf16.mxu0 %vm1338_vm0, %v1337_v1 }
  0x46   : > { %1250 = vmatprep.subr.bf16.mxu0 %v1337_v1  ;;  %1219 = vmatpush3.bf16.msra.mxu1 %v1324_v18 }
  0x49   : > { %1251 = vmatpush3.bf16.msra.mxu0 %v1323_v11 }
  0x4a   : > { %1256 = vmatprep.subr.bf16.mxu0 %v1337_v1 }
  0x4d   : > { %1221 = vmatmul.mubr.msk.bf16.vlgmr.msra.gmra.mrb[0].mxu1 %vm288_vm14, %v531_v32 }
  0x50   : > { %1253 = vmatmul.mubr.msk.bf16.vlgmr.msra.gmra.mrb[0].mxu0 %vm288_vm14, %v884_v36 }
  0x51   : > { %1257 = vmatpush3.bf16.msra.mxu0 %v1327_v24  ;;  %1260 = vmatprep.mubr.msk.bf16.mxu0 %vm1338_vm0, %v1337_v1  ;;  %vm1027_vm0 = vcmask 60416  }
  0x52   : > { %1258 = vmatprep.subr.bf16.mxu0 %v1337_v1 }
  0x55   : > { %1259 = vmatpush3.bf16.msra.mxu0 %v1328_v39 }
  0x5c   : > { %1261 = vmatmul.mubr.msk.bf16.vlgmr.msra.gmra.mrb[0].mxu0 %vm288_vm14, %v960_v23 }
 0x120   : > { %v581_v40 = vpop.f32.mrb[0].mxu1 }
 0x121   : > { %v1222_v20 = vpop.f32.mrb[1].mxu1 }
 0x122   : > { %v584_v41 = vpop.f32.mrb[2].mxu1 }
 0x123   : > { %v1223_v10 = vpop.f32.mrb[3].mxu1 }
 0x12f   : > { %v1010_v42 = vpop.f32.mrb[0].mxu0 }
 0x130   : > { %v1264_v43 = vadd.f32 %v1010_v42, %v581_v40  ;;  %v1262_v44 = vpop.f32.mrb[1].mxu0 }
 0x131   : > { %v1013_v1 = vpop.f32.mrb[2].mxu0 }
 0x132   : > { %v1163_v46 = vpack.c.bf16 %v1264_v43, %v1264_v43  ;;  %v1265_v13 = vadd.f32 %v1013_v1, %v584_v41  ;;  %v1263_v47 = vpop.f32.mrb[3].mxu0 }
 0x134   : > { %1028 = vst.msk [vmem:[%s143_s28] sm:$0xf] %vm1027_vm0, %v1163_v46  ;;  %v1164_v48 = vpack.c.bf16 %v1265_v13, %v1265_v13 }
 0x136   : > { %1029 = vst.msk [vmem:[%s143_s28 + $0x4] sm:$0xf] %vm1027_vm0, %v1164_v48 }
 0x137 PF: > { %s12_s9 = sadd.s32 1, %s1335_s9  }
 0x138   : > { %p9_p4 = scmp.ge.s32.totalorder %s12_s9, 4  }
 0x13a   :  { %11 = sbr.rel (!%p9_p4) target bundleno = 1 (0x1), region = 66 }

// kernel: custom_densenet_forward.37
= control target key start
LH: loop header
LB: loop body
LE: loop exit
PB: predicated region body
PF: predicated region fallthrough
CT: control target
= control target key end

     0   :  { %v26_v0 = vlaneseq  ;;  %v196_v25 = vmov 0   ;;  %vm84_vm0 = vcmask 261120   ;;  %vm156_vm1 = vcmask 125952   ;;  %s258_s1 = inlined_call_operand.vmem [shape: bf16[32,16], index: 1, kind: input, shape index: {}]   ;;  %s259_s2 = inlined_call_operand.vmem [shape: bf16[1,32], index: 2, kind: input, shape index: {}]   ;;  %s260_s3 = inlined_call_operand.vmem [shape: bf16[1,32], index: 3, kind: input, shape index: {}]   ;;  %s261_s0 = inlined_call_operand.vmem [shape: bf16[32,32], index: 0, kind: input, shape index: {}]   ;;  %s262_s4 = inlined_call_operand.vmem [shape: bf16[32,16], index: 4, kind: output, shape index: {}]  }
   0x1   :  { %v194_v1 = vld [vmem:[%s258_s1] sm:$0xff]   ;;  %v195_v2 = vld [vmem:[%s258_s1 + $0x8] sm:$0xff]  }
   0x2   :  { %v27_v3 = vshrl.u32 %v26_v0, 7  ;;  %185 = vmatprep.subr.bf16.mxu0 %v194_v1  ;;  %v22_v4 = vld [vmem:[%s259_s2] sm:$0x1]  ;;  %v19_v11 = vld [vmem:[%s261_s0 + $0x4] sm:$0xf] }
   0x3   :  { %186 = vmatpush3.bf16.msra.mxu0 %v194_v1  ;;  %v24_v5 = vpack.i.b16 %v22_v4, %v22_v4  ;;  %v38_v7 = vld [vmem:[%s260_s3] sm:$0x1]  ;;  %v20_v13 = vld [vmem:[%s261_s0 + $0x8] sm:$0xf]  ;;  %v21_v14 = vld [vmem:[%s261_s0 + $0xc] sm:$0xf] }
   0x4   :  { %v28_v6 = vsub.s32 0, %v27_v3  ;;  %187 = vmatprep.subr.bf16.mxu0 %v195_v2  ;;  %v40_v8 = vpack.i.b16 %v38_v7, %v38_v7  ;;  %v18_v9 = vld [vmem:[%s261_s0] sm:$0xf] }
   0x6   :  { %v29_v10 = vrot.slane %v24_v5, %v28_v6  ;;  %v45_v12 = vrot.slane %v40_v8, %v28_v6 }
   0x7   :  { %188 = vmatpush3.bf16.msra.mxu0 %v195_v2 }
   0x8   :  { %v165_v15 = vcombine.low %v29_v10, %v29_v10  ;;  %v166_v16 = vcombine.low %v45_v12, %v45_v12 }
   0xa   :  { %v34_v17 = vmul.bf16 %v165_v15, %v18_v9  ;;  %v35_v18 = vmul.bf16 %v165_v15, %v19_v11  ;;  %v36_v19 = vmul.bf16 %v165_v15, %v20_v13  ;;  %v37_v20 = vmul.bf16 %v165_v15, %v21_v14 }
   0xc   :  { %v50_v21 = vadd.bf16 %v166_v16, %v34_v17  ;;  %v51_v22 = vadd.bf16 %v166_v16, %v35_v18  ;;  %v52_v23 = vadd.bf16 %v166_v16, %v36_v19  ;;  %v53_v24 = vadd.bf16 %v166_v16, %v37_v20 }
   0xe   :  { %v54_v26 = vmax.bf16 %v196_v25, %v50_v21  ;;  %v55_v27 = vmax.bf16 %v196_v25, %v51_v22  ;;  %v56_v28 = vmax.bf16 %v196_v25, %v52_v23  ;;  %v57_v29 = vmax.bf16 %v196_v25, %v53_v24 }
  0x10   :  { %v167_v30 = vcombine.low %v54_v26, %v55_v27  ;;  %v168_v31 = vcombine.low %v56_v28, %v57_v29 }
  0x12   :  { %189 = vmatprep.mubr.msk.bf16.mxu0 %vm84_vm0, %v167_v30 }
  0x13   :  { %190 = vmatmul.mubr.msk.bf16.vlgmr.msra.gmra.mrb[0].mxu0 %vm84_vm0, %v168_v31 }
  0xe6   :  { %v191_v32 = vpop.f32.mrb[0].mxu0 }
  0xe7   :  { %v179_v33 = vpack.c.bf16 %v191_v32, %v191_v32  ;;  %v125_v34 = vpop.f32.mrb[1].mxu0 }
  0xe8   :  { %v177_v35 = vpack.c.bf16 %v125_v34, %v125_v34  ;;  %v192_v36 = vpop.f32.mrb[2].mxu0 }
  0xe9   :  { %159 = vst.msk [vmem:[%s262_s4 + $0x8] sm:$0xf] %vm156_vm1, %v179_v33  ;;  %v180_v37 = vpack.c.bf16 %v192_v36, %v192_v36  ;;  %v128_v38 = vpop.f32.mrb[3].mxu0 }
  0xea   :  { %157 = vst.msk [vmem:[%s262_s4] sm:$0xf] %vm156_vm1, %v177_v35  ;;  %v178_v39 = vpack.c.bf16 %v128_v38, %v128_v38 }
  0xeb   :  { %160 = vst.msk [vmem:[%s262_s4 + $0xc] sm:$0xf] %vm156_vm1, %v180_v37 }
  0xec   :  { %158 = vst.msk [vmem:[%s262_s4 + $0x4] sm:$0xf] %vm156_vm1, %v178_v39 }

// kernel: custom_densenet_forward.39
= control target key start
LH: loop header
LB: loop body
LE: loop exit
PB: predicated region body
PF: predicated region fallthrough
CT: control target
= control target key end

     0   :  { %v30_v0 = vlaneseq  ;;  %v185_v1 = vmov 0.0   ;;  %vm186_vm0 = vmmov 0   ;;  %v187_v20 = vmov 0   ;;  %s253_s1 = inlined_call_operand.vmem [shape: bf16[32,32], index: 1, kind: input, shape index: {}]   ;;  %s254_s2 = inlined_call_operand.vmem [shape: bf16[1,32], index: 2, kind: input, shape index: {}]   ;;  %s255_s3 = inlined_call_operand.vmem [shape: bf16[1,32], index: 3, kind: input, shape index: {}]   ;;  %s256_s0 = inlined_call_operand.vmem [shape: bf16[16,32], index: 0, kind: input, shape index: {}]   ;;  %s257_s4 = inlined_call_operand.vmem [shape: f32[1,32], index: 4, kind: input, shape index: {}]   ;;  %s258_s5 = inlined_call_operand.vmem [shape: f32[1,32], index: 5, kind: input, shape index: {}]   ;;  %s259_s6 = inlined_call_operand.vmem [shape: bf16[16,32], index: 6, kind: output, shape index: {}]  }
   0x1   :  { %172 = vmatprep.subr.bf16.mxu0 %v185_v1  ;;  %v183_v2 = vld [vmem:[%s253_s1] sm:$0xff]   ;;  %176 = vmatprep.mubr.msk.bf16.mxu0 %vm186_vm0, %v185_v1  ;;  %v184_v4 = vld [vmem:[%s253_s1 + $0x8] sm:$0xff]   ;;  %vm77_vm1 = vcmask 261120   ;;  %vm150_vm2 = vcmask 257024  }
   0x2   :  { %v31_v3 = vshrl.u32 %v30_v0, 7  ;;  %173 = vmatpush3.bf16.msra.mxu0 %v183_v2  ;;  %v26_v5 = vld [vmem:[%s254_s2] sm:$0x1]  ;;  %v25_v12 = vld [vmem:[%s256_s0 + $0x4] sm:$0xf] }
   0x3   :  { %174 = vmatprep.subr.bf16.mxu0 %v185_v1  ;;  %v28_v6 = vpack.i.b16 %v26_v5, %v26_v5  ;;  %v40_v8 = vld [vmem:[%s255_s3] sm:$0x1] }
   0x4   :  { %v32_v7 = vsub.s32 0, %v31_v3  ;;  %v42_v9 = vpack.i.b16 %v40_v8, %v40_v8  ;;  %v24_v11 = vld [vmem:[%s256_s0] sm:$0xf] }
   0x5   :  { %v163_v24 = vld [vmem:[%s257_s4] ss:$0 sm:$0xff] }
   0x6   :  { %v33_v10 = vrot.slane %v28_v6, %v32_v7  ;;  %175 = vmatpush3.bf16.msra.mxu0 %v184_v4  ;;  %v47_v13 = vrot.slane %v42_v9, %v32_v7  ;;  %v164_v26 = vld [vmem:[%s258_s5] ss:$0 sm:$0xff] }
   0x8   :  { %v157_v14 = vcombine.low %v33_v10, %v33_v10  ;;  %v158_v15 = vcombine.low %v47_v13, %v47_v13 }
   0xa   :  { %v38_v16 = vmul.bf16 %v157_v14, %v24_v11  ;;  %v39_v17 = vmul.bf16 %v157_v14, %v25_v12 }
   0xc   :  { %v52_v18 = vadd.bf16 %v158_v15, %v38_v16  ;;  %v53_v19 = vadd.bf16 %v158_v15, %v39_v17 }
   0xe   :  { %v54_v21 = vmax.bf16 %v187_v20, %v52_v18  ;;  %v55_v22 = vmax.bf16 %v187_v20, %v53_v19 }
  0x10   :  { %v159_v23 = vcombine.low %v54_v21, %v55_v22 }
  0x12   :  { %177 = vmatmul.mubr.msk.bf16.vlgmr.msra.gmra.mrb[0].mxu0 %vm77_vm1, %v159_v23 }
  0xe5   :  { %v115_v25 = vpop.f32.mrb[0].mxu0 }
  0xe6   :  { %v129_v27 = vmul.f32 %v163_v24, %v115_v25  ;;  %v178_v28 = vpop.f32.mrb[1].mxu0 }
  0xe7   :  { %v118_v29 = vpop.f32.mrb[2].mxu0 }
  0xe8   :  { %v138_v30 = vadd.f32 %v164_v26, %v129_v27  ;;  %v130_v31 = vmul.f32 %v163_v24, %v118_v29  ;;  %v179_v32 = vpop.f32.mrb[3].mxu0 }
  0xea   :  { %v140_v33 = vmax.f32 %v138_v30, 0.0  ;;  %v139_v34 = vadd.f32 %v164_v26, %v130_v31 }
  0xec   :  { %v167_v35 = vpack.c.bf16 %v140_v33, %v140_v33  ;;  %v141_v36 = vmax.f32 %v139_v34, 0.0 }
  0xee   :  { %151 = vst.msk [vmem:[%s259_s6] sm:$0xf] %vm150_vm2, %v167_v35  ;;  %v168_v37 = vpack.c.bf16 %v141_v36, %v141_v36 }
  0xf0   :  { %152 = vst.msk [vmem:[%s259_s6 + $0x4] sm:$0xf] %vm150_vm2, %v168_v37 }

// kernel: custom_densenet_forward.38
= control target key start
LH: loop header
LB: loop body
LE: loop exit
PB: predicated region body
PF: predicated region fallthrough
CT: control target
= control target key end

     0   :  { %vm72_vm0 = vcmask 123904   ;;  %v284_v0 = vlaneseq  ;;  %v905_v4 = vmov 1966171168   ;;  %v906_v6 = vmov 1935823168   ;;  %s1185_s0 = inlined_call_operand.vmem [shape: bf16[8,2,2,2,16], index: 0, kind: input, shape index: {}]   ;;  %s1186_s1 = inlined_call_operand.vmem [shape: bf16[8,2,16], index: 1, kind: output, shape index: {}]  }
   0x1   :  { %v8_v1 = vld [vmem:[%s1185_s0] sm:$0x1]  ;;  %v9_v2 = vld [vmem:[%s1185_s0 + $0x1] sm:$0x1]  ;;  %v10_v3 = vld [vmem:[%s1185_s0 + $0x2] sm:$0x1]  ;;  %v282_v5 = vunpack.c.l.s4 %v905_v4  ;;  %v506_v7 = vunpack.c.l.s4 %v906_v6 }
   0x2   :  { %v11_v8 = vld [vmem:[%s1185_s0 + $0x3] sm:$0x1]  ;;  %v40_v9 = vunpack.c.l.bf16 %v8_v1  ;;  %v41_v10 = vunpack.c.l.bf16 %v9_v2  ;;  %v42_v11 = vunpack.c.l.bf16 %v10_v3  ;;  %v285_v12 = vshrl.u32 %v284_v0, 7  ;;  %v12_v16 = vld [vmem:[%s1185_s0 + $0x4] sm:$0x1] }
   0x3   :  { %v43_v13 = vunpack.c.l.bf16 %v11_v8  ;;  %v283_v14 = vunpack.c.0.s8 %v282_v5  ;;  %v507_v15 = vunpack.c.0.s8 %v506_v7  ;;  %v13_v17 = vld [vmem:[%s1185_s0 + $0x5] sm:$0x1]  ;;  %v14_v18 = vld [vmem:[%s1185_s0 + $0x6] sm:$0x1]  ;;  %v15_v22 = vld [vmem:[%s1185_s0 + $0x7] sm:$0x1]  ;;  %v44_v30 = vunpack.c.l.bf16 %v12_v16 }
   0x4   :  { %v73_v19 = vsel %vm72_vm0, %v40_v9, 0.0  ;;  %v74_v20 = vsel %vm72_vm0, %v42_v11, 0.0  ;;  %v76_v21 = vsel %vm72_vm0, %v41_v10, 0.0  ;;  %v16_v27 = vld [vmem:[%s1185_s0 + $0x8] sm:$0x1]  ;;  %v45_v31 = vunpack.c.l.bf16 %v13_v17 }
   0x5   :  { %v75_v23 = vadd.f32 %v74_v20, %v73_v19  ;;  %v77_v24 = vsel %vm72_vm0, %v43_v13, 0.0  ;;  %v945_v25 = vsub.s32 %v283_v14, %v285_v12  ;;  %v947_v26 = vsub.s32 %v507_v15, %v285_v12  ;;  %v17_v28 = vld [vmem:[%s1185_s0 + $0x9] sm:$0x1]  ;;  %v18_v35 = vld [vmem:[%s1185_s0 + $0xa] sm:$0x1] }
   0x6   :  { %v78_v29 = vadd.f32 %v77_v24, %v76_v21  ;;  %v46_v32 = vunpack.c.l.bf16 %v14_v18  ;;  %v47_v34 = vunpack.c.l.bf16 %v15_v22  ;;  %v19_v36 = vld [vmem:[%s1185_s0 + $0xb] sm:$0x1]  ;;  %v48_v37 = vunpack.c.l.bf16 %v16_v27  ;;  %v20_v55 = vld [vmem:[%s1185_s0 + $0xc] sm:$0x1]  ;;  %v21_v60 = vld [vmem:[%s1185_s0 + $0xd] sm:$0x1] }
   0x7   :  { %v121_v33 = vsel %vm72_vm0, %v75_v23, 0.0  ;;  %v49_v38 = vunpack.c.l.bf16 %v17_v28  ;;  %v79_v41 = vsel %vm72_vm0, %v44_v30, 0.0  ;;  %v82_v45 = vsel %vm72_vm0, %v45_v31, 0.0  ;;  %v22_v4 = vld [vmem:[%s1185_s0 + $0xe] sm:$0x1] }
   0x8   :  { %v122_v39 = vrot.slane %v121_v33, 4  ;;  %v128_v40 = vsel %vm72_vm0, %v78_v29, 0.0  ;;  %v80_v42 = vsel %vm72_vm0, %v46_v32, 0.0  ;;  %v83_v46 = vsel %vm72_vm0, %v47_v34, 0.0  ;;  %v23_v9 = vld [vmem:[%s1185_s0 + $0xf] sm:$0x1] }
   0x9   :  { %v129_v43 = vrot.slane %v128_v40, 4  ;;  %v81_v44 = vadd.f32 %v80_v42, %v79_v41  ;;  %v84_v48 = vadd.f32 %v83_v46, %v82_v45  ;;  %v50_v49 = vunpack.c.l.bf16 %v18_v35 }
   0xa   :  { %v123_v47 = vadd.f32 %v122_v39, %v121_v33  ;;  %v51_v50 = vunpack.c.l.bf16 %v19_v36  ;;  %v85_v53 = vsel %vm72_vm0, %v48_v37, 0.0  ;;  %v88_v54 = vsel %vm72_vm0, %v49_v38, 0.0 }
   0xb   :  { %v130_v51 = vadd.f32 %v129_v43, %v128_v40  ;;  %v135_v52 = vsel %vm72_vm0, %v81_v44, 0.0  ;;  %v142_v58 = vsel %vm72_vm0, %v84_v48, 0.0  ;;  %v86_v59 = vsel %vm72_vm0, %v50_v49, 0.0 }
   0xc   :  { %v124_v56 = vrot.slane %v123_v47, 2  ;;  %v136_v57 = vrot.slane %v135_v52, 4  ;;  %v143_v62 = vrot.slane %v142_v58, 4  ;;  %v87_v63 = vadd.f32 %v86_v59, %v85_v53 }
   0xd   :  { %v131_v61 = vrot.slane %v130_v51, 2  ;;  %v89_v0 = vsel %vm72_vm0, %v51_v50, 0.0  ;;  %v52_v5 = vunpack.c.l.bf16 %v20_v55  ;;  %v53_v10 = vunpack.c.l.bf16 %v21_v60 }
   0xe   :  { %v125_v1 = vadd.f32 %v124_v56, %v123_v47  ;;  %v137_v2 = vadd.f32 %v136_v57, %v135_v52  ;;  %v90_v3 = vadd.f32 %v89_v0, %v88_v54  ;;  %v144_v7 = vadd.f32 %v143_v62, %v142_v58 }
   0xf   :  { %v132_v6 = vadd.f32 %v131_v61, %v130_v51  ;;  %v149_v8 = vsel %vm72_vm0, %v87_v63, 0.0  ;;  %v54_v18 = vunpack.c.l.bf16 %v22_v4  ;;  %v55_v22 = vunpack.c.l.bf16 %v23_v9 }
  0x10   :  { %v126_v11 = vrot.slane %v125_v1, 1  ;;  %v138_v12 = vrot.slane %v137_v2, 2  ;;  %v150_v13 = vrot.slane %v149_v8, 4  ;;  %v156_v14 = vsel %vm72_vm0, %v90_v3, 0.0 }
  0x11   :  { %v133_v15 = vrot.slane %v132_v6, 1  ;;  %v145_v16 = vrot.slane %v144_v7, 2  ;;  %v157_v17 = vrot.slane %v156_v14, 4  ;;  %v91_v28 = vsel %vm72_vm0, %v52_v5, 0.0 }
  0x12   :  { %v127_v19 = vadd.f32 %v126_v11, %v125_v1  ;;  %v139_v20 = vadd.f32 %v138_v12, %v137_v2  ;;  %v151_v21 = vadd.f32 %v150_v13, %v149_v8  ;;  %v92_v32 = vsel %vm72_vm0, %v54_v18, 0.0  ;;  %v24_v13 = vld [vmem:[%s1185_s0 + $0x10] sm:$0x1] }
  0x13   :  { %v134_v23 = vadd.f32 %v133_v15, %v132_v6  ;;  %v146_v24 = vadd.f32 %v145_v16, %v144_v7  ;;  %v158_v27 = vadd.f32 %v157_v17, %v156_v14  ;;  %v93_v36 = vadd.f32 %v92_v32, %v91_v28 }
  0x14   :  { %v233_v29 = vmul.f32 0.25, %v127_v19  ;;  %v140_v30 = vrot.slane %v139_v20, 1  ;;  %v152_v31 = vrot.slane %v151_v21, 2  ;;  %v94_v40 = vsel %vm72_vm0, %v53_v10, 0.0 }
  0x15   :  { %v234_v33 = vmul.f32 0.25, %v134_v23  ;;  %v147_v34 = vrot.slane %v146_v24, 1  ;;  %v159_v35 = vrot.slane %v158_v27, 2  ;;  %v95_v44 = vsel %vm72_vm0, %v55_v22, 0.0  ;;  %v25_v22 = vld [vmem:[%s1185_s0 + $0x11] sm:$0x1] }
  0x16   :  { %v249_v37 = vpack.c.bf16 %v233_v29, %v233_v29  ;;  %v141_v38 = vadd.f32 %v140_v30, %v139_v20  ;;  %v153_v39 = vadd.f32 %v152_v31, %v151_v21  ;;  %v96_v48 = vadd.f32 %v95_v44, %v94_v40 }
  0x17   :  { %v250_v41 = vpack.c.bf16 %v234_v33, %v234_v33  ;;  %v148_v42 = vadd.f32 %v147_v34, %v146_v24  ;;  %v160_v43 = vadd.f32 %v159_v35, %v158_v27  ;;  %v163_v52 = vsel %vm72_vm0, %v93_v36, 0.0  ;;  %v26_v33 = vld [vmem:[%s1185_s0 + $0x12] sm:$0x1] }
  0x18   :  { %v287_v45 = vrot.slane %v249_v37, %v945_v25  ;;  %v235_v46 = vmul.f32 0.25, %v141_v38  ;;  %v154_v47 = vrot.slane %v153_v39, 1  ;;  %vm746_vm1 = vcmask 1041409   ;;  %v27_v37 = vld [vmem:[%s1185_s0 + $0x13] sm:$0x1] }
  0x19   :  { %v301_v49 = vrot.slane %v250_v41, %v945_v25  ;;  %v236_v50 = vmul.f32 0.25, %v148_v42  ;;  %v161_v51 = vrot.slane %v160_v43, 1  ;;  %v164_v56 = vrot.slane %v163_v52, 4 }
  0x1a   :  { %v294_v53 = vrot.slane %v287_v45, %v945_v25  ;;  %v251_v54 = vpack.c.bf16 %v235_v46, %v235_v46  ;;  %v155_v55 = vadd.f32 %v154_v47, %v153_v39  ;;  %v170_v60 = vsel %vm72_vm0, %v96_v48, 0.0 }
  0x1b   :  { %v308_v57 = vrot.slane %v301_v49, %v945_v25  ;;  %v252_v58 = vpack.c.bf16 %v236_v50, %v236_v50  ;;  %v162_v59 = vadd.f32 %v161_v51, %v160_v43  ;;  %v165_v0 = vadd.f32 %v164_v56, %v163_v52 }
  0x1c   :  { %v511_v61 = vrot.slane %v294_v53, %v947_v26  ;;  %v315_v62 = vrot.slane %v251_v54, %v945_v25  ;;  %v237_v63 = vmul.f32 0.25, %v155_v55  ;;  %v171_v4 = vrot.slane %v170_v60, 4 }
  0x1d   :  { %v525_v1 = vrot.slane %v308_v57, %v947_v26  ;;  %v329_v2 = vrot.slane %v252_v58, %v945_v25  ;;  %v238_v3 = vmul.f32 0.25, %v162_v59  ;;  %v166_v8 = vrot.slane %v165_v0, 2 }
  0x1e   :  { %v518_v5 = vrot.slane %v511_v61, %v947_v26  ;;  %v322_v6 = vrot.slane %v315_v62, %v945_v25  ;;  %v253_v7 = vpack.c.bf16 %v237_v63, %v237_v63  ;;  %v172_v12 = vadd.f32 %v171_v4, %v170_v60  ;;  %v28_v63 = vld [vmem:[%s1185_s0 + $0x14] sm:$0x1] }
  0x1f   :  { %v532_v9 = vrot.slane %v525_v1, %v947_v26  ;;  %v336_v10 = vrot.slane %v329_v2, %v945_v25  ;;  %v254_v11 = vpack.c.bf16 %v238_v3, %v238_v3  ;;  %v167_v17 = vadd.f32 %v166_v8, %v165_v0  ;;  %v29_v8 = vld [vmem:[%s1185_s0 + $0x15] sm:$0x1] }
  0x20   :  { %v729_v14 = vunpack.c.l.b16 %v518_v5  ;;  %v539_v15 = vrot.slane %v322_v6, %v947_v26  ;;  %v343_v16 = vrot.slane %v253_v7, %v945_v25  ;;  %vm890_vm2 = vcmask 122880  }
  0x21   :  { %v730_v18 = vunpack.c.l.b16 %v532_v9  ;;  %v553_v19 = vrot.slane %v336_v10, %v947_v26  ;;  %v357_v20 = vrot.slane %v254_v11, %v945_v25  ;;  %v173_v21 = vrot.slane %v172_v12, 2 }
  0x22   :  { %v546_v23 = vrot.slane %v539_v15, %v947_v26  ;;  %v350_v24 = vrot.slane %v343_v16, %v945_v25  ;;  %v168_v27 = vrot.slane %v167_v17, 1  ;;  %v56_v28 = vunpack.c.l.bf16 %v24_v13  ;;  %v31_v13 = vld [vmem:[%s1185_s0 + $0x17] sm:$0x1] }
  0x23   :  { %v745_v29 = vrot.slane %v730_v18, 7  ;;  %v560_v30 = vrot.slane %v553_v19, %v947_v26  ;;  %v364_v31 = vrot.slane %v357_v20, %v945_v25  ;;  %v174_v32 = vadd.f32 %v173_v21, %v172_v12  ;;  %v30_v12 = vld [vmem:[%s1185_s0 + $0x16] sm:$0x1] }
  0x24   :  { %v731_v34 = vunpack.c.l.b16 %v546_v23  ;;  %v567_v35 = vrot.slane %v350_v24, %v947_v26  ;;  %v169_v36 = vadd.f32 %v168_v27, %v167_v17  ;;  %v57_v38 = vunpack.c.l.bf16 %v25_v22 }
  0x25   :  { %v747_v39 = vsel %vm746_vm1, %v745_v29, %v729_v14  ;;  %v732_v40 = vunpack.c.l.b16 %v560_v30  ;;  %v581_v41 = vrot.slane %v364_v31, %v947_v26  ;;  %v175_v42 = vrot.slane %v174_v32, 1  ;;  %v32_v29 = vld [vmem:[%s1185_s0 + $0x18] sm:$0x1] }
  0x26   :  { %v762_v43 = vpack.c.b16 %v747_v39, %v747_v39  ;;  %v574_v44 = vrot.slane %v567_v35, %v947_v26  ;;  %v239_v45 = vmul.f32 0.25, %v169_v36  ;;  %v58_v46 = vunpack.c.l.bf16 %v26_v33  ;;  %v34_v35 = vld [vmem:[%s1185_s0 + $0x1a] sm:$0x1] }
  0x27   :  { %v748_v47 = vrot.slane %v732_v40, 7  ;;  %v588_v48 = vrot.slane %v581_v41, %v947_v26  ;;  %v176_v49 = vadd.f32 %v175_v42, %v174_v32  ;;  %v59_v50 = vunpack.c.l.bf16 %v27_v37 }
  0x28   :  { %v776_v51 = vrot.slane %v762_v43, %v945_v25  ;;  %v733_v52 = vunpack.c.l.b16 %v574_v44  ;;  %v255_v53 = vpack.c.bf16 %v239_v45, %v239_v45  ;;  %v97_v54 = vsel %vm72_vm0, %v56_v28, 0.0  ;;  %v35_v44 = vld [vmem:[%s1185_s0 + $0x1b] sm:$0x1] }
  0x29   :  { %v749_v55 = vsel %vm746_vm1, %v748_v47, %v731_v34  ;;  %v734_v56 = vunpack.c.l.b16 %v588_v48  ;;  %v240_v57 = vmul.f32 0.25, %v176_v49  ;;  %v98_v58 = vsel %vm72_vm0, %v58_v46, 0.0  ;;  %v33_v34 = vld [vmem:[%s1185_s0 + $0x19] sm:$0x1] }
  0x2a   :  { %v783_v59 = vrot.slane %v776_v51, %v945_v25  ;;  %v763_v60 = vpack.c.b16 %v749_v55, %v749_v55  ;;  %v371_v61 = vrot.slane %v255_v53, %v945_v25  ;;  %v99_v62 = vadd.f32 %v98_v58, %v97_v54 }
  0x2b   :  { %v750_v0 = vrot.slane %v734_v56, 7  ;;  %v256_v1 = vpack.c.bf16 %v240_v57, %v240_v57  ;;  %v100_v2 = vsel %vm72_vm0, %v57_v38, 0.0  ;;  %v101_v3 = vsel %vm72_vm0, %v59_v50, 0.0 }
  0x2c   :  { %891 = vst.msk [vmem:[%s1186_s1] sm:$0x1] %vm890_vm2, %v783_v59  ;;  %v790_v4 = vrot.slane %v763_v60, %v945_v25  ;;  %v378_v5 = vrot.slane %v371_v61, %v945_v25  ;;  %v102_v6 = vadd.f32 %v101_v3, %v100_v2  ;;  %v177_v7 = vsel %vm72_vm0, %v99_v62, 0.0 }
  0x2d   :  { %v751_v9 = vsel %vm746_vm1, %v750_v0, %v733_v52  ;;  %v385_v10 = vrot.slane %v256_v1, %v945_v25  ;;  %v178_v11 = vrot.slane %v177_v7, 4  ;;  %v60_v14 = vunpack.c.l.bf16 %v28_v63 }
  0x2e   :  { %v797_v15 = vrot.slane %v790_v4, %v945_v25  ;;  %v764_v16 = vpack.c.b16 %v751_v9, %v751_v9  ;;  %v595_v17 = vrot.slane %v378_v5, %v947_v26  ;;  %v184_v18 = vsel %vm72_vm0, %v102_v6, 0.0  ;;  %v36_v5 = vld [vmem:[%s1185_s0 + $0x1c] sm:$0x1] }
  0x2f   :  { %v392_v19 = vrot.slane %v385_v10, %v945_v25  ;;  %v179_v20 = vadd.f32 %v178_v11, %v177_v7  ;;  %v185_v21 = vrot.slane %v184_v18, 4  ;;  %v61_v22 = vunpack.c.l.bf16 %v29_v8 }
  0x30   :  { %892 = vst.msk [vmem:[%s1186_s1 + $0x1] sm:$0x1] %vm890_vm2, %v797_v15  ;;  %v804_v23 = vrot.slane %v764_v16, %v945_v25  ;;  %v602_v24 = vrot.slane %v595_v17, %v947_v26  ;;  %v62_v27 = vunpack.c.l.bf16 %v30_v12  ;;  %v63_v28 = vunpack.c.l.bf16 %v31_v13 }
  0x31   :  { %v609_v30 = vrot.slane %v392_v19, %v947_v26  ;;  %v180_v31 = vrot.slane %v179_v20, 2  ;;  %v186_v32 = vadd.f32 %v185_v21, %v184_v18  ;;  %v103_v33 = vsel %vm72_vm0, %v60_v14, 0.0  ;;  %v37_v14 = vld [vmem:[%s1185_s0 + $0x1d] sm:$0x1] }
  0x32   :  { %v811_v36 = vrot.slane %v804_v23, %v945_v25  ;;  %v735_v37 = vunpack.c.l.b16 %v602_v24  ;;  %v104_v38 = vsel %vm72_vm0, %v62_v27, 0.0  ;;  %v106_v39 = vsel %vm72_vm0, %v61_v22, 0.0  ;;  %v38_v23 = vld [vmem:[%s1185_s0 + $0x1e] sm:$0x1]  ;;  %v39_v24 = vld [vmem:[%s1185_s0 + $0x1f] sm:$0x1] }
  0x33   :  { %v616_v40 = vrot.slane %v609_v30, %v947_v26  ;;  %v181_v41 = vadd.f32 %v180_v31, %v179_v20  ;;  %v187_v42 = vrot.slane %v186_v32, 2  ;;  %v105_v43 = vadd.f32 %v104_v38, %v103_v33 }
  0x34   :  { %893 = vst.msk [vmem:[%s1186_s1 + $0x2] sm:$0x1] %vm890_vm2, %v811_v36  ;;  %v107_v45 = vsel %vm72_vm0, %v63_v28, 0.0  ;;  %v64_v46 = vunpack.c.l.bf16 %v32_v29  ;;  %v65_v47 = vunpack.c.l.bf16 %v33_v34  ;;  %v66_v48 = vunpack.c.l.bf16 %v34_v35 }
  0x35   :  { %v736_v49 = vunpack.c.l.b16 %v616_v40  ;;  %v182_v50 = vrot.slane %v181_v41, 1  ;;  %v188_v51 = vadd.f32 %v187_v42, %v186_v32  ;;  %v108_v52 = vadd.f32 %v107_v45, %v106_v39 }
  0x36   :  { %v191_v53 = vsel %vm72_vm0, %v105_v43, 0.0  ;;  %v67_v54 = vunpack.c.l.bf16 %v35_v44  ;;  %v109_v55 = vsel %vm72_vm0, %v64_v46, 0.0  ;;  %v110_v56 = vsel %vm72_vm0, %v66_v48, 0.0 }
  0x37   :  { %v752_v57 = vrot.slane %v736_v49, 7  ;;  %v183_v58 = vadd.f32 %v182_v50, %v181_v41  ;;  %v189_v59 = vrot.slane %v188_v51, 1  ;;  %v192_v60 = vrot.slane %v191_v53, 4 }
  0x38   :  { %v198_v61 = vsel %vm72_vm0, %v108_v52, 0.0  ;;  %v111_v62 = vadd.f32 %v110_v56, %v109_v55  ;;  %v112_v63 = vsel %vm72_vm0, %v65_v47, 0.0  ;;  %v113_v0 = vsel %vm72_vm0, %v67_v54, 0.0 }
  0x39   :  { %v753_v1 = vsel %vm746_vm1, %v752_v57, %v735_v37  ;;  %v190_v2 = vadd.f32 %v189_v59, %v188_v51  ;;  %v241_v3 = vmul.f32 0.25, %v183_v58  ;;  %v193_v4 = vadd.f32 %v192_v60, %v191_v53 }
  0x3a   :  { %v765_v6 = vpack.c.b16 %v753_v1, %v753_v1  ;;  %v199_v7 = vrot.slane %v198_v61, 4  ;;  %v114_v8 = vadd.f32 %v113_v0, %v112_v63  ;;  %v205_v9 = vsel %vm72_vm0, %v111_v62, 0.0 }
  0x3b   :  { %v242_v10 = vmul.f32 0.25, %v190_v2  ;;  %v257_v11 = vpack.c.bf16 %v241_v3, %v241_v3  ;;  %v194_v12 = vrot.slane %v193_v4, 2  ;;  %v206_v13 = vrot.slane %v205_v9, 4 }
  0x3c   :  { %v818_v15 = vrot.slane %v765_v6, %v945_v25  ;;  %v200_v16 = vadd.f32 %v199_v7, %v198_v61  ;;  %v212_v17 = vsel %vm72_vm0, %v114_v8, 0.0  ;;  %v68_v18 = vunpack.c.l.bf16 %v36_v5 }
  0x3d   :  { %v258_v19 = vpack.c.bf16 %v242_v10, %v242_v10  ;;  %v399_v20 = vrot.slane %v257_v11, %v945_v25  ;;  %v195_v21 = vadd.f32 %v194_v12, %v193_v4  ;;  %v207_v22 = vadd.f32 %v206_v13, %v205_v9 }
  0x3e   :  { %v825_v27 = vrot.slane %v818_v15, %v945_v25  ;;  %v201_v28 = vrot.slane %v200_v16, 2  ;;  %v213_v29 = vrot.slane %v212_v17, 4  ;;  %v69_v30 = vunpack.c.l.bf16 %v37_v14 }
  0x3f   :  { %v406_v31 = vrot.slane %v399_v20, %v945_v25  ;;  %v413_v32 = vrot.slane %v258_v19, %v945_v25  ;;  %v196_v33 = vrot.slane %v195_v21, 1  ;;  %v208_v34 = vrot.slane %v207_v22, 2 }
  0x40   :  { %894 = vst.msk [vmem:[%s1186_s1 + $0x3] sm:$0x1] %vm890_vm2, %v825_v27  ;;  %v202_v35 = vadd.f32 %v201_v28, %v200_v16  ;;  %v214_v36 = vadd.f32 %v213_v29, %v212_v17  ;;  %v70_v37 = vunpack.c.l.bf16 %v38_v23  ;;  %v71_v38 = vunpack.c.l.bf16 %v39_v24 }
  0x41   :  { %v420_v39 = vrot.slane %v413_v32, %v945_v25  ;;  %v623_v40 = vrot.slane %v406_v31, %v947_v26  ;;  %v197_v41 = vadd.f32 %v196_v33, %v195_v21  ;;  %v209_v42 = vadd.f32 %v208_v34, %v207_v22 }
  0x42   :  { %v203_v43 = vrot.slane %v202_v35, 1  ;;  %v215_v44 = vrot.slane %v214_v36, 2  ;;  %v115_v45 = vsel %vm72_vm0, %v68_v18, 0.0  ;;  %v116_v46 = vsel %vm72_vm0, %v70_v37, 0.0 }
  0x43   :  { %v630_v47 = vrot.slane %v623_v40, %v947_v26  ;;  %v637_v48 = vrot.slane %v420_v39, %v947_v26  ;;  %v243_v49 = vmul.f32 0.25, %v197_v41  ;;  %v210_v50 = vrot.slane %v209_v42, 1 }
  0x44   :  { %v204_v51 = vadd.f32 %v203_v43, %v202_v35  ;;  %v216_v52 = vadd.f32 %v215_v44, %v214_v36  ;;  %v117_v53 = vadd.f32 %v116_v46, %v115_v45  ;;  %v118_v54 = vsel %vm72_vm0, %v69_v30, 0.0 }
  0x45   :  { %v644_v55 = vrot.slane %v637_v48, %v947_v26  ;;  %v737_v56 = vunpack.c.l.b16 %v630_v47  ;;  %v259_v57 = vpack.c.bf16 %v243_v49, %v243_v49  ;;  %v211_v58 = vadd.f32 %v210_v50, %v209_v42 }
  0x46   :  { %v244_v59 = vmul.f32 0.25, %v204_v51  ;;  %v217_v60 = vrot.slane %v216_v52, 1  ;;  %v119_v61 = vsel %vm72_vm0, %v71_v38, 0.0  ;;  %v219_v62 = vsel %vm72_vm0, %v117_v53, 0.0 }
  0x47   :  { %v738_v63 = vunpack.c.l.b16 %v644_v55  ;;  %v427_v0 = vrot.slane %v259_v57, %v945_v25  ;;  %v245_v1 = vmul.f32 0.25, %v211_v58  ;;  %v120_v2 = vadd.f32 %v119_v61, %v118_v54 }
  0x48   :  { %v260_v3 = vpack.c.bf16 %v244_v59, %v244_v59  ;;  %v218_v4 = vadd.f32 %v217_v60, %v216_v52  ;;  %v220_v5 = vrot.slane %v219_v62, 4 }
  0x49   :  { %v754_v6 = vrot.slane %v738_v63, 7  ;;  %v434_v7 = vrot.slane %v427_v0, %v945_v25  ;;  %v261_v8 = vpack.c.bf16 %v245_v1, %v245_v1  ;;  %v226_v9 = vsel %vm72_vm0, %v120_v2, 0.0 }
  0x4a   :  { %v441_v10 = vrot.slane %v260_v3, %v945_v25  ;;  %v246_v11 = vmul.f32 0.25, %v218_v4  ;;  %v221_v12 = vadd.f32 %v220_v5, %v219_v62  ;;  %v227_v13 = vrot.slane %v226_v9, 4 }
  0x4b   :  { %v755_v14 = vsel %vm746_vm1, %v754_v6, %v737_v56  ;;  %v651_v15 = vrot.slane %v434_v7, %v947_v26  ;;  %v455_v16 = vrot.slane %v261_v8, %v945_v25 }
  0x4c   :  { %v766_v17 = vpack.c.b16 %v755_v14, %v755_v14  ;;  %v448_v18 = vrot.slane %v441_v10, %v945_v25  ;;  %v262_v19 = vpack.c.bf16 %v246_v11, %v246_v11  ;;  %v222_v20 = vrot.slane %v221_v12, 2 }
  0x4d   :  { %v658_v21 = vrot.slane %v651_v15, %v947_v26  ;;  %v462_v22 = vrot.slane %v455_v16, %v945_v25  ;;  %v228_v23 = vadd.f32 %v227_v13, %v226_v9 }
  0x4e   :  { %v832_v24 = vrot.slane %v766_v17, %v945_v25  ;;  %v665_v27 = vrot.slane %v448_v18, %v947_v26  ;;  %v469_v28 = vrot.slane %v262_v19, %v945_v25  ;;  %v223_v29 = vadd.f32 %v222_v20, %v221_v12 }
  0x4f   :  { %v679_v30 = vrot.slane %v462_v22, %v947_v26  ;;  %v229_v31 = vrot.slane %v228_v23, 2  ;;  %v739_v36 = vunpack.c.l.b16 %v658_v21 }
  0x50   :  { %v839_v32 = vrot.slane %v832_v24, %v945_v25  ;;  %v672_v33 = vrot.slane %v665_v27, %v947_v26  ;;  %v476_v34 = vrot.slane %v469_v28, %v945_v25  ;;  %v224_v35 = vrot.slane %v223_v29, 1 }
  0x51   :  { %v230_v37 = vadd.f32 %v229_v31, %v228_v23  ;;  %v686_v39 = vrot.slane %v679_v30, %v947_v26 }
  0x52   :  { %895 = vst.msk [vmem:[%s1186_s1 + $0x4] sm:$0x1] %vm890_vm2, %v839_v32  ;;  %v740_v38 = vunpack.c.l.b16 %v672_v33  ;;  %v693_v40 = vrot.slane %v476_v34, %v947_v26  ;;  %v225_v41 = vadd.f32 %v224_v35, %v223_v29 }
  0x53   :  { %v231_v42 = vrot.slane %v230_v37, 1  ;;  %v741_v48 = vunpack.c.l.b16 %v686_v39 }
  0x54   :  { %v756_v43 = vrot.slane %v740_v38, 7  ;;  %v700_v44 = vrot.slane %v693_v40, %v947_v26  ;;  %v247_v45 = vmul.f32 0.25, %v225_v41 }
  0x55   :  { %v232_v46 = vadd.f32 %v231_v42, %v230_v37 }
  0x56   :  { %v757_v47 = vsel %vm746_vm1, %v756_v43, %v739_v36  ;;  %v742_v49 = vunpack.c.l.b16 %v700_v44  ;;  %v263_v50 = vpack.c.bf16 %v247_v45, %v247_v45 }
  0x57   :  { %v767_v51 = vpack.c.b16 %v757_v47, %v757_v47  ;;  %v248_v52 = vmul.f32 0.25, %v232_v46 }
  0x58   :  { %v758_v53 = vrot.slane %v742_v49, 7  ;;  %v483_v54 = vrot.slane %v263_v50, %v945_v25 }
  0x59   :  { %v846_v55 = vrot.slane %v767_v51, %v945_v25  ;;  %v264_v56 = vpack.c.bf16 %v248_v52, %v248_v52 }
  0x5a   :  { %v759_v57 = vsel %vm746_vm1, %v758_v53, %v741_v48  ;;  %v490_v58 = vrot.slane %v483_v54, %v945_v25 }
  0x5b   :  { %v853_v59 = vrot.slane %v846_v55, %v945_v25  ;;  %v768_v60 = vpack.c.b16 %v759_v57, %v759_v57  ;;  %v497_v61 = vrot.slane %v264_v56, %v945_v25 }
  0x5c   :  { %v707_v62 = vrot.slane %v490_v58, %v947_v26 }
  0x5d   :  { %896 = vst.msk [vmem:[%s1186_s1 + $0x5] sm:$0x1] %vm890_vm2, %v853_v59  ;;  %v860_v63 = vrot.slane %v768_v60, %v945_v25  ;;  %v504_v0 = vrot.slane %v497_v61, %v945_v25 }
  0x5e   :  { %v714_v2 = vrot.slane %v707_v62, %v947_v26 }
  0x5f   :  { %v867_v1 = vrot.slane %v860_v63, %v945_v25  ;;  %v721_v3 = vrot.slane %v504_v0, %v947_v26 }
  0x60   :  { %v743_v5 = vunpack.c.l.b16 %v714_v2 }
  0x61   :  { %897 = vst.msk [vmem:[%s1186_s1 + $0x6] sm:$0x1] %vm890_vm2, %v867_v1  ;;  %v728_v4 = vrot.slane %v721_v3, %v947_v26 }
  0x63   :  { %v744_v6 = vunpack.c.l.b16 %v728_v4 }
  0x65   :  { %v760_v7 = vrot.slane %v744_v6, 7 }
  0x67   :  { %v761_v8 = vsel %vm746_vm1, %v760_v7, %v743_v5 }
  0x68   :  { %v769_v9 = vpack.c.b16 %v761_v8, %v761_v8 }
  0x6a   :  { %v874_v10 = vrot.slane %v769_v9, %v945_v25 }
  0x6c   :  { %v881_v11 = vrot.slane %v874_v10, %v945_v25 }
  0x6e   :  { %898 = vst.msk [vmem:[%s1186_s1 + $0x7] sm:$0x1] %vm890_vm2, %v881_v11 }

// kernel: custom_densenet_forward.40
= control target key start
LH: loop header
LB: loop body
LE: loop exit
PB: predicated region body
PF: predicated region fallthrough
CT: control target
= control target key end

     0   :  { %s1232_s9 = smov 0   ;;  %s1428_s0 = inlined_call_operand.vmem [shape: bf16[2,4,4,32], index: 0, kind: input, shape index: {}]   ;;  %s1429_s1 = inlined_call_operand.vmem [shape: bf16[9,32,8], index: 1, kind: input, shape index: {}]   ;;  %s1430_s2 = inlined_call_operand.vmem [shape: bf16[2,4,8], index: 2, kind: output, shape index: {}]  }
   0x1 LB: > { %s972_s10 = sadd.s32 4294967295, %s1212_s9   ;;  %p976_p0 = scmp.ge.s32.totalorder %s1212_s9, 1  ;;  %s1212_s9 = sphi %s1232_s9, %s12_s9  }
   0x2   : > { %p112_p1 = scmp.lt.s32.totalorder %s1212_s9, 3 }
   0x4   : > { %p113_p2 = pnand %p976_p0, %p112_p1 }
   0x5   : > { %v1188_v0 = vld [vmem:[%s1429_s1 + $0x40] sm:$0xff] (!%p113_p2)   ;;  %v156_v1 = vlaneseq (!%p113_p2)  ;;  %v1214_v2 = vmov (!%p113_p2), 0.0   ;;  %v1189_v3 = vld [vmem:[%s1429_s1 + $0x10] sm:$0xff] (!%p113_p2)   ;;  %v1190_v4 = vld [vmem:[%s1429_s1 + $0x48] sm:$0xff] (!%p113_p2)   ;;  %vm1215_vm0 = vmmov (!%p113_p2), 0   ;;  %p133_p3 = scmp.lt.s32.totalorder (!%p113_p2), %s972_s10, 1 }
   0x6   : > { %116 = sbr.rel (%p113_p2) target bundleno = 296 (0x128), region = 28  ;;  %1108 = vmatprep.subr.bf16.mxu0 (!%p113_p2), %v1214_v2  ;;  %1076 = vmatprep.subr.bf16.mxu1 (!%p113_p2), %v1214_v2  ;;  %v1191_v5 = vld [vmem:[%s1429_s1 + $0x18] sm:$0xff] (!%p113_p2)   ;;  %vm169_vm1 = vsmask.f32 (!%p113_p2), 256  ;;  %v1216_v7 = vmov (!%p113_p2), 1966171168  }
   0x7   : > { %1109 = vmatpush3.bf16.msra.mxu0 (!%p113_p2), %v1188_v0  ;;  %1080 = vmatprep.mubr.msk.bf16.mxu1 (!%p113_p2), %vm1215_vm0, %v1214_v2  ;;  %v157_v6 = vshrl.u32 (!%p113_p2), %v156_v1, 7  ;;  %v154_v8 = vunpack.c.l.s4 (!%p113_p2), %v1216_v7  ;;  %vm170_vm2 = vsmask.f32 (!%p113_p2), 1284  ;;  %vm172_vm3 = vsmask.f32 (!%p113_p2), 2312  ;;  %v1193_v34 = vld [vmem:[%s1429_s1] sm:$0xff] (!%p113_p2)  }
   0x8   : > { %1077 = vmatpush3.bf16.msra.mxu1 (!%p113_p2), %v1189_v3  ;;  %1110 = vmatprep.subr.bf16.mxu0 (!%p113_p2), %v1214_v2  ;;  %vm174_vm4 = vsmask.f32 (!%p113_p2), 3340  ;;  %vm171_vm5 = vmor (!%p113_p2), %vm169_vm1, %vm170_vm2  ;;  %vm176_vm6 = vsmask.f32 (!%p113_p2), 4368  ;;  %vm178_vm8 = vsmask.f32 (!%p113_p2), 5396 }
   0x9   : > { %1078 = vmatprep.subr.bf16.mxu1 (!%p113_p2), %v1214_v2  ;;  %1112 = vmatprep.mubr.msk.bf16.mxu0 (!%p113_p2), %vm1215_vm0, %v1214_v2  ;;  %v155_v9 = vunpack.c.0.s8 (!%p113_p2), %v154_v8  ;;  %vm173_vm7 = vmor (!%p113_p2), %vm171_vm5, %vm172_vm3  ;;  %vm180_vm10 = vsmask.f32 (!%p113_p2), 6424  ;;  %vm182_vm14 = vsmask.f32 (!%p113_p2), 7452  ;;  %vm234_vm1 = vcmask (!%p113_p2), 261120   ;;  %v1192_v36 = vld [vmem:[%s1429_s1 + $0x50] sm:$0xff] (!%p113_p2)  }
   0xa   : > { %vm175_vm9 = vmor (!%p113_p2), %vm173_vm7, %vm174_vm4  ;;  %v1195_v39 = vld [vmem:[%s1429_s1 + $0x8] sm:$0xff] (!%p113_p2)   ;;  %v1194_v41 = vld [vmem:[%s1429_s1 + $0x58] sm:$0xff] (!%p113_p2)  }
   0xb   : > { %1111 = vmatpush3.bf16.msra.mxu0 (!%p113_p2), %v1190_v4  ;;  %v1274_v12 = vsub.s32 (!%p113_p2), %v155_v9, %v157_v6  ;;  %vm177_vm11 = vmor (!%p113_p2), %vm175_vm9, %vm176_vm6  ;;  %v1197_v47 = vld [vmem:[%s1429_s1 + $0x20] sm:$0xff] (!%p113_p2)   ;;  %v1199_v51 = vld [vmem:[%s1429_s1 + $0x28] sm:$0xff] (!%p113_p2)  }
   0xc   : > { %1079 = vmatpush3.bf16.msra.mxu1 (!%p113_p2), %v1191_v5  ;;  %1116 = vmatprep.subr.bf16.mxu0 (!%p113_p2), %v1214_v2  ;;  %vm179_vm12 = vmor (!%p113_p2), %vm177_vm11, %vm178_vm8  ;;  %v1196_v49 = vld [vmem:[%s1429_s1 + $0x60] sm:$0xff] (!%p113_p2)   ;;  %v1198_v54 = vld [vmem:[%s1429_s1 + $0x68] sm:$0xff] (!%p113_p2)  }
   0xd   : > { %s1434_s10 = smov (!%p133_p3, %s972_s10), 1  ;;  %1084 = vmatprep.subr.bf16.mxu1 %v1214_v2  ;;  %vm181_vm13 = vmor %vm179_vm12, %vm180_vm10  ;;  %v1201_v61 = vld [vmem:[%s1429_s1 + $0x30] sm:$0xff]   ;;  %v1203_v3 = vld [vmem:[%s1429_s1 + $0x38] sm:$0xff]  }
   0xe   : > { %s1048_s19 = sshll.u32 %s1434_s10, 3  ;;  %vm1296_vm15 = vmor %vm181_vm13, %vm182_vm14  ;;  %v1200_v63 = vld [vmem:[%s1429_s1 + $0x70] sm:$0xff]   ;;  %v1202_v4 = vld [vmem:[%s1429_s1 + $0x78] sm:$0xff]   ;;  %s979_s25 = sshll.u32 %s1434_s10, 1 }
   0xf   : > { %s1267_s22 = scalar_lea.vmem %s1428_s0, %s1048_s19  ;;  %v1204_v9 = vld [vmem:[%s1429_s1 + $0x80] sm:$0xff]   ;;  %s141_s28 = scalar_lea.vmem %s1430_s2, %s979_s25 }
  0x10   : > { %v143_v10 = vld [vmem:[%s1267_s22] sm:$0x3]  ;;  %v1271_v11 = vld [vmem:[%s1267_s22 + $0x2] sm:$0x3]  ;;  %v1277_v13 = vld [vmem:[%s1267_s22 + $0x4] sm:$0x3] }
  0x11   : > { %v1280_v14 = vrot.slane %v143_v10, %v1274_v12  ;;  %v1284_v15 = vrot.slane %v1271_v11, %v1274_v12  ;;  %v1288_v16 = vrot.slane %v1277_v13, %v1274_v12  ;;  %v278_v38 = vcombine.low %v143_v10, %v1271_v11  ;;  %v146_v45 = vld [vmem:[%s1267_s22 + $0x6] sm:$0x3] }
  0x12   : > { %v753_v48 = vrot.slane %v146_v45, %v1274_v12  ;;  %v676_v52 = vcombine.low %v1277_v13, %v146_v45  ;;  %v430_v0 = vcombine.low %v1271_v11, %v1277_v13  ;;  %v1205_v11 = vld [vmem:[%s1429_s1 + $0x88] sm:$0xff]  }
  0x13   : > { %v160_v17 = vcombine.high %v1280_v14, %v1280_v14  ;;  %v168_v18 = vcombine.high %v1284_v15, %v1284_v15  ;;  %v185_v19 = vshrl.u32 %v1280_v14, 16  ;;  %v194_v20 = vshrl.u32 %v1284_v15, 16 }
  0x14   : > { %v508_v22 = vcombine.high %v1288_v16, %v1288_v16  ;;  %v510_v23 = vshrl.u32 %v1288_v16, 16  ;;  %v1019_v40 = vcombine.high %v1284_v15, %v1288_v16  ;;  %v285_v42 = vrot.slane %v278_v38, %v1274_v12 }
  0x15   : > { %v190_v24 = vshll.u32 %v160_v17, 16  ;;  %v199_v25 = vshll.u32 %v168_v18, 16  ;;  %v996_v50 = vcombine.high %v1280_v14, %v1284_v15  ;;  %v754_v53 = vcombine.high %v753_v48, %v753_v48 }
  0x16   : > { %v515_v26 = vshll.u32 %v508_v22, 16  ;;  %v606_v43 = vrot.slane %v1019_v40, %v1274_v12  ;;  %v292_v44 = vrot.slane %v285_v42, %v1274_v12  ;;  %v683_v56 = vrot.slane %v676_v52, %v1274_v12 }
  0x17   : > { %v192_v27 = vsel %vm1296_vm15, %v185_v19, %v190_v24  ;;  %v201_v28 = vsel %vm1296_vm15, %v194_v20, %v199_v25  ;;  %v360_v55 = vrot.slane %v996_v50, %v1274_v12  ;;  %v756_v57 = vshrl.u32 %v753_v48, 16 }
  0x18   : > { %v207_v29 = vcombine.low %v192_v27, %v201_v28  ;;  %v1309_v30 = vsel %vm1296_vm15, %v510_v23, %v515_v26  ;;  %v613_v46 = vrot.slane %v606_v43, %v1274_v12  ;;  %v761_v58 = vshll.u32 %v754_v53, 16 }
  0x19   : > { %v523_v31 = vcombine.low %v201_v28, %v1309_v30  ;;  %v367_v59 = vrot.slane %v360_v55, %v1274_v12  ;;  %v690_v60 = vrot.slane %v683_v56, %v1274_v12  ;;  %v437_v5 = vrot.slane %v430_v0, %v1274_v12 }
  0x1a   : > { %v214_v32 = vrot.slane %v207_v29, %v1274_v12  ;;  %v763_v62 = vsel %vm1296_vm15, %v756_v57, %v761_v58  ;;  %v1042_v10 = vcombine.high %v1288_v16, %v753_v48 }
  0x1b   : > { %v530_v33 = vrot.slane %v523_v31, %v1274_v12  ;;  %v769_v1 = vcombine.low %v1309_v30, %v763_v62  ;;  %v444_v7 = vrot.slane %v437_v5, %v1274_v12 }
  0x1c   : > { %v221_v35 = vrot.slane %v214_v32, %v1274_v12  ;;  %v852_v13 = vrot.slane %v1042_v10, %v1274_v12 }
  0x1d   : > { %v537_v37 = vrot.slane %v530_v33, %v1274_v12  ;;  %v776_v6 = vrot.slane %v769_v1, %v1274_v12 }
  0x1e   : > { %1081 = vmatmul.mubr.msk.bf16.vlgmr.msra.gmra.mrb[0].mxu1 %vm234_vm1, %v221_v35  ;;  %v859_v14 = vrot.slane %v852_v13, %v1274_v12 }
  0x1f   : > { %1113 = vmatmul.mubr.msk.bf16.vlgmr.msra.gmra.mrb[0].mxu0 %vm234_vm1, %v537_v37  ;;  %1085 = vmatpush3.bf16.msra.mxu1 %v1193_v34  ;;  %v783_v8 = vrot.slane %v776_v6, %v1274_v12 }
  0x20   : > { %1117 = vmatpush3.bf16.msra.mxu0 %v1192_v36  ;;  %1086 = vmatprep.subr.bf16.mxu1 %v1214_v2 }
  0x21   : > { %1118 = vmatprep.subr.bf16.mxu0 %v1214_v2  ;;  %1088 = vmatprep.mubr.msk.bf16.mxu1 %vm1215_vm0, %v1214_v2 }
  0x22   : > { %1120 = vmatprep.mubr.msk.bf16.mxu0 %vm1215_vm0, %v1214_v2 }
  0x23   : > { %1087 = vmatpush3.bf16.msra.mxu1 %v1195_v39 }
  0x24   : > { %1119 = vmatpush3.bf16.msra.mxu0 %v1194_v41  ;;  %1092 = vmatprep.subr.bf16.mxu1 %v1214_v2 }
  0x25   : > { %1124 = vmatprep.subr.bf16.mxu0 %v1214_v2 }
  0x2a   : > { %1089 = vmatmul.mubr.msk.bf16.vlgmr.msra.gmra.mrb[0].mxu1 %vm234_vm1, %v292_v44 }
  0x2b   : > { %1121 = vmatmul.mubr.msk.bf16.vlgmr.msra.gmra.mrb[0].mxu0 %vm234_vm1, %v613_v46  ;;  %1093 = vmatpush3.bf16.msra.mxu1 %v1197_v47 }
  0x2c   : > { %1125 = vmatpush3.bf16.msra.mxu0 %v1196_v49  ;;  %1094 = vmatprep.subr.bf16.mxu1 %v1214_v2 }
  0x2d   : > { %1126 = vmatprep.subr.bf16.mxu0 %v1214_v2  ;;  %1096 = vmatprep.mubr.msk.bf16.mxu1 %vm1215_vm0, %v1214_v2 }
  0x2e   : > { %1128 = vmatprep.mubr.msk.bf16.mxu0 %vm1215_vm0, %v1214_v2 }
  0x2f   : > { %1095 = vmatpush3.bf16.msra.mxu1 %v1199_v51 }
  0x30   : > { %1127 = vmatpush3.bf16.msra.mxu0 %v1198_v54  ;;  %1100 = vmatprep.subr.bf16.mxu1 %v1214_v2 }
  0x31   : > { %1132 = vmatprep.subr.bf16.mxu0 %v1214_v2 }
  0x36   : > { %1097 = vmatmul.mubr.msk.bf16.vlgmr.msra.gmra.mrb[0].mxu1 %vm234_vm1, %v367_v59 }
  0x37   : > { %1129 = vmatmul.mubr.msk.bf16.vlgmr.msra.gmra.mrb[0].mxu0 %vm234_vm1, %v690_v60  ;;  %1101 = vmatpush3.bf16.msra.mxu1 %v1201_v61 }
  0x38   : > { %1133 = vmatpush3.bf16.msra.mxu0 %v1200_v63  ;;  %1102 = vmatprep.subr.bf16.mxu1 %v1214_v2 }
  0x39   : > { %1134 = vmatprep.subr.bf16.mxu0 %v1214_v2  ;;  %1104 = vmatprep.mubr.msk.bf16.mxu1 %vm1215_vm0, %v1214_v2 }
  0x3a   : > { %1136 = vmatprep.mubr.msk.bf16.mxu0 %vm1215_vm0, %v1214_v2 }
  0x3b   : > { %1103 = vmatpush3.bf16.msra.mxu1 %v1203_v3 }
  0x3c   : > { %1135 = vmatpush3.bf16.msra.mxu0 %v1202_v4 }
  0x3d   : > { %1140 = vmatprep.subr.bf16.mxu0 %v1214_v2 }
  0x42   : > { %1105 = vmatmul.mubr.msk.bf16.vlgmr.msra.gmra.mrb[0].mxu1 %vm234_vm1, %v444_v7 }
  0x43   : > { %1137 = vmatmul.mubr.msk.bf16.vlgmr.msra.gmra.mrb[0].mxu0 %vm234_vm1, %v783_v8 }
  0x44   : > { %1141 = vmatpush3.bf16.msra.mxu0 %v1204_v9  ;;  %1144 = vmatprep.mubr.msk.bf16.mxu0 %vm1215_vm0, %v1214_v2  ;;  %vm917_vm0 = vcmask 58368  }
  0x45   : > { %1142 = vmatprep.subr.bf16.mxu0 %v1214_v2 }
  0x48   : > { %1143 = vmatpush3.bf16.msra.mxu0 %v1205_v11 }
  0x4f   : > { %1145 = vmatmul.mubr.msk.bf16.vlgmr.msra.gmra.mrb[0].mxu0 %vm234_vm1, %v859_v14 }
 0x115   : > { %v494_v15 = vpop.f32.mrb[0].mxu1 }
 0x116   : > { %v1106_v17 = vpop.f32.mrb[1].mxu1 }
 0x117   : > { %v497_v16 = vpop.f32.mrb[2].mxu1 }
 0x118   : > { %v1107_v18 = vpop.f32.mrb[3].mxu1 }
 0x122   : > { %v909_v19 = vpop.f32.mrb[0].mxu0 }
 0x123   : > { %v1148_v20 = vadd.f32 %v909_v19, %v494_v15  ;;  %v1146_v21 = vpop.f32.mrb[1].mxu0 }
 0x124   : > { %v912_v2 = vpop.f32.mrb[2].mxu0 }
 0x125   : > { %v916_v22 = vpack.c.bf16 %v1148_v20, %v1148_v20  ;;  %v1147_v23 = vpop.f32.mrb[3].mxu0 }
 0x127   : > { %918 = vst.msk [vmem:[%s141_s28] sm:$0x3] %vm917_vm0, %v916_v22 }
 0x128 PF: > { %s12_s9 = sadd.s32 1, %s1212_s9  }
 0x129   : > { %p9_p4 = scmp.ge.s32.totalorder %s12_s9, 4  }
 0x12b   :  { %11 = sbr.rel (!%p9_p4) target bundleno = 1 (0x1), region = 66 }

// kernel: custom_densenet_forward.43
= control target key start
LH: loop header
LB: loop body
LE: loop exit
PB: predicated region body
PF: predicated region fallthrough
CT: control target
= control target key end

     0   :  { %v24_v0 = vlaneseq  ;;  %v157_v1 = vmov 0.0   ;;  %vm158_vm0 = vmmov 0   ;;  %v159_v20 = vmov 0   ;;  %s209_s1 = inlined_call_operand.vmem [shape: bf16[32,16], index: 1, kind: input, shape index: {}]   ;;  %s210_s2 = inlined_call_operand.vmem [shape: bf16[1,32], index: 2, kind: input, shape index: {}]   ;;  %s211_s3 = inlined_call_operand.vmem [shape: bf16[1,32], index: 3, kind: input, shape index: {}]   ;;  %s212_s0 = inlined_call_operand.vmem [shape: bf16[16,32], index: 0, kind: input, shape index: {}]   ;;  %s213_s4 = inlined_call_operand.vmem [shape: bf16[16,16], index: 4, kind: output, shape index: {}]  }
   0x1   :  { %144 = vmatprep.subr.bf16.mxu0 %v157_v1  ;;  %v155_v2 = vld [vmem:[%s209_s1] sm:$0xff]   ;;  %148 = vmatprep.mubr.msk.bf16.mxu0 %vm158_vm0, %v157_v1  ;;  %v156_v4 = vld [vmem:[%s209_s1 + $0x8] sm:$0xff]   ;;  %vm71_vm1 = vcmask 261120   ;;  %vm124_vm2 = vcmask 125952  }
   0x2   :  { %v25_v3 = vshrl.u32 %v24_v0, 7  ;;  %145 = vmatpush3.bf16.msra.mxu0 %v155_v2  ;;  %v20_v5 = vld [vmem:[%s210_s2] sm:$0x1]  ;;  %v19_v12 = vld [vmem:[%s212_s0 + $0x4] sm:$0xf] }
   0x3   :  { %146 = vmatprep.subr.bf16.mxu0 %v157_v1  ;;  %v22_v6 = vpack.i.b16 %v20_v5, %v20_v5  ;;  %v34_v8 = vld [vmem:[%s211_s3] sm:$0x1] }
   0x4   :  { %v26_v7 = vsub.s32 0, %v25_v3  ;;  %v36_v9 = vpack.i.b16 %v34_v8, %v34_v8  ;;  %v18_v11 = vld [vmem:[%s212_s0] sm:$0xf] }
   0x6   :  { %v27_v10 = vrot.slane %v22_v6, %v26_v7  ;;  %147 = vmatpush3.bf16.msra.mxu0 %v156_v4  ;;  %v41_v13 = vrot.slane %v36_v9, %v26_v7 }
   0x8   :  { %v131_v14 = vcombine.low %v27_v10, %v27_v10  ;;  %v132_v15 = vcombine.low %v41_v13, %v41_v13 }
   0xa   :  { %v32_v16 = vmul.bf16 %v131_v14, %v18_v11  ;;  %v33_v17 = vmul.bf16 %v131_v14, %v19_v12 }
   0xc   :  { %v46_v18 = vadd.bf16 %v132_v15, %v32_v16  ;;  %v47_v19 = vadd.bf16 %v132_v15, %v33_v17 }
   0xe   :  { %v48_v21 = vmax.bf16 %v159_v20, %v46_v18  ;;  %v49_v22 = vmax.bf16 %v159_v20, %v47_v19 }
  0x10   :  { %v133_v23 = vcombine.low %v48_v21, %v49_v22 }
  0x12   :  { %149 = vmatmul.mubr.msk.bf16.vlgmr.msra.gmra.mrb[0].mxu0 %vm71_vm1, %v133_v23 }
  0xe5   :  { %v109_v24 = vpop.f32.mrb[0].mxu0 }
  0xe6   :  { %v139_v25 = vpack.c.bf16 %v109_v24, %v109_v24  ;;  %v150_v26 = vpop.f32.mrb[1].mxu0 }
  0xe7   :  { %v112_v27 = vpop.f32.mrb[2].mxu0 }
  0xe8   :  { %125 = vst.msk [vmem:[%s213_s4] sm:$0xf] %vm124_vm2, %v139_v25  ;;  %v140_v28 = vpack.c.bf16 %v112_v27, %v112_v27  ;;  %v151_v29 = vpop.f32.mrb[3].mxu0 }
  0xea   :  { %126 = vst.msk [vmem:[%s213_s4 + $0x4] sm:$0xf] %vm124_vm2, %v140_v28 }

// kernel: custom_densenet_forward.44
= control target key start
LH: loop header
LB: loop body
LE: loop exit
PB: predicated region body
PF: predicated region fallthrough
CT: control target
= control target key end

     0   :  { %vm40_vm0 = vcmask 123904   ;;  %vm137_vm1 = vcmask 122880   ;;  %vm138_vm2 = vsmask.f32 256  ;;  %s320_s0 = inlined_call_operand.vmem [shape: bf16[8,2,1,2,16], index: 0, kind: input, shape index: {}]   ;;  %s321_s1 = inlined_call_operand.vmem [shape: bf16[8,1,16], index: 1, kind: output, shape index: {}]  }
   0x1   :  { %v8_v0 = vld [vmem:[%s320_s0] sm:$0x1]  ;;  %v9_v1 = vld [vmem:[%s320_s0 + $0x1] sm:$0x1]  ;;  %v10_v4 = vld [vmem:[%s320_s0 + $0x2] sm:$0x1] }
   0x2   :  { %v24_v2 = vunpack.c.l.bf16 %v8_v0  ;;  %v25_v3 = vunpack.c.l.bf16 %v9_v1  ;;  %v11_v5 = vld [vmem:[%s320_s0 + $0x3] sm:$0x1]  ;;  %v26_v6 = vunpack.c.l.bf16 %v10_v4  ;;  %v12_v8 = vld [vmem:[%s320_s0 + $0x4] sm:$0x1]  ;;  %v13_v9 = vld [vmem:[%s320_s0 + $0x5] sm:$0x1] }
   0x3   :  { %v27_v7 = vunpack.c.l.bf16 %v11_v5  ;;  %v28_v12 = vunpack.c.l.bf16 %v12_v8  ;;  %v29_v13 = vunpack.c.l.bf16 %v13_v9  ;;  %v14_v14 = vld [vmem:[%s320_s0 + $0x6] sm:$0x1]  ;;  %v15_v18 = vld [vmem:[%s320_s0 + $0x7] sm:$0x1]  ;;  %v16_v24 = vld [vmem:[%s320_s0 + $0x8] sm:$0x1] }
   0x4   :  { %v41_v10 = vsel %vm40_vm0, %v24_v2, 0.0  ;;  %v42_v11 = vsel %vm40_vm0, %v25_v3, 0.0  ;;  %v44_v16 = vsel %vm40_vm0, %v26_v6, 0.0  ;;  %v30_v19 = vunpack.c.l.bf16 %v14_v14  ;;  %v17_v25 = vld [vmem:[%s320_s0 + $0x9] sm:$0x1]  ;;  %vm248_vm3 = vmand %vm137_vm1, %vm138_vm2 }
   0x5   :  { %v43_v15 = vadd.f32 %v42_v11, %v41_v10  ;;  %v45_v17 = vsel %vm40_vm0, %v27_v7, 0.0  ;;  %v47_v21 = vsel %vm40_vm0, %v28_v12, 0.0  ;;  %v48_v22 = vsel %vm40_vm0, %v29_v13, 0.0  ;;  %v18_v30 = vld [vmem:[%s320_s0 + $0xa] sm:$0x1] }
   0x6   :  { %v46_v20 = vadd.f32 %v45_v17, %v44_v16  ;;  %v31_v23 = vunpack.c.l.bf16 %v15_v18  ;;  %v49_v27 = vadd.f32 %v48_v22, %v47_v21  ;;  %v50_v28 = vsel %vm40_vm0, %v30_v19, 0.0  ;;  %v19_v35 = vld [vmem:[%s320_s0 + $0xb] sm:$0x1]  ;;  %v20_v44 = vld [vmem:[%s320_s0 + $0xc] sm:$0x1] }
   0x7   :  { %v65_v26 = vsel %vm40_vm0, %v43_v15, 0.0  ;;  %v32_v29 = vunpack.c.l.bf16 %v16_v24  ;;  %v33_v34 = vunpack.c.l.bf16 %v17_v25  ;;  %v34_v43 = vunpack.c.l.bf16 %v18_v30  ;;  %v21_v53 = vld [vmem:[%s320_s0 + $0xd] sm:$0x1]  ;;  %v22_v62 = vld [vmem:[%s320_s0 + $0xe] sm:$0x1] }
   0x8   :  { %v66_v31 = vrot.slane %v65_v26, 4  ;;  %v72_v32 = vsel %vm40_vm0, %v46_v20, 0.0  ;;  %v51_v33 = vsel %vm40_vm0, %v31_v23, 0.0  ;;  %v79_v37 = vsel %vm40_vm0, %v49_v27, 0.0  ;;  %v23_v7 = vld [vmem:[%s320_s0 + $0xf] sm:$0x1] }
   0x9   :  { %v73_v36 = vrot.slane %v72_v32, 4  ;;  %v52_v38 = vadd.f32 %v51_v33, %v50_v28  ;;  %v53_v39 = vsel %vm40_vm0, %v32_v29, 0.0  ;;  %v80_v41 = vrot.slane %v79_v37, 4  ;;  %v140_v25 = vld [vmem:[%s321_s1] sm:$0x1] }
   0xa   :  { %v67_v40 = vadd.f32 %v66_v31, %v65_v26  ;;  %v54_v42 = vsel %vm40_vm0, %v33_v34, 0.0  ;;  %v35_v48 = vunpack.c.l.bf16 %v19_v35  ;;  %v56_v52 = vsel %vm40_vm0, %v34_v43, 0.0  ;;  %v143_v31 = vld [vmem:[%s321_s1 + $0x1] sm:$0x1] }
   0xb   :  { %v74_v45 = vadd.f32 %v73_v36, %v72_v32  ;;  %v86_v46 = vsel %vm40_vm0, %v52_v38, 0.0  ;;  %v55_v47 = vadd.f32 %v54_v42, %v53_v39  ;;  %v81_v50 = vadd.f32 %v80_v41, %v79_v37  ;;  %v146_v36 = vld [vmem:[%s321_s1 + $0x2] sm:$0x1] }
   0xc   :  { %v68_v49 = vrot.slane %v67_v40, 2  ;;  %v87_v51 = vrot.slane %v86_v46, 4  ;;  %v57_v56 = vsel %vm40_vm0, %v35_v48, 0.0  ;;  %v36_v57 = vunpack.c.l.bf16 %v20_v44 }
   0xd   :  { %v75_v54 = vrot.slane %v74_v45, 2  ;;  %v93_v55 = vsel %vm40_vm0, %v55_v47, 0.0  ;;  %v82_v59 = vrot.slane %v81_v50, 2  ;;  %v58_v0 = vadd.f32 %v57_v56, %v56_v52  ;;  %v152_v52 = vld [vmem:[%s321_s1 + $0x4] sm:$0x1] }
   0xe   :  { %v69_v58 = vadd.f32 %v68_v49, %v67_v40  ;;  %v88_v60 = vadd.f32 %v87_v51, %v86_v46  ;;  %v94_v61 = vrot.slane %v93_v55, 4  ;;  %v37_v1 = vunpack.c.l.bf16 %v21_v53 }
   0xf   :  { %v76_v63 = vadd.f32 %v75_v54, %v74_v45  ;;  %v59_v2 = vsel %vm40_vm0, %v36_v57, 0.0  ;;  %v83_v4 = vadd.f32 %v82_v59, %v81_v50  ;;  %v100_v9 = vsel %vm40_vm0, %v58_v0, 0.0  ;;  %v149_v45 = vld [vmem:[%s321_s1 + $0x3] sm:$0x1] }
  0x10   :  { %v70_v3 = vrot.slane %v69_v58, 1  ;;  %v89_v5 = vrot.slane %v88_v60, 2  ;;  %v95_v6 = vadd.f32 %v94_v61, %v93_v55  ;;  %v60_v10 = vsel %vm40_vm0, %v37_v1, 0.0  ;;  %v155_v1 = vld [vmem:[%s321_s1 + $0x5] sm:$0x1] }
  0x11   :  { %v77_v8 = vrot.slane %v76_v63, 1  ;;  %v38_v11 = vunpack.c.l.bf16 %v22_v62  ;;  %v84_v13 = vrot.slane %v83_v4, 1  ;;  %v101_v17 = vrot.slane %v100_v9, 4 }
  0x12   :  { %v71_v12 = vadd.f32 %v70_v3, %v69_v58  ;;  %v90_v14 = vadd.f32 %v89_v5, %v88_v60  ;;  %v96_v15 = vrot.slane %v95_v6, 2  ;;  %v61_v18 = vadd.f32 %v60_v10, %v59_v2 }
  0x13   :  { %v78_v16 = vadd.f32 %v77_v8, %v76_v63  ;;  %v39_v19 = vunpack.c.l.bf16 %v23_v7  ;;  %v85_v21 = vadd.f32 %v84_v13, %v83_v4  ;;  %v102_v27 = vadd.f32 %v101_v17, %v100_v9  ;;  %v158_v8 = vld [vmem:[%s321_s1 + $0x6] sm:$0x1] }
  0x14   :  { %v121_v20 = vmul.f32 0.25, %v71_v12  ;;  %v91_v22 = vrot.slane %v90_v14, 1  ;;  %v97_v23 = vadd.f32 %v96_v15, %v95_v6  ;;  %v107_v28 = vsel %vm40_vm0, %v61_v18, 0.0 }
  0x15   :  { %v122_v26 = vmul.f32 0.25, %v78_v16  ;;  %v62_v29 = vsel %vm40_vm0, %v38_v11, 0.0  ;;  %v123_v32 = vmul.f32 0.25, %v85_v21  ;;  %v103_v37 = vrot.slane %v102_v27, 2 }
  0x16   :  { %v129_v30 = vpack.c.bf16 %v121_v20, %v121_v20  ;;  %v92_v33 = vadd.f32 %v91_v22, %v90_v14  ;;  %v98_v34 = vrot.slane %v97_v23, 1  ;;  %v108_v38 = vrot.slane %v107_v28, 4  ;;  %v161_v14 = vld [vmem:[%s321_s1 + $0x7] sm:$0x1] }
  0x17   :  { %v130_v35 = vpack.c.bf16 %v122_v26, %v122_v26  ;;  %v63_v39 = vsel %vm40_vm0, %v39_v19, 0.0  ;;  %v131_v41 = vpack.c.bf16 %v123_v32, %v123_v32  ;;  %v104_v46 = vadd.f32 %v103_v37, %v102_v27 }
  0x18   :  { %v141_v40 = vsel %vm248_vm3, %v129_v30, %v140_v25  ;;  %v124_v42 = vmul.f32 0.25, %v92_v33  ;;  %v99_v43 = vadd.f32 %v98_v34, %v97_v23  ;;  %v109_v47 = vadd.f32 %v108_v38, %v107_v28 }
  0x19   :  { %142 = vst [vmem:[%s321_s1] sm:$0x1] %v141_v40  ;;  %v144_v44 = vsel %vm248_vm3, %v130_v35, %v143_v31  ;;  %v64_v48 = vadd.f32 %v63_v39, %v62_v29  ;;  %v147_v49 = vsel %vm248_vm3, %v131_v41, %v146_v36  ;;  %v105_v53 = vrot.slane %v104_v46, 1 }
  0x1a   :  { %145 = vst [vmem:[%s321_s1 + $0x1] sm:$0x1] %v144_v44  ;;  %v132_v50 = vpack.c.bf16 %v124_v42, %v124_v42  ;;  %v125_v51 = vmul.f32 0.25, %v99_v43  ;;  %148 = vst [vmem:[%s321_s1 + $0x2] sm:$0x1] %v147_v49  ;;  %v110_v54 = vrot.slane %v109_v47, 2 }
  0x1b   :  { %v114_v55 = vsel %vm40_vm0, %v64_v48, 0.0  ;;  %v106_v59 = vadd.f32 %v105_v53, %v104_v46 }
  0x1c   :  { %v150_v56 = vsel %vm248_vm3, %v132_v50, %v149_v45  ;;  %v133_v57 = vpack.c.bf16 %v125_v51, %v125_v51  ;;  %v115_v58 = vrot.slane %v114_v55, 4  ;;  %v111_v60 = vadd.f32 %v110_v54, %v109_v47 }
  0x1d   :  { %151 = vst [vmem:[%s321_s1 + $0x3] sm:$0x1] %v150_v56  ;;  %v126_v63 = vmul.f32 0.25, %v106_v59 }
  0x1e   :  { %v153_v61 = vsel %vm248_vm3, %v133_v57, %v152_v52  ;;  %v116_v62 = vadd.f32 %v115_v58, %v114_v55  ;;  %v112_v0 = vrot.slane %v111_v60, 1 }
  0x1f   :  { %154 = vst [vmem:[%s321_s1 + $0x4] sm:$0x1] %v153_v61  ;;  %v134_v3 = vpack.c.bf16 %v126_v63, %v126_v63 }
  0x20   :  { %v117_v2 = vrot.slane %v116_v62, 2  ;;  %v113_v4 = vadd.f32 %v112_v0, %v111_v60 }
  0x21   :  { %v156_v6 = vsel %vm248_vm3, %v134_v3, %v155_v1 }
  0x22   :  { %v118_v5 = vadd.f32 %v117_v2, %v116_v62  ;;  %v127_v7 = vmul.f32 0.25, %v113_v4  ;;  %157 = vst [vmem:[%s321_s1 + $0x5] sm:$0x1] %v156_v6 }
  0x24   :  { %v119_v9 = vrot.slane %v118_v5, 1  ;;  %v135_v10 = vpack.c.bf16 %v127_v7, %v127_v7 }
  0x26   :  { %v120_v11 = vadd.f32 %v119_v9, %v118_v5  ;;  %v159_v12 = vsel %vm248_vm3, %v135_v10, %v158_v8 }
  0x27   :  { %160 = vst [vmem:[%s321_s1 + $0x6] sm:$0x1] %v159_v12 }
  0x28   :  { %v128_v13 = vmul.f32 0.25, %v120_v11 }
  0x2a   :  { %v136_v15 = vpack.c.bf16 %v128_v13, %v128_v13 }
  0x2c   :  { %v162_v16 = vsel %vm248_vm3, %v136_v15, %v161_v14 }
  0x2d   :  { %163 = vst [vmem:[%s321_s1 + $0x7] sm:$0x1] %v162_v16 }

// kernel: custom_densenet_forward.46
= control target key start
LH: loop header
LB: loop body
LE: loop exit
PB: predicated region body
PF: predicated region fallthrough
CT: control target
= control target key end

     0   :  { %s1032_s9 = smov 0   ;;  %s1157_s0 = inlined_call_operand.vmem [shape: bf16[2,3,3,32], index: 0, kind: input, shape index: {}]   ;;  %s1158_s1 = inlined_call_operand.vmem [shape: bf16[9,32,8], index: 1, kind: input, shape index: {}]   ;;  %s1159_s2 = inlined_call_operand.vmem [shape: bf16[2,1,8], index: 2, kind: output, shape index: {}]  }
   0x1 LB: > { %s781_s10 = sadd.s32 4294967295, %s1012_s9   ;;  %p785_p0 = scmp.ge.s32.totalorder %s1012_s9, 1  ;;  %s1012_s9 = sphi %s1032_s9, %s12_s9  }
   0x2   : > { %p112_p1 = scmp.lt.s32.totalorder %s1012_s9, 3 }
   0x4   : > { %p113_p2 = pnand %p785_p0, %p112_p1 }
   0x5   : > { %v988_v0 = vld [vmem:[%s1158_s1 + $0x40] sm:$0xff] (!%p113_p2)   ;;  %v1014_v1 = vmov (!%p113_p2), 0.0   ;;  %v989_v2 = vld [vmem:[%s1158_s1 + $0x10] sm:$0xff] (!%p113_p2)   ;;  %v157_v3 = vlaneseq (!%p113_p2)  ;;  %v990_v4 = vld [vmem:[%s1158_s1 + $0x48] sm:$0xff] (!%p113_p2)   ;;  %vm1015_vm0 = vmmov (!%p113_p2), 0   ;;  %p132_p3 = scmp.lt.s32.totalorder (!%p113_p2), %s781_s10, 1 }
   0x6   : > { %116 = sbr.rel (%p113_p2) target bundleno = 288 (0x120), region = 28  ;;  %907 = vmatprep.subr.bf16.mxu0 (!%p113_p2), %v1014_v1  ;;  %875 = vmatprep.subr.bf16.mxu1 (!%p113_p2), %v1014_v1  ;;  %v991_v5 = vld [vmem:[%s1158_s1 + $0x18] sm:$0xff] (!%p113_p2)   ;;  %v1016_v6 = vmov (!%p113_p2), 1983009808   ;;  %v992_v15 = vld [vmem:[%s1158_s1 + $0x50] sm:$0xff] (!%p113_p2)   ;;  %vm176_vm1 = vcmask (!%p113_p2), 261120  }
   0x7   : > { %908 = vmatpush3.bf16.msra.mxu0 (!%p113_p2), %v988_v0  ;;  %879 = vmatprep.mubr.msk.bf16.mxu1 (!%p113_p2), %vm1015_vm0, %v1014_v1  ;;  %v155_v7 = vunpack.c.l.s4 (!%p113_p2), %v1016_v6  ;;  %v158_v8 = vshrl.u32 (!%p113_p2), %v157_v3, 7  ;;  %v993_v16 = vld [vmem:[%s1158_s1] sm:$0xff] (!%p113_p2)   ;;  %v994_v19 = vld [vmem:[%s1158_s1 + $0x58] sm:$0xff] (!%p113_p2)   ;;  %v995_v20 = vld [vmem:[%s1158_s1 + $0x8] sm:$0xff] (!%p113_p2)   ;;  %vm728_vm2 = vcmask (!%p113_p2), 57344  }
   0x8   : > { %876 = vmatpush3.bf16.msra.mxu1 (!%p113_p2), %v989_v2  ;;  %909 = vmatprep.subr.bf16.mxu0 (!%p113_p2), %v1014_v1  ;;  %v996_v22 = vld [vmem:[%s1158_s1 + $0x60] sm:$0xff] (!%p113_p2)   ;;  %v998_v24 = vld [vmem:[%s1158_s1 + $0x68] sm:$0xff] (!%p113_p2)   ;;  %v1000_v28 = vld [vmem:[%s1158_s1 + $0x70] sm:$0xff] (!%p113_p2)   ;;  %vm729_vm3 = vsmask.f32 (!%p113_p2), 256 }
   0x9   : > { %877 = vmatprep.subr.bf16.mxu1 (!%p113_p2), %v1014_v1  ;;  %911 = vmatprep.mubr.msk.bf16.mxu0 (!%p113_p2), %vm1015_vm0, %v1014_v1  ;;  %v156_v9 = vunpack.c.0.s8 (!%p113_p2), %v155_v7  ;;  %v997_v23 = vld [vmem:[%s1158_s1 + $0x20] sm:$0xff] (!%p113_p2)   ;;  %v999_v25 = vld [vmem:[%s1158_s1 + $0x28] sm:$0xff] (!%p113_p2)   ;;  %v1001_v29 = vld [vmem:[%s1158_s1 + $0x30] sm:$0xff] (!%p113_p2)  }
   0xa   : > { %v1002_v30 = vld [vmem:[%s1158_s1 + $0x78] sm:$0xff] (!%p113_p2)   ;;  %v1004_v34 = vld [vmem:[%s1158_s1 + $0x80] sm:$0xff] (!%p113_p2)   ;;  %v1005_v35 = vld [vmem:[%s1158_s1 + $0x88] sm:$0xff] (!%p113_p2)  }
   0xb   : > { %910 = vmatpush3.bf16.msra.mxu0 (!%p113_p2), %v990_v4  ;;  %v159_v11 = vsub.s32 (!%p113_p2), %v156_v9, %v158_v8  ;;  %v1003_v31 = vld [vmem:[%s1158_s1 + $0x38] sm:$0xff] (!%p113_p2)   ;;  %vm730_vm4 = vmand (!%p113_p2), %vm728_vm2, %vm729_vm3 }
   0xc   : > { %878 = vmatpush3.bf16.msra.mxu1 (!%p113_p2), %v991_v5  ;;  %915 = vmatprep.subr.bf16.mxu0 (!%p113_p2), %v1014_v1 }
   0xd   : > { %s1161_s10 = smov (!%p132_p3, %s781_s10), 1  ;;  %883 = vmatprep.subr.bf16.mxu1 %v1014_v1 }
   0xe   : > { %s976_s19 = smul.u32 6, %s1161_s10  ;;  %s139_s27 = scalar_lea.vmem %s1159_s2, %s1161_s10 }
   0xf   : > { %v731_v44 = vld [vmem:[%s139_s27] sm:$0x1] }
  0x10   : > { %s1067_s22 = scalar_lea.vmem %s1157_s0, %s976_s19 }
  0x11   : > { %v141_v10 = vld [vmem:[%s1067_s22] sm:$0x3]  ;;  %v142_v12 = vld [vmem:[%s1067_s22 + $0x2] sm:$0x3]  ;;  %v143_v27 = vld [vmem:[%s1067_s22 + $0x4] sm:$0x3] }
  0x12   : > { %v160_v13 = vrot.slane %v141_v10, %v159_v11  ;;  %v410_v14 = vrot.slane %v142_v12, %v159_v11  ;;  %v605_v32 = vrot.slane %v143_v27, %v159_v11 }
  0x14   : > { %v162_v17 = vshrl.u32 %v160_v13, 16  ;;  %v412_v18 = vshrl.u32 %v410_v14, 16  ;;  %v475_v21 = vrot.slane %v410_v14, 1  ;;  %v280_v26 = vrot.slane %v160_v13, 1 }
  0x15   : > { %v607_v33 = vshrl.u32 %v605_v32, 16  ;;  %v670_v36 = vrot.slane %v605_v32, 1 }
  0x16   : > { %880 = vmatmul.mubr.msk.bf16.vlgmr.msra.gmra.mrb[0].mxu1 %vm176_vm1, %v162_v17  ;;  %912 = vmatmul.mubr.msk.bf16.vlgmr.msra.gmra.mrb[0].mxu0 %vm176_vm1, %v412_v18 }
  0x17   : > { %916 = vmatpush3.bf16.msra.mxu0 %v992_v15  ;;  %884 = vmatpush3.bf16.msra.mxu1 %v993_v16 }
  0x18   : > { %917 = vmatprep.subr.bf16.mxu0 %v1014_v1  ;;  %885 = vmatprep.subr.bf16.mxu1 %v1014_v1 }
  0x19   : > { %887 = vmatprep.mubr.msk.bf16.mxu1 %vm1015_vm0, %v1014_v1  ;;  %919 = vmatprep.mubr.msk.bf16.mxu0 %vm1015_vm0, %v1014_v1 }
  0x1b   : > { %918 = vmatpush3.bf16.msra.mxu0 %v994_v19  ;;  %886 = vmatpush3.bf16.msra.mxu1 %v995_v20 }
  0x1c   : > { %923 = vmatprep.subr.bf16.mxu0 %v1014_v1  ;;  %891 = vmatprep.subr.bf16.mxu1 %v1014_v1 }
  0x22   : > { %888 = vmatmul.mubr.msk.bf16.vlgmr.msra.gmra.mrb[0].mxu1 %vm176_vm1, %v141_v10  ;;  %920 = vmatmul.mubr.msk.bf16.vlgmr.msra.gmra.mrb[0].mxu0 %vm176_vm1, %v475_v21 }
  0x23   : > { %924 = vmatpush3.bf16.msra.mxu0 %v996_v22  ;;  %892 = vmatpush3.bf16.msra.mxu1 %v997_v23 }
  0x24   : > { %925 = vmatprep.subr.bf16.mxu0 %v1014_v1  ;;  %893 = vmatprep.subr.bf16.mxu1 %v1014_v1 }
  0x25   : > { %895 = vmatprep.mubr.msk.bf16.mxu1 %vm1015_vm0, %v1014_v1  ;;  %927 = vmatprep.mubr.msk.bf16.mxu0 %vm1015_vm0, %v1014_v1 }
  0x27   : > { %926 = vmatpush3.bf16.msra.mxu0 %v998_v24  ;;  %894 = vmatpush3.bf16.msra.mxu1 %v999_v25 }
  0x28   : > { %931 = vmatprep.subr.bf16.mxu0 %v1014_v1  ;;  %899 = vmatprep.subr.bf16.mxu1 %v1014_v1 }
  0x2e   : > { %896 = vmatmul.mubr.msk.bf16.vlgmr.msra.gmra.mrb[0].mxu1 %vm176_vm1, %v280_v26  ;;  %928 = vmatmul.mubr.msk.bf16.vlgmr.msra.gmra.mrb[0].mxu0 %vm176_vm1, %v143_v27 }
  0x2f   : > { %932 = vmatpush3.bf16.msra.mxu0 %v1000_v28  ;;  %900 = vmatpush3.bf16.msra.mxu1 %v1001_v29 }
  0x30   : > { %933 = vmatprep.subr.bf16.mxu0 %v1014_v1  ;;  %901 = vmatprep.subr.bf16.mxu1 %v1014_v1 }
  0x31   : > { %903 = vmatprep.mubr.msk.bf16.mxu1 %vm1015_vm0, %v1014_v1  ;;  %935 = vmatprep.mubr.msk.bf16.mxu0 %vm1015_vm0, %v1014_v1 }
  0x33   : > { %934 = vmatpush3.bf16.msra.mxu0 %v1002_v30  ;;  %902 = vmatpush3.bf16.msra.mxu1 %v1003_v31 }
  0x34   : > { %939 = vmatprep.subr.bf16.mxu0 %v1014_v1 }
  0x3a   : > { %904 = vmatmul.mubr.msk.bf16.vlgmr.msra.gmra.mrb[0].mxu1 %vm176_vm1, %v142_v12  ;;  %936 = vmatmul.mubr.msk.bf16.vlgmr.msra.gmra.mrb[0].mxu0 %vm176_vm1, %v607_v33 }
  0x3b   : > { %940 = vmatpush3.bf16.msra.mxu0 %v1004_v34  ;;  %943 = vmatprep.mubr.msk.bf16.mxu0 %vm1015_vm0, %v1014_v1 }
  0x3c   : > { %941 = vmatprep.subr.bf16.mxu0 %v1014_v1 }
  0x3f   : > { %942 = vmatpush3.bf16.msra.mxu0 %v1005_v35 }
  0x46   : > { %944 = vmatmul.mubr.msk.bf16.vlgmr.msra.gmra.mrb[0].mxu0 %vm176_vm1, %v670_v36 }
 0x10d   : > { %v391_v37 = vpop.f32.mrb[0].mxu1 }
 0x10e   : > { %v905_v38 = vpop.f32.mrb[1].mxu1 }
 0x10f   : > { %v394_v39 = vpop.f32.mrb[2].mxu1 }
 0x110   : > { %v906_v40 = vpop.f32.mrb[3].mxu1 }
 0x119   : > { %v720_v41 = vpop.f32.mrb[0].mxu0 }
 0x11a   : > { %v947_v42 = vadd.f32 %v720_v41, %v391_v37  ;;  %v945_v43 = vpop.f32.mrb[1].mxu0 }
 0x11b   : > { %v723_v45 = vpop.f32.mrb[2].mxu0 }
 0x11c   : > { %v727_v46 = vpack.c.bf16 %v947_v42, %v947_v42  ;;  %v946_v47 = vpop.f32.mrb[3].mxu0 }
 0x11e   : > { %v732_v48 = vsel %vm730_vm4, %v727_v46, %v731_v44 }
 0x11f   : > { %733 = vst [vmem:[%s139_s27] sm:$0x1] %v732_v48 }
 0x120 PF: > { %s12_s9 = sadd.s32 1, %s1012_s9  }
 0x121   : > { %p9_p4 = scmp.ge.s32.totalorder %s12_s9, 4  }
 0x123   :  { %11 = sbr.rel (!%p9_p4) target bundleno = 1 (0x1), region = 66 }

// kernel: custom_densenet_forward.49
= control target key start
LH: loop header
LB: loop body
LE: loop exit
PB: predicated region body
PF: predicated region fallthrough
CT: control target
= control target key end

     0   :  { %v85_v0 = vlaneseq  ;;  %v568_v1 = vmov 0.0   ;;  %vm569_vm0 = vmmov 0   ;;  %v570_v3 = vmov 1983009808   ;;  %s714_s3 = inlined_call_operand.vmem [shape: bf16[32,32], index: 3, kind: input, shape index: {}]   ;;  %s715_s0 = inlined_call_operand.vmem [shape: bf16[16,1,32], index: 0, kind: input, shape index: {}]   ;;  %s716_s1 = inlined_call_operand.vmem [shape: f32[1,32], index: 1, kind: input, shape index: {}]   ;;  %s717_s2 = inlined_call_operand.vmem [shape: f32[1,32], index: 2, kind: input, shape index: {}]   ;;  %s718_s5 = inlined_call_operand.vmem [shape: bf16[32,16], index: 5, kind: input, shape index: {}]   ;;  %s719_s4 = inlined_call_operand.vmem [shape: f32[1,32], index: 4, kind: input, shape index: {}]   ;;  %s720_s6 = inlined_call_operand.vmem [shape: f32[1,16], index: 6, kind: input, shape index: {}]   ;;  %s721_s7 = inlined_call_operand.vmem [shape: f32[16,16], index: 7, kind: output, shape index: {}]  }
   0x1   :  { %528 = vmatprep.subr.bf16.mxu0 %v568_v1  ;;  %v548_v2 = vld [vmem:[%s714_s3] sm:$0xff]   ;;  %532 = vmatprep.mubr.msk.bf16.mxu0 %vm569_vm0, %v568_v1  ;;  %v83_v4 = vunpack.c.l.s4 %v570_v3  ;;  %v549_v5 = vld [vmem:[%s714_s3 + $0x8] sm:$0xff]   ;;  %vm237_vm1 = vcmask 1041409   ;;  %vm240_vm2 = vcmask 1042434   ;;  %vm243_vm3 = vcmask 1043459  }
   0x2   :  { %v86_v6 = vshrl.u32 %v85_v0, 7  ;;  %536 = vmatprep.subr.bf16.mxu1 %v568_v1  ;;  %540 = vmatprep.mubr.msk.bf16.mxu1 %vm569_vm0, %v568_v1  ;;  %v27_v7 = vld [vmem:[%s715_s0] sm:$0x1]  ;;  %v28_v8 = vld [vmem:[%s715_s0 + $0x1] sm:$0x1]  ;;  %vm246_vm4 = vcmask 1044484  }
   0x3   :  { %529 = vmatpush3.bf16.msra.mxu0 %v548_v2  ;;  %v29_v9 = vld [vmem:[%s715_s0 + $0x2] sm:$0x1]  ;;  %v84_v10 = vunpack.c.0.s8 %v83_v4  ;;  %v30_v11 = vld [vmem:[%s715_s0 + $0x3] sm:$0x1]  ;;  %v31_v12 = vld [vmem:[%s715_s0 + $0x4] sm:$0x1]  ;;  %v43_v19 = vunpack.c.l.bf16 %v27_v7  ;;  %v44_v23 = vunpack.c.l.bf16 %v28_v8 }
   0x4   :  { %530 = vmatprep.subr.bf16.mxu0 %v568_v1  ;;  %v32_v13 = vld [vmem:[%s715_s0 + $0x5] sm:$0x1]  ;;  %v33_v14 = vld [vmem:[%s715_s0 + $0x6] sm:$0x1]  ;;  %v34_v15 = vld [vmem:[%s715_s0 + $0x7] sm:$0x1]  ;;  %v45_v24 = vunpack.c.l.bf16 %v29_v9  ;;  %v46_v25 = vunpack.c.l.bf16 %v30_v11  ;;  %v47_v26 = vunpack.c.l.bf16 %v31_v12 }
   0x5   :  { %v35_v16 = vld [vmem:[%s715_s0 + $0x8] sm:$0x1]  ;;  %v87_v17 = vsub.s32 %v84_v10, %v86_v6  ;;  %v36_v18 = vld [vmem:[%s715_s0 + $0x9] sm:$0x1]  ;;  %v37_v20 = vld [vmem:[%s715_s0 + $0xa] sm:$0x1]  ;;  %v48_v28 = vunpack.c.l.bf16 %v32_v13  ;;  %v49_v29 = vunpack.c.l.bf16 %v33_v14  ;;  %v50_v30 = vunpack.c.l.bf16 %v34_v15 }
   0x6   :  { %v38_v21 = vld [vmem:[%s715_s0 + $0xb] sm:$0x1]  ;;  %v39_v22 = vld [vmem:[%s715_s0 + $0xc] sm:$0x1]  ;;  %v40_v27 = vld [vmem:[%s715_s0 + $0xd] sm:$0x1]  ;;  %v51_v31 = vunpack.c.l.bf16 %v35_v16  ;;  %v52_v36 = vunpack.c.l.bf16 %v36_v18  ;;  %v53_v40 = vunpack.c.l.bf16 %v37_v20 }
   0x7   :  { %531 = vmatpush3.bf16.msra.mxu0 %v549_v5  ;;  %v512_v32 = vld [vmem:[%s716_s1] ss:$0 sm:$0xff]  ;;  %v41_v34 = vld [vmem:[%s715_s0 + $0xe] sm:$0x1]  ;;  %v42_v35 = vld [vmem:[%s715_s0 + $0xf] sm:$0x1]  ;;  %v54_v41 = vunpack.c.l.bf16 %v38_v21  ;;  %v55_v42 = vunpack.c.l.bf16 %v39_v22  ;;  %v56_v44 = vunpack.c.l.bf16 %v40_v27 }
   0x8   :  { %v513_v33 = vld [vmem:[%s717_s2] ss:$0 sm:$0xff]  ;;  %v81_v37 = vcombine.high %v512_v32, %v512_v32  ;;  %v88_v38 = vrot.slane %v512_v32, %v87_v17  ;;  %v57_v48 = vunpack.c.l.bf16 %v41_v34  ;;  %v58_v49 = vunpack.c.l.bf16 %v42_v35 }
   0x9   :  { %v132_v39 = vcombine.high %v513_v33, %v513_v33  ;;  %v139_v43 = vrot.slane %v513_v33, %v87_v17  ;;  %vm249_vm5 = vcmask 1045509   ;;  %vm252_vm6 = vcmask 1046534  }
   0xa   :  { %v95_v45 = vrot.slane %v81_v37, %v87_v17  ;;  %v96_v46 = vcombine.high %v88_v38, %v88_v38  ;;  %v98_v47 = vrot.slane %v88_v38, 1  ;;  %v110_v50 = vmul.f32 %v88_v38, %v43_v19 }
   0xb   :  { %v146_v51 = vrot.slane %v132_v39, %v87_v17  ;;  %v147_v55 = vcombine.high %v139_v43, %v139_v43  ;;  %v118_v58 = vmul.f32 %v88_v38, %v51_v31  ;;  %v149_v59 = vrot.slane %v139_v43, 1 }
   0xc   :  { %v97_v52 = vcombine.high %v95_v45, %v95_v45  ;;  %v99_v53 = vrot.slane %v96_v46, 1  ;;  %v100_v54 = vrot.slane %v95_v45, 1  ;;  %v111_v56 = vmul.f32 %v98_v47, %v44_v23 }
   0xd   :  { %v112_v57 = vmul.f32 %v96_v46, %v45_v24  ;;  %v114_v62 = vmul.f32 %v95_v45, %v47_v26  ;;  %v119_v63 = vmul.f32 %v98_v47, %v52_v36  ;;  %v120_v3 = vmul.f32 %v96_v46, %v53_v40 }
   0xe   :  { %v101_v60 = vrot.slane %v97_v52, 1  ;;  %v113_v61 = vmul.f32 %v99_v53, %v46_v25  ;;  %v115_v0 = vmul.f32 %v100_v54, %v48_v28  ;;  %v116_v2 = vmul.f32 %v97_v52, %v49_v29 }
   0xf   :  { %v121_v4 = vmul.f32 %v99_v53, %v54_v41  ;;  %v122_v6 = vmul.f32 %v95_v45, %v55_v42  ;;  %v148_v7 = vcombine.high %v146_v51, %v146_v51  ;;  %v150_v8 = vrot.slane %v147_v55, 1 }
  0x10   :  { %v117_v5 = vmul.f32 %v101_v60, %v50_v30  ;;  %v123_v9 = vmul.f32 %v100_v54, %v56_v44  ;;  %v124_v10 = vmul.f32 %v97_v52, %v57_v48  ;;  %v151_v11 = vrot.slane %v146_v51, 1 }
  0x11   :  { %v162_v12 = vadd.f32 %v149_v59, %v111_v56  ;;  %v152_v13 = vrot.slane %v148_v7, 1  ;;  %v163_v14 = vadd.f32 %v147_v55, %v112_v57  ;;  %v164_v15 = vadd.f32 %v150_v8, %v113_v61 }
  0x12   :  { %v165_v16 = vadd.f32 %v146_v51, %v114_v62  ;;  %v125_v17 = vmul.f32 %v101_v60, %v58_v49  ;;  %v161_v18 = vadd.f32 %v139_v43, %v110_v50  ;;  %v166_v19 = vadd.f32 %v151_v11, %v115_v0 }
  0x13   :  { %v167_v20 = vadd.f32 %v148_v7, %v116_v2  ;;  %v168_v21 = vadd.f32 %v152_v13, %v117_v5  ;;  %v169_v22 = vadd.f32 %v139_v43, %v118_v58  ;;  %v170_v23 = vadd.f32 %v149_v59, %v119_v63 }
  0x14   :  { %v171_v24 = vadd.f32 %v147_v55, %v120_v3  ;;  %v172_v25 = vadd.f32 %v150_v8, %v121_v4  ;;  %v173_v26 = vadd.f32 %v146_v51, %v122_v6  ;;  %v174_v27 = vadd.f32 %v151_v11, %v123_v9 }
  0x15   :  { %v178_v28 = vpack.c.bf16 %v162_v12, %v162_v12  ;;  %v175_v29 = vadd.f32 %v148_v7, %v124_v10  ;;  %v179_v30 = vpack.c.bf16 %v163_v14, %v163_v14  ;;  %v180_v31 = vpack.c.bf16 %v164_v15, %v164_v15 }
  0x16   :  { %v181_v32 = vpack.c.bf16 %v165_v16, %v165_v16  ;;  %v176_v33 = vadd.f32 %v152_v13, %v125_v17  ;;  %v177_v34 = vpack.c.bf16 %v161_v18, %v161_v18  ;;  %v182_v35 = vpack.c.bf16 %v166_v19, %v166_v19 }
  0x17   :  { %v183_v36 = vpack.c.bf16 %v167_v20, %v167_v20  ;;  %v184_v37 = vpack.c.bf16 %v168_v21, %v168_v21  ;;  %v185_v38 = vpack.c.bf16 %v169_v22, %v169_v22  ;;  %v186_v39 = vpack.c.bf16 %v170_v23, %v170_v23 }
  0x18   :  { %v187_v40 = vpack.c.bf16 %v171_v24, %v171_v24  ;;  %v188_v41 = vpack.c.bf16 %v172_v25, %v172_v25  ;;  %v189_v42 = vpack.c.bf16 %v173_v26, %v173_v26  ;;  %v190_v43 = vpack.c.bf16 %v174_v27, %v174_v27 }
  0x19   :  { %v221_v44 = vunpack.c.l.b16 %v178_v28  ;;  %v191_v45 = vpack.c.bf16 %v175_v29, %v175_v29  ;;  %v222_v46 = vunpack.c.l.b16 %v179_v30  ;;  %v223_v47 = vunpack.c.l.b16 %v180_v31  ;;  %v550_v28 = vld [vmem:[%s718_s5] sm:$0xff]   ;;  %v551_v29 = vld [vmem:[%s718_s5 + $0x8] sm:$0xff]  }
  0x1a   :  { %v224_v48 = vunpack.c.l.b16 %v181_v32  ;;  %v192_v49 = vpack.c.bf16 %v176_v33, %v176_v33  ;;  %v220_v50 = vunpack.c.l.b16 %v177_v34  ;;  %v225_v51 = vunpack.c.l.b16 %v182_v35  ;;  %537 = vmatpush3.bf16.msra.mxu1 %v550_v28  ;;  %v514_v30 = vld [vmem:[%s719_s4] ss:$0 sm:$0xff] }
  0x1b   :  { %v226_v52 = vunpack.c.l.b16 %v183_v36  ;;  %v227_v53 = vunpack.c.l.b16 %v184_v37  ;;  %v228_v54 = vunpack.c.l.b16 %v185_v38  ;;  %v229_v55 = vunpack.c.l.b16 %v186_v39  ;;  %538 = vmatprep.subr.bf16.mxu1 %v568_v1 }
  0x1c   :  { %v230_v56 = vunpack.c.l.b16 %v187_v40  ;;  %v231_v57 = vunpack.c.l.b16 %v188_v41  ;;  %v232_v58 = vunpack.c.l.b16 %v189_v42  ;;  %v236_v59 = vrot.slane %v221_v44, 7 }
  0x1d   :  { %v239_v60 = vrot.slane %v222_v46, 6  ;;  %v233_v61 = vunpack.c.l.b16 %v190_v43  ;;  %v234_v62 = vunpack.c.l.b16 %v191_v45  ;;  %v242_v63 = vrot.slane %v223_v47, 5 }
  0x1e   :  { %v245_v0 = vrot.slane %v224_v48, 4  ;;  %v235_v2 = vunpack.c.l.b16 %v192_v49  ;;  %v238_v3 = vsel %vm237_vm1, %v236_v59, %v220_v50  ;;  %v248_v4 = vrot.slane %v225_v51, 3  ;;  %539 = vmatpush3.bf16.msra.mxu1 %v551_v29 }
  0x1f   :  { %v241_v5 = vsel %vm240_vm2, %v239_v60, %v238_v3  ;;  %v251_v6 = vrot.slane %v226_v52, 2  ;;  %v257_v7 = vrot.slane %v229_v55, 7  ;;  %v259_v8 = vrot.slane %v230_v56, 6 }
  0x20   :  { %v244_v9 = vsel %vm243_vm3, %v242_v63, %v241_v5  ;;  %v261_v10 = vrot.slane %v231_v57, 5  ;;  %v263_v11 = vrot.slane %v232_v58, 4  ;;  %v254_v13 = vrot.slane %v227_v53, 1 }
  0x21   :  { %v247_v12 = vsel %vm246_vm4, %v245_v0, %v244_v9  ;;  %v258_v14 = vsel %vm237_vm1, %v257_v7, %v228_v54  ;;  %v265_v15 = vrot.slane %v233_v61, 3  ;;  %vm255_vm7 = vcmask 1047559  }
  0x22   :  { %v250_v16 = vsel %vm249_vm5, %v248_v4, %v247_v12  ;;  %v260_v17 = vsel %vm240_vm2, %v259_v8, %v258_v14  ;;  %v267_v18 = vrot.slane %v234_v62, 2  ;;  %v269_v21 = vrot.slane %v235_v2, 1 }
  0x23   :  { %v253_v19 = vsel %vm252_vm6, %v251_v6, %v250_v16  ;;  %v262_v20 = vsel %vm243_vm3, %v261_v10, %v260_v17  ;;  %vm284_vm8 = vcmask 261120   ;;  %vm505_vm13 = vcmask 130048  }
  0x24   :  { %v264_v22 = vsel %vm246_vm4, %v263_v11, %v262_v20  ;;  %v256_v23 = vsel %vm255_vm7, %v254_v13, %v253_v19  ;;  %v571_v11 = vmov -1.0  }
  0x25   :  { %v266_v24 = vsel %vm249_vm5, %v265_v15, %v264_v22 }
  0x26   :  { %v268_v25 = vsel %vm252_vm6, %v267_v18, %v266_v24 }
  0x27   :  { %v270_v26 = vsel %vm255_vm7, %v269_v21, %v268_v25  ;;  %v518_v25 = vld [vmem:[%s720_s6] ss:$0 sm:$0xff] }
  0x28   :  { %v271_v27 = vpack.c.b16 %v270_v26, %v256_v23 }
  0x2a   :  { %533 = vmatmul.mubr.msk.bf16.vlgmr.msra.gmra.mrb[0].mxu0 %vm284_vm8, %v271_v27 }
  0xfd   :  { %v322_v31 = vpop.f32.mrb[0].mxu0 }
  0xfe   :  { %v323_v32 = vadd.f32 %v514_v30, %v322_v31  ;;  %v534_v33 = vpop.f32.mrb[1].mxu0 }
  0xff   :  { %v325_v34 = vpop.f32.mrb[2].mxu0 }
 0x100   :  { %v331_v35 = vmul.f32 0.70710677, %v323_v32  ;;  %v326_v36 = vadd.f32 %v514_v30, %v325_v34  ;;  %v535_v37 = vpop.f32.mrb[3].mxu0  ;;  %v329_v19 = vmul.f32 0.5, %v323_v32 }
 0x102   :  { %v337_v38 = vand.u32 2147483647, %v331_v35  ;;  %v332_v39 = vmul.f32 0.70710677, %v326_v36  ;;  %vm333_vm9 = vcmp.ge.f32.partialorder %v331_v35, 0.0  ;;  %v330_v20 = vmul.f32 0.5, %v326_v36 }
 0x103   :  { %v335_v12 = vsel %vm333_vm9, 1.0, %v571_v11 }
 0x104   :  { %v339_v40 = vmul.f32 0.3275911, %v337_v38  ;;  %v338_v1 = vand.u32 2147483647, %v332_v39  ;;  %v365_v44 = vsub.f32 0.0, %v337_v38  ;;  %vm334_vm10 = vcmp.ge.f32.partialorder %v332_v39, 0.0 }
 0x105   :  { %v336_v16 = vsel %vm334_vm10, 1.0, %v571_v11 }
 0x106   :  { %v341_v41 = vadd.f32 1.0, %v339_v40  ;;  %v340_v42 = vmul.f32 0.3275911, %v338_v1  ;;  %v366_v45 = vsub.f32 0.0, %v338_v1  ;;  %v367_v47 = vmul.f32 %v365_v44, %v337_v38 }
 0x108   :  { %552 = vrcp.f32 %v341_v41  ;;  %v342_v43 = vadd.f32 1.0, %v340_v42  ;;  %v368_v51 = vmul.f32 %v366_v45, %v338_v1  ;;  %v369_v52 = vmul.f32 1.442695, %v367_v47 }
 0x10a   :  { %554 = vrcp.f32 %v342_v43  ;;  %v371_v57 = vmul.f32 1.442695, %v368_v51 }
 0x10b   :  { %556 = vpow2.f32 %v369_v52 }
 0x10c   :  { %558 = vpow2.f32 %v371_v57 }
 0x112   :  { %v553_v46 = vpop.eup %552 }
 0x113   :  { %v347_v48 = vmul.f32 1.0614054, %v553_v46 }
 0x114   :  { %v555_v49 = vpop.eup %554 }
 0x115   :  { %v349_v50 = vadd.f32 -1.4531521, %v347_v48  ;;  %v348_v53 = vmul.f32 1.0614054, %v555_v49  ;;  %v557_v5 = vpop.eup %556 }
 0x116   :  { %v559_v9 = vpop.eup %558 }
 0x117   :  { %v351_v54 = vmul.f32 %v553_v46, %v349_v50  ;;  %v350_v55 = vadd.f32 -1.4531521, %v348_v53 }
 0x119   :  { %v353_v56 = vadd.f32 1.4214138, %v351_v54  ;;  %v352_v58 = vmul.f32 %v555_v49, %v350_v55 }
 0x11b   :  { %v355_v59 = vmul.f32 %v553_v46, %v353_v56  ;;  %v354_v60 = vadd.f32 1.4214138, %v352_v58 }
 0x11d   :  { %v357_v61 = vadd.f32 -0.28449672, %v355_v59  ;;  %v356_v62 = vmul.f32 %v555_v49, %v354_v60 }
 0x11f   :  { %v359_v63 = vmul.f32 %v553_v46, %v357_v61  ;;  %v358_v0 = vadd.f32 -0.28449672, %v356_v62 }
 0x121   :  { %v361_v2 = vadd.f32 0.2548296, %v359_v63  ;;  %v360_v3 = vmul.f32 %v555_v49, %v358_v0 }
 0x123   :  { %v363_v4 = vmul.f32 %v553_v46, %v361_v2  ;;  %v362_v6 = vadd.f32 0.2548296, %v360_v3 }
 0x125   :  { %v373_v7 = vmul.f32 %v557_v5, %v363_v4  ;;  %v364_v8 = vmul.f32 %v555_v49, %v362_v6 }
 0x127   :  { %v375_v10 = vsub.f32 1.0, %v373_v7  ;;  %v374_v13 = vmul.f32 %v559_v9, %v364_v8 }
 0x129   :  { %v377_v14 = vmul.f32 %v375_v10, %v335_v12  ;;  %v376_v15 = vsub.f32 1.0, %v374_v13 }
 0x12b   :  { %v379_v17 = vadd.f32 1.0, %v377_v14  ;;  %v378_v18 = vmul.f32 %v376_v15, %v336_v16 }
 0x12d   :  { %v380_v21 = vadd.f32 1.0, %v378_v18  ;;  %v381_v22 = vmul.f32 %v379_v17, %v329_v19 }
 0x12f   :  { %v382_v23 = vmul.f32 %v380_v21, %v330_v20 }
 0x131   :  { %v383_v24 = vpack.c.bf16 %v382_v23, %v381_v22 }
 0x133   :  { %541 = vmatmul.mubr.msk.bf16.vlgmr.msra.gmra.mrb[0].mxu1 %vm284_vm8, %v383_v24 }
 0x206   :  { %v444_v26 = vpop.f32.mrb[0].mxu1 }
 0x207   :  { %v445_v27 = vadd.f32 %v518_v25, %v444_v26  ;;  %v542_v28 = vpop.f32.mrb[1].mxu1 }
 0x208   :  { %v447_v29 = vpop.f32.mrb[2].mxu1 }
 0x209   :  { %v453_v30 = vmul.f32 0.70710677, %v445_v27  ;;  %v448_v31 = vadd.f32 %v518_v25, %v447_v29  ;;  %v543_v33 = vpop.f32.mrb[3].mxu1  ;;  %v451_v10 = vmul.f32 0.5, %v445_v27 }
 0x20b   :  { %v459_v34 = vand.u32 2147483647, %v453_v30  ;;  %v454_v32 = vmul.f32 0.70710677, %v448_v31  ;;  %vm455_vm11 = vcmp.ge.f32.partialorder %v453_v30, 0.0  ;;  %v452_v16 = vmul.f32 0.5, %v448_v31 }
 0x20c   :  { %v457_v6 = vsel %vm455_vm11, 1.0, %v571_v11 }
 0x20d   :  { %v461_v35 = vmul.f32 0.3275911, %v459_v34  ;;  %v460_v36 = vand.u32 2147483647, %v454_v32  ;;  %v487_v40 = vsub.f32 0.0, %v459_v34  ;;  %vm456_vm12 = vcmp.ge.f32.partialorder %v454_v32, 0.0 }
 0x20e   :  { %v458_v13 = vsel %vm456_vm12, 1.0, %v571_v11 }
 0x20f   :  { %v463_v37 = vadd.f32 1.0, %v461_v35  ;;  %v462_v38 = vmul.f32 0.3275911, %v460_v36  ;;  %v488_v1 = vsub.f32 0.0, %v460_v36  ;;  %v489_v42 = vmul.f32 %v487_v40, %v459_v34 }
 0x211   :  { %560 = vrcp.f32 %v463_v37  ;;  %v464_v39 = vadd.f32 1.0, %v462_v38  ;;  %v490_v46 = vmul.f32 %v488_v1, %v460_v36  ;;  %v491_v47 = vmul.f32 1.442695, %v489_v42 }
 0x213   :  { %562 = vrcp.f32 %v464_v39  ;;  %v493_v52 = vmul.f32 1.442695, %v490_v46 }
 0x214   :  { %564 = vpow2.f32 %v491_v47 }
 0x215   :  { %566 = vpow2.f32 %v493_v52 }
 0x21b   :  { %v561_v41 = vpop.eup %560 }
 0x21c   :  { %v469_v43 = vmul.f32 1.0614054, %v561_v41 }
 0x21d   :  { %v563_v44 = vpop.eup %562 }
 0x21e   :  { %v471_v45 = vadd.f32 -1.4531521, %v469_v43  ;;  %v470_v48 = vmul.f32 1.0614054, %v563_v44  ;;  %v565_v63 = vpop.eup %564 }
 0x21f   :  { %v567_v4 = vpop.eup %566 }
 0x220   :  { %v473_v49 = vmul.f32 %v561_v41, %v471_v45  ;;  %v472_v50 = vadd.f32 -1.4531521, %v470_v48 }
 0x222   :  { %v475_v51 = vadd.f32 1.4214138, %v473_v49  ;;  %v474_v53 = vmul.f32 %v563_v44, %v472_v50 }
 0x224   :  { %v477_v54 = vmul.f32 %v561_v41, %v475_v51  ;;  %v476_v55 = vadd.f32 1.4214138, %v474_v53 }
 0x226   :  { %v479_v56 = vadd.f32 -0.28449672, %v477_v54  ;;  %v478_v57 = vmul.f32 %v563_v44, %v476_v55 }
 0x228   :  { %v481_v58 = vmul.f32 %v561_v41, %v479_v56  ;;  %v480_v59 = vadd.f32 -0.28449672, %v478_v57 }
 0x22a   :  { %v483_v60 = vadd.f32 0.2548296, %v481_v58  ;;  %v482_v61 = vmul.f32 %v563_v44, %v480_v59 }
 0x22c   :  { %v485_v62 = vmul.f32 %v561_v41, %v483_v60  ;;  %v484_v0 = vadd.f32 0.2548296, %v482_v61 }
 0x22e   :  { %v495_v2 = vmul.f32 %v565_v63, %v485_v62  ;;  %v486_v3 = vmul.f32 %v563_v44, %v484_v0 }
 0x230   :  { %v497_v5 = vsub.f32 1.0, %v495_v2  ;;  %v496_v7 = vmul.f32 %v567_v4, %v486_v3 }
 0x232   :  { %v499_v8 = vmul.f32 %v497_v5, %v457_v6  ;;  %v498_v9 = vsub.f32 1.0, %v496_v7 }
 0x234   :  { %v501_v12 = vadd.f32 1.0, %v499_v8  ;;  %v500_v14 = vmul.f32 %v498_v9, %v458_v13 }
 0x236   :  { %v503_v15 = vmul.f32 %v501_v12, %v451_v10  ;;  %v502_v17 = vadd.f32 1.0, %v500_v14 }
 0x238   :  { %506 = vst.msk [vmem:[%s721_s7] sm:$0xff] %vm505_vm13, %v503_v15  ;;  %v504_v18 = vmul.f32 %v502_v17, %v452_v16 }
 0x23a   :  { %507 = vst.msk [vmem:[%s721_s7 + $0x8] sm:$0xff] %vm505_vm13, %v504_v18 }

</bundles_post_ra>
